<compile_context>
chip_gen: v6e
topology: v6e:2x2x1
jax: 0.10.0
libtpu: 0.0.40
codegen_flags: <defaults>
</compile_context>

<pallas_src>
import jax
import jax.numpy as jnp
import numpy as np
from jax.experimental import pallas as pl
from jax.experimental.pallas import tpu as pltpu


def _vmem_limit_bytes():
  """Per-chip scoped-VMEM limit: ~3/4 of physical VMEM, capped at 96 MiB."""
  try:
    cap = int(pltpu.get_tpu_info().vmem_capacity_bytes)
  except Exception:  # conservative default (v7x has 64 MiB per TensorCore)
    cap = 64 * 1024 * 1024
  return int(min(cap * 3 // 4, 96 * 1024 * 1024))


def _choose_batch_block(N, H, W, Cin, C, C4, stride, vmem_limit, weight_bytes):
  """Images per grid step: fit the VMEM budget, keep >= min(N,4) grid steps."""
  H2 = (H - 1) // stride + 1
  W2 = (W - 1) // stride + 1
  in_img = H * W * Cin * 2                      # bf16 input block
  out_img = H2 * W2 * C4 * 2                    # bf16 output block
  hpad_img = (H + 2) * (W + 2) * C * 2          # padded scratch
  inter_img = (H * W * C + H2 * W2 * C + 2 * H2 * W2 * C4) * 4   # f32 temps
  if C >= 128:
    inter_img += H2 * W2 * 9 * C * 2            # im2col slab (bf16)
  per_image = 2 * (in_img + out_img) + hpad_img + inter_img
  budget = max(vmem_limit // 2 - 2 * weight_bytes, 2 * 1024 * 1024)
  nb = max(1, min(N, budget // max(per_image, 1)))
  target_steps = min(N, 4)                      # pipeline overlap / megacore
  nb = min(nb, max(1, N // target_steps))
  nb = max(1, int(nb))
  while N % nb:                                 # tile the batch axis evenly
    nb -= 1
  return nb


def _make_bottleneck_kernel(Nb, H, W, Cin, C, C4, stride, has_projection):
  H2 = (H - 1) // stride + 1
  W2 = (W - 1) // stride + 1
  M1 = Nb * H * W
  M2 = Nb * H2 * W2

  def kernel(*refs):
    if has_projection:
      (x_ref, w1_ref, b1_ref, w2_ref, b2_ref, w3_ref, b3_ref,
       wr_ref, br_ref, o_ref, hpad_ref) = refs
    else:
      (x_ref, w1_ref, b1_ref, w2_ref, b2_ref, w3_ref, b3_ref,
       o_ref, hpad_ref) = refs

    x4 = x_ref[...]                              # (Nb, H, W, Cin) bf16
    xf = x4.reshape(M1, Cin)

    # --- conv1: 1x1 conv (BN scale pre-folded into w1) + bias + ReLU --------
    h1 = jnp.dot(xf, w1_ref[...], preferred_element_type=jnp.float32)
    h1 = jnp.maximum(h1 + b1_ref[...], 0.0)

    # --- stage h1 into zero-padded bf16 scratch (pad=1) ----------------------
    # Only the 1-pixel halo is zeroed; the interior is fully overwritten.
    # Re-zeroed every step so each core's scratch is valid under "parallel".
    zdt = hpad_ref.dtype
    hpad_ref[:, 0:1, :, :] = jnp.zeros((Nb, 1, W + 2, C), zdt)
    hpad_ref[:, H + 1:H + 2, :, :] = jnp.zeros((Nb, 1, W + 2, C), zdt)
    hpad_ref[:, :, 0:1, :] = jnp.zeros((Nb, H + 2, 1, C), zdt)
    hpad_ref[:, :, W + 1:W + 2, :] = jnp.zeros((Nb, H + 2, 1, C), zdt)
    hpad_ref[:, 1:H + 1, 1:W + 1, :] = h1.reshape(Nb, H, W, C).astype(zdt)

    # --- conv2: 3x3 / stride-s conv -------------------------------------------
    def tap(dy, dx):
      if stride == 1:
        t = hpad_ref[:, dy:dy + H2, dx:dx + W2, :]
      else:
        # Subsample via reshape + static slice on values (no strided reads).
        t = hpad_ref[:, dy:dy + H2 * stride, dx:dx + W2 * stride, :]
        t = t.reshape(Nb, H2, stride, W2 * stride, C)[:, :, 0, :, :]
        t = t.reshape(Nb, H2, W2, stride, C)[:, :, :, 0, :]
      return t.reshape(M2, C)

    if C >= 128:
      # Lane-dense channels: single im2col matmul with K = 9*C.
      taps = [tap(i // 3, i % 3) for i in range(9)]
      im2col = jnp.concatenate(taps, axis=-1)
      h2 = jnp.dot(im2col, w2_ref[...], preferred_element_type=jnp.float32)
    else:
      # C < 128: 9 accumulated matmuls (no lane-axis relayouts, no im2col slab;
      # v7x MRB accumulates in place, v5e/v6e chain into an f32 accumulator).
      h2 = None
      for idx in range(9):
        part = jnp.dot(tap(idx // 3, idx % 3),
                       w2_ref[idx * C:(idx + 1) * C, :],
                       preferred_element_type=jnp.float32)
        h2 = part if h2 is None else h2 + part
    h2 = jnp.maximum(h2 + b2_ref[...], 0.0)

    # --- conv3: 1x1 conv + bias (ReLU deferred until after residual add) -----
    out = jnp.dot(h2.astype(w3_ref.dtype), w3_ref[...],
                  preferred_element_type=jnp.float32)
    out = out + b3_ref[...]

    # --- residual branch -------------------------------------------------------
    if has_projection:
      if stride == 1:
        xs = xf
      else:
        xs = x4[:, :H2 * stride, :W2 * stride, :]
        xs = xs.reshape(Nb, H2, stride, W2 * stride, Cin)[:, :, 0, :, :]
        xs = xs.reshape(Nb, H2, W2, stride, Cin)[:, :, :, 0, :]
        xs = xs.reshape(M2, Cin)
      ident = jnp.dot(xs, wr_ref[...], preferred_element_type=jnp.float32)
      ident = ident + br_ref[...]
    else:
      ident = xf.astype(jnp.float32)   # identity shortcut (Cin == C4, stride 1)

    out = jnp.maximum(out + ident, 0.0)
    o_ref[...] = out.reshape(Nb, H2, W2, C4).astype(o_ref.dtype)

  return kernel


def bottleneck_forward_nhwc(x_nhwc, params, stride=1):
  """Transpose-free NHWC entry point (output is bfloat16)."""
  N, H, W, Cin = x_nhwc.shape
  C = params["w1"].shape[1]
  C4 = params["w3"].shape[1]
  has_projection = (stride != 1) or (Cin != C4)
  H2 = (H - 1) // stride + 1
  W2 = (W - 1) // stride + 1
  if stride != 1:
    assert H % stride == 0 and W % stride == 0

  bf = jnp.bfloat16
  x = x_nhwc.astype(bf)
  # Fold BN scales into the conv weights (per output channel) in f32, then
  # cast once to bf16; only the bias adds remain in the kernel.
  w1 = (params["w1"] * params["s1"]).astype(bf)
  w2 = (params["w2"].reshape(9 * C, C) * params["s2"]).astype(bf)
  w3 = (params["w3"] * params["s3"]).astype(bf)

  inputs = [x, w1, params["b1"], w2, params["b2"], w3, params["b3"]]
  if has_projection:
    wr = (params["wr"] * params["sr"]).astype(bf)
    inputs += [wr, params["br"]]

  weight_bytes = int(sum(int(a.size) * a.dtype.itemsize for a in inputs[1:]))
  vmem_limit = _vmem_limit_bytes()
  Nb = _choose_batch_block(N, H, W, Cin, C, C4, stride, vmem_limit,
                           weight_bytes)

  kernel = _make_bottleneck_kernel(Nb, H, W, Cin, C, C4, stride,
                                   has_projection)

  def _resident_spec(a, single_buffer):
    # Whole-array block, constant block index -> DMA'd once, resident in VMEM.
    nd = a.ndim
    idx = lambda n, _nd=nd: (0,) * _nd
    if single_buffer:
      # Resident tensors never change -> no need for double buffering.
      return pl.BlockSpec(a.shape, idx, pipeline_mode=pl.Buffered(1))
    return pl.BlockSpec(a.shape, idx)

  def _call(single_buffer_weights):
    in_specs = [pl.BlockSpec((Nb, H, W, Cin), lambda n: (n, 0, 0, 0))]
    in_specs += [_resident_spec(a, single_buffer_weights) for a in inputs[1:]]
    return pl.pallas_call(
        kernel,
        out_shape=jax.ShapeDtypeStruct((N, H2, W2, C4), jnp.bfloat16),
        grid=(N // Nb,),
        in_specs=in_specs,
        out_specs=pl.BlockSpec((Nb, H2, W2, C4), lambda n: (n, 0, 0, 0)),
        scratch_shapes=[pltpu.VMEM((Nb, H + 2, W + 2, C), bf)],
        compiler_params=pltpu.CompilerParams(
            dimension_semantics=("parallel",),
            vmem_limit_bytes=vmem_limit),
    )(*inputs)

  try:
    return _call(True)
  except Exception:
    # Fallback for jax/Mosaic versions that reject single-buffered
    # (pipeline_mode=pl.Buffered(1)) resident BlockSpecs.
    return _call(False)


def bottleneck_forward(x_nchw, params, stride=1):
  """PyTorch-layout adapter (NCHW in / NCHW out). For chained blocks prefer
  bottleneck_forward_nhwc end-to-end and transpose only at model entry/exit."""
  x = jnp.transpose(x_nchw, (0, 2, 3, 1))
  out = bottleneck_forward_nhwc(x, params, stride=stride)
  return jnp.transpose(out, (0, 3, 1, 2))


def init_params(key, in_channels, out_channels, stride):
  C = out_channels
  C4 = out_channels * 4
  eps = 1e-5
  k1, k2, k3, k4 = jax.random.split(key, 4)

  def bn_fold(ch):
    gamma = jnp.ones((1, ch), jnp.float32)     # PyTorch BN default init
    beta = jnp.zeros((1, ch), jnp.float32)
    mean = jnp.zeros((1, ch), jnp.float32)
    var = jnp.ones((1, ch), jnp.float32)
    scale = gamma / jnp.sqrt(var + eps)
    bias = beta - mean * scale
    return scale, bias

  p = {}
  p["w1"] = jax.random.normal(k1, (in_channels, C), jnp.float32) * 0.1
  p["s1"], p["b1"] = bn_fold(C)
  p["w2"] = jax.random.normal(k2, (3, 3, C, C), jnp.float32) * 0.1   # HWIO
  p["s2"], p["b2"] = bn_fold(C)
  p["w3"] = jax.random.normal(k3, (C, C4), jnp.float32) * 0.1
  p["s3"], p["b3"] = bn_fold(C4)
  if stride != 1 or in_channels != C4:
    p["wr"] = jax.random.normal(k4, (in_channels, C4), jnp.float32) * 0.1
    p["sr"], p["br"] = bn_fold(C4)
  return p


def reference_forward(x_nchw, params, stride):
  """Pure-JAX reference (lax.conv) with matching bf16 input rounding."""
  bf = jnp.bfloat16
  x = jnp.transpose(x_nchw, (0, 2, 3, 1)).astype(bf)
  Cin = x.shape[-1]
  C = params["w1"].shape[1]
  C4 = params["w3"].shape[1]
  dn = ("NHWC", "HWIO", "NHWC")

  def conv(a, w, s, pad):
    return jax.lax.conv_general_dilated(
        a.astype(bf), w.astype(bf), window_strides=(s, s), padding=pad,
        dimension_numbers=dn, preferred_element_type=jnp.float32)

  h = conv(x, params["w1"].reshape(1, 1, Cin, C), 1, "VALID")
  h = jnp.maximum(h * params["s1"] + params["b1"], 0.0)
  h = conv(h, params["w2"], stride, ((1, 1), (1, 1)))
  h = jnp.maximum(h * params["s2"] + params["b2"], 0.0)
  out = conv(h, params["w3"].reshape(1, 1, C, C4), 1, "VALID")
  out = out * params["s3"] + params["b3"]
  if "wr" in params:
    ident = conv(x, params["wr"].reshape(1, 1, Cin, C4), stride, "VALID")
    ident = ident * params["sr"] + params["br"]
  else:
    ident = x.astype(jnp.float32)
  out = jnp.maximum(out + ident, 0.0)
  return jnp.transpose(out, (0, 3, 1, 2))


if __name__ == "__main__":
  key = jax.random.PRNGKey(0)

  configs = [
      # (N, Cin, H, W, out_channels, stride)
      (2, 8, 16, 16, 8, 1),    # projection shortcut (Cin != 4*C), stride 1
      (2, 16, 16, 16, 8, 2),   # strided downsample + projection shortcut
      (2, 32, 16, 16, 8, 1),   # identity shortcut (Cin == 4*C)
      (8, 16, 16, 16, 8, 1),   # batch-blocked grid (Nb > 1, 4 grid steps)
  ]
  for (N, Cin, H, W, oc, stride) in configs:
    kx, kp, key = jax.random.split(key, 3)
    x = jax.random.normal(kx, (N, Cin, H, W), jnp.float32)   # NCHW (PyTorch)
    params = init_params(kp, Cin, oc, stride)

    out = jax.block_until_ready(bottleneck_forward(x, params, stride=stride))

    H2 = (H - 1) // stride + 1
    W2 = (W - 1) // stride + 1
    assert out.shape == (N, oc * 4, H2, W2)
    assert out.dtype == jnp.bfloat16
    ref = reference_forward(x, params, stride)
    np.testing.assert_allclose(np.asarray(out.astype(jnp.float32)),
                               np.asarray(ref), rtol=1e-2, atol=1e-2)

  print("KERNEL_OK")
</pallas_src>

<mosaic_0001>
module attributes {stable_mosaic.version = 11 : i64} {
  func.func @kernel(%arg0: i32, %arg1: memref<1x16x16x8xbf16, #tpu.memory_space<vmem>>, %arg2: memref<8x8xbf16, #tpu.memory_space<vmem>>, %arg3: memref<1x8xf32, #tpu.memory_space<vmem>>, %arg4: memref<72x8xbf16, #tpu.memory_space<vmem>>, %arg5: memref<1x8xf32, #tpu.memory_space<vmem>>, %arg6: memref<8x32xbf16, #tpu.memory_space<vmem>>, %arg7: memref<1x32xf32, #tpu.memory_space<vmem>>, %arg8: memref<8x32xbf16, #tpu.memory_space<vmem>>, %arg9: memref<1x32xf32, #tpu.memory_space<vmem>>, %arg10: memref<1x16x16x32xbf16, #tpu.memory_space<vmem>>, %arg11: memref<1x18x18x8xbf16, #tpu.memory_space<vmem>>) attributes {dimension_semantics = [#tpu.dimension_semantics<parallel>], iteration_bounds = array<i64: 2>, scalar_prefetch = 0 : i64, scratch_operands = 1 : i64, tpu.core_type = #tpu.core_type<tc>, window_params = [{transform_indices = @transform_0, window_bounds = array<i64: 1, 16, 16, 8>}, {pipeline_mode = #tpu.pipeline_mode<synchronous>, transform_indices = @transform_1, window_bounds = array<i64: 8, 8>}, {pipeline_mode = #tpu.pipeline_mode<synchronous>, transform_indices = @transform_2, window_bounds = array<i64: 1, 8>}, {pipeline_mode = #tpu.pipeline_mode<synchronous>, transform_indices = @transform_3, window_bounds = array<i64: 72, 8>}, {pipeline_mode = #tpu.pipeline_mode<synchronous>, transform_indices = @transform_4, window_bounds = array<i64: 1, 8>}, {pipeline_mode = #tpu.pipeline_mode<synchronous>, transform_indices = @transform_5, window_bounds = array<i64: 8, 32>}, {pipeline_mode = #tpu.pipeline_mode<synchronous>, transform_indices = @transform_6, window_bounds = array<i64: 1, 32>}, {pipeline_mode = #tpu.pipeline_mode<synchronous>, transform_indices = @transform_7, window_bounds = array<i64: 8, 32>}, {pipeline_mode = #tpu.pipeline_mode<synchronous>, transform_indices = @transform_8, window_bounds = array<i64: 1, 32>}, {transform_indices = @transform_9, window_bounds = array<i64: 1, 16, 16, 32>}]} {
    %c0 = arith.constant 0 : index
    %c0_0 = arith.constant 0 : index
    %c0_1 = arith.constant 0 : index
    %c0_2 = arith.constant 0 : index
    %0 = vector.load %arg1[%c0, %c0_0, %c0_1, %c0_2] : memref<1x16x16x8xbf16, #tpu.memory_space<vmem>>, vector<1x16x16x8xbf16>
    %1 = vector.shape_cast %0 : vector<1x16x16x8xbf16> to vector<256x8xbf16>
    %c0_3 = arith.constant 0 : index
    %c0_4 = arith.constant 0 : index
    %2 = vector.load %arg2[%c0_3, %c0_4] : memref<8x8xbf16, #tpu.memory_space<vmem>>, vector<8x8xbf16>
    %cst = arith.constant dense<0.000000e+00> : vector<256x8xf32>
    %3 = tpu.matmul %1, %2, %cst {dimension_numbers = #tpu.dot_dimension_numbers<[1], [0], [0], [1], [0, 0, 1, 1], [], []>} : vector<256x8xbf16>, vector<8x8xbf16>, vector<256x8xf32> -> vector<256x8xf32>
    %c0_5 = arith.constant 0 : index
    %c0_6 = arith.constant 0 : index
    %4 = vector.load %arg3[%c0_5, %c0_6] : memref<1x8xf32, #tpu.memory_space<vmem>>, vector<1x8xf32>
    %5 = vector.broadcast %4 : vector<1x8xf32> to vector<256x8xf32>
    %6 = arith.addf %3, %5 : vector<256x8xf32>
    %cst_7 = arith.constant 0.000000e+00 : f32
    %7 = vector.broadcast %cst_7 : f32 to vector<256x8xf32>
    %8 = arith.maximumf %6, %7 : vector<256x8xf32>
    %cst_8 = arith.constant 0.000000e+00 : bf16
    %9 = vector.broadcast %cst_8 : bf16 to vector<1x1x18x8xbf16>
    %c0_9 = arith.constant 0 : index
    %c0_10 = arith.constant 0 : index
    %c0_11 = arith.constant 0 : index
    %c0_12 = arith.constant 0 : index
    %10 = vector.load %arg11[%c0_9, %c0_10, %c0_11, %c0_12] : memref<1x18x18x8xbf16, #tpu.memory_space<vmem>>, vector<1x1x18x8xbf16>
    tpu.vector_store %arg11[%c0_9, %c0_10, %c0_11, %c0_12], %9 {strides = array<i32>} : memref<1x18x18x8xbf16, #tpu.memory_space<vmem>>, vector<1x1x18x8xbf16>,
    %cst_13 = arith.constant 0.000000e+00 : bf16
    %11 = vector.broadcast %cst_13 : bf16 to vector<1x1x18x8xbf16>
    %c0_14 = arith.constant 0 : index
    %c17 = arith.constant 17 : index
    %c0_15 = arith.constant 0 : index
    %c0_16 = arith.constant 0 : index
    %12 = vector.load %arg11[%c0_14, %c17, %c0_15, %c0_16] : memref<1x18x18x8xbf16, #tpu.memory_space<vmem>>, vector<1x1x18x8xbf16>
    tpu.vector_store %arg11[%c0_14, %c17, %c0_15, %c0_16], %11 {strides = array<i32>} : memref<1x18x18x8xbf16, #tpu.memory_space<vmem>>, vector<1x1x18x8xbf16>,
    %cst_17 = arith.constant 0.000000e+00 : bf16
    %13 = vector.broadcast %cst_17 : bf16 to vector<1x18x1x8xbf16>
    %c0_18 = arith.constant 0 : index
    %c0_19 = arith.constant 0 : index
    %c0_20 = arith.constant 0 : index
    %c0_21 = arith.constant 0 : index
    %14 = vector.load %arg11[%c0_18, %c0_19, %c0_20, %c0_21] : memref<1x18x18x8xbf16, #tpu.memory_space<vmem>>, vector<1x18x1x8xbf16>
    tpu.vector_store %arg11[%c0_18, %c0_19, %c0_20, %c0_21], %13 {strides = array<i32>} : memref<1x18x18x8xbf16, #tpu.memory_space<vmem>>, vector<1x18x1x8xbf16>,
    %cst_22 = arith.constant 0.000000e+00 : bf16
    %15 = vector.broadcast %cst_22 : bf16 to vector<1x18x1x8xbf16>
    %c0_23 = arith.constant 0 : index
    %c0_24 = arith.constant 0 : index
    %c17_25 = arith.constant 17 : index
    %c0_26 = arith.constant 0 : index
    %16 = vector.load %arg11[%c0_23, %c0_24, %c17_25, %c0_26] : memref<1x18x18x8xbf16, #tpu.memory_space<vmem>>, vector<1x18x1x8xbf16>
    tpu.vector_store %arg11[%c0_23, %c0_24, %c17_25, %c0_26], %15 {strides = array<i32>} : memref<1x18x18x8xbf16, #tpu.memory_space<vmem>>, vector<1x18x1x8xbf16>,
    %17 = vector.shape_cast %8 : vector<256x8xf32> to vector<1x16x16x8xf32>
    %18 = arith.truncf %17 : vector<1x16x16x8xf32> to vector<1x16x16x8xbf16>
    %c0_27 = arith.constant 0 : index
    %c1 = arith.constant 1 : index
    %c1_28 = arith.constant 1 : index
    %c0_29 = arith.constant 0 : index
    %19 = vector.load %arg11[%c0_27, %c1, %c1_28, %c0_29] : memref<1x18x18x8xbf16, #tpu.memory_space<vmem>>, vector<1x16x16x8xbf16>
    tpu.vector_store %arg11[%c0_27, %c1, %c1_28, %c0_29], %18 {strides = array<i32>} : memref<1x18x18x8xbf16, #tpu.memory_space<vmem>>, vector<1x16x16x8xbf16>,
    %c0_30 = arith.constant 0 : index
    %c0_31 = arith.constant 0 : index
    %c0_32 = arith.constant 0 : index
    %c0_33 = arith.constant 0 : index
    %20 = vector.load %arg11[%c0_30, %c0_31, %c0_32, %c0_33] : memref<1x18x18x8xbf16, #tpu.memory_space<vmem>>, vector<1x16x16x8xbf16>
    %21 = vector.shape_cast %20 : vector<1x16x16x8xbf16> to vector<256x8xbf16>
    %c0_34 = arith.constant 0 : index
    %c0_35 = arith.constant 0 : index
    %22 = vector.load %arg4[%c0_34, %c0_35] : memref<72x8xbf16, #tpu.memory_space<vmem>>, vector<8x8xbf16>
    %cst_36 = arith.constant dense<0.000000e+00> : vector<256x8xf32>
    %23 = tpu.matmul %21, %22, %cst_36 {dimension_numbers = #tpu.dot_dimension_numbers<[1], [0], [0], [1], [0, 0, 1, 1], [], []>} : vector<256x8xbf16>, vector<8x8xbf16>, vector<256x8xf32> -> vector<256x8xf32>
    %c0_37 = arith.constant 0 : index
    %c0_38 = arith.constant 0 : index
    %c1_39 = arith.constant 1 : index
    %c0_40 = arith.constant 0 : index
    %24 = vector.load %arg11[%c0_37, %c0_38, %c1_39, %c0_40] : memref<1x18x18x8xbf16, #tpu.memory_space<vmem>>, vector<1x16x16x8xbf16>
    %25 = vector.shape_cast %24 : vector<1x16x16x8xbf16> to vector<256x8xbf16>
    %c8 = arith.constant 8 : index
    %c0_41 = arith.constant 0 : index
    %26 = vector.load %arg4[%c8, %c0_41] : memref<72x8xbf16, #tpu.memory_space<vmem>>, vector<8x8xbf16>
    %cst_42 = arith.constant dense<0.000000e+00> : vector<256x8xf32>
    %27 = tpu.matmul %25, %26, %cst_42 {dimension_numbers = #tpu.dot_dimension_numbers<[1], [0], [0], [1], [0, 0, 1, 1], [], []>} : vector<256x8xbf16>, vector<8x8xbf16>, vector<256x8xf32> -> vector<256x8xf32>
    %28 = arith.addf %23, %27 : vector<256x8xf32>
    %c0_43 = arith.constant 0 : index
    %c0_44 = arith.constant 0 : index
    %c2 = arith.constant 2 : index
    %c0_45 = arith.constant 0 : index
    %29 = vector.load %arg11[%c0_43, %c0_44, %c2, %c0_45] : memref<1x18x18x8xbf16, #tpu.memory_space<vmem>>, vector<1x16x16x8xbf16>
    %30 = vector.shape_cast %29 : vector<1x16x16x8xbf16> to vector<256x8xbf16>
    %c16 = arith.constant 16 : index
    %c0_46 = arith.constant 0 : index
    %31 = vector.load %arg4[%c16, %c0_46] : memref<72x8xbf16, #tpu.memory_space<vmem>>, vector<8x8xbf16>
    %cst_47 = arith.constant dense<0.000000e+00> : vector<256x8xf32>
    %32 = tpu.matmul %30, %31, %cst_47 {dimension_numbers = #tpu.dot_dimension_numbers<[1], [0], [0], [1], [0, 0, 1, 1], [], []>} : vector<256x8xbf16>, vector<8x8xbf16>, vector<256x8xf32> -> vector<256x8xf32>
    %33 = arith.addf %28, %32 : vector<256x8xf32>
    %c0_48 = arith.constant 0 : index
    %c1_49 = arith.constant 1 : index
    %c0_50 = arith.constant 0 : index
    %c0_51 = arith.constant 0 : index
    %34 = vector.load %arg11[%c0_48, %c1_49, %c0_50, %c0_51] : memref<1x18x18x8xbf16, #tpu.memory_space<vmem>>, vector<1x16x16x8xbf16>
    %35 = vector.shape_cast %34 : vector<1x16x16x8xbf16> to vector<256x8xbf16>
    %c24 = arith.constant 24 : index
    %c0_52 = arith.constant 0 : index
    %36 = vector.load %arg4[%c24, %c0_52] : memref<72x8xbf16, #tpu.memory_space<vmem>>, vector<8x8xbf16>
    %cst_53 = arith.constant dense<0.000000e+00> : vector<256x8xf32>
    %37 = tpu.matmul %35, %36, %cst_53 {dimension_numbers = #tpu.dot_dimension_numbers<[1], [0], [0], [1], [0, 0, 1, 1], [], []>} : vector<256x8xbf16>, vector<8x8xbf16>, vector<256x8xf32> -> vector<256x8xf32>
    %38 = arith.addf %33, %37 : vector<256x8xf32>
    %c0_54 = arith.constant 0 : index
    %c1_55 = arith.constant 1 : index
    %c1_56 = arith.constant 1 : index
    %c0_57 = arith.constant 0 : index
    %39 = vector.load %arg11[%c0_54, %c1_55, %c1_56, %c0_57] : memref<1x18x18x8xbf16, #tpu.memory_space<vmem>>, vector<1x16x16x8xbf16>
    %40 = vector.shape_cast %39 : vector<1x16x16x8xbf16> to vector<256x8xbf16>
    %c32 = arith.constant 32 : index
    %c0_58 = arith.constant 0 : index
    %41 = vector.load %arg4[%c32, %c0_58] : memref<72x8xbf16, #tpu.memory_space<vmem>>, vector<8x8xbf16>
    %cst_59 = arith.constant dense<0.000000e+00> : vector<256x8xf32>
    %42 = tpu.matmul %40, %41, %cst_59 {dimension_numbers = #tpu.dot_dimension_numbers<[1], [0], [0], [1], [0, 0, 1, 1], [], []>} : vector<256x8xbf16>, vector<8x8xbf16>, vector<256x8xf32> -> vector<256x8xf32>
    %43 = arith.addf %38, %42 : vector<256x8xf32>
    %c0_60 = arith.constant 0 : index
    %c1_61 = arith.constant 1 : index
    %c2_62 = arith.constant 2 : index
    %c0_63 = arith.constant 0 : index
    %44 = vector.load %arg11[%c0_60, %c1_61, %c2_62, %c0_63] : memref<1x18x18x8xbf16, #tpu.memory_space<vmem>>, vector<1x16x16x8xbf16>
    %45 = vector.shape_cast %44 : vector<1x16x16x8xbf16> to vector<256x8xbf16>
    %c40 = arith.constant 40 : index
    %c0_64 = arith.constant 0 : index
    %46 = vector.load %arg4[%c40, %c0_64] : memref<72x8xbf16, #tpu.memory_space<vmem>>, vector<8x8xbf16>
    %cst_65 = arith.constant dense<0.000000e+00> : vector<256x8xf32>
    %47 = tpu.matmul %45, %46, %cst_65 {dimension_numbers = #tpu.dot_dimension_numbers<[1], [0], [0], [1], [0, 0, 1, 1], [], []>} : vector<256x8xbf16>, vector<8x8xbf16>, vector<256x8xf32> -> vector<256x8xf32>
    %48 = arith.addf %43, %47 : vector<256x8xf32>
    %c0_66 = arith.constant 0 : index
    %c2_67 = arith.constant 2 : index
    %c0_68 = arith.constant 0 : index
    %c0_69 = arith.constant 0 : index
    %49 = vector.load %arg11[%c0_66, %c2_67, %c0_68, %c0_69] : memref<1x18x18x8xbf16, #tpu.memory_space<vmem>>, vector<1x16x16x8xbf16>
    %50 = vector.shape_cast %49 : vector<1x16x16x8xbf16> to vector<256x8xbf16>
    %c48 = arith.constant 48 : index
    %c0_70 = arith.constant 0 : index
    %51 = vector.load %arg4[%c48, %c0_70] : memref<72x8xbf16, #tpu.memory_space<vmem>>, vector<8x8xbf16>
    %cst_71 = arith.constant dense<0.000000e+00> : vector<256x8xf32>
    %52 = tpu.matmul %50, %51, %cst_71 {dimension_numbers = #tpu.dot_dimension_numbers<[1], [0], [0], [1], [0, 0, 1, 1], [], []>} : vector<256x8xbf16>, vector<8x8xbf16>, vector<256x8xf32> -> vector<256x8xf32>
    %53 = arith.addf %48, %52 : vector<256x8xf32>
    %c0_72 = arith.constant 0 : index
    %c2_73 = arith.constant 2 : index
    %c1_74 = arith.constant 1 : index
    %c0_75 = arith.constant 0 : index
    %54 = vector.load %arg11[%c0_72, %c2_73, %c1_74, %c0_75] : memref<1x18x18x8xbf16, #tpu.memory_space<vmem>>, vector<1x16x16x8xbf16>
    %55 = vector.shape_cast %54 : vector<1x16x16x8xbf16> to vector<256x8xbf16>
    %c56 = arith.constant 56 : index
    %c0_76 = arith.constant 0 : index
    %56 = vector.load %arg4[%c56, %c0_76] : memref<72x8xbf16, #tpu.memory_space<vmem>>, vector<8x8xbf16>
    %cst_77 = arith.constant dense<0.000000e+00> : vector<256x8xf32>
    %57 = tpu.matmul %55, %56, %cst_77 {dimension_numbers = #tpu.dot_dimension_numbers<[1], [0], [0], [1], [0, 0, 1, 1], [], []>} : vector<256x8xbf16>, vector<8x8xbf16>, vector<256x8xf32> -> vector<256x8xf32>
    %58 = arith.addf %53, %57 : vector<256x8xf32>
    %c0_78 = arith.constant 0 : index
    %c2_79 = arith.constant 2 : index
    %c2_80 = arith.constant 2 : index
    %c0_81 = arith.constant 0 : index
    %59 = vector.load %arg11[%c0_78, %c2_79, %c2_80, %c0_81] : memref<1x18x18x8xbf16, #tpu.memory_space<vmem>>, vector<1x16x16x8xbf16>
    %60 = vector.shape_cast %59 : vector<1x16x16x8xbf16> to vector<256x8xbf16>
    %c64 = arith.constant 64 : index
    %c0_82 = arith.constant 0 : index
    %61 = vector.load %arg4[%c64, %c0_82] : memref<72x8xbf16, #tpu.memory_space<vmem>>, vector<8x8xbf16>
    %cst_83 = arith.constant dense<0.000000e+00> : vector<256x8xf32>
    %62 = tpu.matmul %60, %61, %cst_83 {dimension_numbers = #tpu.dot_dimension_numbers<[1], [0], [0], [1], [0, 0, 1, 1], [], []>} : vector<256x8xbf16>, vector<8x8xbf16>, vector<256x8xf32> -> vector<256x8xf32>
    %63 = arith.addf %58, %62 : vector<256x8xf32>
    %c0_84 = arith.constant 0 : index
    %c0_85 = arith.constant 0 : index
    %64 = vector.load %arg5[%c0_84, %c0_85] : memref<1x8xf32, #tpu.memory_space<vmem>>, vector<1x8xf32>
    %65 = vector.broadcast %64 : vector<1x8xf32> to vector<256x8xf32>
    %66 = arith.addf %63, %65 : vector<256x8xf32>
    %cst_86 = arith.constant 0.000000e+00 : f32
    %67 = vector.broadcast %cst_86 : f32 to vector<256x8xf32>
    %68 = arith.maximumf %66, %67 : vector<256x8xf32>
    %69 = arith.truncf %68 : vector<256x8xf32> to vector<256x8xbf16>
    %c0_87 = arith.constant 0 : index
    %c0_88 = arith.constant 0 : index
    %70 = vector.load %arg6[%c0_87, %c0_88] : memref<8x32xbf16, #tpu.memory_space<vmem>>, vector<8x32xbf16>
    %cst_89 = arith.constant dense<0.000000e+00> : vector<256x32xf32>
    %71 = tpu.matmul %69, %70, %cst_89 {dimension_numbers = #tpu.dot_dimension_numbers<[1], [0], [0], [1], [0, 0, 1, 1], [], []>} : vector<256x8xbf16>, vector<8x32xbf16>, vector<256x32xf32> -> vector<256x32xf32>
    %c0_90 = arith.constant 0 : index
    %c0_91 = arith.constant 0 : index
    %72 = vector.load %arg7[%c0_90, %c0_91] : memref<1x32xf32, #tpu.memory_space<vmem>>, vector<1x32xf32>
    %73 = vector.broadcast %72 : vector<1x32xf32> to vector<256x32xf32>
    %74 = arith.addf %71, %73 : vector<256x32xf32>
    %c0_92 = arith.constant 0 : index
    %c0_93 = arith.constant 0 : index
    %75 = vector.load %arg8[%c0_92, %c0_93] : memref<8x32xbf16, #tpu.memory_space<vmem>>, vector<8x32xbf16>
    %cst_94 = arith.constant dense<0.000000e+00> : vector<256x32xf32>
    %76 = tpu.matmul %1, %75, %cst_94 {dimension_numbers = #tpu.dot_dimension_numbers<[1], [0], [0], [1], [0, 0, 1, 1], [], []>} : vector<256x8xbf16>, vector<8x32xbf16>, vector<256x32xf32> -> vector<256x32xf32>
    %c0_95 = arith.constant 0 : index
    %c0_96 = arith.constant 0 : index
    %77 = vector.load %arg9[%c0_95, %c0_96] : memref<1x32xf32, #tpu.memory_space<vmem>>, vector<1x32xf32>
    %78 = vector.broadcast %77 : vector<1x32xf32> to vector<256x32xf32>
    %79 = arith.addf %76, %78 : vector<256x32xf32>
    %80 = arith.addf %74, %79 : vector<256x32xf32>
    %cst_97 = arith.constant 0.000000e+00 : f32
    %81 = vector.broadcast %cst_97 : f32 to vector<256x32xf32>
    %82 = arith.maximumf %80, %81 : vector<256x32xf32>
    %83 = vector.shape_cast %82 : vector<256x32xf32> to vector<1x16x16x32xf32>
    %84 = arith.truncf %83 : vector<1x16x16x32xf32> to vector<1x16x16x32xbf16>
    %c0_98 = arith.constant 0 : index
    %c0_99 = arith.constant 0 : index
    %c0_100 = arith.constant 0 : index
    %c0_101 = arith.constant 0 : index
    %85 = vector.load %arg10[%c0_98, %c0_99, %c0_100, %c0_101] : memref<1x16x16x32xbf16, #tpu.memory_space<vmem>>, vector<1x16x16x32xbf16>
    tpu.vector_store %arg10[%c0_98, %c0_99, %c0_100, %c0_101], %84 {strides = array<i32>} : memref<1x16x16x32xbf16, #tpu.memory_space<vmem>>, vector<1x16x16x32xbf16>,
    return
  }
  func.func @transform_0(%arg0: i32) -> (i32, i32, i32, i32) {
    %c0_i32 = arith.constant 0 : i32
    %c0_i32_0 = arith.constant 0 : i32
    %c0_i32_1 = arith.constant 0 : i32
    %c0_i32_2 = arith.constant 0 : i32
    return %arg0, %c0_i32, %c0_i32_0, %c0_i32_1 : i32, i32, i32, i32
  }
  func.func @transform_1(%arg0: i32) -> (i32, i32) {
    %c0_i32 = arith.constant 0 : i32
    %c0_i32_0 = arith.constant 0 : i32
    %c0_i32_1 = arith.constant 0 : i32
    return %c0_i32, %c0_i32_0 : i32, i32
  }
  func.func @transform_2(%arg0: i32) -> (i32, i32) {
    %c0_i32 = arith.constant 0 : i32
    %c0_i32_0 = arith.constant 0 : i32
    %c0_i32_1 = arith.constant 0 : i32
    return %c0_i32, %c0_i32_0 : i32, i32
  }
  func.func @transform_3(%arg0: i32) -> (i32, i32) {
    %c0_i32 = arith.constant 0 : i32
    %c0_i32_0 = arith.constant 0 : i32
    %c0_i32_1 = arith.constant 0 : i32
    return %c0_i32, %c0_i32_0 : i32, i32
  }
  func.func @transform_4(%arg0: i32) -> (i32, i32) {
    %c0_i32 = arith.constant 0 : i32
    %c0_i32_0 = arith.constant 0 : i32
    %c0_i32_1 = arith.constant 0 : i32
    return %c0_i32, %c0_i32_0 : i32, i32
  }
  func.func @transform_5(%arg0: i32) -> (i32, i32) {
    %c0_i32 = arith.constant 0 : i32
    %c0_i32_0 = arith.constant 0 : i32
    %c0_i32_1 = arith.constant 0 : i32
    return %c0_i32, %c0_i32_0 : i32, i32
  }
  func.func @transform_6(%arg0: i32) -> (i32, i32) {
    %c0_i32 = arith.constant 0 : i32
    %c0_i32_0 = arith.constant 0 : i32
    %c0_i32_1 = arith.constant 0 : i32
    return %c0_i32, %c0_i32_0 : i32, i32
  }
  func.func @transform_7(%arg0: i32) -> (i32, i32) {
    %c0_i32 = arith.constant 0 : i32
    %c0_i32_0 = arith.constant 0 : i32
    %c0_i32_1 = arith.constant 0 : i32
    return %c0_i32, %c0_i32_0 : i32, i32
  }
  func.func @transform_8(%arg0: i32) -> (i32, i32) {
    %c0_i32 = arith.constant 0 : i32
    %c0_i32_0 = arith.constant 0 : i32
    %c0_i32_1 = arith.constant 0 : i32
    return %c0_i32, %c0_i32_0 : i32, i32
  }
  func.func @transform_9(%arg0: i32) -> (i32, i32, i32, i32) {
    %c0_i32 = arith.constant 0 : i32
    %c0_i32_0 = arith.constant 0 : i32
    %c0_i32_1 = arith.constant 0 : i32
    %c0_i32_2 = arith.constant 0 : i32
    return %arg0, %c0_i32, %c0_i32_0, %c0_i32_1 : i32, i32, i32, i32
  }
}

module attributes {stable_mosaic.version = 11 : i64} {
  func.func @kernel(%arg0: i32, %arg1: memref<1x16x16x8xbf16, #tpu.memory_space<vmem>>, %arg2: memref<8x8xbf16, #tpu.memory_space<vmem>>, %arg3: memref<1x8xf32, #tpu.memory_space<vmem>>, %arg4: memref<72x8xbf16, #tpu.memory_space<vmem>>, %arg5: memref<1x8xf32, #tpu.memory_space<vmem>>, %arg6: memref<8x32xbf16, #tpu.memory_space<vmem>>, %arg7: memref<1x32xf32, #tpu.memory_space<vmem>>, %arg8: memref<8x32xbf16, #tpu.memory_space<vmem>>, %arg9: memref<1x32xf32, #tpu.memory_space<vmem>>, %arg10: memref<1x16x16x32xbf16, #tpu.memory_space<vmem>>, %arg11: memref<1x18x18x8xbf16, #tpu.memory_space<vmem>>) attributes {dimension_semantics = [#tpu.dimension_semantics<parallel>], iteration_bounds = array<i64: 2>, scalar_prefetch = 0 : i64, scratch_operands = 1 : i64, tpu.core_type = #tpu.core_type<tc>, window_params = [{transform_indices = @transform_0, window_bounds = array<i64: 1, 16, 16, 8>}, {pipeline_mode = #tpu.pipeline_mode<synchronous>, transform_indices = @transform_1, window_bounds = array<i64: 8, 8>}, {pipeline_mode = #tpu.pipeline_mode<synchronous>, transform_indices = @transform_2, window_bounds = array<i64: 1, 8>}, {pipeline_mode = #tpu.pipeline_mode<synchronous>, transform_indices = @transform_3, window_bounds = array<i64: 72, 8>}, {pipeline_mode = #tpu.pipeline_mode<synchronous>, transform_indices = @transform_4, window_bounds = array<i64: 1, 8>}, {pipeline_mode = #tpu.pipeline_mode<synchronous>, transform_indices = @transform_5, window_bounds = array<i64: 8, 32>}, {pipeline_mode = #tpu.pipeline_mode<synchronous>, transform_indices = @transform_6, window_bounds = array<i64: 1, 32>}, {pipeline_mode = #tpu.pipeline_mode<synchronous>, transform_indices = @transform_7, window_bounds = array<i64: 8, 32>}, {pipeline_mode = #tpu.pipeline_mode<synchronous>, transform_indices = @transform_8, window_bounds = array<i64: 1, 32>}, {transform_indices = @transform_9, window_bounds = array<i64: 1, 16, 16, 32>}]} {
    %c0 = arith.constant 0 : index
    %c0_0 = arith.constant 0 : index
    %c0_1 = arith.constant 0 : index
    %c0_2 = arith.constant 0 : index
    %0 = vector.load %arg1[%c0, %c0_0, %c0_1, %c0_2] : memref<1x16x16x8xbf16, #tpu.memory_space<vmem>>, vector<1x16x16x8xbf16>
    %1 = vector.shape_cast %0 : vector<1x16x16x8xbf16> to vector<256x8xbf16>
    %c0_3 = arith.constant 0 : index
    %c0_4 = arith.constant 0 : index
    %2 = vector.load %arg2[%c0_3, %c0_4] : memref<8x8xbf16, #tpu.memory_space<vmem>>, vector<8x8xbf16>
    %cst = arith.constant dense<0.000000e+00> : vector<256x8xf32>
    %3 = tpu.matmul %1, %2, %cst {dimension_numbers = #tpu.dot_dimension_numbers<[1], [0], [0], [1], [0, 0, 1, 1], [], []>} : vector<256x8xbf16>, vector<8x8xbf16>, vector<256x8xf32> -> vector<256x8xf32>
    %c0_5 = arith.constant 0 : index
    %c0_6 = arith.constant 0 : index
    %4 = vector.load %arg3[%c0_5, %c0_6] : memref<1x8xf32, #tpu.memory_space<vmem>>, vector<1x8xf32>
    %5 = vector.broadcast %4 : vector<1x8xf32> to vector<256x8xf32>
    %6 = arith.addf %3, %5 : vector<256x8xf32>
    %cst_7 = arith.constant 0.000000e+00 : f32
    %7 = vector.broadcast %cst_7 : f32 to vector<256x8xf32>
    %8 = arith.maximumf %6, %7 : vector<256x8xf32>
    %cst_8 = arith.constant 0.000000e+00 : bf16
    %9 = vector.broadcast %cst_8 : bf16 to vector<1x1x18x8xbf16>
    %c0_9 = arith.constant 0 : index
    %c0_10 = arith.constant 0 : index
    %c0_11 = arith.constant 0 : index
    %c0_12 = arith.constant 0 : index
    %10 = vector.load %arg11[%c0_9, %c0_10, %c0_11, %c0_12] : memref<1x18x18x8xbf16, #tpu.memory_space<vmem>>, vector<1x1x18x8xbf16>
    tpu.vector_store %arg11[%c0_9, %c0_10, %c0_11, %c0_12], %9 {strides = array<i32>} : memref<1x18x18x8xbf16, #tpu.memory_space<vmem>>, vector<1x1x18x8xbf16>,
    %cst_13 = arith.constant 0.000000e+00 : bf16
    %11 = vector.broadcast %cst_13 : bf16 to vector<1x1x18x8xbf16>
    %c0_14 = arith.constant 0 : index
    %c17 = arith.constant 17 : index
    %c0_15 = arith.constant 0 : index
    %c0_16 = arith.constant 0 : index
    %12 = vector.load %arg11[%c0_14, %c17, %c0_15, %c0_16] : memref<1x18x18x8xbf16, #tpu.memory_space<vmem>>, vector<1x1x18x8xbf16>
    tpu.vector_store %arg11[%c0_14, %c17, %c0_15, %c0_16], %11 {strides = array<i32>} : memref<1x18x18x8xbf16, #tpu.memory_space<vmem>>, vector<1x1x18x8xbf16>,
    %cst_17 = arith.constant 0.000000e+00 : bf16
    %13 = vector.broadcast %cst_17 : bf16 to vector<1x18x1x8xbf16>
    %c0_18 = arith.constant 0 : index
    %c0_19 = arith.constant 0 : index
    %c0_20 = arith.constant 0 : index
    %c0_21 = arith.constant 0 : index
    %14 = vector.load %arg11[%c0_18, %c0_19, %c0_20, %c0_21] : memref<1x18x18x8xbf16, #tpu.memory_space<vmem>>, vector<1x18x1x8xbf16>
    tpu.vector_store %arg11[%c0_18, %c0_19, %c0_20, %c0_21], %13 {strides = array<i32>} : memref<1x18x18x8xbf16, #tpu.memory_space<vmem>>, vector<1x18x1x8xbf16>,
    %cst_22 = arith.constant 0.000000e+00 : bf16
    %15 = vector.broadcast %cst_22 : bf16 to vector<1x18x1x8xbf16>
    %c0_23 = arith.constant 0 : index
    %c0_24 = arith.constant 0 : index
    %c17_25 = arith.constant 17 : index
    %c0_26 = arith.constant 0 : index
    %16 = vector.load %arg11[%c0_23, %c0_24, %c17_25, %c0_26] : memref<1x18x18x8xbf16, #tpu.memory_space<vmem>>, vector<1x18x1x8xbf16>
    tpu.vector_store %arg11[%c0_23, %c0_24, %c17_25, %c0_26], %15 {strides = array<i32>} : memref<1x18x18x8xbf16, #tpu.memory_space<vmem>>, vector<1x18x1x8xbf16>,
    %17 = vector.shape_cast %8 : vector<256x8xf32> to vector<1x16x16x8xf32>
    %18 = arith.truncf %17 : vector<1x16x16x8xf32> to vector<1x16x16x8xbf16>
    %c0_27 = arith.constant 0 : index
    %c1 = arith.constant 1 : index
    %c1_28 = arith.constant 1 : index
    %c0_29 = arith.constant 0 : index
    %19 = vector.load %arg11[%c0_27, %c1, %c1_28, %c0_29] : memref<1x18x18x8xbf16, #tpu.memory_space<vmem>>, vector<1x16x16x8xbf16>
    tpu.vector_store %arg11[%c0_27, %c1, %c1_28, %c0_29], %18 {strides = array<i32>} : memref<1x18x18x8xbf16, #tpu.memory_space<vmem>>, vector<1x16x16x8xbf16>,
    %c0_30 = arith.constant 0 : index
    %c0_31 = arith.constant 0 : index
    %c0_32 = arith.constant 0 : index
    %c0_33 = arith.constant 0 : index
    %20 = vector.load %arg11[%c0_30, %c0_31, %c0_32, %c0_33] : memref<1x18x18x8xbf16, #tpu.memory_space<vmem>>, vector<1x16x16x8xbf16>
    %21 = vector.shape_cast %20 : vector<1x16x16x8xbf16> to vector<256x8xbf16>
    %c0_34 = arith.constant 0 : index
    %c0_35 = arith.constant 0 : index
    %22 = vector.load %arg4[%c0_34, %c0_35] : memref<72x8xbf16, #tpu.memory_space<vmem>>, vector<8x8xbf16>
    %cst_36 = arith.constant dense<0.000000e+00> : vector<256x8xf32>
    %23 = tpu.matmul %21, %22, %cst_36 {dimension_numbers = #tpu.dot_dimension_numbers<[1], [0], [0], [1], [0, 0, 1, 1], [], []>} : vector<256x8xbf16>, vector<8x8xbf16>, vector<256x8xf32> -> vector<256x8xf32>
    %c0_37 = arith.constant 0 : index
    %c0_38 = arith.constant 0 : index
    %c1_39 = arith.constant 1 : index
    %c0_40 = arith.constant 0 : index
    %24 = vector.load %arg11[%c0_37, %c0_38, %c1_39, %c0_40] : memref<1x18x18x8xbf16, #tpu.memory_space<vmem>>, vector<1x16x16x8xbf16>
    %25 = vector.shape_cast %24 : vector<1x16x16x8xbf16> to vector<256x8xbf16>
    %c8 = arith.constant 8 : index
    %c0_41 = arith.constant 0 : index
    %26 = vector.load %arg4[%c8, %c0_41] : memref<72x8xbf16, #tpu.memory_space<vmem>>, vector<8x8xbf16>
    %cst_42 = arith.constant dense<0.000000e+00> : vector<256x8xf32>
    %27 = tpu.matmul %25, %26, %cst_42 {dimension_numbers = #tpu.dot_dimension_numbers<[1], [0], [0], [1], [0, 0, 1, 1], [], []>} : vector<256x8xbf16>, vector<8x8xbf16>, vector<256x8xf32> -> vector<256x8xf32>
    %28 = arith.addf %23, %27 : vector<256x8xf32>
    %c0_43 = arith.constant 0 : index
    %c0_44 = arith.constant 0 : index
    %c2 = arith.constant 2 : index
    %c0_45 = arith.constant 0 : index
    %29 = vector.load %arg11[%c0_43, %c0_44, %c2, %c0_45] : memref<1x18x18x8xbf16, #tpu.memory_space<vmem>>, vector<1x16x16x8xbf16>
    %30 = vector.shape_cast %29 : vector<1x16x16x8xbf16> to vector<256x8xbf16>
    %c16 = arith.constant 16 : index
    %c0_46 = arith.constant 0 : index
    %31 = vector.load %arg4[%c16, %c0_46] : memref<72x8xbf16, #tpu.memory_space<vmem>>, vector<8x8xbf16>
    %cst_47 = arith.constant dense<0.000000e+00> : vector<256x8xf32>
    %32 = tpu.matmul %30, %31, %cst_47 {dimension_numbers = #tpu.dot_dimension_numbers<[1], [0], [0], [1], [0, 0, 1, 1], [], []>} : vector<256x8xbf16>, vector<8x8xbf16>, vector<256x8xf32> -> vector<256x8xf32>
    %33 = arith.addf %28, %32 : vector<256x8xf32>
    %c0_48 = arith.constant 0 : index
    %c1_49 = arith.constant 1 : index
    %c0_50 = arith.constant 0 : index
    %c0_51 = arith.constant 0 : index
    %34 = vector.load %arg11[%c0_48, %c1_49, %c0_50, %c0_51] : memref<1x18x18x8xbf16, #tpu.memory_space<vmem>>, vector<1x16x16x8xbf16>
    %35 = vector.shape_cast %34 : vector<1x16x16x8xbf16> to vector<256x8xbf16>
    %c24 = arith.constant 24 : index
    %c0_52 = arith.constant 0 : index
    %36 = vector.load %arg4[%c24, %c0_52] : memref<72x8xbf16, #tpu.memory_space<vmem>>, vector<8x8xbf16>
    %cst_53 = arith.constant dense<0.000000e+00> : vector<256x8xf32>
    %37 = tpu.matmul %35, %36, %cst_53 {dimension_numbers = #tpu.dot_dimension_numbers<[1], [0], [0], [1], [0, 0, 1, 1], [], []>} : vector<256x8xbf16>, vector<8x8xbf16>, vector<256x8xf32> -> vector<256x8xf32>
    %38 = arith.addf %33, %37 : vector<256x8xf32>
    %c0_54 = arith.constant 0 : index
    %c1_55 = arith.constant 1 : index
    %c1_56 = arith.constant 1 : index
    %c0_57 = arith.constant 0 : index
    %39 = vector.load %arg11[%c0_54, %c1_55, %c1_56, %c0_57] : memref<1x18x18x8xbf16, #tpu.memory_space<vmem>>, vector<1x16x16x8xbf16>
    %40 = vector.shape_cast %39 : vector<1x16x16x8xbf16> to vector<256x8xbf16>
    %c32 = arith.constant 32 : index
    %c0_58 = arith.constant 0 : index
    %41 = vector.load %arg4[%c32, %c0_58] : memref<72x8xbf16, #tpu.memory_space<vmem>>, vector<8x8xbf16>
    %cst_59 = arith.constant dense<0.000000e+00> : vector<256x8xf32>
    %42 = tpu.matmul %40, %41, %cst_59 {dimension_numbers = #tpu.dot_dimension_numbers<[1], [0], [0], [1], [0, 0, 1, 1], [], []>} : vector<256x8xbf16>, vector<8x8xbf16>, vector<256x8xf32> -> vector<256x8xf32>
    %43 = arith.addf %38, %42 : vector<256x8xf32>
    %c0_60 = arith.constant 0 : index
    %c1_61 = arith.constant 1 : index
    %c2_62 = arith.constant 2 : index
    %c0_63 = arith.constant 0 : index
    %44 = vector.load %arg11[%c0_60, %c1_61, %c2_62, %c0_63] : memref<1x18x18x8xbf16, #tpu.memory_space<vmem>>, vector<1x16x16x8xbf16>
    %45 = vector.shape_cast %44 : vector<1x16x16x8xbf16> to vector<256x8xbf16>
    %c40 = arith.constant 40 : index
    %c0_64 = arith.constant 0 : index
    %46 = vector.load %arg4[%c40, %c0_64] : memref<72x8xbf16, #tpu.memory_space<vmem>>, vector<8x8xbf16>
    %cst_65 = arith.constant dense<0.000000e+00> : vector<256x8xf32>
    %47 = tpu.matmul %45, %46, %cst_65 {dimension_numbers = #tpu.dot_dimension_numbers<[1], [0], [0], [1], [0, 0, 1, 1], [], []>} : vector<256x8xbf16>, vector<8x8xbf16>, vector<256x8xf32> -> vector<256x8xf32>
    %48 = arith.addf %43, %47 : vector<256x8xf32>
    %c0_66 = arith.constant 0 : index
    %c2_67 = arith.constant 2 : index
    %c0_68 = arith.constant 0 : index
    %c0_69 = arith.constant 0 : index
    %49 = vector.load %arg11[%c0_66, %c2_67, %c0_68, %c0_69] : memref<1x18x18x8xbf16, #tpu.memory_space<vmem>>, vector<1x16x16x8xbf16>
    %50 = vector.shape_cast %49 : vector<1x16x16x8xbf16> to vector<256x8xbf16>
    %c48 = arith.constant 48 : index
    %c0_70 = arith.constant 0 : index
    %51 = vector.load %arg4[%c48, %c0_70] : memref<72x8xbf16, #tpu.memory_space<vmem>>, vector<8x8xbf16>
    %cst_71 = arith.constant dense<0.000000e+00> : vector<256x8xf32>
    %52 = tpu.matmul %50, %51, %cst_71 {dimension_numbers = #tpu.dot_dimension_numbers<[1], [0], [0], [1], [0, 0, 1, 1], [], []>} : vector<256x8xbf16>, vector<8x8xbf16>, vector<256x8xf32> -> vector<256x8xf32>
    %53 = arith.addf %48, %52 : vector<256x8xf32>
    %c0_72 = arith.constant 0 : index
    %c2_73 = arith.constant 2 : index
    %c1_74 = arith.constant 1 : index
    %c0_75 = arith.constant 0 : index
    %54 = vector.load %arg11[%c0_72, %c2_73, %c1_74, %c0_75] : memref<1x18x18x8xbf16, #tpu.memory_space<vmem>>, vector<1x16x16x8xbf16>
    %55 = vector.shape_cast %54 : vector<1x16x16x8xbf16> to vector<256x8xbf16>
    %c56 = arith.constant 56 : index
    %c0_76 = arith.constant 0 : index
    %56 = vector.load %arg4[%c56, %c0_76] : memref<72x8xbf16, #tpu.memory_space<vmem>>, vector<8x8xbf16>
    %cst_77 = arith.constant dense<0.000000e+00> : vector<256x8xf32>
    %57 = tpu.matmul %55, %56, %cst_77 {dimension_numbers = #tpu.dot_dimension_numbers<[1], [0], [0], [1], [0, 0, 1, 1], [], []>} : vector<256x8xbf16>, vector<8x8xbf16>, vector<256x8xf32> -> vector<256x8xf32>
    %58 = arith.addf %53, %57 : vector<256x8xf32>
    %c0_78 = arith.constant 0 : index
    %c2_79 = arith.constant 2 : index
    %c2_80 = arith.constant 2 : index
    %c0_81 = arith.constant 0 : index
    %59 = vector.load %arg11[%c0_78, %c2_79, %c2_80, %c0_81] : memref<1x18x18x8xbf16, #tpu.memory_space<vmem>>, vector<1x16x16x8xbf16>
    %60 = vector.shape_cast %59 : vector<1x16x16x8xbf16> to vector<256x8xbf16>
    %c64 = arith.constant 64 : index
    %c0_82 = arith.constant 0 : index
    %61 = vector.load %arg4[%c64, %c0_82] : memref<72x8xbf16, #tpu.memory_space<vmem>>, vector<8x8xbf16>
    %cst_83 = arith.constant dense<0.000000e+00> : vector<256x8xf32>
    %62 = tpu.matmul %60, %61, %cst_83 {dimension_numbers = #tpu.dot_dimension_numbers<[1], [0], [0], [1], [0, 0, 1, 1], [], []>} : vector<256x8xbf16>, vector<8x8xbf16>, vector<256x8xf32> -> vector<256x8xf32>
    %63 = arith.addf %58, %62 : vector<256x8xf32>
    %c0_84 = arith.constant 0 : index
    %c0_85 = arith.constant 0 : index
    %64 = vector.load %arg5[%c0_84, %c0_85] : memref<1x8xf32, #tpu.memory_space<vmem>>, vector<1x8xf32>
    %65 = vector.broadcast %64 : vector<1x8xf32> to vector<256x8xf32>
    %66 = arith.addf %63, %65 : vector<256x8xf32>
    %cst_86 = arith.constant 0.000000e+00 : f32
    %67 = vector.broadcast %cst_86 : f32 to vector<256x8xf32>
    %68 = arith.maximumf %66, %67 : vector<256x8xf32>
    %69 = arith.truncf %68 : vector<256x8xf32> to vector<256x8xbf16>
    %c0_87 = arith.constant 0 : index
    %c0_88 = arith.constant 0 : index
    %70 = vector.load %arg6[%c0_87, %c0_88] : memref<8x32xbf16, #tpu.memory_space<vmem>>, vector<8x32xbf16>
    %cst_89 = arith.constant dense<0.000000e+00> : vector<256x32xf32>
    %71 = tpu.matmul %69, %70, %cst_89 {dimension_numbers = #tpu.dot_dimension_numbers<[1], [0], [0], [1], [0, 0, 1, 1], [], []>} : vector<256x8xbf16>, vector<8x32xbf16>, vector<256x32xf32> -> vector<256x32xf32>
    %c0_90 = arith.constant 0 : index
    %c0_91 = arith.constant 0 : index
    %72 = vector.load %arg7[%c0_90, %c0_91] : memref<1x32xf32, #tpu.memory_space<vmem>>, vector<1x32xf32>
    %73 = vector.broadcast %72 : vector<1x32xf32> to vector<256x32xf32>
    %74 = arith.addf %71, %73 : vector<256x32xf32>
    %c0_92 = arith.constant 0 : index
    %c0_93 = arith.constant 0 : index
    %75 = vector.load %arg8[%c0_92, %c0_93] : memref<8x32xbf16, #tpu.memory_space<vmem>>, vector<8x32xbf16>
    %cst_94 = arith.constant dense<0.000000e+00> : vector<256x32xf32>
    %76 = tpu.matmul %1, %75, %cst_94 {dimension_numbers = #tpu.dot_dimension_numbers<[1], [0], [0], [1], [0, 0, 1, 1], [], []>} : vector<256x8xbf16>, vector<8x32xbf16>, vector<256x32xf32> -> vector<256x32xf32>
    %c0_95 = arith.constant 0 : index
    %c0_96 = arith.constant 0 : index
    %77 = vector.load %arg9[%c0_95, %c0_96] : memref<1x32xf32, #tpu.memory_space<vmem>>, vector<1x32xf32>
    %78 = vector.broadcast %77 : vector<1x32xf32> to vector<256x32xf32>
    %79 = arith.addf %76, %78 : vector<256x32xf32>
    %80 = arith.addf %74, %79 : vector<256x32xf32>
    %cst_97 = arith.constant 0.000000e+00 : f32
    %81 = vector.broadcast %cst_97 : f32 to vector<256x32xf32>
    %82 = arith.maximumf %80, %81 : vector<256x32xf32>
    %83 = vector.shape_cast %82 : vector<256x32xf32> to vector<1x16x16x32xf32>
    %84 = arith.truncf %83 : vector<1x16x16x32xf32> to vector<1x16x16x32xbf16>
    %c0_98 = arith.constant 0 : index
    %c0_99 = arith.constant 0 : index
    %c0_100 = arith.constant 0 : index
    %c0_101 = arith.constant 0 : index
    %85 = vector.load %arg10[%c0_98, %c0_99, %c0_100, %c0_101] : memref<1x16x16x32xbf16, #tpu.memory_space<vmem>>, vector<1x16x16x32xbf16>
    tpu.vector_store %arg10[%c0_98, %c0_99, %c0_100, %c0_101], %84 {strides = array<i32>} : memref<1x16x16x32xbf16, #tpu.memory_space<vmem>>, vector<1x16x16x32xbf16>,
    return
  }
  func.func @transform_0(%arg0: i32) -> (i32, i32, i32, i32) {
    %c0_i32 = arith.constant 0 : i32
    %c0_i32_0 = arith.constant 0 : i32
    %c0_i32_1 = arith.constant 0 : i32
    %c0_i32_2 = arith.constant 0 : i32
    return %arg0, %c0_i32, %c0_i32_0, %c0_i32_1 : i32, i32, i32, i32
  }
  func.func @transform_1(%arg0: i32) -> (i32, i32) {
    %c0_i32 = arith.constant 0 : i32
    %c0_i32_0 = arith.constant 0 : i32
    %c0_i32_1 = arith.constant 0 : i32
    return %c0_i32, %c0_i32_0 : i32, i32
  }
  func.func @transform_2(%arg0: i32) -> (i32, i32) {
    %c0_i32 = arith.constant 0 : i32
    %c0_i32_0 = arith.constant 0 : i32
    %c0_i32_1 = arith.constant 0 : i32
    return %c0_i32, %c0_i32_0 : i32, i32
  }
  func.func @transform_3(%arg0: i32) -> (i32, i32) {
    %c0_i32 = arith.constant 0 : i32
    %c0_i32_0 = arith.constant 0 : i32
    %c0_i32_1 = arith.constant 0 : i32
    return %c0_i32, %c0_i32_0 : i32, i32
  }
  func.func @transform_4(%arg0: i32) -> (i32, i32) {
    %c0_i32 = arith.constant 0 : i32
    %c0_i32_0 = arith.constant 0 : i32
    %c0_i32_1 = arith.constant 0 : i32
    return %c0_i32, %c0_i32_0 : i32, i32
  }
  func.func @transform_5(%arg0: i32) -> (i32, i32) {
    %c0_i32 = arith.constant 0 : i32
    %c0_i32_0 = arith.constant 0 : i32
    %c0_i32_1 = arith.constant 0 : i32
    return %c0_i32, %c0_i32_0 : i32, i32
  }
  func.func @transform_6(%arg0: i32) -> (i32, i32) {
    %c0_i32 = arith.constant 0 : i32
    %c0_i32_0 = arith.constant 0 : i32
    %c0_i32_1 = arith.constant 0 : i32
    return %c0_i32, %c0_i32_0 : i32, i32
  }
  func.func @transform_7(%arg0: i32) -> (i32, i32) {
    %c0_i32 = arith.constant 0 : i32
    %c0_i32_0 = arith.constant 0 : i32
    %c0_i32_1 = arith.constant 0 : i32
    return %c0_i32, %c0_i32_0 : i32, i32
  }
  func.func @transform_8(%arg0: i32) -> (i32, i32) {
    %c0_i32 = arith.constant 0 : i32
    %c0_i32_0 = arith.constant 0 : i32
    %c0_i32_1 = arith.constant 0 : i32
    return %c0_i32, %c0_i32_0 : i32, i32
  }
  func.func @transform_9(%arg0: i32) -> (i32, i32, i32, i32) {
    %c0_i32 = arith.constant 0 : i32
    %c0_i32_0 = arith.constant 0 : i32
    %c0_i32_1 = arith.constant 0 : i32
    %c0_i32_2 = arith.constant 0 : i32
    return %arg0, %c0_i32, %c0_i32_0, %c0_i32_1 : i32, i32, i32, i32
  }
}

</mosaic_0001>

<bundles_post_ra>
// kernel: tpu_custom_call.1
= control target key start
LH: loop header
LB: loop body
LE: loop exit
PB: predicated region body
PF: predicated region fallthrough
CT: control target
= control target key end

     0   :  { %14 = vsyncpa [#allocation4], 0  ;;  %s11001_s0 = inlined_call_operand.vmem [shape: bf16[2,16,16,8], index: 0, kind: input, shape index: {}]   ;;  %s11002_s1 = inlined_call_operand.vmem [shape: bf16[8,8], index: 1, kind: input, shape index: {}]   ;;  %s11003_s2 = inlined_call_operand.vmem [shape: f32[1,8], index: 2, kind: input, shape index: {}]   ;;  %s11004_s3 = inlined_call_operand.vmem [shape: bf16[72,8], index: 3, kind: input, shape index: {}]   ;;  %s11005_s4 = inlined_call_operand.vmem [shape: f32[1,8], index: 4, kind: input, shape index: {}]   ;;  %s11006_s5 = inlined_call_operand.vmem [shape: bf16[8,32], index: 5, kind: input, shape index: {}]   ;;  %s11007_s6 = inlined_call_operand.vmem [shape: f32[1,32], index: 6, kind: input, shape index: {}]   ;;  %s11008_s7 = inlined_call_operand.vmem [shape: bf16[8,32], index: 7, kind: input, shape index: {}]   ;;  %s11009_s8 = inlined_call_operand.vmem [shape: f32[1,32], index: 8, kind: input, shape index: {}]   ;;  %s11010_s9 = inlined_call_operand.hbm [shape: bf16[2,16,16,32], index: 9, kind: output, shape index: {}]  }
   0x1   :  { %16 = vsyncpa [#allocation4 + $0x1], 0  ;;  %s8097_s30 = smov 0   ;;  %s8099_s10 = smov 0  }
   0x2   :  { %s8101_s11 = smov 0   ;;  %s8103_s12 = smov 0  }
   0x3 LB: > { %s8118_s13 = sadd.s32 4294967295, %s8041_s12   ;;  %s6681_s14 = sadd.s32 4294967294, %s8041_s12   ;;  %s8041_s12 = sphi %s8103_s12, %s11176_s12   ;;  %s8037_s11 = sphi %s8101_s11, %s11175_s11   ;;  %s8033_s10 = sphi %s8099_s10, %s11174_s10   ;;  %s8029_s30 = sphi %s8097_s30, %s11173_s30  }
   0x4   : > { %s8122_s15 = sadd.s32 1, %s8041_s12   ;;  %s223_s16 = sadd.s32 1, %s8037_s11 }
   0x5   : > { %s220_s17 = ssub.s32 %s8041_s12, %s8122_s15  ;;  %p233_p0 = scmp.ne.s32.totalorder %s8037_s11, %s8033_s10 }
   0x6   : > { %p221_p1 = scmp.eq.s32.totalorder %s220_s17, 0  ;;  %p234_p2 = scmp.eq.s32.totalorder %s8118_s13, 1 }
   0x7   : > { %p239_p3 = scmp.ne.s32.totalorder %s8033_s10, %s8029_s30  ;;  %p240_p4 = scmp.eq.s32.totalorder %s6681_s14, 1 }
   0x8   : > { %s8133_s18 = scalar_select %p221_p1, %s8037_s11, %s223_s16  }
   0x9   : > { %p8135_p5 = por %p234_p2, %p233_p0  ;;  %p8139_p6 = por %p240_p4, %p239_p3 }
   0xa   : > { %p6684_p7 = scmp.ge.s32.totalorder %s8041_s12, 1  ;;  %p290_p8 = scmp.lt.s32.totalorder %s8041_s12, 3 }
   0xc   : > { %p291_p9 = pnand %p6684_p7, %p290_p8 }
   0xe   : > { %294 = sbr.rel (%p291_p9) target bundleno = 1066 (0x42a), region = 56 }
  0x13   : > { %v364_v0 = vld [vmem:[%s11002_s1] sm:$0xf]  ;;  %vm501_vm0 = vcmask 1043456   ;;  %p326_p10 = scmp.lt.s32.totalorder %s8118_s13, 1  ;;  %vm452_vm1 = vcmask 64512   ;;  %vm701_vm2 = vcmask 57344  }
  0x14   : > { %7839 = vmatprep.subr.msk.bf16.mxu0 %vm501_vm0, %v364_v0  ;;  %v503_v1 = vsel %vm501_vm0, %v364_v0, 0  ;;  %vm708_vm3 = vsmask.f32 256  ;;  %v716_v19 = vld [vmem:[#allocation2 + $0x18] sm:$0x1]  ;;  %vm698_vm7 = vcmask 60416  }
  0x15   : > { %7432 = vmatpush3.bf16.msra.mxu0 %v503_v1  ;;  %s327_s23 = scalar_select %p326_p10, %s8118_s13, 1  ;;  %vm8191_vm4 = vmand %vm701_vm2, %vm708_vm3  ;;  %vm764_vm5 = vsmask.f32 7938  ;;  %v713_v22 = vld [vmem:[#allocation2 + $0xc] sm:$0x1]  ;;  %v8043_v32 = vmov 0  }
  0x16   : > { %v717_v20 = vsel %vm8191_vm4, 0, %v716_v19  ;;  %vm8199_vm6 = vmand %vm701_vm2, %vm764_vm5  ;;  %v714_v23 = vsel %vm8191_vm4, 0, %v713_v22  ;;  %v772_v24 = vld [vmem:[#allocation2 + $0x20] sm:$0x1]  ;;  %v769_v26 = vld [vmem:[#allocation2 + $0x14] sm:$0x1] }
  0x17   : > { %s7161_s24 = sshll.u32 %s327_s23, 7  ;;  %718 = vst [vmem:[#allocation2 + $0x18] sm:$0x1] %v717_v20  ;;  %715 = vst [vmem:[#allocation2 + $0xc] sm:$0x1] %v714_v23  ;;  %v773_v25 = vsel %vm8199_vm6, 0, %v772_v24 }
  0x18   : > { %s8155_s27 = scalar_lea.vmem %s11001_s0, %s7161_s24  ;;  %774 = vst [vmem:[#allocation2 + $0x20] sm:$0x1] %v773_v25  ;;  %v770_v27 = vsel %vm8199_vm6, 0, %v769_v26  ;;  %v722_v28 = vld [vmem:[#allocation2 + $0x30] sm:$0x1]  ;;  %vm8317_vm12 = vmand %vm698_vm7, %vm764_vm5  ;;  %vm2390_vm14 = vcmask 1042432  }
  0x19   : > { %v7893_v2 = vld [vmem:[%s8155_s27] sm:$0xff]   ;;  %v7894_v3 = vld [vmem:[%s8155_s27 + $0x8] sm:$0xff]   ;;  %v7895_v4 = vld [vmem:[%s8155_s27 + $0x10] sm:$0xff]   ;;  %771 = vst [vmem:[#allocation2 + $0x14] sm:$0x1] %v770_v27  ;;  %v723_v29 = vsel %vm8191_vm4, 0, %v722_v28 }
  0x1a   : > { %7433 = vmatprep.mubr.msk.bf16.mxu0 %vm452_vm1, %v7893_v2  ;;  %v7896_v5 = vld [vmem:[%s8155_s27 + $0x18] sm:$0xff]   ;;  %v7897_v6 = vld [vmem:[%s8155_s27 + $0x20] sm:$0xff]   ;;  %v7898_v7 = vld [vmem:[%s8155_s27 + $0x28] sm:$0xff]   ;;  %724 = vst [vmem:[#allocation2 + $0x30] sm:$0x1] %v723_v29  ;;  %vm2391_vm15 = vcmask 1046532  }
  0x1b   : > { %7434 = vmatmul.mubr.msk.bf16.vlgmr.msra.gmra.mxu0 %vm452_vm1, %v7894_v3  ;;  %v7899_v8 = vld [vmem:[%s8155_s27 + $0x30] sm:$0xff]   ;;  %v7900_v9 = vld [vmem:[%s8155_s27 + $0x38] sm:$0xff]   ;;  %v7901_v10 = vld [vmem:[%s8155_s27 + $0x40] sm:$0xff]   ;;  %699 = vst.msk [vmem:[#allocation2] sm:$0xf] %vm698_vm7, %v8043_v32  ;;  %s323_s28 = sand.u32 1, %s8033_s10  }
  0x1c   : > { %7437 = vmatprep.mubr.msk.bf16.mxu0 %vm452_vm1, %v7895_v4  ;;  %v7902_v11 = vld [vmem:[%s8155_s27 + $0x48] sm:$0xff]   ;;  %v7903_v12 = vld [vmem:[%s8155_s27 + $0x50] sm:$0xff]   ;;  %v7904_v13 = vld [vmem:[%s8155_s27 + $0x58] sm:$0xff]   ;;  %700 = vst.msk [vmem:[#allocation2 + $0x4] sm:$0xf] %vm698_vm7, %v8043_v32  ;;  %s6685_s29 = sshll.u32 %s323_s28, 7 }
  0x1d   : > { %v7905_v14 = vld [vmem:[%s8155_s27 + $0x60] sm:$0xff]   ;;  %v7906_v15 = vld [vmem:[%s8155_s27 + $0x68] sm:$0xff]   ;;  %v7907_v16 = vld [vmem:[%s8155_s27 + $0x70] sm:$0xff]   ;;  %702 = vst.msk [vmem:[#allocation2 + $0x8] sm:$0x1] %vm701_vm2, %v8043_v32  ;;  %s10804_s14 = scalar_lea.vmem [#allocation3], %s6685_s29 }
  0x1e   : > { %v7908_v17 = vld [vmem:[%s8155_s27 + $0x78] sm:$0xff]   ;;  %v719_v30 = vld [vmem:[#allocation2 + $0x24] sm:$0x1]  ;;  %704 = vst.msk [vmem:[#allocation2 + $0xcc] sm:$0xf] %vm698_vm7, %v8043_v32  ;;  %s7226_s16 = sshll.u32 %s8118_s13, 11 }
  0x1f   : > { %v720_v31 = vsel %vm8191_vm4, 0, %v719_v30  ;;  %705 = vst.msk [vmem:[#allocation2 + $0xd0] sm:$0xf] %vm698_vm7, %v8043_v32  ;;  %v778_v33 = vld [vmem:[#allocation2 + $0x38] sm:$0x1]  ;;  %s6619_s17 = sshll.u32 %s10804_s14, 4  ;;  %s10951_s22 = scalar_lea.hbm %s11010_s9, %s7226_s16  ;;  %s10953_s17 = int_to_ptr.vmem [resolvable:$true] %s6619_s17 }
  0x20   : > { %721 = vst [vmem:[#allocation2 + $0x24] sm:$0x1] %v720_v31  ;;  %706 = vst.msk [vmem:[#allocation2 + $0xd4] sm:$0x1] %vm701_vm2, %v8043_v32  ;;  %v779_v34 = vsel %vm8199_vm6, 0, %v778_v33  ;;  %s10961_s13 = scalar_lea.sflag [#allocation4], %s323_s28 }
  0x21   : > { %780 = vst [vmem:[#allocation2 + $0x38] sm:$0x1] %v779_v34  ;;  %v775_v35 = vld [vmem:[#allocation2 + $0x2c] sm:$0x1]  ;;  %v728_v37 = vld [vmem:[#allocation2 + $0x48] sm:$0x1]  ;;  %vm8804_vm2 = vmor %vm2390_vm14, %vm2391_vm15 }
  0x22   : > { %v776_v36 = vsel %vm8199_vm6, 0, %v775_v35  ;;  %v729_v38 = vsel %vm8191_vm4, 0, %v728_v37  ;;  %v710_v39 = vld [vmem:[#allocation2] sm:$0x1]  ;;  %v725_v40 = vld [vmem:[#allocation2 + $0x3c] sm:$0x1] }
  0x23   : > { %7438 = vmatmul.mubr.msk.bf16.gmra.mxu0 %vm452_vm1, %v7896_v5  ;;  %777 = vst [vmem:[#allocation2 + $0x2c] sm:$0x1] %v776_v36  ;;  %730 = vst [vmem:[#allocation2 + $0x48] sm:$0x1] %v729_v38  ;;  %v711_v41 = vsel %vm8191_vm4, 0, %v710_v39  ;;  %v726_v42 = vsel %vm8191_vm4, 0, %v725_v40 }
  0x24   : > { %7441 = vmatprep.mubr.msk.bf16.mxu0 %vm452_vm1, %v7897_v6  ;;  %712 = vst [vmem:[#allocation2] sm:$0x1] %v711_v41  ;;  %727 = vst [vmem:[#allocation2 + $0x3c] sm:$0x1] %v726_v42  ;;  %v784_v43 = vld [vmem:[#allocation2 + $0x50] sm:$0x1] }
  0x25   : > { %v785_v44 = vsel %vm8199_vm6, 0, %v784_v43  ;;  %v781_v45 = vld [vmem:[#allocation2 + $0x44] sm:$0x1]  ;;  %v1385_v46 = vld [vmem:[%s11004_s3] sm:$0xf]  ;;  %s7981_s23 = scalar_lea.vmem %s10953_s17, 2048 }
  0x26   : > { %786 = vst [vmem:[#allocation2 + $0x50] sm:$0x1] %v785_v44  ;;  %v782_v47 = vsel %vm8199_vm6, 0, %v781_v45  ;;  %7841 = vmatprep.subr.msk.bf16.mxu0 %vm501_vm0, %v1385_v46  ;;  %v2179_v48 = vsel %vm501_vm0, %v1385_v46, 0  ;;  %v1354_v50 = vld [vmem:[#allocation2 + $0x4] sm:$0xf]  ;;  %p7982_p11 = scmp.ne.s32.totalorder %s10953_s17, %s7981_s23 }
  0x27   : > { %783 = vst [vmem:[#allocation2 + $0x44] sm:$0x1] %v782_v47  ;;  %v734_v51 = vld [vmem:[#allocation2 + $0x60] sm:$0x1]  ;;  %7500 = vmatpush3.bf16.msra.mxu0 %v2179_v48  ;;  %v731_v54 = vld [vmem:[#allocation2 + $0x54] sm:$0x1] }
  0x28   : > { %v735_v53 = vsel %vm8191_vm4, 0, %v734_v51  ;;  %v732_v55 = vsel %vm8191_vm4, 0, %v731_v54  ;;  %v790_v56 = vld [vmem:[#allocation2 + $0x68] sm:$0x1]  ;;  %v787_v58 = vld [vmem:[#allocation2 + $0x5c] sm:$0x1]  ;;  %p7983_p12 = pnand %p7982_p11, %p8135_p5 }
  0x29   : > { %736 = vst [vmem:[#allocation2 + $0x60] sm:$0x1] %v735_v53  ;;  %733 = vst [vmem:[#allocation2 + $0x54] sm:$0x1] %v732_v55  ;;  %v791_v57 = vsel %vm8199_vm6, 0, %v790_v56  ;;  %v788_v59 = vsel %vm8199_vm6, 0, %v787_v58 }
  0x2a   : > { %792 = vst [vmem:[#allocation2 + $0x68] sm:$0x1] %v791_v57  ;;  %v766_v60 = vld [vmem:[#allocation2 + $0x8] sm:$0x1]  ;;  %789 = vst [vmem:[#allocation2 + $0x5c] sm:$0x1] %v788_v59  ;;  %p7984_p13 = pneg %p7983_p12 }
  0x2b   : > { %7442 = vmatmul.mubr.msk.bf16.gmra.mxu0 %vm452_vm1, %v7898_v7  ;;  %v1353_v49 = vld [vmem:[#allocation2] sm:$0xf]  ;;  %v767_v61 = vsel %vm8199_vm6, 0, %v766_v60  ;;  %v1415_v0 = vshll.u32 %v1354_v50, 16  ;;  %v1419_v1 = vshrl.u32 %v1354_v50, 16  ;;  %s8044_s24 = smov [#allocation3]  }
  0x2c   : > { %7445 = vmatprep.mubr.msk.bf16.mxu0 %vm452_vm1, %v7899_v8  ;;  %v6785_v52 = vcombine.low %v1353_v49, %v1354_v50  ;;  %768 = vst [vmem:[#allocation2 + $0x8] sm:$0x1] %v767_v61  ;;  %v1406_v62 = vshrl.u32 %v1353_v49, 16  ;;  %v1409_v63 = vshll.u32 %v1353_v49, 16  ;;  %vm1402_vm8 = vsmask.f32 3328 }
  0x2d   : > { %v1417_v4 = vrot.slane %v1415_v0, 5  ;;  %v1421_v5 = vrot.slane %v1419_v1, 4  ;;  %v740_v7 = vld [vmem:[#allocation2 + $0x78] sm:$0x1]  ;;  %vm1403_vm9 = vsmask.f32 7440 }
  0x2e   : > { %v1408_v2 = vrot.slane %v1406_v62, 4  ;;  %v1411_v3 = vrot.slane %v1409_v63, 5  ;;  %vm8257_vm10 = vmor %vm1402_vm8, %vm1403_vm9  ;;  %v737_v23 = vld [vmem:[#allocation2 + $0x6c] sm:$0x1]  ;;  %v796_v25 = vld [vmem:[#allocation2 + $0x80] sm:$0x1] }
  0x2f   : > { %v738_v24 = vsel %vm8191_vm4, 0, %v737_v23  ;;  %v797_v26 = vsel %vm8199_vm6, 0, %v796_v25  ;;  %v793_v27 = vld [vmem:[#allocation2 + $0x74] sm:$0x1]  ;;  %v8277_v29 = vld [vmem:[%s11004_s3 + $0x8] sm:$0xf] }
  0x30   : > { %v1412_v8 = vor.u32 %v1411_v3, %v1408_v2  ;;  %739 = vst [vmem:[#allocation2 + $0x6c] sm:$0x1] %v738_v24  ;;  %798 = vst [vmem:[#allocation2 + $0x80] sm:$0x1] %v797_v26  ;;  %v794_v28 = vsel %vm8199_vm6, 0, %v793_v27  ;;  %s7985_s25 = sshll.u32 %s8044_s24, 4  ;;  %s7986_s25 = int_to_ptr.vmem [resolvable:$false] %s7985_s25 }
  0x31   : > { %795 = vst [vmem:[#allocation2 + $0x74] sm:$0x1] %v794_v28  ;;  %v746_v30 = vld [vmem:[#allocation2 + $0x90] sm:$0x1]  ;;  %v743_v32 = vld [vmem:[#allocation2 + $0x84] sm:$0x1]  ;;  %p7988_p0 = scmp.lt.s32.totalorder %s10953_s17, %s7986_s25 }
  0x32   : > { %v747_v31 = vsel %vm8191_vm4, 0, %v746_v30  ;;  %v744_v33 = vsel %vm8191_vm4, 0, %v743_v32  ;;  %v802_v34 = vld [vmem:[#allocation2 + $0x98] sm:$0x1]  ;;  %v799_v36 = vld [vmem:[#allocation2 + $0x8c] sm:$0x1] }
  0x33   : > { %7446 = vmatmul.mubr.msk.bf16.gmra.mxu0 %vm452_vm1, %v7900_v9  ;;  %v8249_v6 = vld [vmem:[#allocation2 + $0x8] sm:$0x1]  ;;  %v1422_v9 = vor.u32 %v1421_v5, %v1417_v4  ;;  %748 = vst [vmem:[#allocation2 + $0x90] sm:$0x1] %v747_v31  ;;  %745 = vst [vmem:[#allocation2 + $0x84] sm:$0x1] %v744_v33 }
  0x34   : > { %7449 = vmatprep.mubr.msk.bf16.mxu0 %vm452_vm1, %v7901_v10  ;;  %v1425_v10 = vshll.u32 %v8249_v6, 16  ;;  %v803_v35 = vsel %vm8199_vm6, 0, %v802_v34  ;;  %v800_v37 = vsel %vm8199_vm6, 0, %v799_v36  ;;  %v752_v38 = vld [vmem:[#allocation2 + $0xa8] sm:$0x1]  ;;  %s7987_s26 = scalar_lea.vmem %s7986_s25, 4096 }
  0x35   : > { %804 = vst [vmem:[#allocation2 + $0x98] sm:$0x1] %v803_v35  ;;  %801 = vst [vmem:[#allocation2 + $0x8c] sm:$0x1] %v800_v37  ;;  %v753_v39 = vsel %vm8191_vm4, 0, %v752_v38  ;;  %p7989_p1 = scmp.lt.s32.totalorder %s7987_s26, %s7981_s23 }
  0x36   : > { %754 = vst [vmem:[#allocation2 + $0xa8] sm:$0x1] %v753_v39  ;;  %v749_v40 = vld [vmem:[#allocation2 + $0x9c] sm:$0x1]  ;;  %v808_v42 = vld [vmem:[#allocation2 + $0xb0] sm:$0x1] }
  0x37   : > { %v750_v41 = vsel %vm8191_vm4, 0, %v749_v40  ;;  %v809_v43 = vsel %vm8199_vm6, 0, %v808_v42  ;;  %v805_v44 = vld [vmem:[#allocation2 + $0xa4] sm:$0x1]  ;;  %v758_v46 = vld [vmem:[#allocation2 + $0xc0] sm:$0x1]  ;;  %p7990_p2 = por %p7989_p1, %p7988_p0 }
  0x38   : > { %751 = vst [vmem:[#allocation2 + $0x9c] sm:$0x1] %v750_v41  ;;  %810 = vst [vmem:[#allocation2 + $0xb0] sm:$0x1] %v809_v43  ;;  %v806_v45 = vsel %vm8199_vm6, 0, %v805_v44  ;;  %v759_v47 = vsel %vm8191_vm4, 0, %v758_v46 }
  0x39   : > { %807 = vst [vmem:[#allocation2 + $0xa4] sm:$0x1] %v806_v45  ;;  %760 = vst [vmem:[#allocation2 + $0xc0] sm:$0x1] %v759_v47  ;;  %v755_v48 = vld [vmem:[#allocation2 + $0xb4] sm:$0x1]  ;;  %p7991_p3 = pnand %p7990_p2, %p7984_p13 }
  0x3a   : > { %v756_v49 = vsel %vm8191_vm4, 0, %v755_v48  ;;  %v814_v50 = vld [vmem:[#allocation2 + $0xc8] sm:$0x1]  ;;  %v8308_v54 = vld [vmem:[%s11003_s2] ss:$0 sm:$0xff] }
  0x3b   : > { %7450 = vmatmul.mubr.msk.bf16.gmra.mxu0 %vm452_vm1, %v7902_v11  ;;  %v741_v11 = vsel %vm8191_vm4, 0, %v740_v7  ;;  %757 = vst [vmem:[#allocation2 + $0xb4] sm:$0x1] %v756_v49  ;;  %v815_v51 = vsel %vm8199_vm6, 0, %v814_v50  ;;  %vm916_vm11 = vsmask.f32 4368 }
  0x3c   : > { %7453 = vmatprep.mubr.msk.bf16.mxu0 %vm452_vm1, %v7903_v12  ;;  %742 = vst [vmem:[#allocation2 + $0x78] sm:$0x1] %v741_v11  ;;  %v1413_v12 = vrot.slane %v1412_v8, 4  ;;  %816 = vst [vmem:[#allocation2 + $0xc8] sm:$0x1] %v815_v51  ;;  %v2398_v7 = vrot.slane %v8249_v6, 5 }
  0x3d   : > { %v1241_v26 = vld [vmem:[#allocation2 + $0xc] sm:$0xf]  ;;  %vm8331_vm13 = vmor %vm708_vm3, %vm916_vm11  ;;  %v1252_v37 = vld [vmem:[#allocation2 + $0x20] sm:$0x1] }
  0x3e   : > { %v1418_v19 = vsel %vm8257_vm10, %v1413_v12, %v1417_v4 }
  0x43   : > { %7454 = vmatmul.mubr.msk.bf16.gmra.mxu0 %vm452_vm1, %v7904_v13  ;;  %v1423_v13 = vrot.slane %v1422_v9, 4 }
  0x44   : > { %7457 = vmatprep.mubr.msk.bf16.mxu0 %vm452_vm1, %v7905_v14  ;;  %v1427_v14 = vrot.slane %v1425_v10, 5 }
  0x46   : > { %v1428_v20 = vsel %vm8257_vm10, %v1423_v13, %v1427_v14  ;;  %v1248_v13 = vld [vmem:[#allocation2 + $0x18] sm:$0xf] }
  0x47   : > { %v6753_v22 = vcombine.low %v1418_v19, %v1428_v20  ;;  %v8324_v20 = vsel %vm501_vm0, %v8277_v29, 0 }
  0x49   : > { %7467 = vmatprep.mubr.msk.bf16.mxu1 %vm452_vm1, %v6753_v22 }
  0x4b   : > { %7458 = vmatmul.mubr.msk.bf16.gmra.mxu0 %vm452_vm1, %v7906_v15  ;;  %v1789_v15 = vld [vmem:[%s11004_s3 + $0x4] sm:$0xf] }
  0x4c   : > { %7461 = vmatprep.mubr.msk.bf16.mxu0 %vm452_vm1, %v7907_v16  ;;  %7840 = vmatprep.subr.msk.bf16.mxu1 %vm501_vm0, %v1789_v15 }
  0x53   : > { %7462 = vmatmul.mubr.msk.bf16.gmra.mxu0 %vm452_vm1, %v7908_v17  ;;  %v1887_v17 = vsel %vm501_vm0, %v1789_v15, 0 }
  0x54   : > { %7501 = vmatprep.mubr.msk.bf16.mxu0 %vm452_vm1, %v6785_v52  ;;  %7466 = vmatpush3.bf16.msra.mxu1 %v1887_v17  ;;  %v811_v52 = vld [vmem:[#allocation2 + $0xbc] sm:$0x1] }
  0x55   : > { %7842 = vmatprep.subr.msk.bf16.mxu1 %vm501_vm0, %v8277_v29  ;;  %v812_v53 = vsel %vm8199_vm6, 0, %v811_v52 }
  0x56   : > { %813 = vst [vmem:[#allocation2 + $0xbc] sm:$0x1] %v812_v53 }
  0xdb   : > { %v7435_v55 = vpop.f32.mrf.mxu0 }
  0xdc   : > { %v548_v56 = vadd.f32 %v7435_v55, %v8308_v54  ;;  %v1245_v55 = vld [vmem:[#allocation2 + $0x14] sm:$0x1] }
  0xdd   : > { %v539_v57 = vpop.f32.mrf.mxu0 }
  0xde   : > { %v668_v58 = vmax.f32 %v548_v56, 0.0  ;;  %v540_v59 = vadd.f32 %v8308_v54, %v539_v57 }
  0xdf   : > { %v7436_v60 = vpop.f32.mrf.mxu0 }
  0xe0   : > { %v7164_v61 = vpack.c.bf16 %v668_v58, %v668_v58  ;;  %v666_v62 = vmax.f32 %v540_v59, 0.0  ;;  %v551_v63 = vadd.f32 %v7436_v60, %v8308_v54 }
  0xe1   : > { %v542_v0 = vpop.f32.mrf.mxu0 }
  0xe2   : > { %v936_v1 = vshrl.u32 %v7164_v61, 16  ;;  %v7162_v2 = vpack.c.bf16 %v666_v62, %v666_v62  ;;  %v669_v3 = vmax.f32 %v551_v63, 0.0  ;;  %v543_v4 = vadd.f32 %v8308_v54, %v542_v0  ;;  %v1262_v63 = vld [vmem:[#allocation2 + $0x30] sm:$0xf] }
  0xe3   : > { %v7439_v5 = vpop.f32.mrf.mxu0  ;;  %v939_v9 = vshll.u32 %v7164_v61, 16 }
  0xe4   : > { %v938_v8 = vrot.slane %v936_v1, 7  ;;  %v919_v10 = vshrl.u32 %v7162_v2, 16  ;;  %v7165_v11 = vpack.c.bf16 %v669_v3, %v669_v3  ;;  %v922_v14 = vshll.u32 %v7162_v2, 16 }
  0xe5   : > { %v667_v15 = vmax.f32 %v543_v4, 0.0  ;;  %v564_v17 = vadd.f32 %v7439_v5, %v8308_v54  ;;  %v555_v19 = vpop.f32.mrf.mxu0 }
  0xe6   : > { %v941_v22 = vor.u32 %v939_v9, %v938_v8  ;;  %v942_v23 = vrot.slane %v938_v8, 4  ;;  %v921_v24 = vrot.slane %v919_v10, 7  ;;  %v944_v25 = vshrl.u32 %v7165_v11, 16 }
  0xe7   : > { %v947_v27 = vshll.u32 %v7165_v11, 16  ;;  %v7163_v28 = vpack.c.bf16 %v667_v15, %v667_v15  ;;  %v672_v30 = vmax.f32 %v564_v17, 0.0  ;;  %v556_v31 = vadd.f32 %v8308_v54, %v555_v19  ;;  %v7440_v32 = vpop.f32.mrf.mxu0  ;;  %v1255_v19 = vld [vmem:[#allocation2 + $0x24] sm:$0xf] }
  0xe8   : > { %v1249_v33 = vsel %vm8317_vm12, %v941_v22, %v1248_v13  ;;  %v924_v34 = vor.u32 %v922_v14, %v921_v24  ;;  %v925_v35 = vrot.slane %v921_v24, 4  ;;  %v946_v36 = vrot.slane %v944_v25, 7 }
  0xe9   : > { %1250 = vst [vmem:[#allocation2 + $0x18] sm:$0xf] %v1249_v33  ;;  %v927_v38 = vshrl.u32 %v7163_v28, 16  ;;  %v930_v39 = vshll.u32 %v7163_v28, 16  ;;  %v7168_v40 = vpack.c.bf16 %v672_v30, %v672_v30  ;;  %v670_v41 = vmax.f32 %v556_v31, 0.0  ;;  %v558_v42 = vpop.f32.mrf.mxu0 }
  0xea   : > { %v1242_v43 = vsel %vm8317_vm12, %v924_v34, %v1241_v26  ;;  %v949_v44 = vor.u32 %v947_v27, %v946_v36  ;;  %v951_v45 = vrot.slane %v946_v36, 4  ;;  %v567_v46 = vadd.f32 %v7440_v32, %v8308_v54  ;;  %v1266_v30 = vld [vmem:[#allocation2 + $0x38] sm:$0x1] }
  0xeb   : > { %1243 = vst [vmem:[#allocation2 + $0xc] sm:$0xf] %v1242_v43  ;;  %v929_v47 = vrot.slane %v927_v38, 7  ;;  %v970_v48 = vshrl.u32 %v7168_v40, 16  ;;  %v973_v49 = vshll.u32 %v7168_v40, 16  ;;  %v7166_v50 = vpack.c.bf16 %v670_v41, %v670_v41  ;;  %v7443_v51 = vpop.f32.mrf.mxu0 }
  0xec   : > { %v950_v52 = vsel %vm8331_vm13, %v942_v23, %v949_v44  ;;  %v1253_v53 = vsel %vm8191_vm4, %v951_v45, %v1252_v37  ;;  %v673_v56 = vmax.f32 %v567_v46, 0.0  ;;  %v559_v57 = vadd.f32 %v8308_v54, %v558_v42  ;;  %v1259_v41 = vld [vmem:[#allocation2 + $0x2c] sm:$0x1] }
  0xed   : > { %1251 = vst.msk [vmem:[#allocation2 + $0x1c] sm:$0xf] %vm698_vm7, %v950_v52  ;;  %1254 = vst [vmem:[#allocation2 + $0x20] sm:$0x1] %v1253_v53  ;;  %v932_v58 = vor.u32 %v930_v39, %v929_v47  ;;  %v934_v59 = vrot.slane %v929_v47, 4  ;;  %v972_v60 = vrot.slane %v970_v48, 7  ;;  %v571_v62 = vpop.f32.mrf.mxu0  ;;  %v580_v3 = vadd.f32 %v7443_v51, %v8308_v54 }
  0xee   : > { %v953_v61 = vshrl.u32 %v7166_v50, 16  ;;  %v956_v0 = vshll.u32 %v7166_v50, 16  ;;  %v7169_v1 = vpack.c.bf16 %v673_v56, %v673_v56  ;;  %v671_v2 = vmax.f32 %v559_v57, 0.0  ;;  %v2830_v47 = vld [vmem:[%s11004_s3 + $0xc] sm:$0xf] }
  0xef   : > { %v933_v4 = vsel %vm8331_vm13, %v925_v35, %v932_v58  ;;  %v1246_v5 = vsel %vm8191_vm4, %v934_v59, %v1245_v55  ;;  %v975_v8 = vor.u32 %v973_v49, %v972_v60  ;;  %v976_v9 = vrot.slane %v972_v60, 4  ;;  %v7444_v10 = vpop.f32.mrf.mxu0  ;;  %7843 = vmatprep.subr.msk.bf16.mxu0 %vm501_vm0, %v2830_v47  ;;  %v1276_v60 = vld [vmem:[#allocation2 + $0x48] sm:$0xf] }
  0xf0   : > { %1244 = vst.msk [vmem:[#allocation2 + $0x10] sm:$0xf] %vm698_vm7, %v933_v4  ;;  %1247 = vst [vmem:[#allocation2 + $0x14] sm:$0x1] %v1246_v5  ;;  %v955_v11 = vrot.slane %v953_v61, 7  ;;  %v978_v13 = vshrl.u32 %v7169_v1, 16  ;;  %v7167_v15 = vpack.c.bf16 %v671_v2, %v671_v2  ;;  %v572_v23 = vadd.f32 %v8308_v54, %v571_v62 }
  0xf1   : > { %v981_v14 = vshll.u32 %v7169_v1, 16  ;;  %v1263_v17 = vsel %vm8317_vm12, %v975_v8, %v1262_v63  ;;  %v676_v22 = vmax.f32 %v580_v3, 0.0  ;;  %v583_v24 = vadd.f32 %v7444_v10, %v8308_v54  ;;  %v574_v25 = vpop.f32.mrf.mxu0  ;;  %v1269_v4 = vld [vmem:[#allocation2 + $0x3c] sm:$0xf] }
  0xf2   : > { %1264 = vst [vmem:[#allocation2 + $0x30] sm:$0xf] %v1263_v17  ;;  %v958_v26 = vor.u32 %v956_v0, %v955_v11  ;;  %v959_v27 = vrot.slane %v955_v11, 4  ;;  %v980_v28 = vrot.slane %v978_v13, 7  ;;  %v961_v31 = vshrl.u32 %v7167_v15, 16 }
  0xf3   : > { %v964_v32 = vshll.u32 %v7167_v15, 16  ;;  %v7172_v33 = vpack.c.bf16 %v676_v22, %v676_v22  ;;  %v674_v34 = vmax.f32 %v572_v23, 0.0  ;;  %v677_v35 = vmax.f32 %v583_v24, 0.0  ;;  %v7447_v36 = vpop.f32.mrf.mxu0  ;;  %v1280_v17 = vld [vmem:[#allocation2 + $0x50] sm:$0x1] }
  0xf4   : > { %v1256_v37 = vsel %vm8317_vm12, %v958_v26, %v1255_v19  ;;  %v983_v38 = vor.u32 %v981_v14, %v980_v28  ;;  %v985_v39 = vrot.slane %v980_v28, 4  ;;  %v963_v40 = vrot.slane %v961_v31, 7 }
  0xf5   : > { %1257 = vst [vmem:[#allocation2 + $0x24] sm:$0xf] %v1256_v37  ;;  %v1004_v42 = vshrl.u32 %v7172_v33, 16  ;;  %v1007_v43 = vshll.u32 %v7172_v33, 16  ;;  %v7170_v44 = vpack.c.bf16 %v674_v34, %v674_v34  ;;  %v7173_v45 = vpack.c.bf16 %v677_v35, %v677_v35  ;;  %v587_v46 = vpop.f32.mrf.mxu0  ;;  %v8390_v37 = vld [vmem:[#allocation2 + $0xc] sm:$0xf] }
  0xf6   : > { %v984_v48 = vsel %vm8331_vm13, %v976_v9, %v983_v38  ;;  %v1267_v49 = vsel %vm8191_vm4, %v985_v39, %v1266_v30  ;;  %v966_v50 = vor.u32 %v964_v32, %v963_v40  ;;  %v968_v51 = vrot.slane %v963_v40, 4  ;;  %v8385_v32 = vld [vmem:[#allocation2 + $0x18] sm:$0xf] }
  0xf7   : > { %1265 = vst.msk [vmem:[#allocation2 + $0x34] sm:$0xf] %vm698_vm7, %v984_v48  ;;  %1268 = vst [vmem:[#allocation2 + $0x38] sm:$0x1] %v1267_v49  ;;  %v1006_v52 = vrot.slane %v1004_v42, 7  ;;  %v987_v53 = vshrl.u32 %v7170_v44, 16  ;;  %v7448_v57 = vpop.f32.mrf.mxu0  ;;  %v575_v62 = vadd.f32 %v8308_v54, %v574_v25  ;;  %v596_v8 = vadd.f32 %v7447_v36, %v8308_v54 }
  0xf8   : > { %v990_v55 = vshll.u32 %v7170_v44, 16  ;;  %v1012_v56 = vshrl.u32 %v7173_v45, 16  ;;  %v967_v58 = vsel %vm8331_vm13, %v959_v27, %v966_v50  ;;  %v1260_v59 = vsel %vm8191_vm4, %v968_v51, %v1259_v41  ;;  %v8378_v26 = vld [vmem:[#allocation2 + $0x10] sm:$0xf]  ;;  %v1273_v44 = vld [vmem:[#allocation2 + $0x44] sm:$0x1] }
  0xf9   : > { %v1015_v61 = vshll.u32 %v7173_v45, 16  ;;  %1258 = vst.msk [vmem:[#allocation2 + $0x28] sm:$0xf] %vm698_vm7, %v967_v58  ;;  %1261 = vst [vmem:[#allocation2 + $0x2c] sm:$0x1] %v1260_v59  ;;  %v1009_v63 = vor.u32 %v1007_v43, %v1006_v52  ;;  %v1010_v0 = vrot.slane %v1006_v52, 4  ;;  %v590_v3 = vpop.f32.mrf.mxu0  ;;  %v588_v9 = vadd.f32 %v8308_v54, %v587_v46 }
  0xfa   : > { %v989_v1 = vrot.slane %v987_v53, 7  ;;  %v1014_v2 = vrot.slane %v1012_v56, 7  ;;  %v675_v5 = vmax.f32 %v575_v62, 0.0  ;;  %v599_v10 = vadd.f32 %v7448_v57, %v8308_v54  ;;  %v1290_v48 = vld [vmem:[#allocation2 + $0x60] sm:$0xf] }
  0xfb   : > { %v1277_v11 = vsel %vm8317_vm12, %v1009_v63, %v1276_v60  ;;  %v8376_v19 = vpop.f32.mrf.mxu0  ;;  %v680_v24 = vmax.f32 %v596_v8, 0.0  ;;  %v678_v25 = vmax.f32 %v588_v9, 0.0  ;;  %v591_v31 = vadd.f32 %v8308_v54, %v590_v3  ;;  %v1283_v57 = vld [vmem:[#allocation2 + $0x54] sm:$0xf]  ;;  %v1294_v62 = vld [vmem:[#allocation2 + $0x68] sm:$0x1] }
  0xfc   : > { %v992_v13 = vor.u32 %v990_v55, %v989_v1  ;;  %v993_v14 = vrot.slane %v989_v1, 4  ;;  %v1017_v15 = vor.u32 %v1015_v61, %v1014_v2  ;;  %1278 = vst [vmem:[#allocation2 + $0x48] sm:$0xf] %v1277_v11  ;;  %v1019_v22 = vrot.slane %v1014_v2, 4 }
  0xfd   : > { %v7171_v23 = vpack.c.bf16 %v675_v5, %v675_v5  ;;  %v681_v30 = vmax.f32 %v599_v10, 0.0  ;;  %v7176_v36 = vpack.c.bf16 %v680_v24, %v680_v24  ;;  %v603_v38 = vpop.f32.mrf.mxu0  ;;  %v7174_v39 = vpack.c.bf16 %v678_v25, %v678_v25  ;;  %v8403_v5 = vld [vmem:[#allocation2 + $0x1c] sm:$0xf] }
  0xfe   : > { %v1270_v27 = vsel %vm8317_vm12, %v992_v13, %v1269_v4  ;;  %v1018_v28 = vsel %vm8331_vm13, %v1010_v0, %v1017_v15  ;;  %v1281_v33 = vsel %vm8191_vm4, %v1019_v22, %v1280_v17  ;;  %v679_v41 = vmax.f32 %v591_v31, 0.0 }
  0xff   : > { %1271 = vst [vmem:[#allocation2 + $0x3c] sm:$0xf] %v1270_v27  ;;  %1279 = vst.msk [vmem:[#allocation2 + $0x4c] sm:$0xf] %vm698_vm7, %v1018_v28  ;;  %v995_v34 = vshrl.u32 %v7171_v23, 16  ;;  %v998_v35 = vshll.u32 %v7171_v23, 16  ;;  %v7177_v40 = vpack.c.bf16 %v681_v30, %v681_v30  ;;  %v6786_v42 = vcombine.low %v8390_v37, %v8378_v26  ;;  %v7452_v59 = vpop.f32.mrf.mxu0 }
 0x100   : > { %1282 = vst [vmem:[#allocation2 + $0x50] sm:$0x1] %v1281_v33  ;;  %v1038_v45 = vshrl.u32 %v7176_v36, 16  ;;  %v1041_v46 = vshll.u32 %v7176_v36, 16  ;;  %v1454_v47 = vshrl.u32 %v8385_v32, 16  ;;  %v1021_v49 = vshrl.u32 %v7174_v39, 16 }
 0x101   : > { %v997_v43 = vrot.slane %v995_v34, 7  ;;  %v1024_v50 = vshll.u32 %v7174_v39, 16  ;;  %v1046_v51 = vshrl.u32 %v7177_v40, 16  ;;  %v1049_v52 = vshll.u32 %v7177_v40, 16  ;;  %7502 = vmatmul.mubr.msk.bf16.vlgmr.msra.gmra.mxu0 %vm452_vm1, %v6786_v42  ;;  %v606_v22 = vpop.f32.mrf.mxu0  ;;  %v1359_v23 = vld [vmem:[#allocation2 + $0x24] sm:$0xf] }
 0x102   : > { %v1040_v56 = vrot.slane %v1038_v45, 7  ;;  %v7175_v58 = vpack.c.bf16 %v679_v41, %v679_v41  ;;  %v1023_v60 = vrot.slane %v1021_v49, 7  ;;  %v8396_v63 = vrot.slane %v1454_v47, 4 }
 0x103   : > { %v1000_v53 = vor.u32 %v998_v35, %v997_v43  ;;  %v1002_v55 = vrot.slane %v997_v43, 4  ;;  %v1048_v61 = vrot.slane %v1046_v51, 7  ;;  %v1457_v0 = vshll.u32 %v8385_v32, 16  ;;  %v1287_v35 = vld [vmem:[#allocation2 + $0x5c] sm:$0x1] }
 0x104   : > { %v1043_v3 = vor.u32 %v1041_v46, %v1040_v56  ;;  %v1044_v4 = vrot.slane %v1040_v56, 4  ;;  %v1026_v8 = vor.u32 %v1024_v50, %v1023_v60  ;;  %v1027_v9 = vrot.slane %v1023_v60, 4  ;;  %v8426_v46 = vld [vmem:[#allocation2 + $0x28] sm:$0xf] }
 0x105   : > { %v1001_v1 = vsel %vm8331_vm13, %v993_v14, %v1000_v53  ;;  %v1274_v2 = vsel %vm8191_vm4, %v1002_v55, %v1273_v44  ;;  %v1051_v10 = vor.u32 %v1049_v52, %v1048_v61  ;;  %v1053_v11 = vrot.slane %v1048_v61, 4 }
 0x106   : > { %1272 = vst.msk [vmem:[#allocation2 + $0x40] sm:$0xf] %vm698_vm7, %v1001_v1  ;;  %1275 = vst [vmem:[#allocation2 + $0x44] sm:$0x1] %v1274_v2  ;;  %v1291_v13 = vsel %vm8317_vm12, %v1043_v3, %v1290_v48  ;;  %v1029_v15 = vshrl.u32 %v7175_v58, 16  ;;  %v1032_v17 = vshll.u32 %v7175_v58, 16  ;;  %v1284_v24 = vsel %vm8317_vm12, %v1026_v8, %v1283_v57  ;;  %v8439_v57 = vpop.f32.mrf.mxu0 }
 0x107   : > { %v8408_v14 = vrot.slane %v1457_v0, 5  ;;  %1292 = vst [vmem:[#allocation2 + $0x60] sm:$0xf] %v1291_v13  ;;  %v1052_v25 = vsel %vm8331_vm13, %v1044_v4, %v1051_v10  ;;  %v1295_v27 = vsel %vm8191_vm4, %v1053_v11, %v1294_v62  ;;  %v1467_v28 = vshrl.u32 %v8403_v5, 16  ;;  %1285 = vst [vmem:[#allocation2 + $0x54] sm:$0xf] %v1284_v24 }
 0x108   : > { %1293 = vst.msk [vmem:[#allocation2 + $0x64] sm:$0xf] %vm698_vm7, %v1052_v25  ;;  %1296 = vst [vmem:[#allocation2 + $0x68] sm:$0x1] %v1295_v27  ;;  %v1031_v30 = vrot.slane %v1029_v15, 7  ;;  %v6787_v31 = vcombine.low %v8385_v32, %v8403_v5  ;;  %v612_v33 = vadd.f32 %v8376_v19, %v8308_v54  ;;  %v604_v34 = vadd.f32 %v8308_v54, %v603_v38  ;;  %v619_v25 = vpop.f32.mrf.mxu0 }
 0x109   : > { %v615_v36 = vadd.f32 %v7452_v59, %v8308_v54  ;;  %v607_v39 = vadd.f32 %v8308_v54, %v606_v22  ;;  %v1478_v40 = vshrl.u32 %v1359_v23, 16  ;;  %v1481_v41 = vshll.u32 %v1359_v23, 16  ;;  %v1304_v62 = vld [vmem:[#allocation2 + $0x78] sm:$0xf]  ;;  %v1297_v0 = vld [vmem:[#allocation2 + $0x6c] sm:$0xf] }
 0x10a   : > { %v1034_v42 = vor.u32 %v1032_v17, %v1031_v30  ;;  %v1036_v43 = vrot.slane %v1031_v30, 4  ;;  %7505 = vmatprep.mubr.msk.bf16.mxu0 %vm452_vm1, %v6787_v31  ;;  %v684_v44 = vmax.f32 %v612_v33, 0.0  ;;  %v682_v45 = vmax.f32 %v604_v34, 0.0  ;;  %v1308_v10 = vld [vmem:[#allocation2 + $0x80] sm:$0x1] }
 0x10b   : > { %v685_v32 = vmax.f32 %v615_v36, 0.0  ;;  %v683_v47 = vmax.f32 %v607_v39, 0.0  ;;  %v8428_v19 = vrot.slane %v1478_v40, 4  ;;  %v8430_v38 = vrot.slane %v1481_v41, 5  ;;  %v1301_v22 = vld [vmem:[#allocation2 + $0x74] sm:$0x1] }
 0x10c   : > { %v1035_v48 = vsel %vm8331_vm13, %v1027_v9, %v1034_v42  ;;  %v1288_v49 = vsel %vm8191_vm4, %v1036_v43, %v1287_v35  ;;  %v7180_v50 = vpack.c.bf16 %v684_v44, %v684_v44  ;;  %v7178_v51 = vpack.c.bf16 %v682_v45, %v682_v45  ;;  %v8446_v40 = vld [vmem:[#allocation2 + $0x14] sm:$0x1] }
 0x10d   : > { %1286 = vst.msk [vmem:[#allocation2 + $0x58] sm:$0xf] %vm698_vm7, %v1035_v48  ;;  %1289 = vst [vmem:[#allocation2 + $0x5c] sm:$0x1] %v1288_v49  ;;  %v7181_v52 = vpack.c.bf16 %v685_v32, %v685_v32  ;;  %v7179_v53 = vpack.c.bf16 %v683_v47, %v683_v47  ;;  %v1491_v55 = vshrl.u32 %v8426_v46, 16  ;;  %v6788_v56 = vcombine.low %v1359_v23, %v8426_v46  ;;  %v7456_v49 = vpop.f32.mrf.mxu0 }
 0x10e   : > { %v1072_v58 = vshrl.u32 %v7180_v50, 16  ;;  %v1075_v59 = vshll.u32 %v7180_v50, 16  ;;  %v1055_v60 = vshrl.u32 %v7178_v51, 16  ;;  %v1058_v61 = vshll.u32 %v7178_v51, 16  ;;  %v8452_v44 = vld [vmem:[#allocation2 + $0x34] sm:$0xf] }
 0x10f   : > { %v1080_v1 = vshrl.u32 %v7181_v52, 16  ;;  %v1083_v2 = vshll.u32 %v7181_v52, 16  ;;  %v1063_v3 = vshrl.u32 %v7179_v53, 16  ;;  %v1066_v4 = vshll.u32 %v7179_v53, 16  ;;  %7506 = vmatmul.mubr.msk.bf16.gmra.mxu0 %vm452_vm1, %v6788_v56  ;;  %v8673_v29 = vld [vmem:[#allocation2 + $0x68] sm:$0x1] }
 0x110   : > { %v1074_v8 = vrot.slane %v1072_v58, 7  ;;  %v1057_v9 = vrot.slane %v1055_v60, 7  ;;  %v1430_v11 = vshrl.u32 %v8390_v37, 16  ;;  %v1433_v13 = vshll.u32 %v8390_v37, 16 }
 0x111   : > { %v1082_v15 = vrot.slane %v1080_v1, 7  ;;  %v1065_v17 = vrot.slane %v1063_v3, 7  ;;  %v1439_v23 = vshll.u32 %v8378_v26, 16  ;;  %v1443_v24 = vshrl.u32 %v8378_v26, 16  ;;  %v1361_v26 = vld [vmem:[#allocation2 + $0x30] sm:$0xf] }
 0x112   : > { %v1077_v27 = vor.u32 %v1075_v59, %v1074_v8  ;;  %v1078_v30 = vrot.slane %v1074_v8, 4  ;;  %v1060_v31 = vor.u32 %v1058_v61, %v1057_v9  ;;  %v1061_v33 = vrot.slane %v1057_v9, 4 }
 0x113   : > { %v1085_v34 = vor.u32 %v1083_v2, %v1082_v15  ;;  %v1087_v35 = vrot.slane %v1082_v15, 4  ;;  %v1068_v36 = vor.u32 %v1066_v4, %v1065_v17  ;;  %v1070_v39 = vrot.slane %v1065_v17, 4  ;;  %v1388_v2 = vld [vmem:[#allocation2 + $0x20] sm:$0x1] }
 0x114   : > { %v1305_v37 = vsel %vm8317_vm12, %v1077_v27, %v1304_v62  ;;  %v1298_v41 = vsel %vm8317_vm12, %v1060_v31, %v1297_v0  ;;  %v1432_v42 = vrot.slane %v1430_v11, 4  ;;  %v1435_v43 = vrot.slane %v1433_v13, 5  ;;  %v8487_v31 = vld [vmem:[#allocation2 + $0x3c] sm:$0xf] }
 0x115   : > { %1306 = vst [vmem:[#allocation2 + $0x78] sm:$0xf] %v1305_v37  ;;  %1299 = vst [vmem:[#allocation2 + $0x6c] sm:$0xf] %v1298_v41  ;;  %v1086_v45 = vsel %vm8331_vm13, %v1078_v30, %v1085_v34  ;;  %v1309_v32 = vsel %vm8191_vm4, %v1087_v35, %v1308_v10  ;;  %v1069_v47 = vsel %vm8331_vm13, %v1061_v33, %v1068_v36  ;;  %v1441_v51 = vrot.slane %v1439_v23, 5  ;;  %v622_v10 = vpop.f32.mrf.mxu0 }
 0x116   : > { %v1302_v48 = vsel %vm8191_vm4, %v1070_v39, %v1301_v22  ;;  %1307 = vst.msk [vmem:[#allocation2 + $0x7c] sm:$0xf] %vm698_vm7, %v1086_v45  ;;  %1310 = vst [vmem:[#allocation2 + $0x80] sm:$0x1] %v1309_v32  ;;  %v1436_v50 = vor.u32 %v1435_v43, %v1432_v42  ;;  %v1445_v52 = vrot.slane %v1443_v24, 4  ;;  %v1449_v53 = vshll.u32 %v8446_v40, 16 }
 0x117   : > { %1300 = vst.msk [vmem:[#allocation2 + $0x70] sm:$0xf] %vm698_vm7, %v1069_v47  ;;  %1303 = vst [vmem:[#allocation2 + $0x74] sm:$0x1] %v1302_v48  ;;  %v2405_v56 = vrot.slane %v8446_v40, 5  ;;  %v1502_v58 = vshrl.u32 %v1361_v26, 16  ;;  %v6789_v1 = vcombine.low %v1361_v26, %v8452_v44  ;;  %v628_v8 = vadd.f32 %v8439_v57, %v8308_v54 }
 0x118   : > { %v1505_v59 = vshll.u32 %v1361_v26, 16  ;;  %v1515_v60 = vshrl.u32 %v8452_v44, 16  ;;  %v1437_v61 = vrot.slane %v1436_v50, 4  ;;  %v1446_v62 = vor.u32 %v1445_v52, %v1441_v51  ;;  %v8494_v37 = vld [vmem:[%s11004_s3 + $0x10] sm:$0xf]  ;;  %v8500_v50 = vpop.f32.mrf.mxu0 }
 0x119   : > { %v1451_v0 = vrot.slane %v1449_v53, 5  ;;  %v8468_v3 = vrot.slane %v1502_v58, 4  ;;  %v1460_v9 = vor.u32 %v8408_v14, %v8396_v63  ;;  %7509 = vmatprep.mubr.msk.bf16.mxu0 %vm452_vm1, %v6789_v1  ;;  %v1463_v15 = vshll.u32 %v8403_v5, 16  ;;  %v1318_v45 = vld [vmem:[#allocation2 + $0x90] sm:$0xf] }
 0x11a   : > { %v8470_v4 = vrot.slane %v1505_v59, 5  ;;  %v1442_v11 = vsel %vm8257_vm10, %v1437_v61, %v1441_v51  ;;  %v1447_v13 = vrot.slane %v1446_v62, 4  ;;  %v1469_v17 = vrot.slane %v1467_v28, 4  ;;  %v8508_v1 = vld [vmem:[#allocation2 + $0x40] sm:$0xf] }
 0x11b   : > { %v688_v22 = vmax.f32 %v628_v8, 0.0  ;;  %v1461_v23 = vrot.slane %v1460_v9, 4  ;;  %v1473_v24 = vshll.u32 %v1388_v2, 16  ;;  %v620_v57 = vadd.f32 %v8308_v54, %v619_v25 }
 0x11c   : > { %v1452_v63 = vsel %vm8257_vm10, %v1447_v13, %v1451_v0  ;;  %v1465_v14 = vrot.slane %v1463_v15, 5  ;;  %v631_v27 = vadd.f32 %v7456_v49, %v8308_v54  ;;  %v623_v30 = vadd.f32 %v8308_v54, %v622_v10  ;;  %v1315_v13 = vld [vmem:[#allocation2 + $0x8c] sm:$0x1] }
 0x11d   : > { %v6754_v33 = vcombine.low %v1442_v11, %v1452_v63  ;;  %v7184_v34 = vpack.c.bf16 %v688_v22, %v688_v22  ;;  %v1475_v35 = vrot.slane %v1473_v24, 5  ;;  %v686_v5 = vmax.f32 %v620_v57, 0.0  ;;  %v1322_v11 = vld [vmem:[#allocation2 + $0x98] sm:$0x1]  ;;  %v8512_v24 = vld [vmem:[#allocation2 + $0x2c] sm:$0x1]  ;;  %v635_v57 = vpop.f32.mrf.mxu0 }
 0x11e   : > { %v1466_v28 = vsel %vm8257_vm10, %v1461_v23, %v1465_v14  ;;  %v1470_v36 = vor.u32 %v1469_v17, %v1465_v14  ;;  %v689_v39 = vmax.f32 %v631_v27, 0.0  ;;  %v687_v25 = vmax.f32 %v623_v30, 0.0 }
 0x11f   : > { %7468 = vmatmul.mubr.msk.bf16.vlgmr.msra.gmra.mxu1 %vm452_vm1, %v6754_v33  ;;  %v1106_v41 = vshrl.u32 %v7184_v34, 16  ;;  %v1109_v42 = vshll.u32 %v7184_v34, 16  ;;  %v7182_v43 = vpack.c.bf16 %v686_v5, %v686_v5  ;;  %v1526_v26 = vshrl.u32 %v8487_v31, 16  ;;  %v1365_v33 = vld [vmem:[#allocation2 + $0x48] sm:$0xf] }
 0x120   : > { %7534 = vmatpush3.bf16.msra.mxu1 %v8324_v20  ;;  %v1471_v32 = vrot.slane %v1470_v36, 4  ;;  %v7185_v47 = vpack.c.bf16 %v689_v39, %v689_v39  ;;  %v7183_v48 = vpack.c.bf16 %v687_v25, %v687_v25  ;;  %v1529_v49 = vshll.u32 %v8487_v31, 16  ;;  %v1311_v20 = vld [vmem:[#allocation2 + $0x84] sm:$0xf] }
 0x121   : > { %v1108_v51 = vrot.slane %v1106_v41, 7  ;;  %v1089_v52 = vshrl.u32 %v7182_v43, 16  ;;  %v1092_v53 = vshll.u32 %v7182_v43, 16  ;;  %v8502_v58 = vrot.slane %v1526_v26, 4  ;;  %7844 = vmatprep.subr.msk.bf16.mxu1 %vm501_vm0, %v8494_v37 }
 0x122   : > { %v1476_v59 = vsel %vm8257_vm10, %v1471_v32, %v1475_v35  ;;  %v1114_v61 = vshrl.u32 %v7185_v47, 16  ;;  %v1117_v62 = vshll.u32 %v7185_v47, 16  ;;  %v1097_v0 = vshrl.u32 %v7183_v48, 16  ;;  %v7460_v32 = vpop.f32.mrf.mxu0 }
 0x123   : > { %v1111_v2 = vor.u32 %v1109_v42, %v1108_v51  ;;  %v1112_v8 = vrot.slane %v1108_v51, 4  ;;  %v6755_v9 = vcombine.low %v1466_v28, %v1476_v59  ;;  %v1091_v10 = vrot.slane %v1089_v52, 7  ;;  %v8525_v42 = vld [vmem:[#allocation2 + $0x4c] sm:$0xf]  ;;  %v8543_v59 = vld [vmem:[#allocation2 + $0x38] sm:$0x1] }
 0x124   : > { %v1116_v15 = vrot.slane %v1114_v61, 7  ;;  %v1099_v17 = vrot.slane %v1097_v0, 7  ;;  %v1100_v22 = vshll.u32 %v7183_v48, 16  ;;  %v8510_v23 = vrot.slane %v1529_v49, 5 }
 0x125   : > { %v1319_v63 = vsel %vm8317_vm12, %v1111_v2, %v1318_v45  ;;  %7471 = vmatprep.mubr.msk.bf16.mxu1 %vm452_vm1, %v6755_v9  ;;  %v1094_v14 = vor.u32 %v1092_v53, %v1091_v10  ;;  %v1095_v27 = vrot.slane %v1091_v10, 4  ;;  %v1539_v30 = vshrl.u32 %v8508_v1, 16  ;;  %v638_v9 = vpop.f32.mrf.mxu0 }
 0x126   : > { %1320 = vst [vmem:[#allocation2 + $0x90] sm:$0xf] %v1319_v63  ;;  %v1119_v34 = vor.u32 %v1117_v62, %v1116_v15  ;;  %v1121_v35 = vrot.slane %v1116_v15, 4  ;;  %v1102_v5 = vor.u32 %v1100_v22, %v1099_v17  ;;  %v1104_v28 = vrot.slane %v1099_v17, 4 }
 0x127   : > { %v1312_v36 = vsel %vm8317_vm12, %v1094_v14, %v1311_v20  ;;  %v6790_v39 = vcombine.low %v8487_v31, %v8508_v1  ;;  %v1484_v25 = vor.u32 %v8430_v38, %v8428_v19  ;;  %v1487_v41 = vshll.u32 %v8426_v46, 16 }
 0x128   : > { %1313 = vst [vmem:[#allocation2 + $0x84] sm:$0xf] %v1312_v36  ;;  %v1120_v43 = vsel %vm8331_vm13, %v1112_v8, %v1119_v34  ;;  %v1323_v26 = vsel %vm8191_vm4, %v1121_v35, %v1322_v11  ;;  %v1103_v45 = vsel %vm8331_vm13, %v1095_v27, %v1102_v5  ;;  %v1316_v31 = vsel %vm8191_vm4, %v1104_v28, %v1315_v13  ;;  %v8567_v5 = vld [vmem:[#allocation2 + $0x58] sm:$0xf] }
 0x129   : > { %1321 = vst.msk [vmem:[#allocation2 + $0x94] sm:$0xf] %vm698_vm7, %v1120_v43  ;;  %1324 = vst [vmem:[#allocation2 + $0x98] sm:$0x1] %v1323_v26  ;;  %7510 = vmatmul.mubr.msk.bf16.gmra.mxu0 %vm452_vm1, %v6790_v39  ;;  %v1485_v19 = vrot.slane %v1484_v25, 4  ;;  %v1489_v38 = vrot.slane %v1487_v41, 5  ;;  %v6791_v53 = vcombine.low %v1365_v33, %v8525_v42  ;;  %v644_v0 = vadd.f32 %v8500_v50, %v8308_v54 }
 0x12a   : > { %1314 = vst.msk [vmem:[#allocation2 + $0x88] sm:$0xf] %vm698_vm7, %v1103_v45  ;;  %1317 = vst [vmem:[#allocation2 + $0x8c] sm:$0x1] %v1316_v31  ;;  %v1493_v47 = vrot.slane %v1491_v55, 4  ;;  %v1497_v48 = vshll.u32 %v8512_v24, 16  ;;  %v1508_v2 = vor.u32 %v8470_v4, %v8468_v3  ;;  %v636_v22 = vadd.f32 %v8308_v54, %v635_v57 }
 0x12b   : > { %v1550_v49 = vshrl.u32 %v1365_v33, 16  ;;  %v1553_v51 = vshll.u32 %v1365_v33, 16  ;;  %v1563_v52 = vshrl.u32 %v8525_v42, 16  ;;  %v1490_v20 = vsel %vm8257_vm10, %v1485_v19, %v1489_v38  ;;  %7513 = vmatprep.mubr.msk.bf16.mxu0 %vm452_vm1, %v6791_v53  ;;  %v1367_v33 = vld [vmem:[#allocation2 + $0x54] sm:$0xf] }
 0x12c   : > { %v1494_v61 = vor.u32 %v1493_v47, %v1489_v38  ;;  %v1499_v62 = vrot.slane %v1497_v48, 5  ;;  %v1511_v8 = vshll.u32 %v8452_v44, 16  ;;  %v692_v11 = vmax.f32 %v644_v0, 0.0  ;;  %v1332_v38 = vld [vmem:[#allocation2 + $0xa8] sm:$0xf] }
 0x12d   : > { %v8549_v46 = vrot.slane %v1550_v49, 4  ;;  %v8551_v55 = vrot.slane %v1553_v51, 5  ;;  %v1517_v13 = vrot.slane %v1515_v60, 4  ;;  %v1521_v15 = vshll.u32 %v8543_v59, 16 }
 0x12e   : > { %v1495_v10 = vrot.slane %v1494_v61, 4  ;;  %v1509_v50 = vrot.slane %v1508_v2, 4  ;;  %v1513_v17 = vrot.slane %v1511_v8, 5  ;;  %v647_v63 = vadd.f32 %v7460_v32, %v8308_v54 }
 0x12f   : > { %v7188_v3 = vpack.c.bf16 %v692_v11, %v692_v11  ;;  %v1523_v4 = vrot.slane %v1521_v15, 5  ;;  %v639_v27 = vadd.f32 %v8308_v54, %v638_v9  ;;  %v690_v35 = vmax.f32 %v636_v22, 0.0  ;;  %v8570_v54 = vpop.f32.mrf.mxu0 }
 0x130   : > { %v1500_v14 = vsel %vm8257_vm10, %v1495_v10, %v1499_v62  ;;  %v1514_v44 = vsel %vm8257_vm10, %v1509_v50, %v1513_v17  ;;  %v1518_v60 = vor.u32 %v1517_v13, %v1513_v17  ;;  %v693_v36 = vmax.f32 %v647_v63, 0.0  ;;  %v1325_v13 = vld [vmem:[#allocation2 + $0x9c] sm:$0xf]  ;;  %v1336_v50 = vld [vmem:[#allocation2 + $0xb0] sm:$0x1] }
 0x131   : > { %v6756_v34 = vcombine.low %v1490_v20, %v1500_v14  ;;  %v1140_v28 = vshrl.u32 %v7188_v3, 16  ;;  %v1143_v57 = vshll.u32 %v7188_v3, 16  ;;  %v691_v39 = vmax.f32 %v639_v27, 0.0  ;;  %v651_v10 = vpop.f32.mrf.mxu0  ;;  %v8583_v27 = vld [vmem:[#allocation2 + $0x44] sm:$0x1] }
 0x132   : > { %v1519_v25 = vrot.slane %v1518_v60, 4  ;;  %v7186_v41 = vpack.c.bf16 %v690_v35, %v690_v35  ;;  %v1574_v43 = vshrl.u32 %v1367_v33, 16  ;;  %v1577_v26 = vshll.u32 %v1367_v33, 16 }
 0x133   : > { %7472 = vmatmul.mubr.msk.bf16.gmra.mxu1 %vm452_vm1, %v6756_v34  ;;  %v1142_v45 = vrot.slane %v1140_v28, 7  ;;  %v7189_v31 = vpack.c.bf16 %v693_v36, %v693_v36  ;;  %v7187_v32 = vpack.c.bf16 %v691_v39, %v691_v39  ;;  %v1587_v19 = vshrl.u32 %v8567_v5, 16 }
 0x134   : > { %v1524_v47 = vsel %vm8257_vm10, %v1519_v25, %v1523_v4  ;;  %v1123_v48 = vshrl.u32 %v7186_v41, 16  ;;  %v1126_v49 = vshll.u32 %v7186_v41, 16  ;;  %v8575_v51 = vrot.slane %v1574_v43, 4  ;;  %v1329_v4 = vld [vmem:[#allocation2 + $0xa4] sm:$0x1]  ;;  %v7464_v43 = vpop.f32.mrf.mxu0 }
 0x135   : > { %v1145_v53 = vor.u32 %v1143_v57, %v1142_v45  ;;  %v1146_v20 = vrot.slane %v1142_v45, 4  ;;  %v6757_v61 = vcombine.low %v1514_v44, %v1524_v47  ;;  %v1148_v62 = vshrl.u32 %v7189_v31, 16  ;;  %v8593_v41 = vld [vmem:[#allocation2 + $0x64] sm:$0xf]  ;;  %v8605_v47 = vld [vmem:[#allocation2 + $0x50] sm:$0x1] }
 0x136   : > { %v1125_v0 = vrot.slane %v1123_v48, 7  ;;  %v1151_v2 = vshll.u32 %v7189_v31, 16  ;;  %v1131_v8 = vshrl.u32 %v7187_v32, 16  ;;  %v1134_v9 = vshll.u32 %v7187_v32, 16 }
 0x137   : > { %v1333_v11 = vsel %vm8317_vm12, %v1145_v53, %v1332_v38  ;;  %7475 = vmatprep.mubr.msk.bf16.mxu1 %vm452_vm1, %v6757_v61  ;;  %v1150_v15 = vrot.slane %v1148_v62, 7  ;;  %v8580_v17 = vrot.slane %v1577_v26, 5  ;;  %v6792_v22 = vcombine.low %v1367_v33, %v8567_v5  ;;  %v1369_v33 = vld [vmem:[#allocation2 + $0x60] sm:$0xf] }
 0x138   : > { %1334 = vst [vmem:[#allocation2 + $0xa8] sm:$0xf] %v1333_v11  ;;  %v1128_v63 = vor.u32 %v1126_v49, %v1125_v0  ;;  %v1129_v14 = vrot.slane %v1125_v0, 4  ;;  %v1133_v3 = vrot.slane %v1131_v8, 7  ;;  %v1532_v34 = vor.u32 %v8510_v23, %v8502_v58 }
 0x139   : > { %v1153_v44 = vor.u32 %v1151_v2, %v1150_v15  ;;  %v1155_v60 = vrot.slane %v1150_v15, 4  ;;  %7514 = vmatmul.mubr.msk.bf16.gmra.mxu0 %vm452_vm1, %v6792_v22  ;;  %v1535_v35 = vshll.u32 %v8508_v1, 16  ;;  %v1541_v28 = vrot.slane %v1539_v30, 4  ;;  %v7957_v2 = vld [vmem:[%s11003_s2] ss:$0 sm:$0xff] }
 0x13a   : > { %v1326_v57 = vsel %vm8317_vm12, %v1128_v63, %v1325_v13  ;;  %v1136_v36 = vor.u32 %v1134_v9, %v1133_v3  ;;  %v1138_v39 = vrot.slane %v1133_v3, 4  ;;  %v1533_v25 = vrot.slane %v1532_v34, 4  ;;  %v654_v9 = vpop.f32.mrf.mxu0 }
 0x13b   : > { %1327 = vst [vmem:[#allocation2 + $0x9c] sm:$0xf] %v1326_v57  ;;  %v1154_v58 = vsel %vm8331_vm13, %v1146_v20, %v1153_v44  ;;  %v1337_v23 = vsel %vm8191_vm4, %v1155_v60, %v1336_v50  ;;  %v1537_v26 = vrot.slane %v1535_v35, 5  ;;  %v1545_v30 = vshll.u32 %v8583_v27, 16  ;;  %v8629_v60 = vld [vmem:[#allocation2 + $0x6c] sm:$0xf] }
 0x13c   : > { %1335 = vst.msk [vmem:[#allocation2 + $0xac] sm:$0xf] %vm698_vm7, %v1154_v58  ;;  %1338 = vst [vmem:[#allocation2 + $0xb0] sm:$0x1] %v1337_v23  ;;  %v1137_v45 = vsel %vm8331_vm13, %v1129_v14, %v1136_v36  ;;  %v1330_v31 = vsel %vm8191_vm4, %v1138_v39, %v1329_v4  ;;  %v1598_v32 = vshrl.u32 %v1369_v33, 16  ;;  %v1601_v38 = vshll.u32 %v1369_v33, 16 }
 0x13d   : > { %1328 = vst.msk [vmem:[#allocation2 + $0xa0] sm:$0xf] %vm698_vm7, %v1137_v45  ;;  %1331 = vst [vmem:[#allocation2 + $0xa4] sm:$0x1] %v1330_v31  ;;  %v1538_v48 = vsel %vm8257_vm10, %v1533_v25, %v1537_v26  ;;  %v1542_v49 = vor.u32 %v1541_v28, %v1537_v26  ;;  %v1547_v53 = vrot.slane %v1545_v30, 5  ;;  %v1611_v20 = vshrl.u32 %v8593_v41, 16 }
 0x13e   : > { %v8611_v61 = vrot.slane %v1598_v32, 4  ;;  %v8613_v62 = vrot.slane %v1601_v38, 5  ;;  %v6793_v0 = vcombine.low %v1369_v33, %v8593_v41  ;;  %v660_v8 = vadd.f32 %v7957_v2, %v8570_v54  ;;  %v1346_v58 = vld [vmem:[#allocation2 + $0xc0] sm:$0xf] }
 0x13f   : > { %v1543_v11 = vrot.slane %v1542_v49, 4  ;;  %v1556_v13 = vor.u32 %v8551_v55, %v8549_v46  ;;  %v1559_v15 = vshll.u32 %v8525_v42, 16  ;;  %v1565_v50 = vrot.slane %v1563_v52, 4 }
 0x140   : > { %7517 = vmatprep.mubr.msk.bf16.mxu0 %vm452_vm1, %v6793_v0  ;;  %v696_v22 = vmax.f32 %v660_v8, 0.0  ;;  %v1569_v63 = vshll.u32 %v8605_v47, 16  ;;  %v652_v14 = vadd.f32 %v7957_v2, %v651_v10  ;;  %v663_v3 = vadd.f32 %v7957_v2, %v7464_v43  ;;  %v8640_v8 = vld [vmem:[#allocation2 + $0x70] sm:$0xf] }
 0x141   : > { %v1548_v54 = vsel %vm8257_vm10, %v1543_v11, %v1547_v53  ;;  %v1557_v4 = vrot.slane %v1556_v13, 4  ;;  %v1561_v34 = vrot.slane %v1559_v15, 5  ;;  %v655_v44 = vadd.f32 %v7957_v2, %v654_v9 }
 0x142   : > { %v6758_v46 = vcombine.low %v1538_v48, %v1548_v54  ;;  %v7192_v55 = vpack.c.bf16 %v696_v22, %v696_v22  ;;  %v1571_v35 = vrot.slane %v1569_v63, 5  ;;  %v694_v28 = vmax.f32 %v652_v14, 0.0  ;;  %v1350_v63 = vld [vmem:[#allocation2 + $0xc8] sm:$0x1] }
 0x143   : > { %v1562_v52 = vsel %vm8257_vm10, %v1557_v4, %v1561_v34  ;;  %v1566_v33 = vor.u32 %v1565_v50, %v1561_v34  ;;  %v697_v57 = vmax.f32 %v663_v3, 0.0  ;;  %v695_v36 = vmax.f32 %v655_v44, 0.0  ;;  %v1339_v50 = vld [vmem:[#allocation2 + $0xb4] sm:$0xf] }
 0x144   : > { %7476 = vmatmul.mubr.msk.bf16.gmra.mxu1 %vm452_vm1, %v6758_v46  ;;  %v1174_v10 = vshrl.u32 %v7192_v55, 16  ;;  %v1177_v39 = vshll.u32 %v7192_v55, 16  ;;  %v7190_v25 = vpack.c.bf16 %v694_v28, %v694_v28  ;;  %v1622_v43 = vshrl.u32 %v8629_v60, 16  ;;  %v1343_v46 = vld [vmem:[#allocation2 + $0xbc] sm:$0x1] }
 0x145   : > { %v1567_v23 = vrot.slane %v1566_v33, 4  ;;  %v7193_v26 = vpack.c.bf16 %v697_v57, %v697_v57  ;;  %v7191_v30 = vpack.c.bf16 %v695_v36, %v695_v36  ;;  %v1625_v45 = vshll.u32 %v8629_v60, 16  ;;  %v1373_v36 = vld [vmem:[#allocation2 + $0x78] sm:$0xf] }
 0x146   : > { %v1176_v31 = vrot.slane %v1174_v10, 7  ;;  %v1157_v32 = vshrl.u32 %v7190_v25, 16  ;;  %v1160_v38 = vshll.u32 %v7190_v25, 16  ;;  %v8636_v48 = vrot.slane %v1622_v43, 4  ;;  %v8650_v10 = vld [vmem:[#allocation2 + $0x7c] sm:$0xf] }
 0x147   : > { %v1572_v49 = vsel %vm8257_vm10, %v1567_v23, %v1571_v35  ;;  %v1182_v53 = vshrl.u32 %v7193_v26, 16  ;;  %v1185_v0 = vshll.u32 %v7193_v26, 16  ;;  %v1165_v2 = vshrl.u32 %v7191_v30, 16  ;;  %v8648_v35 = vld [vmem:[#allocation2 + $0x5c] sm:$0x1] }
 0x148   : > { %v1179_v9 = vor.u32 %v1177_v39, %v1176_v31  ;;  %v1180_v11 = vrot.slane %v1176_v31, 4  ;;  %v6759_v13 = vcombine.low %v1562_v52, %v1572_v49  ;;  %v1159_v15 = vrot.slane %v1157_v32, 7 }
 0x149   : > { %v1184_v22 = vrot.slane %v1182_v53, 7  ;;  %v1167_v14 = vrot.slane %v1165_v2, 7  ;;  %v1168_v3 = vshll.u32 %v7191_v30, 16  ;;  %v8642_v54 = vrot.slane %v1625_v45, 5  ;;  %v1375_v53 = vld [vmem:[#allocation2 + $0x84] sm:$0xf] }
 0x14a   : > { %v1347_v4 = vsel %vm8317_vm12, %v1179_v9, %v1346_v58  ;;  %7479 = vmatprep.mubr.msk.bf16.mxu1 %vm452_vm1, %v6759_v13  ;;  %v1162_v34 = vor.u32 %v1160_v38, %v1159_v15  ;;  %v1163_v44 = vrot.slane %v1159_v15, 4  ;;  %v1635_v55 = vshrl.u32 %v8640_v8, 16 }
 0x14b   : > { %1348 = vst [vmem:[#allocation2 + $0xc0] sm:$0xf] %v1347_v4  ;;  %v1187_v28 = vor.u32 %v1185_v0, %v1184_v22  ;;  %v1189_v52 = vrot.slane %v1184_v22, 4  ;;  %v1170_v33 = vor.u32 %v1168_v3, %v1167_v14  ;;  %v1172_v57 = vrot.slane %v1167_v14, 4 }
 0x14c   : > { %v1340_v39 = vsel %vm8317_vm12, %v1162_v34, %v1339_v50  ;;  %v6794_v25 = vcombine.low %v8629_v60, %v8640_v8  ;;  %v1580_v43 = vor.u32 %v8580_v17, %v8575_v51  ;;  %v1583_v58 = vshll.u32 %v8567_v5, 16 }
 0x14d   : > { %1341 = vst [vmem:[#allocation2 + $0xb4] sm:$0xf] %v1340_v39  ;;  %v1188_v23 = vsel %vm8331_vm13, %v1180_v11, %v1187_v28  ;;  %v1351_v26 = vsel %vm8191_vm4, %v1189_v52, %v1350_v63  ;;  %v1171_v30 = vsel %vm8331_vm13, %v1163_v44, %v1170_v33  ;;  %v1344_v12 = vsel %vm8191_vm4, %v1172_v57, %v1343_v46  ;;  %v8687_v63 = vld [vmem:[#allocation2 + $0x74] sm:$0x1]  ;;  %v1377_v28 = vld [vmem:[#allocation2 + $0x90] sm:$0xf] }
 0x14e   : > { %1349 = vst.msk [vmem:[#allocation2 + $0xc4] sm:$0xf] %vm698_vm7, %v1188_v23  ;;  %1352 = vst [vmem:[#allocation2 + $0xc8] sm:$0x1] %v1351_v26  ;;  %7518 = vmatmul.mubr.msk.bf16.gmra.mxu0 %vm452_vm1, %v6794_v25  ;;  %v1581_v51 = vrot.slane %v1580_v43, 4  ;;  %v1585_v17 = vrot.slane %v1583_v58, 5  ;;  %v6795_v49 = vcombine.low %v1373_v36, %v8650_v10  ;;  %v1604_v11 = vor.u32 %v8613_v62, %v8611_v61 }
 0x14f   : > { %1342 = vst.msk [vmem:[#allocation2 + $0xb8] sm:$0xf] %vm698_vm7, %v1171_v30  ;;  %1345 = vst [vmem:[#allocation2 + $0xbc] sm:$0x1] %v1344_v12  ;;  %v1589_v60 = vrot.slane %v1587_v19, 4  ;;  %v1593_v45 = vshll.u32 %v8648_v35, 16 }
 0x150   : > { %v1646_v31 = vshrl.u32 %v1373_v36, 16  ;;  %v1649_v32 = vshll.u32 %v1373_v36, 16  ;;  %v1659_v38 = vshrl.u32 %v8650_v10, 16  ;;  %v1586_v0 = vsel %vm8257_vm10, %v1581_v51, %v1585_v17  ;;  %v8681_v19 = vld [vmem:[#allocation2 + $0x88] sm:$0xf]  ;;  %7521 = vmatprep.mubr.msk.bf16.mxu0 %vm452_vm1, %v6795_v49 }
 0x151   : > { %v1590_v2 = vor.u32 %v1589_v60, %v1585_v17  ;;  %v1595_v9 = vrot.slane %v1593_v45, 5  ;;  %v1607_v50 = vshll.u32 %v8593_v41, 16  ;;  %v1613_v22 = vrot.slane %v1611_v20, 4  ;;  %v8696_v36 = vld [vmem:[#allocation2 + $0x94] sm:$0xf] }
 0x152   : > { %v1648_v13 = vrot.slane %v1646_v31, 4  ;;  %v1651_v15 = vrot.slane %v1649_v32, 5  ;;  %v1605_v3 = vrot.slane %v1604_v11, 4  ;;  %v1617_v4 = vshll.u32 %v8673_v29, 16  ;;  %v8708_v32 = vld [vmem:[#allocation2 + $0x80] sm:$0x1] }
 0x153   : > { %v1591_v14 = vrot.slane %v1590_v2, 4  ;;  %v1670_v34 = vshrl.u32 %v1375_v53, 16  ;;  %v1609_v44 = vrot.slane %v1607_v50, 5  ;;  %v1673_v61 = vshll.u32 %v1375_v53, 16  ;;  %v8713_v11 = vld [vmem:[#allocation2 + $0xa0] sm:$0xf] }
 0x154   : > { %v1683_v62 = vshrl.u32 %v8681_v19, 16  ;;  %v6796_v46 = vcombine.low %v1375_v53, %v8681_v19  ;;  %v1619_v33 = vrot.slane %v1617_v4, 5  ;;  %v1628_v20 = vor.u32 %v8642_v54, %v8636_v48  ;;  %v1379_v53 = vld [vmem:[#allocation2 + $0x9c] sm:$0xf] }
 0x155   : > { %v1596_v52 = vsel %vm8257_vm10, %v1591_v14, %v1595_v9  ;;  %v1672_v57 = vrot.slane %v1670_v34, 4  ;;  %v1610_v25 = vsel %vm8257_vm10, %v1605_v3, %v1609_v44  ;;  %v1614_v43 = vor.u32 %v1613_v22, %v1609_v44 }
 0x156   : > { %v6760_v39 = vcombine.low %v1586_v0, %v1596_v52  ;;  %v1675_v58 = vrot.slane %v1673_v61, 5  ;;  %7522 = vmatmul.mubr.msk.bf16.gmra.mxu0 %vm452_vm1, %v6796_v46  ;;  %v1629_v23 = vrot.slane %v1628_v20, 4  ;;  %v1631_v26 = vshll.u32 %v8640_v8, 16  ;;  %v8722_v52 = vld [vmem:[#allocation2 + $0x8c] sm:$0x1] }
 0x157   : > { %v1637_v30 = vrot.slane %v1635_v55, 4  ;;  %v1641_v12 = vshll.u32 %v8687_v63, 16  ;;  %v1615_v48 = vrot.slane %v1614_v43, 4  ;;  %v1694_v54 = vshrl.u32 %v1377_v28, 16 }
 0x158   : > { %7480 = vmatmul.mubr.msk.bf16.gmra.mxu1 %vm452_vm1, %v6760_v39  ;;  %v1697_v51 = vshll.u32 %v1377_v28, 16  ;;  %v1707_v17 = vshrl.u32 %v8696_v36, 16  ;;  %v1633_v60 = vrot.slane %v1631_v26, 5  ;;  %v6797_v31 = vcombine.low %v1377_v28, %v8696_v36 }
 0x159   : > { %v1643_v45 = vrot.slane %v1641_v12, 5  ;;  %v1652_v49 = vor.u32 %v1651_v15, %v1648_v13  ;;  %v1620_v55 = vsel %vm8257_vm10, %v1615_v48, %v1619_v33  ;;  %v1696_v0 = vrot.slane %v1694_v54, 4  ;;  %v8732_v12 = vld [vmem:[#allocation2 + $0xac] sm:$0xf] }
 0x15a   : > { %v1699_v2 = vrot.slane %v1697_v51, 5  ;;  %v1655_v9 = vshll.u32 %v8650_v10, 16  ;;  %v6761_v50 = vcombine.low %v1610_v25, %v1620_v55  ;;  %v1634_v22 = vsel %vm8257_vm10, %v1629_v23, %v1633_v60  ;;  %7525 = vmatprep.mubr.msk.bf16.mxu0 %vm452_vm1, %v6797_v31  ;;  %v8735_v31 = vld [vmem:[#allocation2 + $0x98] sm:$0x1] }
 0x15b   : > { %v1638_v14 = vor.u32 %v1637_v30, %v1633_v60  ;;  %v1653_v3 = vrot.slane %v1652_v49, 4  ;;  %v1661_v13 = vrot.slane %v1659_v38, 4  ;;  %v1665_v15 = vshll.u32 %v8708_v32, 16  ;;  %v1381_v38 = vld [vmem:[#allocation2 + $0xa8] sm:$0xf] }
 0x15c   : > { %v1657_v4 = vrot.slane %v1655_v9, 5  ;;  %v1718_v34 = vshrl.u32 %v1379_v53, 16  ;;  %7483 = vmatprep.mubr.msk.bf16.mxu1 %vm452_vm1, %v6761_v50  ;;  %v1721_v61 = vshll.u32 %v1379_v53, 16  ;;  %v1731_v46 = vshrl.u32 %v8713_v11, 16  ;;  %v1383_v49 = vld [vmem:[#allocation2 + $0xb4] sm:$0xf] }
 0x15d   : > { %v1639_v44 = vrot.slane %v1638_v14, 4  ;;  %v6798_v28 = vcombine.low %v1379_v53, %v8713_v11  ;;  %v1667_v39 = vrot.slane %v1665_v15, 5  ;;  %v1676_v26 = vor.u32 %v1675_v58, %v1672_v57 }
 0x15e   : > { %v1658_v33 = vsel %vm8257_vm10, %v1653_v3, %v1657_v4  ;;  %v1662_v20 = vor.u32 %v1661_v13, %v1657_v4  ;;  %v8726_v25 = vrot.slane %v1718_v34, 4  ;;  %v1723_v23 = vrot.slane %v1721_v61, 5  ;;  %v8744_v13 = vld [vmem:[#allocation2 + $0xb8] sm:$0xf] }
 0x15f   : > { %v1644_v43 = vsel %vm8257_vm10, %v1639_v44, %v1643_v45  ;;  %7526 = vmatmul.mubr.msk.bf16.gmra.mxu0 %vm452_vm1, %v6798_v28  ;;  %v1679_v30 = vshll.u32 %v8681_v19, 16  ;;  %v1685_v51 = vrot.slane %v1683_v62, 4  ;;  %v1689_v60 = vshll.u32 %v8722_v52, 16 }
 0x160   : > { %v6762_v48 = vcombine.low %v1634_v22, %v1644_v43  ;;  %v1663_v54 = vrot.slane %v1662_v20, 4  ;;  %v1677_v53 = vrot.slane %v1676_v26, 4  ;;  %v1742_v9 = vshrl.u32 %v1381_v38, 16 }
 0x161   : > { %v1681_v55 = vrot.slane %v1679_v30, 5  ;;  %v1745_v45 = vshll.u32 %v1381_v38, 16  ;;  %v1691_v58 = vrot.slane %v1689_v60, 5  ;;  %v1755_v50 = vshrl.u32 %v8732_v12, 16 }
 0x162   : > { %7484 = vmatmul.mubr.msk.bf16.gmra.mxu1 %vm452_vm1, %v6762_v48  ;;  %v1668_v57 = vsel %vm8257_vm10, %v1663_v54, %v1667_v39  ;;  %v6799_v22 = vcombine.low %v1381_v38, %v8732_v12  ;;  %v1744_v4 = vrot.slane %v1742_v9, 4  ;;  %v1700_v34 = vor.u32 %v1699_v2, %v1696_v0  ;;  %v8750_v38 = vld [vmem:[#allocation2 + $0xa4] sm:$0x1] }
 0x163   : > { %v6763_v62 = vcombine.low %v1658_v33, %v1668_v57  ;;  %v1682_v14 = vsel %vm8257_vm10, %v1677_v53, %v1681_v55  ;;  %v1686_v3 = vor.u32 %v1685_v51, %v1681_v55  ;;  %v1747_v15 = vrot.slane %v1745_v45, 5  ;;  %v7925_v51 = vld [vmem:[#allocation2 + $0xc] sm:$0xff]  }
 0x164   : > { %7529 = vmatprep.mubr.msk.bf16.mxu0 %vm452_vm1, %v6799_v22  ;;  %v1703_v44 = vshll.u32 %v8696_v36, 16  ;;  %v1709_v61 = vrot.slane %v1707_v17, 4  ;;  %v1713_v20 = vshll.u32 %v8735_v31, 16  ;;  %v1766_v33 = vshrl.u32 %v1383_v49, 16  ;;  %v8760_v45 = vld [vmem:[#allocation2 + $0xb0] sm:$0x1] }
 0x165   : > { %7487 = vmatprep.mubr.msk.bf16.mxu1 %vm452_vm1, %v6763_v62  ;;  %v1687_v28 = vrot.slane %v1686_v3, 4  ;;  %v1769_v39 = vshll.u32 %v1383_v49, 16  ;;  %v1701_v43 = vrot.slane %v1700_v34, 4  ;;  %v1779_v30 = vshrl.u32 %v8744_v13, 16 }
 0x166   : > { %v1705_v26 = vrot.slane %v1703_v44, 5  ;;  %v6800_v48 = vcombine.low %v1383_v49, %v8744_v13  ;;  %v1715_v2 = vrot.slane %v1713_v20, 5  ;;  %v1768_v17 = vrot.slane %v1766_v33, 4  ;;  %v2342_v44 = vld [vmem:[#allocation2] sm:$0xe] }
 0x167   : > { %v1692_v0 = vsel %vm8257_vm10, %v1687_v28, %v1691_v58  ;;  %v1771_v54 = vrot.slane %v1769_v39, 5  ;;  %v1724_v9 = vor.u32 %v1723_v23, %v8726_v25  ;;  %v1727_v49 = vshll.u32 %v8713_v11, 16  ;;  %v8770_v25 = vld [vmem:[%s11004_s3 + $0x14] sm:$0xf]  ;;  %v7958_v20 = vld [vmem:[%s11004_s3 + $0xc] sm:$0xf] }
 0x168   : > { %v6764_v60 = vcombine.low %v1682_v14, %v1692_v0  ;;  %v1706_v53 = vsel %vm8257_vm10, %v1701_v43, %v1705_v26  ;;  %v1710_v55 = vor.u32 %v1709_v61, %v1705_v26  ;;  %7530 = vmatmul.mubr.msk.bf16.gmra.mxu0 %vm452_vm1, %v6800_v48  ;;  %v1733_v57 = vrot.slane %v1731_v46, 4  ;;  %v8779_v33 = vld [vmem:[#allocation2 + $0xbc] sm:$0x1] }
 0x169   : > { %v1737_v58 = vshll.u32 %v8750_v38, 16  ;;  %7569 = vmatprep.mubr.msk.bf16.mxu0 %vm452_vm1, %v7925_v51  ;;  %v1748_v22 = vor.u32 %v1747_v15, %v1744_v4  ;;  %v1725_v14 = vrot.slane %v1724_v9, 4  ;;  %v1751_v3 = vshll.u32 %v8732_v12, 16  ;;  %v2343_v51 = vld [vmem:[#allocation2 + $0xc] sm:$0xe] }
 0x16a   : > { %7488 = vmatmul.mubr.msk.bf16.gmra.mxu1 %vm452_vm1, %v6764_v60  ;;  %v1711_v62 = vrot.slane %v1710_v55, 4  ;;  %v1757_v34 = vrot.slane %v1755_v50, 4  ;;  %v1729_v23 = vrot.slane %v1727_v49, 5  ;;  %v1761_v28 = vshll.u32 %v8760_v45, 16  ;;  %v7926_v55 = vld [vmem:[#allocation2 + $0x18] sm:$0xff]  }
 0x16b   : > { %v1739_v46 = vrot.slane %v1737_v58, 5  ;;  %v1749_v61 = vrot.slane %v1748_v22, 4  ;;  %v1753_v15 = vrot.slane %v1751_v3, 5  ;;  %v2960_v50 = vsel %vm501_vm0, %v7958_v20, 0 }
 0x16c   : > { %v1716_v4 = vsel %vm8257_vm10, %v1711_v62, %v1715_v2  ;;  %v1772_v39 = vor.u32 %v1771_v54, %v1768_v17  ;;  %v1730_v26 = vsel %vm8257_vm10, %v1725_v14, %v1729_v23  ;;  %v1734_v48 = vor.u32 %v1733_v57, %v1729_v23  ;;  %7568 = vmatpush3.bf16.msra.mxu0 %v2960_v50  ;;  %v7927_v57 = vld [vmem:[#allocation2 + $0x24] sm:$0xff]  }
 0x16d   : > { %v6765_v43 = vcombine.low %v1706_v53, %v1716_v4  ;;  %v1763_v0 = vrot.slane %v1761_v28, 5  ;;  %v1754_v2 = vsel %vm8257_vm10, %v1749_v61, %v1753_v15  ;;  %v1758_v60 = vor.u32 %v1757_v34, %v1753_v15  ;;  %7845 = vmatprep.subr.msk.bf16.mxu0 %vm501_vm0, %v8770_v25  ;;  %v7959_v14 = vld [vmem:[#allocation2 + $0x4] sm:$0xf]  ;;  %v7960_v28 = vld [vmem:[#allocation2 + $0x10] sm:$0xf] }
 0x16e   : > { %v1773_v9 = vrot.slane %v1772_v39, 4  ;;  %v1775_v49 = vshll.u32 %v8744_v13, 16  ;;  %v1735_v17 = vrot.slane %v1734_v48, 4  ;;  %v1781_v54 = vrot.slane %v1779_v30, 4 }
 0x16f   : > { %7491 = vmatprep.mubr.msk.bf16.mxu1 %vm452_vm1, %v6765_v43  ;;  %v1785_v53 = vshll.u32 %v8779_v33, 16  ;;  %v6817_v58 = vrot.slane %v2342_v44, 9  ;;  %v1759_v22 = vrot.slane %v1758_v60, 4  ;;  %v2395_v3 = vrot.slane %v7959_v14, 5  ;;  %v2344_v44 = vld [vmem:[#allocation2 + $0x18] sm:$0xe] }
 0x170   : > { %7570 = vmatmul.mubr.msk.bf16.vlgmr.msra.gmra.mxu0 %vm452_vm1, %v7926_v55  ;;  %v1777_v62 = vrot.slane %v1775_v49, 5  ;;  %v6818_v34 = vrot.slane %v2343_v51, 9  ;;  %v1740_v23 = vsel %vm8257_vm10, %v1735_v17, %v1739_v46  ;;  %v2402_v4 = vrot.slane %v7960_v28, 5  ;;  %v2345_v43 = vld [vmem:[#allocation2 + $0x24] sm:$0xe] }
 0x171   : > { %v1787_v61 = vrot.slane %v1785_v53, 5  ;;  %7573 = vmatprep.mubr.msk.bf16.mxu0 %vm452_vm1, %v7927_v57  ;;  %v8796_v30 = vsel %vm501_vm0, %v8494_v37, 0  ;;  %v6766_v15 = vcombine.low %v1730_v26, %v1740_v23  ;;  %v1764_v20 = vsel %vm8257_vm10, %v1759_v22, %v1763_v0  ;;  %v7962_v17 = vld [vmem:[#allocation2 + $0x20] sm:$0x1]  ;;  %v7963_v57 = vld [vmem:[#allocation2 + $0x28] sm:$0xf] }
 0x172   : > { %v1778_v50 = vsel %vm8257_vm10, %v1773_v9, %v1777_v62  ;;  %v1782_v39 = vor.u32 %v1781_v54, %v1777_v62  ;;  %v6767_v48 = vcombine.low %v1754_v2, %v1764_v20  ;;  %v2396_v37 = vsel %vm8804_vm2, %v6817_v58, %v2395_v3  ;;  %v7961_v9 = vld [vmem:[#allocation2 + $0x1c] sm:$0xf]  ;;  %v2346_v22 = vld [vmem:[#allocation2 + $0x30] sm:$0xe]  ;;  %v7964_v20 = vld [vmem:[#allocation2 + $0x34] sm:$0xf] }
 0x173   : > { %v2397_v51 = vrot.slane %v2395_v3, 4  ;;  %v8812_v26 = vsel %vm8804_vm2, %v6818_v34, %v2402_v4  ;;  %7492 = vmatmul.mubr.msk.bf16.gmra.mxu1 %vm452_vm1, %v6766_v15  ;;  %v2404_v60 = vrot.slane %v2402_v4, 4  ;;  %v6819_v55 = vrot.slane %v2344_v44, 9  ;;  %v7928_v3 = vld [vmem:[#allocation2 + $0x30] sm:$0xff]   ;;  %v7929_v4 = vld [vmem:[#allocation2 + $0x3c] sm:$0xff]  }
 0x174   : > { %v1783_v0 = vrot.slane %v1782_v39, 4  ;;  %v2409_v49 = vrot.slane %v7961_v9, 5  ;;  %7495 = vmatprep.mubr.msk.bf16.mxu1 %vm452_vm1, %v6767_v48  ;;  %v2412_v54 = vrot.slane %v7962_v17, 5  ;;  %v6820_v53 = vrot.slane %v2345_v43, 9  ;;  %v2349_v9 = vld [vmem:[#allocation2 + $0x54] sm:$0xe] }
 0x175   : > { %v2399_v2 = vsel %vm8804_vm2, %v2397_v51, %v2398_v7  ;;  %v2416_v58 = vrot.slane %v7963_v57, 5  ;;  %v8826_v34 = vsel %vm8804_vm2, %v2404_v60, %v2405_v56  ;;  %v2347_v7 = vld [vmem:[#allocation2 + $0x3c] sm:$0xe]  ;;  %v2419_v56 = vrot.slane %v8512_v24, 5  ;;  %v2348_v51 = vld [vmem:[#allocation2 + $0x48] sm:$0xe] }
 0x176   : > { %v1788_v62 = vsel %vm8257_vm10, %v1783_v0, %v1787_v61  ;;  %v6833_v14 = vcombine.low %v2396_v37, %v2399_v2  ;;  %v8830_v6 = vsel %vm8804_vm2, %v6819_v55, %v2409_v49  ;;  %v6834_v28 = vcombine.low %v8812_v26, %v8826_v34 }
 0x177   : > { %v6768_v23 = vcombine.low %v1778_v50, %v1788_v62  ;;  %v2411_v44 = vrot.slane %v2409_v49, 4  ;;  %v8836_v61 = vsel %vm8804_vm2, %v6820_v53, %v2416_v58  ;;  %v2418_v40 = vrot.slane %v2416_v58, 4  ;;  %v2350_v58 = vld [vmem:[#allocation2 + $0x60] sm:$0xe] }
 0x178   : > { %7574 = vmatmul.mubr.msk.bf16.gmra.mxu0 %vm452_vm1, %v7928_v3  ;;  %v6821_v15 = vrot.slane %v2346_v22, 9  ;;  %v2423_v39 = vrot.slane %v7964_v20, 5  ;;  %v2426_v43 = vrot.slane %v8543_v59, 5  ;;  %v6822_v48 = vrot.slane %v2347_v7, 9  ;;  %v7930_v7 = vld [vmem:[#allocation2 + $0x48] sm:$0xff]  }
 0x179   : > { %7577 = vmatprep.mubr.msk.bf16.mxu0 %vm452_vm1, %v7929_v4  ;;  %v8843_v50 = vsel %vm8804_vm2, %v2411_v44, %v2412_v54  ;;  %v2430_v37 = vrot.slane %v8508_v1, 5  ;;  %v8851_v24 = vsel %vm8804_vm2, %v2418_v40, %v2419_v56  ;;  %v2433_v2 = vrot.slane %v8583_v27, 5  ;;  %v7931_v4 = vld [vmem:[#allocation2 + $0x54] sm:$0xff]  }
 0x17a   : > { %v6835_v0 = vcombine.low %v8830_v6, %v8843_v50  ;;  %v8855_v60 = vsel %vm8804_vm2, %v6821_v15, %v2423_v39  ;;  %v2425_v55 = vrot.slane %v2423_v39, 4  ;;  %v6836_v59 = vcombine.low %v8836_v61, %v8851_v24  ;;  %v2351_v6 = vld [vmem:[#allocation2 + $0x6c] sm:$0xe]  ;;  %v2352_v50 = vld [vmem:[#allocation2 + $0x78] sm:$0xe] }
 0x17b   : > { %v8861_v1 = vsel %vm8804_vm2, %v6822_v48, %v2430_v37  ;;  %v2432_v49 = vrot.slane %v2430_v37, 4  ;;  %7496 = vmatmul.mubr.msk.bf16.gmra.mxu1 %vm452_vm1, %v6768_v23  ;;  %v6823_v54 = vrot.slane %v2348_v51, 9  ;;  %v2437_v53 = vrot.slane %v8525_v42, 5  ;;  %v2353_v51 = vld [vmem:[#allocation2 + $0x84] sm:$0xe] }
 0x17c   : > { %v8867_v17 = vsel %vm8804_vm2, %v2425_v55, %v2426_v43  ;;  %v2440_v57 = vrot.slane %v8605_v47, 5  ;;  %7535 = vmatprep.mubr.msk.bf16.mxu1 %vm452_vm1, %v6833_v14  ;;  %v6824_v62 = vrot.slane %v2349_v9, 9  ;;  %v2444_v3 = vrot.slane %v8567_v5, 5 }
 0x17d   : > { %v6837_v22 = vcombine.low %v8855_v60, %v8867_v17  ;;  %v8876_v27 = vsel %vm8804_vm2, %v2432_v49, %v2433_v2  ;;  %v8883_v47 = vsel %vm8804_vm2, %v6823_v54, %v2437_v53  ;;  %v2439_v14 = vrot.slane %v2437_v53, 4  ;;  %v2354_v49 = vld [vmem:[#allocation2 + $0x90] sm:$0xe] }
 0x17e   : > { %v6838_v42 = vcombine.low %v8861_v1, %v8876_v27  ;;  %v2447_v23 = vrot.slane %v8648_v35, 5  ;;  %v8888_v44 = vsel %vm8804_vm2, %v6824_v62, %v2444_v3  ;;  %v2446_v40 = vrot.slane %v2444_v3, 4  ;;  %v2355_v3 = vld [vmem:[#allocation2 + $0x9c] sm:$0xe] }
 0x17f   : > { %v6825_v56 = vrot.slane %v2350_v58, 9  ;;  %v2451_v5 = vrot.slane %v8593_v41, 5  ;;  %v8894_v15 = vsel %vm8804_vm2, %v2439_v14, %v2440_v57  ;;  %v2454_v20 = vrot.slane %v8673_v29, 5  ;;  %v8925_v58 = vld [vmem:[%s11004_s3 + $0x18] sm:$0xf]  ;;  %v7932_v14 = vld [vmem:[#allocation2 + $0x60] sm:$0xff]  }
 0x180   : > { %7578 = vmatmul.mubr.msk.bf16.gmra.mxu0 %vm452_vm1, %v7930_v7  ;;  %v6826_v39 = vrot.slane %v2351_v6, 9  ;;  %v2458_v35 = vrot.slane %v8640_v8, 5  ;;  %v6839_v43 = vcombine.low %v8883_v47, %v8894_v15  ;;  %v8903_v41 = vsel %vm8804_vm2, %v2446_v40, %v2447_v23  ;;  %v3880_v7 = vld [vmem:[#allocation2 + $0xc] sm:$0xe]  ;;  %v7937_v15 = vld [vmem:[#allocation2 + $0x9c] sm:$0xff]  }
 0x181   : > { %7581 = vmatprep.mubr.msk.bf16.mxu0 %vm452_vm1, %v7931_v4  ;;  %v8907_v48 = vsel %vm8804_vm2, %v6825_v56, %v2451_v5  ;;  %v2453_v37 = vrot.slane %v2451_v5, 4  ;;  %v6840_v29 = vcombine.low %v8888_v44, %v8903_v41  ;;  %v2461_v9 = vrot.slane %v8687_v63, 5  ;;  %v8952_v4 = vld [vmem:[#allocation2 + $0x10] sm:$0xf]  ;;  %v7938_v41 = vld [vmem:[#allocation2 + $0xa8] sm:$0xff]  }
 0x182   : > { %v8913_v8 = vsel %vm8804_vm2, %v6826_v39, %v2458_v35  ;;  %v2460_v55 = vrot.slane %v2458_v35, 4  ;;  %v6827_v54 = vrot.slane %v2352_v50, 9  ;;  %v2465_v53 = vrot.slane %v8650_v10, 5  ;;  %v7933_v40 = vld [vmem:[#allocation2 + $0x6c] sm:$0xff]   ;;  %v8962_v39 = vld [vmem:[#allocation2 + $0x14] sm:$0x1] }
 0x183   : > { %v8918_v2 = vsel %vm8804_vm2, %v2453_v37, %v2454_v20  ;;  %v2468_v57 = vrot.slane %v8708_v32, 5  ;;  %7536 = vmatmul.mubr.msk.bf16.vlgmr.msra.gmra.mxu1 %vm452_vm1, %v6834_v28  ;;  %v6828_v10 = vrot.slane %v2353_v51, 9  ;;  %v2472_v32 = vrot.slane %v8681_v19, 5 }
 0x184   : > { %v6841_v63 = vcombine.low %v8907_v48, %v8918_v2  ;;  %v8935_v62 = vsel %vm8804_vm2, %v2460_v55, %v2461_v9  ;;  %7602 = vmatpush3.bf16.msra.mxu1 %v8796_v30  ;;  %7539 = vmatprep.mubr.msk.bf16.mxu1 %vm452_vm1, %v6835_v0  ;;  %v8944_v34 = vsel %vm8804_vm2, %v6827_v54, %v2465_v53  ;;  %v2467_v28 = vrot.slane %v2465_v53, 4  ;;  %v3885_v2 = vld [vmem:[#allocation2 + $0x48] sm:$0xe] }
 0x185   : > { %v6842_v26 = vcombine.low %v8913_v8, %v8935_v62  ;;  %v2475_v6 = vrot.slane %v8722_v52, 5  ;;  %v8949_v19 = vsel %vm8804_vm2, %v6828_v10, %v2472_v32  ;;  %v2474_v23 = vrot.slane %v2472_v32, 4  ;;  %7846 = vmatprep.subr.msk.bf16.mxu1 %vm501_vm0, %v8925_v58  ;;  %v8989_v32 = vld [vmem:[#allocation2 + $0x1c] sm:$0xf] }
 0x186   : > { %v6829_v30 = vrot.slane %v2354_v49, 9  ;;  %v2479_v0 = vrot.slane %v8696_v36, 5  ;;  %v8958_v56 = vsel %vm8804_vm2, %v2467_v28, %v2468_v57  ;;  %v2482_v52 = vrot.slane %v8735_v31, 5  ;;  %v2356_v31 = vld [vmem:[#allocation2 + $0xa8] sm:$0xe] }
 0x187   : > { %v6830_v5 = vrot.slane %v2355_v3, 9  ;;  %v2486_v20 = vrot.slane %v8713_v11, 5  ;;  %v6843_v36 = vcombine.low %v8944_v34, %v8958_v56  ;;  %v8969_v35 = vsel %vm8804_vm2, %v2474_v23, %v2475_v6  ;;  %v3881_v49 = vld [vmem:[#allocation2 + $0x18] sm:$0xe]  ;;  %v2357_v23 = vld [vmem:[#allocation2 + $0xb4] sm:$0xe] }
 0x188   : > { %7582 = vmatmul.mubr.msk.bf16.gmra.mxu0 %vm452_vm1, %v7932_v14  ;;  %v8973_v50 = vsel %vm8804_vm2, %v6829_v30, %v2479_v0  ;;  %v2481_v37 = vrot.slane %v2479_v0, 4  ;;  %v2489_v9 = vrot.slane %v8750_v38, 5  ;;  %v6929_v53 = vrot.slane %v3880_v7, 9  ;;  %v8998_v14 = vld [vmem:[#allocation2 + $0x20] sm:$0x1] }
 0x189   : > { %7585 = vmatprep.mubr.msk.bf16.mxu0 %vm452_vm1, %v7933_v40  ;;  %v8980_v51 = vsel %vm8804_vm2, %v6830_v5, %v2486_v20  ;;  %v2488_v55 = vrot.slane %v2486_v20, 4  ;;  %v3946_v57 = vrot.slane %v8952_v4, 5  ;;  %v3949_v10 = vrot.slane %v8962_v39, 5  ;;  %v9026_v5 = vld [vmem:[#allocation2 + $0x28] sm:$0xf]  ;;  %v7934_v20 = vld [vmem:[#allocation2 + $0x78] sm:$0xff]  }
 0x18a   : > { %v8985_v54 = vsel %vm8804_vm2, %v2481_v37, %v2482_v52  ;;  %v6831_v38 = vrot.slane %v2356_v31, 9  ;;  %v2493_v6 = vrot.slane %v8732_v12, 5  ;;  %v2496_v40 = vrot.slane %v8760_v45, 5  ;;  %v3882_v52 = vld [vmem:[#allocation2 + $0x24] sm:$0xe] }
 0x18b   : > { %v8995_v28 = vsel %vm8804_vm2, %v2488_v55, %v2489_v9  ;;  %7540 = vmatmul.mubr.msk.bf16.gmra.mxu1 %vm452_vm1, %v6836_v59  ;;  %v9008_v30 = vsel %vm8804_vm2, %v6929_v53, %v3946_v57  ;;  %v3948_v0 = vrot.slane %v3946_v57, 4  ;;  %v9014_v12 = vld [vmem:[%s11004_s3 + $0x1c] sm:$0xf]  ;;  %v4154_v59 = vsel %vm501_vm0, %v8770_v25, 0  ;;  %v9034_v31 = vld [vmem:[#allocation2 + $0x2c] sm:$0x1] }
 0x18c   : > { %7543 = vmatprep.mubr.msk.bf16.mxu1 %vm452_vm1, %v6837_v22  ;;  %v9022_v61 = vsel %vm8804_vm2, %v6831_v38, %v2493_v6  ;;  %v2495_v24 = vrot.slane %v2493_v6, 4  ;;  %v6930_v45 = vrot.slane %v3881_v49, 9  ;;  %7636 = vmatpush3.bf16.msra.mxu0 %v4154_v59  ;;  %v3953_v60 = vrot.slane %v8989_v32, 5  ;;  %v7935_v55 = vld [vmem:[#allocation2 + $0x84] sm:$0xff]   ;;  %v3155_v57 = vld [vmem:[#allocation2 + $0xc] sm:$0xf] }
 0x18d   : > { %v9030_v37 = vsel %vm8804_vm2, %v3948_v0, %v3949_v10  ;;  %v3956_v17 = vrot.slane %v8998_v14, 5  ;;  %v6832_v22 = vrot.slane %v2357_v23, 9  ;;  %v2500_v49 = vrot.slane %v8744_v13, 5  ;;  %7847 = vmatprep.subr.msk.bf16.mxu0 %vm501_vm0, %v9014_v12  ;;  %v9075_v10 = vld [vmem:[#allocation2 + $0x34] sm:$0xf] }
 0x18e   : > { %v6945_v25 = vcombine.low %v9008_v30, %v9030_v37  ;;  %v9040_v9 = vsel %vm8804_vm2, %v2495_v24, %v2496_v40  ;;  %v2503_v53 = vrot.slane %v8779_v33, 5  ;;  %v9051_v38 = vsel %vm8804_vm2, %v6930_v45, %v3953_v60  ;;  %v3158_v7 = vld [vmem:[#allocation2 + $0x18] sm:$0xf]  ;;  %v9109_v3 = vld [vmem:[#allocation2 + $0x44] sm:$0x1] }
 0x18f   : > { %v3955_v6 = vrot.slane %v3953_v60, 4  ;;  %v6931_v23 = vrot.slane %v3882_v52, 9  ;;  %v9056_v13 = vsel %vm8804_vm2, %v6832_v22, %v2500_v49  ;;  %v2502_v33 = vrot.slane %v2500_v49, 4  ;;  %v3883_v52 = vld [vmem:[#allocation2 + $0x30] sm:$0xe] }
 0x190   : > { %7586 = vmatmul.mubr.msk.bf16.gmra.mxu0 %vm452_vm1, %v7934_v20  ;;  %v3960_v0 = vrot.slane %v9026_v5, 5  ;;  %v3963_v40 = vrot.slane %v9034_v31, 5  ;;  %v3204_v59 = vshrl.u32 %v3155_v57, 16  ;;  %v3207_v45 = vshll.u32 %v3155_v57, 16 }
 0x191   : > { %7589 = vmatprep.mubr.msk.bf16.mxu0 %vm452_vm1, %v7935_v55  ;;  %v9062_v24 = vsel %vm8804_vm2, %v3955_v6, %v3956_v17  ;;  %v3213_v20 = vshll.u32 %v8952_v4, 16  ;;  %v9069_v22 = vsel %vm8804_vm2, %v2502_v33, %v2503_v53  ;;  %v9077_v17 = vld [vmem:[#allocation2 + $0x38] sm:$0x1]  ;;  %v3217_v1 = vshrl.u32 %v8952_v4, 16 }
 0x192   : > { %v9073_v55 = vsel %vm8804_vm2, %v6931_v23, %v3960_v0  ;;  %v3962_v49 = vrot.slane %v3960_v0, 4  ;;  %v3206_v6 = vrot.slane %v3204_v59, 4  ;;  %v3209_v53 = vrot.slane %v3207_v45, 5  ;;  %v7936_v0 = vld [vmem:[#allocation2 + $0x90] sm:$0xff]  }
 0x193   : > { %7544 = vmatmul.mubr.msk.bf16.gmra.mxu1 %vm452_vm1, %v6838_v42  ;;  %v3215_v33 = vrot.slane %v3213_v20, 5  ;;  %v3223_v27 = vshll.u32 %v8962_v39, 16  ;;  %v6932_v42 = vrot.slane %v3883_v52, 9  ;;  %v3967_v20 = vrot.slane %v9075_v10, 5 }
 0x194   : > { %7547 = vmatprep.mubr.msk.bf16.mxu1 %vm452_vm1, %v6839_v43  ;;  %v9091_v23 = vsel %vm8804_vm2, %v3962_v49, %v3963_v40  ;;  %v3210_v45 = vor.u32 %v3209_v53, %v3206_v6  ;;  %v3970_v47 = vrot.slane %v9077_v17, 5  ;;  %v3219_v43 = vrot.slane %v3217_v1, 4  ;;  %v3884_v49 = vld [vmem:[#allocation2 + $0x3c] sm:$0xe]  ;;  %v9105_v53 = vld [vmem:[#allocation2 + $0x40] sm:$0xf] }
 0x195   : > { %v3225_v57 = vrot.slane %v3223_v27, 5  ;;  %v3228_v60 = vshrl.u32 %v3158_v7, 16  ;;  %v3231_v40 = vshll.u32 %v3158_v7, 16  ;;  %v9102_v39 = vsel %vm8804_vm2, %v6932_v42, %v3967_v20 }
 0x196   : > { %v3211_v4 = vrot.slane %v3210_v45, 4  ;;  %v3969_v52 = vrot.slane %v3967_v20, 4  ;;  %v3237_v6 = vshll.u32 %v8989_v32, 16  ;;  %v3220_v59 = vor.u32 %v3219_v43, %v3215_v33 }
 0x197   : > { %v3230_v1 = vrot.slane %v3228_v60, 4  ;;  %v3233_v27 = vrot.slane %v3231_v40, 5  ;;  %v3241_v7 = vshrl.u32 %v8989_v32, 16  ;;  %v3247_v20 = vshll.u32 %v8998_v14, 16  ;;  %v3161_v40 = vld [vmem:[#allocation2 + $0x24] sm:$0xf] }
 0x198   : > { %7590 = vmatmul.mubr.msk.bf16.gmra.mxu0 %vm452_vm1, %v7936_v0  ;;  %v3216_v0 = vsel %vm8257_vm10, %v3211_v4, %v3215_v33  ;;  %v9115_v42 = vsel %vm8804_vm2, %v3969_v52, %v3970_v47  ;;  %v3239_v45 = vrot.slane %v3237_v6, 5  ;;  %v3221_v11 = vrot.slane %v3220_v59, 4 }
 0x199   : > { %7593 = vmatprep.mubr.msk.bf16.mxu0 %vm452_vm1, %v7937_v15  ;;  %v6948_v15 = vcombine.low %v9102_v39, %v9115_v42  ;;  %v3234_v60 = vor.u32 %v3233_v27, %v3230_v1  ;;  %v3243_v43 = vrot.slane %v3241_v7, 4  ;;  %v3249_v32 = vrot.slane %v3247_v20, 5  ;;  %v7939_v1 = vld [vmem:[#allocation2 + $0xb4] sm:$0xff]   ;;  %v9145_v7 = vld [vmem:[#allocation2 + $0x4c] sm:$0xf] }
 0x19a   : > { %v6933_v33 = vrot.slane %v3884_v49, 9  ;;  %v3974_v47 = vrot.slane %v9105_v53, 5  ;;  %v3977_v4 = vrot.slane %v9109_v3, 5  ;;  %v3226_v14 = vsel %vm8257_vm10, %v3221_v11, %v3225_v57 }
 0x19b   : > { %7548 = vmatmul.mubr.msk.bf16.gmra.mxu1 %vm452_vm1, %v6840_v29  ;;  %v3235_v59 = vrot.slane %v3234_v60, 4  ;;  %v3244_v52 = vor.u32 %v3243_v43, %v3239_v45  ;;  %v9134_v44 = vsel %vm501_vm0, %v8925_v58, 0  ;;  %v9136_v29 = vcombine.low %v3216_v0, %v3226_v14 }
 0x19c   : > { %7551 = vmatprep.mubr.msk.bf16.mxu1 %vm452_vm1, %v6841_v63  ;;  %v9140_v49 = vsel %vm8804_vm2, %v6933_v33, %v3974_v47  ;;  %v3976_v6 = vrot.slane %v3974_v47, 4  ;;  %v3252_v48 = vshrl.u32 %v3161_v40, 16  ;;  %v3164_v63 = vld [vmem:[#allocation2 + $0x30] sm:$0xf]  ;;  %v3255_v27 = vshll.u32 %v3161_v40, 16 }
 0x19d   : > { %v3240_v11 = vsel %vm8257_vm10, %v3235_v59, %v3239_v45  ;;  %v3245_v57 = vrot.slane %v3244_v52, 4  ;;  %v3261_v58 = vshll.u32 %v9026_v5, 16  ;;  %v3265_v60 = vshrl.u32 %v9026_v5, 16  ;;  %v9154_v33 = vld [vmem:[#allocation2 + $0x50] sm:$0x1] }
 0x19e   : > { %v9150_v0 = vsel %vm8804_vm2, %v3976_v6, %v3977_v4  ;;  %v3254_v20 = vrot.slane %v3252_v48, 4  ;;  %v3271_v43 = vshll.u32 %v9034_v31, 16  ;;  %v3257_v47 = vrot.slane %v3255_v27, 5 }
 0x19f   : > { %v3250_v45 = vsel %vm8257_vm10, %v3245_v57, %v3249_v32  ;;  %v6949_v40 = vcombine.low %v9140_v49, %v9150_v0  ;;  %v3263_v14 = vrot.slane %v3261_v58, 5  ;;  %v3267_v4 = vrot.slane %v3265_v60, 4  ;;  %v9171_v58 = vld [vmem:[#allocation2 + $0x58] sm:$0xf] }
 0x1a0   : > { %7594 = vmatmul.mubr.msk.bf16.gmra.mxu0 %vm452_vm1, %v7938_v41  ;;  %v9161_v59 = vcombine.low %v3240_v11, %v3250_v45  ;;  %v3273_v52 = vrot.slane %v3271_v43, 5  ;;  %v6934_v41 = vrot.slane %v3885_v2, 9  ;;  %v3258_v5 = vor.u32 %v3257_v47, %v3254_v20 }
 0x1a1   : > { %7597 = vmatprep.mubr.msk.bf16.mxu0 %vm452_vm1, %v7939_v1  ;;  %v3981_v31 = vrot.slane %v9145_v7, 5  ;;  %v3984_v6 = vrot.slane %v9154_v33, 5  ;;  %v3276_v48 = vshrl.u32 %v3164_v63, 16  ;;  %v3886_v1 = vld [vmem:[#allocation2 + $0x54] sm:$0xe]  ;;  %v3268_v32 = vor.u32 %v3267_v4, %v3263_v14 }
 0x1a2   : > { %v3279_v57 = vshll.u32 %v3164_v63, 16  ;;  %v3285_v11 = vshll.u32 %v9075_v10, 16  ;;  %v3289_v27 = vshrl.u32 %v9075_v10, 16  ;;  %v3259_v2 = vrot.slane %v3258_v5, 4  ;;  %v7940_v63 = vld [vmem:[#allocation2 + $0xc0] sm:$0xff]  }
 0x1a3   : > { %7552 = vmatmul.mubr.msk.bf16.gmra.mxu1 %vm452_vm1, %v6842_v26  ;;  %v9179_v20 = vsel %vm8804_vm2, %v6934_v41, %v3981_v31  ;;  %v3983_v8 = vrot.slane %v3981_v31, 4  ;;  %v3278_v62 = vrot.slane %v3276_v48, 4  ;;  %v9181_v26 = vld [vmem:[#allocation2 + $0x5c] sm:$0x1]  ;;  %v3269_v60 = vrot.slane %v3268_v32, 4 }
 0x1a4   : > { %7555 = vmatprep.mubr.msk.bf16.mxu1 %vm452_vm1, %v6843_v36  ;;  %v3281_v43 = vrot.slane %v3279_v57, 5  ;;  %v3287_v10 = vrot.slane %v3285_v11, 5  ;;  %v3291_v45 = vrot.slane %v3289_v27, 4  ;;  %v3264_v47 = vsel %vm8257_vm10, %v3259_v2, %v3263_v14  ;;  %v3167_v4 = vld [vmem:[#allocation2 + $0x3c] sm:$0xf] }
 0x1a5   : > { %v9187_v34 = vsel %vm8804_vm2, %v3983_v8, %v3984_v6  ;;  %v3295_v56 = vshll.u32 %v9077_v17, 16  ;;  %v6935_v36 = vrot.slane %v3886_v1, 9  ;;  %v3274_v41 = vsel %vm8257_vm10, %v3269_v60, %v3273_v52  ;;  %v9203_v27 = vld [vmem:[#allocation2 + $0x64] sm:$0xf]  ;;  %v3887_v8 = vld [vmem:[#allocation2 + $0x60] sm:$0xe] }
 0x1a6   : > { %v6950_v5 = vcombine.low %v9179_v20, %v9187_v34  ;;  %v3282_v31 = vor.u32 %v3281_v43, %v3278_v62  ;;  %v3292_v48 = vor.u32 %v3291_v45, %v3287_v10  ;;  %v9199_v14 = vcombine.low %v3264_v47, %v3274_v41  ;;  %v9219_v47 = vld [vmem:[#allocation2 + $0x68] sm:$0x1] }
 0x1a7   : > { %v3297_v17 = vrot.slane %v3295_v56, 5  ;;  %v3988_v6 = vrot.slane %v9171_v58, 5  ;;  %v3991_v1 = vrot.slane %v9181_v26, 5  ;;  %v3300_v52 = vshrl.u32 %v3167_v4, 16  ;;  %v3170_v56 = vld [vmem:[#allocation2 + $0x48] sm:$0xf] }
 0x1a8   : > { %7598 = vmatmul.mubr.msk.bf16.gmra.mxu0 %vm452_vm1, %v7940_v63  ;;  %v3283_v32 = vrot.slane %v3282_v31, 4  ;;  %v3293_v57 = vrot.slane %v3292_v48, 4  ;;  %v3303_v11 = vshll.u32 %v3167_v4, 16  ;;  %v3309_v37 = vshll.u32 %v9105_v53, 16 }
 0x1a9   : > { %7637 = vmatprep.mubr.msk.bf16.mxu0 %vm452_vm1, %v6945_v25  ;;  %v9207_v2 = vsel %vm8804_vm2, %v6935_v36, %v3988_v6  ;;  %v3990_v30 = vrot.slane %v3988_v6, 4  ;;  %v3313_v25 = vshrl.u32 %v9105_v53, 16  ;;  %v11034_v62 = vcombine.low %v8949_v19, %v8969_v35 }
 0x1aa   : > { %v3288_v63 = vsel %vm8257_vm10, %v3283_v32, %v3287_v10  ;;  %v3298_v60 = vsel %vm8257_vm10, %v3293_v57, %v3297_v17  ;;  %v3302_v43 = vrot.slane %v3300_v52, 4  ;;  %v3305_v45 = vrot.slane %v3303_v11, 5 }
 0x1ab   : > { %7556 = vmatmul.mubr.msk.bf16.gmra.mxu1 %vm452_vm1, %v11034_v62  ;;  %v11035_v53 = vcombine.low %v8973_v50, %v8985_v54  ;;  %v9225_v36 = vcombine.low %v3288_v63, %v3298_v60  ;;  %v9229_v19 = vsel %vm8804_vm2, %v3990_v30, %v3991_v1  ;;  %v3311_v35 = vrot.slane %v3309_v37, 5  ;;  %v3888_v30 = vld [vmem:[#allocation2 + $0x6c] sm:$0xe]  ;;  %v3173_v37 = vld [vmem:[#allocation2 + $0x54] sm:$0xf] }
 0x1ac   : > { %v3315_v10 = vrot.slane %v3313_v25, 4  ;;  %v6951_v4 = vcombine.low %v9207_v2, %v9229_v19  ;;  %v3306_v41 = vor.u32 %v3305_v45, %v3302_v43  ;;  %v3319_v31 = vshll.u32 %v9109_v3, 16  ;;  %v9249_v62 = vld [vmem:[#allocation2 + $0x70] sm:$0xf] }
 0x1ad   : > { %7559 = vmatprep.mubr.msk.bf16.mxu1 %vm452_vm1, %v11035_v53  ;;  %v6936_v48 = vrot.slane %v3887_v8, 9  ;;  %v3995_v50 = vrot.slane %v9203_v27, 5  ;;  %v3998_v54 = vrot.slane %v9219_v47, 5  ;;  %v3324_v6 = vshrl.u32 %v3170_v56, 16 }
 0x1ae   : > { %v3316_v17 = vor.u32 %v3315_v10, %v3311_v35  ;;  %v11036_v32 = vcombine.low %v9051_v38, %v9062_v24  ;;  %v3307_v1 = vrot.slane %v3306_v41, 4  ;;  %v3321_v57 = vrot.slane %v3319_v31, 5 }
 0x1af   : > { %v3327_v52 = vshll.u32 %v3170_v56, 16  ;;  %v3333_v11 = vshll.u32 %v9145_v7, 16  ;;  %v11037_v3 = vcombine.low %v9073_v55, %v9091_v23  ;;  %v9247_v8 = vsel %vm8804_vm2, %v6936_v48, %v3995_v50  ;;  %v9254_v56 = vld [vmem:[#allocation2 + $0x74] sm:$0x1] }
 0x1b0   : > { %7638 = vmatmul.mubr.msk.bf16.vlgmr.msra.gmra.mxu0 %vm452_vm1, %v11036_v32  ;;  %v3317_v25 = vrot.slane %v3316_v17, 4  ;;  %v3997_v38 = vrot.slane %v3995_v50, 4  ;;  %v3326_v24 = vrot.slane %v3324_v6, 4  ;;  %v3312_v63 = vsel %vm8257_vm10, %v3307_v1, %v3311_v35 }
 0x1b1   : > { %7641 = vmatprep.mubr.msk.bf16.mxu0 %vm452_vm1, %v11037_v3  ;;  %v3329_v60 = vrot.slane %v3327_v52, 5  ;;  %v3335_v43 = vrot.slane %v3333_v11, 5  ;;  %v3337_v45 = vshrl.u32 %v9145_v7, 16  ;;  %v3343_v53 = vshll.u32 %v9154_v33, 16 }
 0x1b2   : > { %v3322_v55 = vsel %vm8257_vm10, %v3317_v25, %v3321_v57  ;;  %v9260_v23 = vsel %vm8804_vm2, %v3997_v38, %v3998_v54  ;;  %v6937_v10 = vrot.slane %v3888_v30, 9  ;;  %v11038_v41 = vcombine.low %v8980_v51, %v8995_v28  ;;  %v3889_v57 = vld [vmem:[#allocation2 + $0x78] sm:$0xe]  ;;  %v9283_v30 = vld [vmem:[#allocation2 + $0x7c] sm:$0xf] }
 0x1b3   : > { %v9267_v35 = vcombine.low %v3312_v63, %v3322_v55  ;;  %v6952_v7 = vcombine.low %v9247_v8, %v9260_v23  ;;  %v3330_v31 = vor.u32 %v3329_v60, %v3326_v24  ;;  %v3339_v48 = vrot.slane %v3337_v45, 4  ;;  %v9291_v24 = vld [vmem:[#allocation2 + $0x80] sm:$0x1]  ;;  %v3892_v23 = vld [vmem:[#allocation2 + $0x9c] sm:$0xe] }
 0x1b4   : > { %7560 = vmatmul.mubr.msk.bf16.gmra.mxu1 %vm452_vm1, %v11038_v41  ;;  %v11039_v17 = vcombine.low %v9022_v61, %v9040_v9  ;;  %v3345_v50 = vrot.slane %v3343_v53, 5  ;;  %v4002_v33 = vrot.slane %v9249_v62, 5  ;;  %v4005_v54 = vrot.slane %v9254_v56, 5  ;;  %v3176_v63 = vld [vmem:[#allocation2 + $0x60] sm:$0xf] }
 0x1b5   : > { %v3348_v51 = vshrl.u32 %v3173_v37, 16  ;;  %v3331_v28 = vrot.slane %v3330_v31, 4  ;;  %v3340_v6 = vor.u32 %v3339_v48, %v3335_v43  ;;  %v3351_v32 = vshll.u32 %v3173_v37, 16 }
 0x1b6   : > { %7563 = vmatprep.mubr.msk.bf16.mxu1 %vm452_vm1, %v11039_v17  ;;  %v3357_v1 = vshll.u32 %v9171_v58, 16  ;;  %v9280_v52 = vsel %vm8804_vm2, %v6937_v10, %v4002_v33  ;;  %v4004_v11 = vrot.slane %v4002_v33, 4  ;;  %v3361_v9 = vshrl.u32 %v9171_v58, 16  ;;  %v3179_v17 = vld [vmem:[#allocation2 + $0x6c] sm:$0xf] }
 0x1b7   : > { %v3350_v61 = vrot.slane %v3348_v51, 4  ;;  %v3336_v37 = vsel %vm8257_vm10, %v3331_v28, %v3335_v43  ;;  %v3341_v3 = vrot.slane %v3340_v6, 4  ;;  %v3353_v25 = vrot.slane %v3351_v32, 5 }
 0x1b8   : > { %7642 = vmatmul.mubr.msk.bf16.gmra.mxu0 %vm452_vm1, %v6948_v15  ;;  %v3359_v38 = vrot.slane %v3357_v1, 5  ;;  %v9299_v58 = vsel %vm8804_vm2, %v4004_v11, %v4005_v54  ;;  %v3363_v39 = vrot.slane %v3361_v9, 4  ;;  %v3367_v42 = vshll.u32 %v9181_v26, 16  ;;  %v9329_v1 = vld [vmem:[#allocation2 + $0x88] sm:$0xf] }
 0x1b9   : > { %7645 = vmatprep.mubr.msk.bf16.mxu0 %vm452_vm1, %v6949_v40  ;;  %v6938_v15 = vrot.slane %v3889_v57, 9  ;;  %v3346_v60 = vsel %vm8257_vm10, %v3341_v3, %v3345_v50  ;;  %v6953_v43 = vcombine.low %v9280_v52, %v9299_v58  ;;  %v3354_v45 = vor.u32 %v3353_v25, %v3350_v61  ;;  %v9404_v58 = vld [vmem:[#allocation2 + $0xa0] sm:$0xf] }
 0x1ba   : > { %v4009_v49 = vrot.slane %v9283_v30, 5  ;;  %v9307_v0 = vcombine.low %v3336_v37, %v3346_v60  ;;  %v3364_v40 = vor.u32 %v3363_v39, %v3359_v38  ;;  %v3369_v55 = vrot.slane %v3367_v42, 5  ;;  %v9351_v60 = vld [vmem:[#allocation2 + $0x94] sm:$0xf] }
 0x1bb   : > { %v4012_v53 = vrot.slane %v9291_v24, 5  ;;  %v11040_v26 = vcombine.low %v9056_v13, %v9069_v22  ;;  %v3355_v10 = vrot.slane %v3354_v45, 4  ;;  %v3372_v48 = vshrl.u32 %v3176_v63, 16  ;;  %v3890_v13 = vld [vmem:[#allocation2 + $0x84] sm:$0xe] }
 0x1bc   : > { %v9316_v41 = vsel %vm8804_vm2, %v6938_v15, %v4009_v49  ;;  %v4011_v31 = vrot.slane %v4009_v49, 4  ;;  %v3365_v50 = vrot.slane %v3364_v40, 4  ;;  %v3375_v33 = vshll.u32 %v3176_v63, 16  ;;  %v3891_v15 = vld [vmem:[#allocation2 + $0x90] sm:$0xe] }
 0x1bd   : > { %7564 = vmatmul.mubr.msk.bf16.gmra.mxu1 %vm452_vm1, %v11040_v26  ;;  %v3381_v54 = vshll.u32 %v9203_v27, 16  ;;  %v3385_v51 = vshrl.u32 %v9203_v27, 16  ;;  %v3360_v22 = vsel %vm8257_vm10, %v3355_v10, %v3359_v38  ;;  %v3374_v6 = vrot.slane %v3372_v48, 4  ;;  %v9360_v49 = vld [vmem:[%s11004_s3 + $0x20] sm:$0xf] }
 0x1be   : > { %7603 = vmatprep.mubr.msk.bf16.mxu1 %vm452_vm1, %v9136_v29  ;;  %v9326_v28 = vsel %vm8804_vm2, %v4011_v31, %v4012_v53  ;;  %v3391_v32 = vshll.u32 %v9219_v47, 16  ;;  %v9331_v29 = vld [vmem:[#allocation2 + $0x8c] sm:$0x1]  ;;  %v3370_v57 = vsel %vm8257_vm10, %v3365_v50, %v3369_v55  ;;  %v3377_v11 = vrot.slane %v3375_v33, 5  ;;  %v9364_v26 = vld [vmem:[#allocation2 + $0x98] sm:$0x1] }
 0x1bf   : > { %v6954_v27 = vcombine.low %v9316_v41, %v9326_v28  ;;  %v3383_v61 = vrot.slane %v3381_v54, 5  ;;  %v9341_v9 = vcombine.low %v3360_v22, %v3370_v57  ;;  %v3387_v47 = vrot.slane %v3385_v51, 4 }
 0x1c0   : > { %7646 = vmatmul.mubr.msk.bf16.gmra.mxu0 %vm452_vm1, %v6950_v5  ;;  %v3393_v37 = vrot.slane %v3391_v32, 5  ;;  %v6939_v3 = vrot.slane %v3890_v13, 9  ;;  %v3378_v25 = vor.u32 %v3377_v11, %v3374_v6  ;;  %v4016_v38 = vrot.slane %v9329_v1, 5  ;;  %v3185_v11 = vld [vmem:[#allocation2 + $0x84] sm:$0xf] }
 0x1c1   : > { %7649 = vmatprep.mubr.msk.bf16.mxu0 %vm452_vm1, %v6951_v4  ;;  %v4019_v39 = vrot.slane %v9331_v29, 5  ;;  %v3396_v42 = vshrl.u32 %v3179_v17, 16  ;;  %v3388_v20 = vor.u32 %v3387_v47, %v3383_v61  ;;  %v3399_v34 = vshll.u32 %v3179_v17, 16  ;;  %v3182_v17 = vld [vmem:[#allocation2 + $0x78] sm:$0xf] }
 0x1c2   : > { %v3405_v5 = vshll.u32 %v9249_v62, 16  ;;  %v3409_v63 = vshrl.u32 %v9249_v62, 16  ;;  %v3379_v45 = vrot.slane %v3378_v25, 4  ;;  %v9355_v2 = vsel %vm8804_vm2, %v6939_v3, %v4016_v38 }
 0x1c3   : > { %v4018_v19 = vrot.slane %v4016_v38, 4  ;;  %v3398_v4 = vrot.slane %v3396_v42, 4  ;;  %v3389_v40 = vrot.slane %v3388_v20, 4  ;;  %v3401_v55 = vrot.slane %v3399_v34, 5 }
 0x1c4   : > { %v3407_v62 = vrot.slane %v3405_v5, 5  ;;  %v3411_v53 = vrot.slane %v3409_v63, 4  ;;  %v3384_v10 = vsel %vm8257_vm10, %v3379_v45, %v3383_v61  ;;  %v6940_v48 = vrot.slane %v3891_v15, 9 }
 0x1c5   : > { %7604 = vmatmul.mubr.msk.bf16.vlgmr.msra.gmra.mxu1 %vm452_vm1, %v9161_v59  ;;  %v9373_v31 = vsel %vm8804_vm2, %v4018_v19, %v4019_v39  ;;  %v3415_v59 = vshll.u32 %v9254_v56, 16  ;;  %v3394_v50 = vsel %vm8257_vm10, %v3389_v40, %v3393_v37  ;;  %v3402_v33 = vor.u32 %v3401_v55, %v3398_v4 }
 0x1c6   : > { %7670 = vmatpush3.bf16.msra.mxu1 %v9134_v44  ;;  %7607 = vmatprep.mubr.msk.bf16.mxu1 %vm452_vm1, %v9199_v14  ;;  %v6955_v44 = vcombine.low %v9355_v2, %v9373_v31  ;;  %v3412_v54 = vor.u32 %v3411_v53, %v3407_v62  ;;  %v9382_v14 = vcombine.low %v3384_v10, %v3394_v50  ;;  %v4023_v13 = vrot.slane %v9351_v60, 5  ;;  %v3188_v53 = vld [vmem:[#allocation2 + $0x90] sm:$0xf] }
 0x1c7   : > { %7848 = vmatprep.subr.msk.bf16.mxu1 %vm501_vm0, %v9360_v49  ;;  %v3417_v51 = vrot.slane %v3415_v59, 5  ;;  %v4026_v56 = vrot.slane %v9364_v26, 5  ;;  %v3403_v22 = vrot.slane %v3402_v33, 4  ;;  %v3420_v32 = vshrl.u32 %v3182_v17, 16 }
 0x1c8   : > { %7650 = vmatmul.mubr.msk.bf16.gmra.mxu0 %vm452_vm1, %v6952_v7  ;;  %v3413_v6 = vrot.slane %v3412_v54, 4  ;;  %v3423_v57 = vshll.u32 %v3182_v17, 16  ;;  %v9396_v61 = vsel %vm8804_vm2, %v6940_v48, %v4023_v13  ;;  %v4025_v47 = vrot.slane %v4023_v13, 4  ;;  %v9428_v48 = vpop.f32.mrf.mxu0 }
 0x1c9   : > { %7653 = vmatprep.mubr.msk.bf16.mxu0 %vm452_vm1, %v6953_v43  ;;  %v3429_v37 = vshll.u32 %v9283_v30, 16  ;;  %v3433_v8 = vshrl.u32 %v9283_v30, 16  ;;  %v3408_v7 = vsel %vm8257_vm10, %v3403_v22, %v3407_v62  ;;  %v3422_v25 = vrot.slane %v3420_v32, 4  ;;  %v9406_v43 = vld [vmem:[#allocation2 + $0xa4] sm:$0x1] }
 0x1ca   : > { %v3418_v3 = vsel %vm8257_vm10, %v3413_v6, %v3417_v51  ;;  %v3425_v52 = vrot.slane %v3423_v57, 5  ;;  %v9412_v39 = vsel %vm8804_vm2, %v4025_v47, %v4026_v56  ;;  %v3439_v34 = vshll.u32 %v9291_v24, 16  ;;  %v3893_v62 = vld [vmem:[#allocation2 + $0xa8] sm:$0xe]  ;;  %v9437_v51 = vld [vmem:[#allocation2 + $0xb0] sm:$0x1]  ;;  %v9449_v47 = vpop.f32.mrf.mxu0 }
 0x1cb   : > { %v9408_v38 = vcombine.low %v3408_v7, %v3418_v3  ;;  %v3431_v30 = vrot.slane %v3429_v37, 5  ;;  %v3435_v42 = vrot.slane %v3433_v8, 4  ;;  %v6956_v15 = vcombine.low %v9396_v61, %v9412_v39  ;;  %v3894_v7 = vld [vmem:[#allocation2 + $0xb4] sm:$0xe] }
 0x1cc   : > { %v3426_v20 = vor.u32 %v3425_v52, %v3422_v25  ;;  %v6941_v5 = vrot.slane %v3892_v23, 9  ;;  %v4030_v45 = vrot.slane %v9404_v58, 5  ;;  %v4033_v2 = vrot.slane %v9406_v43, 5 }
 0x1cd   : > { %7608 = vmatmul.mubr.msk.bf16.gmra.mxu1 %vm452_vm1, %v9225_v36  ;;  %v3436_v63 = vor.u32 %v3435_v42, %v3431_v30  ;;  %v3444_v19 = vshrl.u32 %v3185_v11, 16  ;;  %v3441_v40 = vrot.slane %v3439_v34, 5  ;;  %v3447_v55 = vshll.u32 %v3185_v11, 16  ;;  %v9459_v42 = vld [vmem:[#allocation2 + $0xb8] sm:$0xf] }
 0x1ce   : > { %7611 = vmatprep.mubr.msk.bf16.mxu1 %vm452_vm1, %v9267_v35  ;;  %v3427_v4 = vrot.slane %v3426_v20, 4  ;;  %v3453_v36 = vshll.u32 %v9329_v1, 16  ;;  %v4031_v24 = vsel %vm8804_vm2, %v6941_v5, %v4030_v45  ;;  %v4032_v31 = vrot.slane %v4030_v45, 4  ;;  %v9426_v35 = vld [vmem:[#allocation2 + $0xac] sm:$0xf] }
 0x1cf   : > { %v3437_v10 = vrot.slane %v3436_v63, 4  ;;  %v3446_v59 = vrot.slane %v3444_v19, 4  ;;  %v3449_v50 = vrot.slane %v3447_v55, 5  ;;  %v3457_v54 = vshrl.u32 %v9329_v1, 16  ;;  %v9463_v63 = vld [vmem:[#allocation2 + $0xbc] sm:$0x1] }
 0x1d0   : > { %7654 = vmatmul.mubr.msk.bf16.gmra.mxu0 %vm452_vm1, %v6954_v27  ;;  %v3432_v17 = vsel %vm8257_vm10, %v3427_v4, %v3431_v30  ;;  %v3455_v33 = vrot.slane %v3453_v36, 5  ;;  %v4034_v56 = vsel %vm8804_vm2, %v4032_v31, %v4033_v2  ;;  %v3463_v41 = vshll.u32 %v9331_v29, 16  ;;  %v3191_v4 = vld [vmem:[#allocation2 + $0x9c] sm:$0xf] }
 0x1d1   : > { %7657 = vmatprep.mubr.msk.bf16.mxu0 %vm452_vm1, %v6955_v44  ;;  %v3442_v13 = vsel %vm8257_vm10, %v3437_v10, %v3441_v40  ;;  %v6942_v28 = vrot.slane %v3893_v62, 9  ;;  %v6957_v22 = vcombine.low %v4031_v24, %v4034_v56  ;;  %v3450_v6 = vor.u32 %v3449_v50, %v3446_v59  ;;  %v9468_v40 = vpop.f32.mrf.mxu0  ;;  %v3194_v59 = vld [vmem:[#allocation2 + $0xa8] sm:$0xf] }
 0x1d2   : > { %v9445_v27 = vcombine.low %v3432_v17, %v3442_v13  ;;  %v3459_v32 = vrot.slane %v3457_v54, 4  ;;  %v3465_v57 = vrot.slane %v3463_v41, 5  ;;  %v4037_v1 = vrot.slane %v9426_v35, 5  ;;  %v3895_v13 = vld [vmem:[#allocation2 + $0xc0] sm:$0xe] }
 0x1d3   : > { %v4040_v11 = vrot.slane %v9437_v51, 5  ;;  %v3468_v44 = vshrl.u32 %v3188_v53, 16  ;;  %v3451_v37 = vrot.slane %v3450_v6, 4  ;;  %v3471_v29 = vshll.u32 %v3188_v53, 16  ;;  %v9485_v56 = vpop.f32.mrf.mxu0 }
 0x1d4   : > { %v3460_v8 = vor.u32 %v3459_v32, %v3455_v33  ;;  %v3477_v23 = vshll.u32 %v9351_v60, 16  ;;  %v4038_v3 = vsel %vm8804_vm2, %v6942_v28, %v4037_v1  ;;  %v4039_v25 = vrot.slane %v4037_v1, 4  ;;  %v9494_v32 = vld [vmem:[#allocation2 + $0xc4] sm:$0xf] }
 0x1d5   : > { %7612 = vmatmul.mubr.msk.bf16.gmra.mxu1 %vm452_vm1, %v9307_v0  ;;  %v3470_v52 = vrot.slane %v3468_v44, 4  ;;  %v3481_v30 = vshrl.u32 %v9351_v60, 16  ;;  %v3456_v0 = vsel %vm8257_vm10, %v3451_v37, %v3455_v33  ;;  %v3473_v34 = vrot.slane %v3471_v29, 5 }
 0x1d6   : > { %7615 = vmatprep.mubr.msk.bf16.mxu1 %vm452_vm1, %v9341_v9  ;;  %v3461_v20 = vrot.slane %v3460_v8, 4  ;;  %v3479_v5 = vrot.slane %v3477_v23, 5  ;;  %v4041_v9 = vsel %vm8804_vm2, %v4039_v25, %v4040_v11  ;;  %v3487_v2 = vshll.u32 %v9364_v26, 16  ;;  %v9506_v25 = vpop.f32.mrf.mxu0 }
 0x1d7   : > { %v3483_v45 = vrot.slane %v3481_v30, 4  ;;  %v6943_v19 = vrot.slane %v3894_v7, 9  ;;  %v6958_v55 = vcombine.low %v4038_v3, %v4041_v9  ;;  %v3474_v36 = vor.u32 %v3473_v34, %v3470_v52 }
 0x1d8   : > { %7658 = vmatmul.mubr.msk.bf16.gmra.mxu0 %vm452_vm1, %v6956_v15  ;;  %v3466_v60 = vsel %vm8257_vm10, %v3461_v20, %v3465_v57  ;;  %v4044_v62 = vrot.slane %v9459_v42, 5  ;;  %v3489_v10 = vrot.slane %v3487_v2, 5  ;;  %v4047_v24 = vrot.slane %v9463_v63, 5  ;;  %v9496_v57 = vld [vmem:[#allocation2 + $0xc8] sm:$0x1] }
 0x1d9   : > { %7661 = vmatprep.mubr.msk.bf16.mxu0 %vm452_vm1, %v6957_v22  ;;  %v9478_v53 = vcombine.low %v3456_v0, %v3466_v60  ;;  %v3484_v26 = vor.u32 %v3483_v45, %v3479_v5  ;;  %v3475_v31 = vrot.slane %v3474_v36, 4  ;;  %v3492_v15 = vshrl.u32 %v3191_v4, 16  ;;  %v4707_v20 = vld [vmem:[#allocation2 + $0x18] sm:$0xf] }
 0x1da   : > { %v4045_v61 = vsel %vm8804_vm2, %v6943_v19, %v4044_v62  ;;  %v4046_v39 = vrot.slane %v4044_v62, 4  ;;  %v3495_v50 = vshll.u32 %v3191_v4, 16  ;;  %v3501_v33 = vshll.u32 %v9404_v58, 16  ;;  %v9519_v62 = vld [vmem:[#allocation2 + $0x1c] sm:$0xf] }
 0x1db   : > { %v3485_v17 = vrot.slane %v3484_v26, 4  ;;  %v3505_v54 = vshrl.u32 %v9404_v58, 16  ;;  %v3480_v41 = vsel %vm8257_vm10, %v3475_v31, %v3479_v5  ;;  %v3494_v22 = vrot.slane %v3492_v15, 4  ;;  %v9527_v15 = vld [vmem:[#allocation2 + $0x20] sm:$0x1] }
 0x1dc   : > { %v4048_v28 = vsel %vm8804_vm2, %v4046_v39, %v4047_v24  ;;  %v3511_v6 = vshll.u32 %v9406_v43, 16  ;;  %v3497_v1 = vrot.slane %v3495_v50, 5  ;;  %v3503_v11 = vrot.slane %v3501_v33, 5 }
 0x1dd   : > { %7616 = vmatmul.mubr.msk.bf16.gmra.mxu1 %vm452_vm1, %v9382_v14  ;;  %v3490_v58 = vsel %vm8257_vm10, %v3485_v17, %v3489_v10  ;;  %v6959_v14 = vcombine.low %v4045_v61, %v4048_v28  ;;  %v3507_v37 = vrot.slane %v3505_v54, 4  ;;  %v6944_v29 = vrot.slane %v3895_v13, 9  ;;  %v9521_v10 = vpop.f32.mrf.mxu0 }
 0x1de   : > { %7619 = vmatprep.mubr.msk.bf16.mxu1 %vm452_vm1, %v9408_v38  ;;  %v9502_v44 = vcombine.low %v3480_v41, %v3490_v58  ;;  %v3513_v8 = vrot.slane %v3511_v6, 5  ;;  %v3498_v23 = vor.u32 %v3497_v1, %v3494_v22  ;;  %v4051_v43 = vrot.slane %v9494_v32, 5 }
 0x1df   : > { %v4054_v7 = vrot.slane %v9496_v57, 5  ;;  %v3516_v3 = vshrl.u32 %v3194_v59, 16  ;;  %v3508_v38 = vor.u32 %v3507_v37, %v3503_v11  ;;  %v3519_v52 = vshll.u32 %v3194_v59, 16  ;;  %v3197_v59 = vld [vmem:[#allocation2 + $0xb4] sm:$0xf]  ;;  %v9536_v1 = vpop.f32.mrf.mxu0 }
 0x1e0   : > { %7662 = vmatmul.mubr.msk.bf16.gmra.mxu0 %vm452_vm1, %v6958_v55  ;;  %v3525_v30 = vshll.u32 %v9426_v35, 16  ;;  %v3529_v0 = vshrl.u32 %v9426_v35, 16  ;;  %v3499_v34 = vrot.slane %v3498_v23, 4  ;;  %v4052_v5 = vsel %vm8804_vm2, %v6944_v29, %v4051_v43  ;;  %v4710_v29 = vld [vmem:[#allocation2 + $0x24] sm:$0xf] }
 0x1e1   : > { %7665 = vmatprep.mubr.msk.bf16.mxu0 %vm452_vm1, %v6959_v14  ;;  %v4053_v9 = vrot.slane %v4051_v43, 4  ;;  %v3518_v45 = vrot.slane %v3516_v3, 4  ;;  %v3509_v2 = vrot.slane %v3508_v38, 4  ;;  %v3521_v19 = vrot.slane %v3519_v52, 5  ;;  %v9534_v14 = vpop.f32.mrf.mxu1 }
 0x1e2   : > { %v3527_v4 = vrot.slane %v3525_v30, 5  ;;  %v3531_v60 = vrot.slane %v3529_v0, 4  ;;  %v3504_v55 = vsel %vm8257_vm10, %v3499_v34, %v3503_v11  ;;  %v3535_v35 = vshll.u32 %v9437_v51, 16 }
 0x1e3   : > { %v4055_v36 = vsel %vm8804_vm2, %v4053_v9, %v4054_v7  ;;  %v4756_v26 = vshrl.u32 %v4707_v20, 16  ;;  %v3514_v24 = vsel %vm8257_vm10, %v3509_v2, %v3513_v8  ;;  %v3522_v61 = vor.u32 %v3521_v19, %v3518_v45  ;;  %v9548_v9 = vld [vmem:[#allocation2 + $0x28] sm:$0xf]  ;;  %v9550_v2 = vpop.f32.mrf.mxu1  ;;  %v9552_v19 = vpop.f32.mrf.mxu0 }
 0x1e4   : > { %v6960_v31 = vcombine.low %v4052_v5, %v4055_v36  ;;  %v3532_v39 = vor.u32 %v3531_v60, %v3527_v4  ;;  %v6909_v51 = vcombine.low %v3504_v55, %v3514_v24  ;;  %v3537_v17 = vrot.slane %v3535_v35, 5  ;;  %11041 = vst [vmem:[#allocation6_spill] sm:$0xff] %v9552_v19  ;;  %v9556_v36 = vld [vmem:[#allocation2 + $0x2c] sm:$0x1]  ;;  %v3200_v24 = vld [vmem:[#allocation2 + $0xc0] sm:$0xf] }
 0x1e5   : > { %7620 = vmatmul.mubr.msk.bf16.gmra.mxu1 %vm452_vm1, %v9445_v27  ;;  %v4758_v50 = vrot.slane %v4756_v26, 4  ;;  %v4759_v33 = vshll.u32 %v4707_v20, 16  ;;  %v3523_v54 = vrot.slane %v3522_v61, 4  ;;  %v4765_v27 = vshll.u32 %v9519_v62, 16 }
 0x1e6   : > { %7623 = vmatprep.mubr.msk.bf16.mxu1 %vm452_vm1, %v9478_v53  ;;  %v3533_v13 = vrot.slane %v3532_v39, 4  ;;  %v4769_v41 = vshrl.u32 %v9519_v62, 16  ;;  %v4775_v22 = vshll.u32 %v9527_v15, 16  ;;  %v3540_v6 = vshrl.u32 %v3197_v59, 16 }
 0x1e7   : > { %v4761_v28 = vrot.slane %v4759_v33, 5  ;;  %v3543_v58 = vshll.u32 %v3197_v59, 16  ;;  %v3528_v53 = vsel %vm8257_vm10, %v3523_v54, %v3527_v4  ;;  %v4767_v37 = vrot.slane %v4765_v27, 5  ;;  %v9566_v33 = vpop.f32.mrf.mxu1 }
 0x1e8   : > { %7666 = vmatmul.mubr.msk.bf16.gmra.mxu0 %vm452_vm1, %v6960_v31  ;;  %v3538_v11 = vsel %vm8257_vm10, %v3533_v13, %v3537_v17  ;;  %v4771_v8 = vrot.slane %v4769_v41, 4  ;;  %v4777_v7 = vrot.slane %v4775_v22, 5  ;;  %v3542_v3 = vrot.slane %v3540_v6, 4 }
 0x1e9   : > { %v6910_v23 = vcombine.low %v3528_v53, %v3538_v11  ;;  %v4762_v43 = vor.u32 %v4761_v28, %v4758_v50  ;;  %v3545_v52 = vrot.slane %v3543_v58, 5  ;;  %v3549_v30 = vshll.u32 %v9459_v42, 16  ;;  %v9568_v54 = vpop.f32.mrf.mxu0  ;;  %v4713_v11 = vld [vmem:[#allocation2 + $0x30] sm:$0xf] }
 0x1ea   : > { %v4772_v38 = vor.u32 %v4771_v8, %v4767_v37  ;;  %v3553_v0 = vshrl.u32 %v9459_v42, 16  ;;  %v3559_v34 = vshll.u32 %v9463_v63, 16  ;;  %v5237_v5 = vsel %vm501_vm0, %v9014_v12, 0 }
 0x1eb   : > { %v4763_v20 = vrot.slane %v4762_v43, 4  ;;  %v4780_v45 = vshrl.u32 %v4710_v29, 16  ;;  %v3546_v60 = vor.u32 %v3545_v52, %v3542_v3  ;;  %v3551_v55 = vrot.slane %v3549_v30, 5  ;;  %7704 = vmatpush3.bf16.msra.mxu0 %v5237_v5  ;;  %v9577_v30 = vld [vmem:[#allocation2 + $0x34] sm:$0xf] }
 0x1ec   : > { %v4773_v4 = vrot.slane %v4772_v38, 4  ;;  %v3555_v42 = vrot.slane %v3553_v0, 4  ;;  %v3561_v63 = vrot.slane %v3559_v34, 5  ;;  %v4783_v26 = vshll.u32 %v4710_v29, 16  ;;  %v9579_v0 = vpop.f32.mrf.mxu1 }
 0x1ed   : > { %7624 = vmatmul.mubr.msk.bf16.gmra.mxu1 %vm452_vm1, %v9502_v44  ;;  %v4768_v12 = vsel %vm8257_vm10, %v4763_v20, %v4767_v37  ;;  %v4782_v35 = vrot.slane %v4780_v45, 4  ;;  %v3547_v44 = vrot.slane %v3546_v60, 4  ;;  %v4789_v39 = vshll.u32 %v9548_v9, 16  ;;  %v9581_v20 = vpop.f32.mrf.mxu0 }
 0x1ee   : > { %7627 = vmatprep.mubr.msk.bf16.mxu1 %vm452_vm1, %v6909_v51  ;;  %v4778_v31 = vsel %vm8257_vm10, %v4773_v4, %v4777_v7  ;;  %v3556_v61 = vor.u32 %v3555_v42, %v3551_v55  ;;  %v4785_v17 = vrot.slane %v4783_v26, 5  ;;  %v4793_v50 = vshrl.u32 %v9548_v9, 16  ;;  %v9588_v42 = vld [vmem:[#allocation2 + $0x38] sm:$0x1] }
 0x1ef   : > { %v7009_v59 = vcombine.low %v4768_v12, %v4778_v31  ;;  %v4799_v51 = vshll.u32 %v9556_v36, 16  ;;  %v3552_v13 = vsel %vm8257_vm10, %v3547_v44, %v3551_v55  ;;  %v4791_v41 = vrot.slane %v4789_v39, 5  ;;  %v9594_v39 = vld [vmem:[#allocation2 + $0x40] sm:$0xf] }
 0x1f0   : > { %v3557_v27 = vrot.slane %v3556_v61, 4  ;;  %v3564_v28 = vshrl.u32 %v3200_v24, 16  ;;  %v4786_v22 = vor.u32 %v4785_v17, %v4782_v35  ;;  %v4795_v6 = vrot.slane %v4793_v50, 4  ;;  %v9598_v17 = vpop.f32.mrf.mxu0 }
 0x1f1   : > { %7705 = vmatprep.mubr.msk.bf16.mxu0 %vm452_vm1, %v7009_v59  ;;  %v4801_v58 = vrot.slane %v4799_v51, 5  ;;  %v3567_v53 = vshll.u32 %v3200_v24, 16  ;;  %v3573_v29 = vshll.u32 %v9494_v32, 16  ;;  %v3577_v43 = vshrl.u32 %v9494_v32, 16  ;;  %v4716_v24 = vld [vmem:[#allocation2 + $0x3c] sm:$0xf] }
 0x1f2   : > { %v3562_v37 = vsel %vm8257_vm10, %v3557_v27, %v3561_v63  ;;  %v3566_v8 = vrot.slane %v3564_v28, 4  ;;  %v4787_v3 = vrot.slane %v4786_v22, 4  ;;  %v4796_v38 = vor.u32 %v4795_v6, %v4791_v41 }
 0x1f3   : > { %v6911_v7 = vcombine.low %v3552_v13, %v3562_v37  ;;  %v3569_v52 = vrot.slane %v3567_v53, 5  ;;  %v3575_v34 = vrot.slane %v3573_v29, 5  ;;  %v3579_v5 = vrot.slane %v3577_v43, 4  ;;  %v9596_v59 = vpop.f32.mrf.mxu1  ;;  %v9606_v53 = vld [vmem:[#allocation2 + $0x44] sm:$0x1] }
 0x1f4   : > { %v3583_v45 = vshll.u32 %v9496_v57, 16  ;;  %v4804_v4 = vshrl.u32 %v4713_v11, 16  ;;  %v4792_v32 = vsel %vm8257_vm10, %v4787_v3, %v4791_v41  ;;  %v4797_v60 = vrot.slane %v4796_v38, 4  ;;  %v7941_v3 = vld [vmem:[#allocation2 + $0x18] sm:$0xff]  }
 0x1f5   : > { %7628 = vmatmul.mubr.msk.bf16.gmra.mxu1 %vm452_vm1, %v6910_v23  ;;  %v3570_v55 = vor.u32 %v3569_v52, %v3566_v8  ;;  %v4807_v12 = vshll.u32 %v4713_v11, 16  ;;  %v3580_v63 = vor.u32 %v3579_v5, %v3575_v34  ;;  %v4813_v23 = vshll.u32 %v9577_v30, 16  ;;  %v4719_v8 = vld [vmem:[#allocation2 + $0x48] sm:$0xf]  ;;  %v9609_v52 = vpop.f32.mrf.mxu1  ;;  %v9611_v5 = vpop.f32.mrf.mxu0 }
 0x1f6   : > { %7631 = vmatprep.mubr.msk.bf16.mxu1 %vm452_vm1, %v6911_v7  ;;  %v3585_v35 = vrot.slane %v3583_v45, 5  ;;  %v4806_v26 = vrot.slane %v4804_v4, 4  ;;  %v4802_v57 = vsel %vm8257_vm10, %v4797_v60, %v4801_v58  ;;  %v4817_v61 = vshrl.u32 %v9577_v30, 16  ;;  %v9614_v60 = vld [vmem:[#allocation2 + $0x4c] sm:$0xf] }
 0x1f7   : > { %v3571_v31 = vrot.slane %v3570_v55, 4  ;;  %v4809_v44 = vrot.slane %v4807_v12, 5  ;;  %v7010_v50 = vcombine.low %v4792_v32, %v4802_v57  ;;  %v3581_v51 = vrot.slane %v3580_v63, 4  ;;  %v9625_v57 = vld [vmem:[#allocation2 + $0x50] sm:$0x1] }
 0x1f8   : > { %v4815_v13 = vrot.slane %v4813_v23, 5  ;;  %v4823_v27 = vshll.u32 %v9588_v42, 16  ;;  %v4819_v28 = vrot.slane %v4817_v61, 4  ;;  %v4828_v22 = vshrl.u32 %v4716_v24, 16 }
 0x1f9   : > { %v4810_v41 = vor.u32 %v4809_v44, %v4806_v26  ;;  %7706 = vmatmul.mubr.msk.bf16.vlgmr.msra.gmra.mxu0 %vm452_vm1, %v7010_v50  ;;  %v3576_v6 = vsel %vm8257_vm10, %v3571_v31, %v3575_v34  ;;  %v3586_v58 = vsel %vm8257_vm10, %v3581_v51, %v3585_v35  ;;  %v4831_v11 = vshll.u32 %v4716_v24, 16  ;;  %v9633_v51 = vpop.f32.mrf.mxu0 }
 0x1fa   : > { %v4837_v37 = vshll.u32 %v9594_v39, 16  ;;  %v6912_v29 = vcombine.low %v3576_v6, %v3586_v58  ;;  %v4820_v7 = vor.u32 %v4819_v28, %v4815_v13  ;;  %v4830_v38 = vrot.slane %v4828_v22, 4 }
 0x1fb   : > { %v4811_v43 = vrot.slane %v4810_v41, 4  ;;  %v4825_v45 = vrot.slane %v4823_v27, 5  ;;  %v4833_v34 = vrot.slane %v4831_v11, 5  ;;  %v4841_v32 = vshrl.u32 %v9594_v39, 16 }
 0x1fc   : > { %v4839_v4 = vrot.slane %v4837_v37, 5  ;;  %v4821_v55 = vrot.slane %v4820_v7, 4  ;;  %v4847_v12 = vshll.u32 %v9606_v53, 16  ;;  %v9620_v63 = vadd.f32 %v9428_v48, %v9534_v14  ;;  %v9631_v14 = vpop.f32.mrf.mxu1  ;;  %v4722_v37 = vld [vmem:[#allocation2 + $0x54] sm:$0xf] }
 0x1fd   : > { %7632 = vmatmul.mubr.msk.bf16.gmra.mxu1 %vm452_vm1, %v6912_v29  ;;  %v4852_v35 = vshrl.u32 %v4719_v8, 16  ;;  %v4816_v26 = vsel %vm8257_vm10, %v4811_v43, %v4815_v13  ;;  %v4834_v23 = vor.u32 %v4833_v34, %v4830_v38  ;;  %v4843_v24 = vrot.slane %v4841_v32, 4 }
 0x1fe   : > { %7671 = vmatprep.mubr.msk.bf16.mxu1 %vm452_vm1, %v7941_v3  ;;  %v4855_v31 = vshll.u32 %v4719_v8, 16  ;;  %v4826_v44 = vsel %vm8257_vm10, %v4821_v55, %v4825_v45  ;;  %v4861_v50 = vshll.u32 %v9614_v60, 16  ;;  %v4865_v48 = vshrl.u32 %v9614_v60, 16  ;;  %v9643_v3 = vld [vmem:[#allocation2 + $0x58] sm:$0xf]  ;;  %v7942_v45 = vld [vmem:[#allocation2 + $0x24] sm:$0xff]  }
 0x1ff   : > { %v4854_v61 = vrot.slane %v4852_v35, 4  ;;  %v7011_v13 = vcombine.low %v4816_v26, %v4826_v44  ;;  %v4835_v27 = vrot.slane %v4834_v23, 4  ;;  %v4844_v41 = vor.u32 %v4843_v24, %v4839_v4  ;;  %v9653_v35 = vpop.f32.mrf.mxu1  ;;  %v7943_v26 = vld [vmem:[#allocation2 + $0x30] sm:$0xff]   ;;  %v4725_v44 = vld [vmem:[#allocation2 + $0x60] sm:$0xf] }
 0x200   : > { %v4857_v28 = vrot.slane %v4855_v31, 5  ;;  %v4849_v22 = vrot.slane %v4847_v12, 5  ;;  %v4863_v6 = vrot.slane %v4861_v50, 5  ;;  %v4867_v58 = vrot.slane %v4865_v48, 4  ;;  %v9651_v12 = vld [vmem:[#allocation2 + $0x5c] sm:$0x1] }
 0x201   : > { %v4871_v11 = vshll.u32 %v9625_v57, 16  ;;  %7709 = vmatprep.mubr.msk.bf16.mxu0 %vm452_vm1, %v7011_v13  ;;  %v4845_v8 = vrot.slane %v4844_v41, 4  ;;  %v5706_v43 = vsel %vm501_vm0, %v9360_v49, 0  ;;  %v9641_v7 = vadd.f32 %v9449_v47, %v9550_v2  ;;  %11042 = vst [vmem:[#allocation7_spill] sm:$0xff] %v9653_v35  ;;  %v9655_v49 = vpop.f32.mrf.mxu0 }
 0x202   : > { %v4858_v29 = vor.u32 %v4857_v28, %v4854_v61  ;;  %v4840_v38 = vsel %vm8257_vm10, %v4835_v27, %v4839_v4  ;;  %v4868_v34 = vor.u32 %v4867_v58, %v4863_v6  ;;  %v9649_v55 = vadd.f32 %v9468_v40, %v9566_v33  ;;  %v9666_v27 = vld [vmem:[#allocation2 + $0x64] sm:$0xf] }
 0x203   : > { %v4873_v32 = vrot.slane %v4871_v11, 5  ;;  %v4850_v47 = vsel %vm8257_vm10, %v4845_v8, %v4849_v22  ;;  %v4876_v23 = vshrl.u32 %v4722_v37, 16  ;;  %v4879_v4 = vshll.u32 %v4722_v37, 16  ;;  %v9677_v37 = vpop.f32.mrf.mxu0 }
 0x204   : > { %v4859_v2 = vrot.slane %v4858_v29, 4  ;;  %v7012_v24 = vcombine.low %v4840_v38, %v4850_v47  ;;  %v4869_v31 = vrot.slane %v4868_v34, 4  ;;  %v4885_v40 = vshll.u32 %v9643_v3, 16  ;;  %v7477_v11 = vpop.f32.mrf.mxu1 }
 0x205   : > { %7672 = vmatmul.mubr.msk.bf16.vlgmr.msra.gmra.mxu1 %vm452_vm1, %v7942_v45  ;;  %v4889_v33 = vshrl.u32 %v9643_v3, 16  ;;  %v4878_v50 = vrot.slane %v4876_v23, 4  ;;  %v4881_v48 = vrot.slane %v4879_v4, 5  ;;  %v4895_v13 = vshll.u32 %v9651_v12, 16  ;;  %v4728_v4 = vld [vmem:[#allocation2 + $0x6c] sm:$0xf] }
 0x206   : > { %v4864_v61 = vsel %vm8257_vm10, %v4859_v2, %v4863_v6  ;;  %7738 = vmatpush3.bf16.msra.mxu1 %v5706_v43  ;;  %7675 = vmatprep.mubr.msk.bf16.mxu1 %vm452_vm1, %v7943_v26  ;;  %v4874_v41 = vsel %vm8257_vm10, %v4869_v31, %v4873_v32  ;;  %v4887_v28 = vrot.slane %v4885_v40, 5  ;;  %v9673_v58 = vadd.f32 %v9506_v25, %v9596_v59  ;;  %v9675_v6 = vld [vmem:[#allocation2 + $0x68] sm:$0x1]  ;;  %v7944_v25 = vld [vmem:[#allocation2 + $0x3c] sm:$0xff]  }
 0x207   : > { %7710 = vmatmul.mubr.msk.bf16.gmra.mxu0 %vm452_vm1, %v7012_v24  ;;  %v4891_v22 = vrot.slane %v4889_v33, 4  ;;  %v7013_v8 = vcombine.low %v4864_v61, %v4874_v41  ;;  %v4882_v29 = vor.u32 %v4881_v48, %v4878_v50  ;;  %v4897_v43 = vrot.slane %v4895_v13, 5  ;;  %v1955_v61 = vpop.f32.mrf.mxu1  ;;  %v9689_v50 = vpop.f32.mrf.mxu0  ;;  %v7945_v41 = vld [vmem:[#allocation2 + $0x48] sm:$0xff]  }
 0x208   : > { %v4900_v38 = vshrl.u32 %v4725_v44, 16  ;;  %v4903_v34 = vshll.u32 %v4725_v44, 16  ;;  %v4909_v47 = vshll.u32 %v9666_v27, 16  ;;  %v4913_v32 = vshrl.u32 %v9666_v27, 16  ;;  %v9687_v44 = vld [vmem:[#allocation2 + $0x70] sm:$0xf] }
 0x209   : > { %v4892_v45 = vor.u32 %v4891_v22, %v4887_v28  ;;  %7713 = vmatprep.mubr.msk.bf16.mxu0 %vm452_vm1, %v7013_v8  ;;  %v4883_v2 = vrot.slane %v4882_v29, 4  ;;  %v4919_v26 = vshll.u32 %v9675_v6, 16  ;;  %v9685_v23 = vadd.f32 %v9521_v10, %v9609_v52  ;;  %v9697_v10 = vld [vmem:[#allocation2 + $0x74] sm:$0x1] }
 0x20a   : > { %v4902_v59 = vrot.slane %v4900_v38, 4  ;;  %v4905_v31 = vrot.slane %v4903_v34, 5  ;;  %v4911_v40 = vrot.slane %v4909_v47, 5  ;;  %v4915_v33 = vrot.slane %v4913_v32, 4 }
 0x20b   : > { %11043 = vst [vmem:[#allocation8_spill] sm:$0xff] %v9685_v23  ;;  %v4893_v24 = vrot.slane %v4892_v45, 4  ;;  %v4888_v48 = vsel %vm8257_vm10, %v4883_v2, %v4887_v28  ;;  %v4921_v13 = vrot.slane %v4919_v26, 5  ;;  %v9695_v22 = vadd.f32 %v9536_v1, %v9631_v14  ;;  %v4731_v1 = vld [vmem:[#allocation2 + $0x78] sm:$0xf] }
 0x20c   : > { %v4906_v8 = vor.u32 %v4905_v31, %v4902_v59  ;;  %v4916_v29 = vor.u32 %v4915_v33, %v4911_v40  ;;  %v4924_v38 = vshrl.u32 %v4728_v4, 16  ;;  %v4927_v28 = vshll.u32 %v4728_v4, 16  ;;  %v9737_v23 = vld [vmem:[#allocation2 + $0x8c] sm:$0x1] }
 0x20d   : > { %11044 = vst [vmem:[#allocation9_spill] sm:$0xff] %v9695_v22  ;;  %v4898_v52 = vsel %vm8257_vm10, %v4893_v24, %v4897_v43  ;;  %7676 = vmatmul.mubr.msk.bf16.gmra.mxu1 %vm452_vm1, %v7944_v25  ;;  %v4933_v34 = vshll.u32 %v9687_v44, 16  ;;  %v4937_v47 = vshrl.u32 %v9687_v44, 16  ;;  %v4943_v26 = vshll.u32 %v9697_v10, 16  ;;  %v9706_v43 = vld [vmem:[#allocation2 + $0x7c] sm:$0xf]  ;;  %v7478_v25 = vpop.f32.mrf.mxu1 }
 0x20e   : > { %v7014_v45 = vcombine.low %v4888_v48, %v4898_v52  ;;  %7679 = vmatprep.mubr.msk.bf16.mxu1 %vm452_vm1, %v7945_v41  ;;  %v4907_v14 = vrot.slane %v4906_v8, 4  ;;  %v4917_v32 = vrot.slane %v4916_v29, 4  ;;  %v4926_v2 = vrot.slane %v4924_v38, 4  ;;  %v9708_v59 = vpop.f32.mrf.mxu0  ;;  %v9714_v48 = vld [vmem:[#allocation2 + $0x80] sm:$0x1]  ;;  %11048 = vst [vmem:[#allocation13_spill] sm:$0xff] %v9737_v23 }
 0x20f   : > { %v4929_v24 = vrot.slane %v4927_v28, 5  ;;  %v4935_v31 = vrot.slane %v4933_v34, 5  ;;  %v4939_v4 = vrot.slane %v4937_v47, 4  ;;  %v9712_v33 = vadd.f32 %v9568_v54, %v7477_v11  ;;  %v7946_v34 = vld [vmem:[#allocation2 + $0x54] sm:$0xff]  }
 0x210   : > { %7714 = vmatmul.mubr.msk.bf16.gmra.mxu0 %vm452_vm1, %v7014_v45  ;;  %v4912_v41 = vsel %vm8257_vm10, %v4907_v14, %v4911_v40  ;;  %v4922_v52 = vsel %vm8257_vm10, %v4917_v32, %v4921_v13  ;;  %v4945_v8 = vrot.slane %v4943_v26, 5  ;;  %v4948_v29 = vshrl.u32 %v4731_v1, 16  ;;  %v9720_v38 = vpop.f32.mrf.mxu0  ;;  %v1958_v40 = vpop.f32.mrf.mxu1  ;;  %v4734_v14 = vld [vmem:[#allocation2 + $0x84] sm:$0xf] }
 0x211   : > { %11045 = vst [vmem:[#allocation10_spill] sm:$0xff] %v9712_v33  ;;  %v7015_v22 = vcombine.low %v4912_v41, %v4922_v52  ;;  %v4930_v45 = vor.u32 %v4929_v24, %v4926_v2  ;;  %v4940_v28 = vor.u32 %v4939_v4, %v4935_v31  ;;  %v4951_v47 = vshll.u32 %v4731_v1, 16  ;;  %v7947_v2 = vld [vmem:[#allocation2 + $0x60] sm:$0xff]   ;;  %v9731_v1 = vld [vmem:[#allocation2 + $0x88] sm:$0xf] }
 0x212   : > { %v4950_v19 = vrot.slane %v4948_v29, 4  ;;  %v4957_v54 = vshll.u32 %v9706_v43, 16  ;;  %v4961_v11 = vshrl.u32 %v9706_v43, 16  ;;  %v4967_v33 = vshll.u32 %v9714_v48, 16  ;;  %v9725_v35 = vpop.f32.mrf.mxu0 }
 0x213   : > { %7717 = vmatprep.mubr.msk.bf16.mxu0 %vm452_vm1, %v7015_v22  ;;  %v4931_v13 = vrot.slane %v4930_v45, 4  ;;  %v4941_v32 = vrot.slane %v4940_v28, 4  ;;  %v4953_v26 = vrot.slane %v4951_v47, 5  ;;  %v9729_v24 = vadd.f32 %v9581_v20, %v1955_v61 }
 0x214   : > { %v4959_v4 = vrot.slane %v4957_v54, 5  ;;  %v4963_v41 = vrot.slane %v4961_v11, 4  ;;  %v4969_v52 = vrot.slane %v4967_v33, 5  ;;  %v9735_v29 = vadd.f32 %v9598_v17, %v7478_v25  ;;  %v9739_v22 = vpop.f32.mrf.mxu0 }
 0x215   : > { %11046 = vst [vmem:[#allocation11_spill] sm:$0xff] %v9729_v24  ;;  %7680 = vmatmul.mubr.msk.bf16.gmra.mxu1 %vm452_vm1, %v7946_v34  ;;  %11049 = vst [vmem:[#allocation14_spill] sm:$0xff] %v9739_v22  ;;  %v4936_v45 = vsel %vm8257_vm10, %v4931_v13, %v4935_v31  ;;  %v4946_v20 = vsel %vm8257_vm10, %v4941_v32, %v4945_v8  ;;  %v4954_v61 = vor.u32 %v4953_v26, %v4950_v19  ;;  %v4737_v19 = vld [vmem:[#allocation2 + $0x90] sm:$0xf]  ;;  %v9764_v22 = vld [vmem:[#allocation2 + $0x98] sm:$0x1] }
 0x216   : > { %11047 = vst [vmem:[#allocation12_spill] sm:$0xff] %v9735_v29  ;;  %7683 = vmatprep.mubr.msk.bf16.mxu1 %vm452_vm1, %v7947_v2  ;;  %v9747_v28 = vadd.f32 %v9611_v5, %v1958_v40  ;;  %v7016_v33 = vcombine.low %v4936_v45, %v4946_v20  ;;  %v4964_v34 = vor.u32 %v4963_v41, %v4959_v4  ;;  %v4972_v17 = vshrl.u32 %v4734_v14, 16  ;;  %v9749_v47 = vpop.f32.mrf.mxu0 }
 0x217   : > { %v4975_v25 = vshll.u32 %v4734_v14, 16  ;;  %v4955_v54 = vrot.slane %v4954_v61, 4  ;;  %v4981_v11 = vshll.u32 %v9731_v1, 16  ;;  %v4985_v31 = vshrl.u32 %v9731_v1, 16  ;;  %v9758_v14 = vld [vmem:[#allocation2 + $0x94] sm:$0xf] }
 0x218   : > { %11050 = vst [vmem:[#allocation15_spill] sm:$0xff] %v9747_v28  ;;  %v4991_v13 = vshll.u32 %v9737_v23, 16  ;;  %v7481_v8 = vpop.f32.mrf.mxu1  ;;  %7718 = vmatmul.mubr.msk.bf16.gmra.mxu0 %vm452_vm1, %v7016_v33  ;;  %v4965_v32 = vrot.slane %v4964_v34, 4  ;;  %v4974_v5 = vrot.slane %v4972_v17, 4  ;;  %11052 = vst [vmem:[#allocation17_spill] sm:$0xff] %v9758_v14  ;;  %v9760_v2 = vpop.f32.mrf.mxu0  ;;  %v7948_v17 = vld [vmem:[#allocation2 + $0x6c] sm:$0xff]  }
 0x219   : > { %v4977_v40 = vrot.slane %v4975_v25, 5  ;;  %v9756_v26 = vadd.f32 %v9633_v51, %v7481_v8  ;;  %v4960_v41 = vsel %vm8257_vm10, %v4955_v54, %v4959_v4  ;;  %v4983_v45 = vrot.slane %v4981_v11, 5  ;;  %11053 = vst [vmem:[#allocation18_spill] sm:$0xff] %v9764_v22  ;;  %v7949_v54 = vld [vmem:[#allocation2 + $0x78] sm:$0xff]  }
 0x21a   : > { %v4987_v20 = vrot.slane %v4985_v31, 4  ;;  %v4993_v61 = vrot.slane %v4991_v13, 5  ;;  %v1971_v28 = vpop.f32.mrf.mxu1  ;;  %v4970_v33 = vsel %vm8257_vm10, %v4965_v32, %v4969_v52  ;;  %v4996_v51 = vshrl.u32 %v4737_v19, 16  ;;  %v9768_v8 = vpop.f32.mrf.mxu0  ;;  %v4740_v32 = vld [vmem:[#allocation2 + $0x9c] sm:$0xf] }
 0x21b   : > { %11051 = vst [vmem:[#allocation16_spill] sm:$0xff] %v9756_v26  ;;  %v4978_v34 = vor.u32 %v4977_v40, %v4974_v5  ;;  %v4999_v25 = vshll.u32 %v4737_v19, 16  ;;  %v7017_v26 = vcombine.low %v4960_v41, %v4970_v33  ;;  %v5005_v24 = vshll.u32 %v9758_v14, 16 }
 0x21c   : > { %v4988_v29 = vor.u32 %v4987_v20, %v4983_v45  ;;  %v5009_v4 = vshrl.u32 %v9758_v14, 16  ;;  %v7482_v11 = vpop.f32.mrf.mxu1  ;;  %v4998_v13 = vrot.slane %v4996_v51, 4  ;;  %v5015_v52 = vshll.u32 %v9764_v22, 16  ;;  %v9774_v5 = vpop.f32.mrf.mxu0 }
 0x21d   : > { %v4979_v31 = vrot.slane %v4978_v34, 4  ;;  %7684 = vmatmul.mubr.msk.bf16.gmra.mxu1 %vm452_vm1, %v7948_v17  ;;  %v5001_v23 = vrot.slane %v4999_v25, 5  ;;  %11054 = vst [vmem:[#allocation19_spill] sm:$0xff] %v9774_v5  ;;  %7721 = vmatprep.mubr.msk.bf16.mxu0 %vm452_vm1, %v7017_v26  ;;  %v5007_v40 = vrot.slane %v5005_v24, 5  ;;  %v9779_v20 = vadd.f32 %v9655_v49, %v1971_v28  ;;  %v9781_v34 = vld [vmem:[#allocation2 + $0xa0] sm:$0xf] }
 0x21e   : > { %v4989_v19 = vrot.slane %v4988_v29, 4  ;;  %v5011_v41 = vrot.slane %v5009_v4, 4  ;;  %7687 = vmatprep.mubr.msk.bf16.mxu1 %vm452_vm1, %v7949_v54  ;;  %v1974_v33 = vpop.f32.mrf.mxu1  ;;  %11056 = vst [vmem:[#allocation21_spill] sm:$0xff] %v9781_v34  ;;  %v9786_v25 = vadd.f32 %v9677_v37, %v7482_v11  ;;  %v9795_v49 = vld [vmem:[#allocation2 + $0xa4] sm:$0x1]  ;;  %v5020_v28 = vshrl.u32 %v4740_v32, 16 }
 0x21f   : > { %11055 = vst [vmem:[#allocation20_spill] sm:$0xff] %v9779_v20  ;;  %v4984_v17 = vsel %vm8257_vm10, %v4979_v31, %v4983_v45  ;;  %v5002_v51 = vor.u32 %v5001_v23, %v4998_v13  ;;  %v9788_v5 = vpop.f32.mrf.mxu0  ;;  %v9793_v26 = vadd.f32 %v9689_v50, %v1974_v33  ;;  %11059 = vst [vmem:[#allocation24_spill] sm:$0xff] %v9795_v49  ;;  %v5023_v20 = vshll.u32 %v4740_v32, 16  ;;  %v4743_v45 = vld [vmem:[#allocation2 + $0xa8] sm:$0xf] }
 0x220   : > { %11057 = vst [vmem:[#allocation22_spill] sm:$0xff] %v9786_v25  ;;  %v4994_v24 = vsel %vm8257_vm10, %v4989_v19, %v4993_v61  ;;  %v5012_v29 = vor.u32 %v5011_v41, %v5007_v40  ;;  %v5029_v23 = vshll.u32 %v9781_v34, 16  ;;  %v5017_v31 = vrot.slane %v5015_v52, 5  ;;  %v9801_v41 = vld [vmem:[#allocation2 + $0xac] sm:$0xf] }
 0x221   : > { %11058 = vst [vmem:[#allocation23_spill] sm:$0xff] %v9793_v26  ;;  %v7018_v4 = vcombine.low %v4984_v17, %v4994_v24  ;;  %v5003_v54 = vrot.slane %v5002_v51, 4  ;;  %v9798_v37 = vpop.f32.mrf.mxu0  ;;  %v5022_v13 = vrot.slane %v5020_v28, 4  ;;  %v5033_v61 = vshrl.u32 %v9781_v34, 16  ;;  %11060 = vst [vmem:[#allocation25_spill] sm:$0xff] %v9801_v41  ;;  %v7950_v51 = vld [vmem:[#allocation2 + $0x84] sm:$0xff]  }
 0x222   : > { %v5013_v11 = vrot.slane %v5012_v29, 4  ;;  %v7485_v19 = vpop.f32.mrf.mxu1  ;;  %v5025_v50 = vrot.slane %v5023_v20, 5  ;;  %v5031_v33 = vrot.slane %v5029_v23, 5  ;;  %v5039_v17 = vshll.u32 %v9795_v49, 16  ;;  %v9808_v24 = vld [vmem:[#allocation2 + $0xb0] sm:$0x1] }
 0x223   : > { %7722 = vmatmul.mubr.msk.bf16.gmra.mxu0 %vm452_vm1, %v7018_v4  ;;  %v9806_v32 = vadd.f32 %v9708_v59, %v7485_v19  ;;  %11062 = vst [vmem:[#allocation27_spill] sm:$0xff] %v9808_v24  ;;  %v9810_v29 = vpop.f32.mrf.mxu0  ;;  %v5008_v52 = vsel %vm8257_vm10, %v5003_v54, %v5007_v40  ;;  %v5035_v26 = vrot.slane %v5033_v61, 4  ;;  %v5044_v4 = vshrl.u32 %v4743_v45, 16  ;;  %v7951_v20 = vld [vmem:[#allocation2 + $0x90] sm:$0xff]  }
 0x224   : > { %v5018_v28 = vsel %vm8257_vm10, %v5013_v11, %v5017_v31  ;;  %v1987_v23 = vpop.f32.mrf.mxu1  ;;  %v5026_v49 = vor.u32 %v5025_v50, %v5022_v13  ;;  %v5047_v59 = vshll.u32 %v4743_v45, 16  ;;  %v5053_v19 = vshll.u32 %v9801_v41, 16  ;;  %v4746_v31 = vld [vmem:[#allocation2 + $0xb4] sm:$0xf] }
 0x225   : > { %11061 = vst [vmem:[#allocation26_spill] sm:$0xff] %v9806_v32  ;;  %v7019_v25 = vcombine.low %v5008_v52, %v5018_v28  ;;  %7688 = vmatmul.mubr.msk.bf16.gmra.mxu1 %vm452_vm1, %v7950_v51  ;;  %v9818_v32 = vpop.f32.mrf.mxu0  ;;  %v5036_v34 = vor.u32 %v5035_v26, %v5031_v33  ;;  %v5046_v22 = vrot.slane %v5044_v4, 4  ;;  %v5057_v40 = vshrl.u32 %v9801_v41, 16  ;;  %v9827_v51 = vld [vmem:[#allocation2 + $0xb8] sm:$0xf] }
 0x226   : > { %11063 = vst [vmem:[#allocation28_spill] sm:$0xff] %v9818_v32  ;;  %v5063_v54 = vshll.u32 %v9808_v24, 16  ;;  %7691 = vmatprep.mubr.msk.bf16.mxu1 %vm452_vm1, %v7951_v20  ;;  %v7486_v11 = vpop.f32.mrf.mxu1  ;;  %v5027_v13 = vrot.slane %v5026_v49, 4  ;;  %v5049_v61 = vrot.slane %v5047_v59, 5  ;;  %v5055_v50 = vrot.slane %v5053_v19, 5  ;;  %11065 = vst [vmem:[#allocation30_spill] sm:$0xff] %v9827_v51 }
 0x227   : > { %7725 = vmatprep.mubr.msk.bf16.mxu0 %vm452_vm1, %v7019_v25  ;;  %v9825_v45 = vadd.f32 %v9720_v38, %v1987_v23  ;;  %v5037_v26 = vrot.slane %v5036_v34, 4  ;;  %v5041_v52 = vrot.slane %v5039_v17, 5  ;;  %v5059_v28 = vrot.slane %v5057_v40, 4  ;;  %v9838_v19 = vld [vmem:[#allocation2 + $0xbc] sm:$0x1] }
 0x228   : > { %v9830_v4 = vadd.f32 %v9725_v35, %v7486_v11  ;;  %v9832_v32 = vpop.f32.mrf.mxu1  ;;  %v9834_v20 = vpop.f32.mrf.mxu0  ;;  %v5032_v25 = vsel %vm8257_vm10, %v5027_v13, %v5031_v33  ;;  %v5050_v49 = vor.u32 %v5049_v61, %v5046_v22  ;;  %v5065_v59 = vrot.slane %v5063_v54, 5  ;;  %11068 = vst [vmem:[#allocation33_spill] sm:$0xff] %v9838_v19  ;;  %v4749_v11 = vld [vmem:[#allocation2 + $0xc0] sm:$0xf]  ;;  %v7953_v54 = vld [vmem:[#allocation2 + $0xa8] sm:$0xff]  }
 0x229   : > { %11064 = vst [vmem:[#allocation29_spill] sm:$0xff] %v9825_v45  ;;  %11067 = vst [vmem:[#allocation32_spill] sm:$0xff] %v9832_v32  ;;  %v5068_v38 = vshrl.u32 %v4746_v31, 16  ;;  %v5042_v34 = vsel %vm8257_vm10, %v5037_v26, %v5041_v52  ;;  %v5060_v17 = vor.u32 %v5059_v28, %v5055_v50  ;;  %v5071_v23 = vshll.u32 %v4746_v31, 16  ;;  %v7952_v33 = vld [vmem:[#allocation2 + $0x9c] sm:$0xff]  }
 0x22a   : > { %11066 = vst [vmem:[#allocation31_spill] sm:$0xff] %v9830_v4  ;;  %v5077_v35 = vshll.u32 %v9827_v51, 16  ;;  %v7489_v40 = vpop.f32.mrf.mxu1  ;;  %v9843_v4 = vpop.f32.mrf.mxu0  ;;  %v7020_v32 = vcombine.low %v5032_v25, %v5042_v34  ;;  %v5051_v24 = vrot.slane %v5050_v49, 4  ;;  %v5081_v22 = vshrl.u32 %v9827_v51, 16  ;;  %v9847_v52 = vld [vmem:[#allocation2 + $0xc4] sm:$0xf] }
 0x22b   : > { %v5070_v45 = vrot.slane %v5068_v38, 4  ;;  %v5061_v13 = vrot.slane %v5060_v17, 4  ;;  %v5073_v61 = vrot.slane %v5071_v23, 5  ;;  %v5087_v26 = vshll.u32 %v9838_v19, 16 }
 0x22c   : > { %v5079_v41 = vrot.slane %v5077_v35, 5  ;;  %v2003_v31 = vpop.f32.mrf.mxu1  ;;  %v9849_v28 = vpop.f32.mrf.mxu0  ;;  %7726 = vmatmul.mubr.msk.bf16.gmra.mxu0 %vm452_vm1, %v7020_v32  ;;  %v5083_v14 = vrot.slane %v5081_v22, 4  ;;  %v9853_v25 = vadd.f32 %v9749_v47, %v7489_v40  ;;  %v5092_v49 = vshrl.u32 %v4749_v11, 16  ;;  %v9863_v47 = vld [vmem:[#allocation2 + $0xc8] sm:$0x1] }
 0x22d   : > { %7692 = vmatmul.mubr.msk.bf16.gmra.mxu1 %vm452_vm1, %v7952_v33  ;;  %v5056_v38 = vsel %vm8257_vm10, %v5051_v24, %v5055_v50  ;;  %v5066_v34 = vsel %vm8257_vm10, %v5061_v13, %v5065_v59  ;;  %v5074_v17 = vor.u32 %v5073_v61, %v5070_v45  ;;  %v5095_v23 = vshll.u32 %v4749_v11, 16  ;;  %v761_v11 = vld [vmem:[#allocation2 + $0xcc] sm:$0x1] }
 0x22e   : > { %11069 = vst [vmem:[#allocation34_spill] sm:$0xff] %v9853_v25  ;;  %7695 = vmatprep.mubr.msk.bf16.mxu1 %vm452_vm1, %v7953_v54  ;;  %v7490_v35 = vpop.f32.mrf.mxu1  ;;  %v9861_v19 = vpop.f32.mrf.mxu0  ;;  %v7021_v32 = vcombine.low %v5056_v38, %v5066_v34  ;;  %v5084_v22 = vor.u32 %v5083_v14, %v5079_v41  ;;  %v5094_v40 = vrot.slane %v5092_v49, 4  ;;  %v5101_v33 = vshll.u32 %v9847_v52, 16 }
 0x22f   : > { %11070 = vst [vmem:[#allocation35_spill] sm:$0xff] %v9861_v19  ;;  %v5075_v25 = vrot.slane %v5074_v17, 4  ;;  %v5089_v51 = vrot.slane %v5087_v26, 5  ;;  %v5097_v24 = vrot.slane %v5095_v23, 5  ;;  %v5105_v50 = vshrl.u32 %v9847_v52, 16 }
 0x230   : > { %v9867_v59 = vpop.f32.mrf.mxu1  ;;  %v9869_v45 = vpop.f32.mrf.mxu0  ;;  %7729 = vmatprep.mubr.msk.bf16.mxu0 %vm452_vm1, %v7021_v32  ;;  %v5085_v54 = vrot.slane %v5084_v22, 4  ;;  %v5103_v13 = vrot.slane %v5101_v33, 5  ;;  %v9873_v14 = vadd.f32 %v9760_v2, %v2003_v31  ;;  %v9876_v61 = vadd.f32 %v9768_v8, %v7490_v35  ;;  %v817_v17 = vld [vmem:[#allocation2 + $0xd4] sm:$0x1]  ;;  %v9881_v23 = vld [vmem:[#allocation2 + $0xd0] sm:$0xf] }
 0x231   : > { %v5098_v49 = vor.u32 %v5097_v24, %v5094_v40  ;;  %v5107_v26 = vrot.slane %v5105_v50, 4  ;;  %v5111_v38 = vshll.u32 %v9863_v47, 16  ;;  %v5080_v32 = vsel %vm8257_vm10, %v5075_v25, %v5079_v41  ;;  %v7954_v2 = vld [vmem:[#allocation2 + $0xb4] sm:$0xff]   ;;  %v7955_v24 = vld [vmem:[#allocation2 + $0xc0] sm:$0xff]  }
 0x232   : > { %11071 = vst [vmem:[#allocation36_spill] sm:$0xff] %v9876_v61  ;;  %v9879_v34 = vpop.f32.mrf.mxu0  ;;  %v5090_v22 = vsel %vm8257_vm10, %v5085_v54, %v5089_v51  ;;  %v762_v8 = vsel %vm8191_vm4, 0, %v761_v11  ;;  %v5432_v50 = vld [vmem:[#allocation2 + $0x18] sm:$0xe]  ;;  %v5498_v19 = vrot.slane %v9519_v62, 5  ;;  %v818_v18 = vsel %vm8199_vm6, 0, %v817_v17 }
 0x233   : > { %v7022_v31 = vcombine.low %v5080_v32, %v5090_v22  ;;  %v5099_v35 = vrot.slane %v5098_v49, 4  ;;  %v5108_v40 = vor.u32 %v5107_v26, %v5103_v13  ;;  %v7493_v33 = vpop.f32.mrf.mxu1  ;;  %763 = vst [vmem:[#allocation2 + $0xcc] sm:$0x1] %v762_v8  ;;  %v5125_v51 = vshll.u32 %v9881_v23, 16  ;;  %819 = vst [vmem:[#allocation2 + $0xd4] sm:$0x1] %v818_v18 }
 0x234   : > { %v9890_v61 = vpop.f32.mrf.mxu0  ;;  %v9893_v41 = vadd.f32 %v9788_v5, %v7493_v33  ;;  %v5113_v11 = vrot.slane %v5111_v38, 5  ;;  %v5500_v62 = vrot.slane %v5498_v19, 4  ;;  %v5501_v49 = vrot.slane %v9527_v15, 5  ;;  %v5433_v22 = vld [vmem:[#allocation2 + $0x24] sm:$0xe] }
 0x235   : > { %7696 = vmatmul.mubr.msk.bf16.gmra.mxu1 %vm452_vm1, %v7954_v2  ;;  %7730 = vmatmul.mubr.msk.bf16.gmra.mxu0 %vm452_vm1, %v7022_v31  ;;  %v5109_v25 = vrot.slane %v5108_v40, 4  ;;  %v2019_v54 = vpop.f32.mrf.mxu1  ;;  %v7041_v21 = vrot.slane %v5432_v50, 9  ;;  %v9907_v17 = vrot.slane %v5125_v51, 5  ;;  %v5129_v32 = vshrl.u32 %v9881_v23, 16  ;;  %v5434_v50 = vld [vmem:[#allocation2 + $0x30] sm:$0xe] }
 0x236   : > { %7699 = vmatprep.mubr.msk.bf16.mxu1 %vm452_vm1, %v7955_v24  ;;  %v9902_v5 = vpop.f32.mrf.mxu0  ;;  %v9905_v26 = vadd.f32 %v9798_v37, %v2019_v54  ;;  %v5104_v38 = vsel %vm8257_vm10, %v5099_v35, %v5103_v13  ;;  %v5502_v15 = vsel %vm8804_vm2, %v5500_v62, %v5501_v49  ;;  %v5505_v37 = vrot.slane %v9548_v9, 5 }
 0x237   : > { %11072 = vst [vmem:[#allocation37_spill] sm:$0xff] %v9902_v5  ;;  %v5114_v2 = vsel %vm8257_vm10, %v5109_v25, %v5113_v11  ;;  %v7494_v8 = vpop.f32.mrf.mxu1  ;;  %v5131_v24 = vrot.slane %v5129_v32, 4  ;;  %v5499_v13 = vsel %vm8804_vm2, %v7041_v21, %v5498_v19  ;;  %v7042_v35 = vrot.slane %v5433_v22, 9 }
 0x238   : > { %v9916_v31 = vpop.f32.mrf.mxu0  ;;  %v7023_v40 = vcombine.low %v5104_v38, %v5114_v2  ;;  %v9920_v33 = vadd.f32 %v9810_v29, %v7494_v8  ;;  %v5507_v51 = vrot.slane %v5505_v37, 4  ;;  %v5512_v11 = vrot.slane %v9577_v30, 5 }
 0x239   : > { %v9922_v18 = vpop.f32.mrf.mxu1  ;;  %v9931_v9 = vadd.f32 %v9485_v56, %v9579_v0  ;;  %v7057_v54 = vcombine.low %v5499_v13, %v5502_v15  ;;  %v5132_v49 = vor.u32 %v5131_v24, %v9907_v17  ;;  %v5508_v32 = vrot.slane %v9556_v36, 5 }
 0x23a   : > { %v9926_v25 = vpop.f32.mrf.mxu0  ;;  %7733 = vmatprep.mubr.msk.bf16.mxu0 %vm452_vm1, %v7023_v40  ;;  %v7956_v29 = vld [vmem:[#allocation2 + $0xcc] sm:$0xff]   ;;  %v5506_v38 = vsel %vm8804_vm2, %v7042_v35, %v5505_v37  ;;  %v7043_v30 = vrot.slane %v5434_v50, 9  ;;  %v9944_v0 = vld [vmem:[#allocation2 + $0xd4] sm:$0x1]  ;;  %v5514_v36 = vrot.slane %v5512_v11, 4  ;;  %v5515_v15 = vrot.slane %v9588_v42, 5 }
 0x23b   : > { %v4752_v62 = vld [vmem:[#allocation2 + $0xcc] sm:$0xf]  ;;  %v7497_v19 = vpop.f32.mrf.mxu1  ;;  %v5509_v8 = vsel %vm8804_vm2, %v5507_v51, %v5508_v32  ;;  %v5435_v40 = vld [vmem:[#allocation2 + $0x3c] sm:$0xe]  ;;  %v5133_v13 = vrot.slane %v5132_v49, 4 }
 0x23c   : > { %v5116_v21 = vshrl.u32 %v4752_v62, 16  ;;  %v5119_v22 = vshll.u32 %v4752_v62, 16  ;;  %v9938_v2 = vpop.f32.mrf.mxu0  ;;  %v9941_v56 = vadd.f32 %v9834_v20, %v7497_v19  ;;  %v5135_v20 = vshll.u32 %v9944_v0, 16 }
 0x23d   : > { %7700 = vmatmul.mubr.msk.bf16.gmra.mxu1 %vm452_vm1, %v7956_v29  ;;  %v2035_v37 = vpop.f32.mrf.mxu1  ;;  %v5513_v51 = vsel %vm8804_vm2, %v7043_v30, %v5512_v11  ;;  %v5516_v42 = vsel %vm8804_vm2, %v5514_v36, %v5515_v15  ;;  %v5519_v62 = vrot.slane %v9594_v39, 5  ;;  %v7058_v49 = vcombine.low %v5506_v38, %v5509_v8  ;;  %v5437_v30 = vld [vmem:[#allocation2 + $0x54] sm:$0xe] }
 0x23e   : > { %7739 = vmatprep.mubr.msk.bf16.mxu1 %vm452_vm1, %v7057_v54  ;;  %v5118_v24 = vrot.slane %v5116_v21, 4  ;;  %v5121_v50 = vrot.slane %v5119_v22, 5  ;;  %v9951_v35 = vpop.f32.mrf.mxu0  ;;  %v9954_v29 = vadd.f32 %v9843_v4, %v2035_v37  ;;  %v5436_v54 = vld [vmem:[#allocation2 + $0x48] sm:$0xe]  ;;  %v5137_v19 = vrot.slane %v5135_v20, 5 }
 0x23f   : > { %11073 = vst [vmem:[#allocation38_spill] sm:$0xff] %v9951_v35  ;;  %v7498_v21 = vpop.f32.mrf.mxu1  ;;  %v7044_v5 = vrot.slane %v5435_v40, 9  ;;  %v5521_v4 = vrot.slane %v5519_v62, 4  ;;  %v5522_v37 = vrot.slane %v9606_v53, 5  ;;  %v5526_v11 = vrot.slane %v9614_v60, 5 }
 0x240   : > { %v5122_v32 = vor.u32 %v5121_v50, %v5118_v24  ;;  %v9961_v22 = vpop.f32.mrf.mxu0  ;;  %v9964_v35 = vadd.f32 %v9849_v28, %v7498_v21  ;;  %v5138_v39 = vsel %vm8257_vm10, %v5133_v13, %v5137_v19  ;;  %v7059_v24 = vcombine.low %v5513_v51, %v5516_v42  ;;  %v5438_v50 = vld [vmem:[#allocation2 + $0x60] sm:$0xe] }
 0x241   : > { %v9970_v15 = vpop.f32.mrf.mxu1  ;;  %v7045_v8 = vrot.slane %v5436_v54, 9  ;;  %v5520_v28 = vsel %vm8804_vm2, %v7044_v5, %v5519_v62  ;;  %v5523_v40 = vsel %vm8804_vm2, %v5521_v4, %v5522_v37  ;;  %v5528_v53 = vrot.slane %v5526_v11, 4 }
 0x242   : > { %v5123_v36 = vrot.slane %v5122_v32, 4  ;;  %v9972_v38 = vpop.f32.mrf.mxu0  ;;  %v5529_v60 = vrot.slane %v9625_v57, 5  ;;  %v7046_v54 = vrot.slane %v5437_v30, 9  ;;  %v5533_v5 = vrot.slane %v9643_v3, 5 }
 0x243   : > { %v7537_v20 = vpop.f32.mrf.mxu1  ;;  %v5527_v51 = vsel %vm8804_vm2, %v7045_v8, %v5526_v11  ;;  %v7060_v57 = vcombine.low %v5520_v28, %v5523_v40  ;;  %v5536_v37 = vrot.slane %v9651_v12, 5  ;;  %v7047_v3 = vrot.slane %v5438_v50, 9 }
 0x244   : > { %v5128_v13 = vsel %vm8257_vm10, %v5123_v36, %v9907_v17  ;;  %v9984_v42 = vpop.f32.mrf.mxu0  ;;  %v9988_v32 = vadd.f32 %v7537_v20, %v9620_v63  ;;  %v5530_v16 = vsel %vm8804_vm2, %v5528_v53, %v5529_v60  ;;  %v5439_v17 = vld [vmem:[#allocation2 + $0x6c] sm:$0xe]  ;;  %v5535_v4 = vrot.slane %v5533_v5, 4 }
 0x245   : > { %v7024_v62 = vcombine.low %v5128_v13, %v5138_v39  ;;  %7740 = vmatmul.mubr.msk.bf16.vlgmr.msra.gmra.mxu1 %vm452_vm1, %v7058_v49  ;;  %v2639_v19 = vpop.f32.mrf.mxu1  ;;  %v5540_v11 = vrot.slane %v9666_v27, 5  ;;  %v7061_v49 = vcombine.low %v5527_v51, %v5530_v16  ;;  %v10004_v30 = vsel %vm8804_vm2, %v7046_v54, %v5533_v5  ;;  %v5441_v54 = vld [vmem:[#allocation2 + $0x84] sm:$0xe] }
 0x246   : > { %7743 = vmatprep.mubr.msk.bf16.mxu1 %vm452_vm1, %v7059_v24  ;;  %v9994_v21 = vpop.f32.mrf.mxu0  ;;  %v10000_v63 = vadd.f32 %v2639_v19, %v9641_v7  ;;  %v5547_v36 = vrot.slane %v9687_v44, 5  ;;  %v10011_v12 = vsel %vm8804_vm2, %v5535_v4, %v5536_v37  ;;  %v5543_v8 = vrot.slane %v9675_v6, 5  ;;  %v5440_v7 = vld [vmem:[#allocation2 + $0x78] sm:$0xe] }
 0x247   : > { %11074 = vst [vmem:[#allocation39_spill] sm:$0xff] %v9994_v21  ;;  %7734 = vmatmul.mubr.msk.bf16.gmra.mxu0 %vm452_vm1, %v7024_v62  ;;  %v7538_v39 = vpop.f32.mrf.mxu1  ;;  %v5542_v27 = vrot.slane %v5540_v11, 4  ;;  %v7048_v28 = vrot.slane %v5439_v17, 9  ;;  %v5550_v44 = vrot.slane %v9697_v10, 5  ;;  %v10024_v20 = vsel %vm8804_vm2, %v7047_v3, %v5540_v11  ;;  %v5442_v17 = vld [vmem:[#allocation2 + $0x90] sm:$0xe] }
 0x248   : > { %v10007_v24 = vpop.f32.mrf.mxu0  ;;  %v10015_v40 = vadd.f32 %v7538_v39, %v9649_v55  ;;  %v5549_v60 = vrot.slane %v5547_v36, 4  ;;  %v5554_v51 = vrot.slane %v9706_v43, 5  ;;  %v7049_v16 = vrot.slane %v5440_v7, 9 }
 0x249   : > { %v2642_v50 = vpop.f32.mrf.mxu1  ;;  %v5544_v6 = vsel %vm8804_vm2, %v5542_v27, %v5543_v8  ;;  %v10030_v55 = vsel %vm8804_vm2, %v7048_v28, %v5547_v36  ;;  %v5557_v43 = vrot.slane %v9714_v48, 5  ;;  %v7050_v39 = vrot.slane %v5441_v54, 9  ;;  %v11075_v27 = vld [vmem:[#allocation17_spill] sm:$0xff] }
 0x24a   : > { %v10020_v13 = vpop.f32.mrf.mxu0  ;;  %v10034_v5 = vadd.f32 %v2642_v50, %v9931_v9  ;;  %v7063_v10 = vcombine.low %v10024_v20, %v5544_v6  ;;  %v10039_v62 = vsel %vm8804_vm2, %v5549_v60, %v5550_v44  ;;  %v5556_v3 = vrot.slane %v5554_v51, 4  ;;  %v11078_v44 = vld [vmem:[#allocation8_spill] sm:$0xff] }
 0x24b   : > { %v7541_v19 = vpop.f32.mrf.mxu1  ;;  %v5561_v9 = vrot.slane %v9731_v1, 5  ;;  %v10053_v36 = vsel %vm8804_vm2, %v7049_v16, %v5554_v51  ;;  %v5568_v8 = vrot.slane %v11075_v27, 5  ;;  %v11077_v1 = vld [vmem:[#allocation13_spill] sm:$0xff]  ;;  %v11079_v51 = vld [vmem:[#allocation18_spill] sm:$0xff]  ;;  %v11080_v16 = vld [vmem:[#allocation7_spill] sm:$0xff] }
 0x24c   : > { %v10041_v4 = vpop.f32.mrf.mxu0  ;;  %v10048_v11 = vadd.f32 %v7541_v19, %v9673_v58  ;;  %v10061_v48 = vsel %vm8804_vm2, %v5556_v3, %v5557_v43  ;;  %v5564_v60 = vrot.slane %v11077_v1, 5  ;;  %v5571_v54 = vrot.slane %v11079_v51, 5  ;;  %v11081_v19 = vld [vmem:[#allocation6_spill] sm:$0xff]  ;;  %v11082_v43 = vld [vmem:[#allocation21_spill] sm:$0xff] }
 0x24d   : > { %7744 = vmatmul.mubr.msk.bf16.gmra.mxu1 %vm452_vm1, %v7060_v57  ;;  %v2655_v28 = vpop.f32.mrf.mxu1  ;;  %v5563_v58 = vrot.slane %v5561_v9, 4  ;;  %v7051_v57 = vrot.slane %v5442_v17, 9  ;;  %v7065_v20 = vcombine.low %v10053_v36, %v10061_v48  ;;  %v5570_v6 = vrot.slane %v5568_v8, 4  ;;  %v11086_v1 = vld [vmem:[#allocation30_spill] sm:$0xff] }
 0x24e   : > { %7747 = vmatprep.mubr.msk.bf16.mxu1 %vm452_vm1, %v7061_v49  ;;  %v10057_v7 = vpop.f32.mrf.mxu0  ;;  %v2770_v50 = vadd.f32 %v2655_v28, %v11078_v44  ;;  %v5443_v49 = vld [vmem:[#allocation2 + $0x9c] sm:$0xe]  ;;  %v2235_v27 = vadd.f32 %v11081_v19, %v11080_v16  ;;  %v10074_v3 = vsel %vm8804_vm2, %v7050_v39, %v5561_v9  ;;  %v5575_v36 = vrot.slane %v11082_v43, 5  ;;  %v11083_v28 = vld [vmem:[#allocation9_spill] sm:$0xff]  ;;  %v11084_v19 = vld [vmem:[#allocation24_spill] sm:$0xff] }
 0x24f   : > { %11076 = vst [vmem:[#allocation17_spill] sm:$0xff] %v10057_v7  ;;  %v7542_v37 = vpop.f32.mrf.mxu1  ;;  %v10078_v17 = vsel %vm8804_vm2, %v5563_v58, %v5564_v60  ;;  %v10086_v44 = vsel %vm8804_vm2, %v7051_v57, %v5568_v8  ;;  %v10090_v51 = vsel %vm8804_vm2, %v5570_v6, %v5571_v54  ;;  %v5445_v9 = vld [vmem:[#allocation2 + $0xb4] sm:$0xe]  ;;  %v7052_v60 = vrot.slane %v5443_v49, 9  ;;  %v11087_v49 = vld [vmem:[#allocation10_spill] sm:$0xff] }
 0x250   : > { %v10070_v53 = vpop.f32.mrf.mxu0  ;;  %v2773_v48 = vadd.f32 %v7542_v37, %v11083_v28  ;;  %v5577_v37 = vrot.slane %v5575_v36, 4  ;;  %v5578_v43 = vrot.slane %v11084_v19, 5  ;;  %v5589_v8 = vrot.slane %v11086_v1, 5  ;;  %v11089_v19 = vld [vmem:[#allocation33_spill] sm:$0xff] }
 0x251   : > { %v2658_v39 = vpop.f32.mrf.mxu1  ;;  %v10104_v6 = vsel %vm8804_vm2, %v7052_v60, %v5575_v36  ;;  %v7054_v58 = vrot.slane %v5445_v9, 9  ;;  %v11094_v1 = vcombine.low %v10030_v55, %v10039_v62  ;;  %v11095_v62 = vld [vmem:[#allocation20_spill] sm:$0xff] }
 0x252   : > { %v10092_v16 = vpop.f32.mrf.mxu0  ;;  %v10097_v28 = vadd.f32 %v2658_v39, %v2235_v27  ;;  %v10108_v54 = vsel %vm8804_vm2, %v5577_v37, %v5578_v43  ;;  %v11088_v27 = vcombine.low %v10004_v30, %v10011_v12  ;;  %v5591_v39 = vrot.slane %v5589_v8, 4  ;;  %v11090_v37 = vld [vmem:[#allocation11_spill] sm:$0xff] }
 0x253   : > { %v7545_v57 = vpop.f32.mrf.mxu1  ;;  %v10124_v43 = vsel %vm8804_vm2, %v7054_v58, %v5589_v8  ;;  %v10141_v58 = vadd.f32 %v9879_v34, %v10000_v63  ;;  %v6208_v8 = vld [vmem:[%s11008_s7] sm:$0xf] }
 0x254   : > { %11085 = vst [vmem:[#allocation13_spill] sm:$0xff] %v10097_v28  ;;  %v10100_v7 = vpop.f32.mrf.mxu0  ;;  %v2776_v21 = vadd.f32 %v7545_v57, %v11087_v49  ;;  %v5592_v28 = vrot.slane %v11089_v19, 5  ;;  %v10137_v19 = vadd.f32 %v9869_v45, %v9988_v32  ;;  %7850 = vmatprep.subr.msk.bf16.mxu1 %vm501_vm0, %v6208_v8  ;;  %v11092_v45 = vld [vmem:[#allocation15_spill] sm:$0xff]  ;;  %v10162_v32 = vadd.f32 %v9916_v31, %v10048_v11 }
 0x255   : > { %7748 = vmatmul.mubr.msk.bf16.gmra.mxu1 %vm452_vm1, %v11088_v27  ;;  %v2671_v36 = vpop.f32.mrf.mxu1  ;;  %v6217_v55 = vsel %vm501_vm0, %v6208_v8, 0  ;;  %v11098_v8 = vld [vmem:[#allocation23_spill] sm:$0xff] }
 0x256   : > { %7751 = vmatprep.mubr.msk.bf16.mxu1 %vm452_vm1, %v7063_v10  ;;  %v10119_v60 = vpop.f32.mrf.mxu0  ;;  %v2774_v9 = vadd.f32 %v2671_v36, %v11090_v37  ;;  %v10128_v30 = vsel %vm8804_vm2, %v5591_v39, %v5592_v28  ;;  %v11091_v10 = vld [vmem:[#allocation12_spill] sm:$0xff]  ;;  %v5988_v28 = vld [vmem:[%s11006_s5] sm:$0xf]  ;;  %v10153_v37 = vadd.f32 %v9890_v61, %v10015_v40  ;;  %v10170_v61 = vadd.f32 %v9938_v2, %v2773_v48 }
 0x257   : > { %v7546_v12 = vpop.f32.mrf.mxu1  ;;  %7849 = vmatprep.subr.msk.bf16.mxu0 %vm501_vm0, %v5988_v28  ;;  %v11093_v40 = vld [vmem:[#allocation16_spill] sm:$0xff]  ;;  %7806 = vmatpush3.bf16.msra.mxu1 %v6217_v55  ;;  %v11102_v55 = vcombine.low %v10074_v3, %v10078_v17  ;;  %v11107_v17 = vld [vmem:[#allocation14_spill] sm:$0xff] }
 0x258   : > { %v10130_v57 = vpop.f32.mrf.mxu0  ;;  %v2777_v27 = vadd.f32 %v7546_v12, %v11091_v10  ;;  %v10167_v10 = vadd.f32 %v9926_v25, %v2770_v50  ;;  %v10181_v31 = vadd.f32 %v9972_v38, %v2774_v9  ;;  %v6045_v50 = vsel %vm501_vm0, %v5988_v28, 0  ;;  %v11097_v9 = vld [vmem:[#allocation25_spill] sm:$0xff]  ;;  %v11106_v3 = vld [vmem:[#allocation32_spill] sm:$0xff] }
 0x259   : > { %v2674_v39 = vpop.f32.mrf.mxu1  ;;  %7772 = vmatpush3.bf16.msra.mxu0 %v6045_v50  ;;  %vm6572_vm0 = vcmask 257024  }
 0x25a   : > { %v10149_v36 = vpop.f32.mrf.mxu0  ;;  %v10158_v34 = vadd.f32 %v2674_v39, %v11092_v45  ;;  %v10178_v39 = vadd.f32 %v9961_v22, %v2776_v21  ;;  %v10187_v2 = vadd.f32 %v9984_v42, %v2777_v27  ;;  %v5582_v45 = vrot.slane %v11097_v9, 5  ;;  %v11105_v9 = vld [vmem:[#allocation27_spill] sm:$0xff] }
 0x25b   : > { %v7549_v63 = vpop.f32.mrf.mxu1 }
 0x25c   : > { %v10164_v12 = vpop.f32.mrf.mxu0  ;;  %v2780_v49 = vadd.f32 %v7549_v63, %v11093_v40 }
 0x25d   : > { %7752 = vmatmul.mubr.msk.bf16.gmra.mxu1 %vm452_vm1, %v11094_v1  ;;  %v2687_v25 = vpop.f32.mrf.mxu1 }
 0x25e   : > { %7755 = vmatprep.mubr.msk.bf16.mxu1 %vm452_vm1, %v7065_v20  ;;  %v10184_v11 = vpop.f32.mrf.mxu0  ;;  %v2778_v48 = vadd.f32 %v2687_v25, %v11095_v62  ;;  %v10193_v22 = vadd.f32 %v10007_v24, %v2780_v49  ;;  %v11096_v20 = vld [vmem:[#allocation22_spill] sm:$0xff]  ;;  %v5584_v62 = vrot.slane %v5582_v45, 4 }
 0x25f   : > { %v7550_v38 = vpop.f32.mrf.mxu1  ;;  %v11101_v25 = vld [vmem:[#allocation26_spill] sm:$0xff] }
 0x260   : > { %v10195_v21 = vpop.f32.mrf.mxu0  ;;  %v2781_v1 = vadd.f32 %v7550_v38, %v11096_v20  ;;  %v10200_v42 = vadd.f32 %v10020_v13, %v2778_v48  ;;  %v5444_v13 = vld [vmem:[#allocation2 + $0xa8] sm:$0xe]  ;;  %v11103_v48 = vcombine.low %v10086_v44, %v10090_v51  ;;  %v11104_v20 = vld [vmem:[#allocation29_spill] sm:$0xff]  ;;  %v11108_v44 = vld [vmem:[#allocation31_spill] sm:$0xff] }
 0x261   : > { %v2690_v27 = vpop.f32.mrf.mxu1 }
 0x262   : > { %v10202_v28 = vpop.f32.mrf.mxu0  ;;  %v10205_v63 = vadd.f32 %v2690_v27, %v11098_v8  ;;  %v10208_v24 = vadd.f32 %v10041_v4, %v2781_v1  ;;  %v5585_v27 = vrot.slane %v11105_v9, 5 }
 0x263   : > { %v7553_v49 = vpop.f32.mrf.mxu1 }
 0x264   : > { %11099 = vst [vmem:[#allocation8_spill] sm:$0xff] %v10205_v63  ;;  %11100 = vst [vmem:[#allocation18_spill] sm:$0xff] %v10208_v24  ;;  %v10210_v40 = vpop.f32.mrf.mxu0  ;;  %v2784_v50 = vadd.f32 %v7553_v49, %v11101_v25  ;;  %v2283_v49 = vadd.f32 %v11107_v17, %v11106_v3  ;;  %v5596_v24 = vrot.slane %v9847_v52, 5  ;;  %v11110_v52 = vcombine.low %v10104_v6, %v10108_v54  ;;  %v11111_v54 = vld [vmem:[#allocation19_spill] sm:$0xff] }
 0x265   : > { %7756 = vmatmul.mubr.msk.bf16.gmra.mxu1 %vm452_vm1, %v11102_v55  ;;  %v2703_v38 = vpop.f32.mrf.mxu1  ;;  %v7053_v55 = vrot.slane %v5444_v13, 9 }
 0x266   : > { %7759 = vmatprep.mubr.msk.bf16.mxu1 %vm452_vm1, %v11103_v48  ;;  %v10221_v4 = vpop.f32.mrf.mxu0  ;;  %v2782_v1 = vadd.f32 %v2703_v38, %v11104_v20  ;;  %v10226_v8 = vadd.f32 %v10070_v53, %v2784_v50  ;;  %v5586_v48 = vsel %vm8804_vm2, %v5584_v62, %v5585_v27  ;;  %v11109_v62 = vld [vmem:[#allocation34_spill] sm:$0xff] }
 0x267   : > { %v7554_v25 = vpop.f32.mrf.mxu1  ;;  %v5583_v9 = vsel %vm8804_vm2, %v7053_v55, %v5582_v45  ;;  %v5603_v55 = vrot.slane %v9881_v23, 5 }
 0x268   : > { %v10230_v63 = vpop.f32.mrf.mxu0  ;;  %v2785_v51 = vadd.f32 %v7554_v25, %v11108_v44  ;;  %v10237_v38 = vadd.f32 %v10092_v16, %v2782_v1  ;;  %v7069_v17 = vcombine.low %v5583_v9, %v5586_v48  ;;  %v5598_v16 = vrot.slane %v5596_v24, 4  ;;  %v5447_v48 = vld [vmem:[#allocation2 + $0xcc] sm:$0xe] }
 0x269   : > { %v2706_v20 = vpop.f32.mrf.mxu1  ;;  %v11112_v9 = vld [vmem:[#allocation36_spill] sm:$0xff] }
 0x26a   : > { %v10239_v53 = vpop.f32.mrf.mxu0  ;;  %v2783_v50 = vadd.f32 %v2706_v20, %v2283_v49  ;;  %v10244_v13 = vadd.f32 %v10100_v7, %v2785_v51  ;;  %v5446_v7 = vld [vmem:[#allocation2 + $0xc0] sm:$0xe]  ;;  %v5599_v51 = vrot.slane %v9863_v47, 5 }
 0x26b   : > { %v7557_v3 = vpop.f32.mrf.mxu1 }
 0x26c   : > { %v10246_v25 = vpop.f32.mrf.mxu0  ;;  %v2788_v27 = vadd.f32 %v7557_v3, %v11109_v62  ;;  %v10254_v1 = vadd.f32 %v10119_v60, %v2783_v50  ;;  %v2299_v60 = vadd.f32 %v11111_v54, %v9867_v59  ;;  %v5600_v23 = vsel %vm8804_vm2, %v5598_v16, %v5599_v51 }
 0x26d   : > { %7760 = vmatmul.mubr.msk.bf16.gmra.mxu1 %vm452_vm1, %v11110_v52  ;;  %v2719_v45 = vpop.f32.mrf.mxu1  ;;  %v7056_v62 = vrot.slane %v5447_v48, 9  ;;  %v5605_v52 = vrot.slane %v5603_v55, 4 }
 0x26e   : > { %7763 = vmatprep.mubr.msk.bf16.mxu1 %vm452_vm1, %v7069_v17  ;;  %v10257_v49 = vpop.f32.mrf.mxu0  ;;  %v2786_v44 = vadd.f32 %v2719_v45, %v9873_v14  ;;  %v10263_v6 = vadd.f32 %v10130_v57, %v2788_v27  ;;  %v7055_v17 = vrot.slane %v5446_v7, 9  ;;  %v5606_v57 = vrot.slane %v9944_v0, 5 }
 0x26f   : > { %v7558_v20 = vpop.f32.mrf.mxu1 }
 0x270   : > { %v10267_v50 = vpop.f32.mrf.mxu0  ;;  %v2789_v3 = vadd.f32 %v7558_v20, %v11112_v9  ;;  %v10273_v14 = vadd.f32 %v10149_v36, %v2786_v44  ;;  %v5597_v45 = vsel %vm8804_vm2, %v7055_v17, %v5596_v24  ;;  %v11113_v44 = vcombine.low %v10124_v43, %v10128_v30 }
 0x271   : > { %v2722_v47 = vpop.f32.mrf.mxu1  ;;  %v7071_v20 = vcombine.low %v5597_v45, %v5600_v23  ;;  %v5607_v51 = vsel %vm8804_vm2, %v5605_v52, %v5606_v57 }
 0x272   : > { %v10276_v27 = vpop.f32.mrf.mxu0  ;;  %v2787_v59 = vadd.f32 %v2722_v47, %v2299_v60  ;;  %v10281_v54 = vadd.f32 %v10164_v12, %v2789_v3  ;;  %v5604_v12 = vsel %vm8804_vm2, %v7056_v62, %v5603_v55 }
 0x273   : > { %v7072_v17 = vcombine.low %v5604_v12, %v5607_v51 }
 0x274   : > { %v7561_v7 = vpop.f32.mrf.mxu1  ;;  %v10283_v16 = vpop.f32.mrf.mxu0  ;;  %v10291_v0 = vadd.f32 %v10184_v11, %v2787_v59  ;;  %v11114_v11 = vld [vmem:[#allocation28_spill] sm:$0xff] }
 0x275   : > { %v2792_v36 = vadd.f32 %v7561_v7, %v9893_v41  ;;  %7764 = vmatmul.mubr.msk.bf16.gmra.mxu1 %vm452_vm1, %v11113_v44  ;;  %v2315_v9 = vadd.f32 %v11114_v11, %v9922_v18  ;;  %v7967_v11 = vld [vmem:[%s8155_s27 + $0x10] sm:$0xff]  }
 0x276   : > { %7767 = vmatprep.mubr.msk.bf16.mxu1 %vm452_vm1, %v7071_v20  ;;  %v2735_v24 = vpop.f32.mrf.mxu1  ;;  %v10298_v48 = vpop.f32.mrf.mxu0 }
 0x277   : > { %v2790_v41 = vadd.f32 %v2735_v24, %v9905_v26  ;;  %v10302_v43 = vadd.f32 %v10195_v21, %v2792_v36 }
 0x278   : > { %v7562_v30 = vpop.f32.mrf.mxu1  ;;  %v7643_v60 = vpop.f32.mrf.mxu0 }
 0x279   : > { %v2793_v3 = vadd.f32 %v7562_v30, %v9920_v33  ;;  %v10308_v55 = vadd.f32 %v10202_v28, %v2790_v41  ;;  %v7965_v28 = vld [vmem:[%s8155_s27] sm:$0xff]  }
 0x27a   : > { %v2738_v46 = vpop.f32.mrf.mxu1  ;;  %v4206_v23 = vpop.f32.mrf.mxu0 }
 0x27b   : > { %v2791_v47 = vadd.f32 %v2738_v46, %v2315_v9  ;;  %v10311_v26 = vadd.f32 %v10210_v40, %v2793_v3 }
 0x27c   : > { %v10313_v62 = vpop.f32.mrf.mxu0 }
 0x27d   : > { %v7565_v21 = vpop.f32.mrf.mxu1  ;;  %7768 = vmatmul.mubr.msk.bf16.gmra.mxu1 %vm452_vm1, %v7072_v17  ;;  %v10318_v18 = vadd.f32 %v10221_v4, %v2791_v47  ;;  %v11116_v17 = vld [vmem:[#allocation37_spill] sm:$0xff] }
 0x27e   : > { %v2796_v52 = vadd.f32 %v7565_v21, %v9941_v56  ;;  %v10320_v57 = vpop.f32.mrf.mxu0  ;;  %7807 = vmatprep.mubr.msk.bf16.mxu1 %vm452_vm1, %v7965_v28  ;;  %v11115_v56 = vld [vmem:[#allocation35_spill] sm:$0xff]  ;;  %v3124_v46 = vadd.f32 %v11116_v17, %v10034_v5 }
 0x27f   : > { %v2751_v33 = vpop.f32.mrf.mxu1  ;;  %v2331_v20 = vadd.f32 %v11115_v56, %v9970_v15  ;;  %v7966_v15 = vld [vmem:[%s8155_s27 + $0x8] sm:$0xff]   ;;  %v7969_v5 = vld [vmem:[%s8155_s27 + $0x20] sm:$0xff]  }
 0x280   : > { %v2794_v40 = vadd.f32 %v2751_v33, %v9954_v29  ;;  %v10326_v59 = vadd.f32 %v10230_v63, %v2796_v52  ;;  %v7647_v7 = vpop.f32.mrf.mxu0 }
 0x281   : > { %v7566_v45 = vpop.f32.mrf.mxu1 }
 0x282   : > { %v2797_v4 = vadd.f32 %v7566_v45, %v9964_v35  ;;  %v10332_v36 = vadd.f32 %v10239_v53, %v2794_v40  ;;  %v4222_v24 = vpop.f32.mrf.mxu0  ;;  %v7968_v40 = vld [vmem:[%s8155_s27 + $0x18] sm:$0xff]  }
 0x283   : > { %v2754_v44 = vpop.f32.mrf.mxu1 }
 0x284   : > { %v2795_v12 = vadd.f32 %v2754_v44, %v2331_v20  ;;  %v10335_v51 = vadd.f32 %v10246_v25, %v2797_v4  ;;  %v10337_v63 = vpop.f32.mrf.mxu0 }
 0x285   : > { %v7605_v29 = vpop.f32.mrf.mxu1  ;;  %7808 = vmatmul.mubr.msk.bf16.vlgmr.msra.gmra.mxu1 %vm452_vm1, %v7966_v15 }
 0x286   : > { %v3850_v41 = vadd.f32 %v7605_v29, %v10137_v19  ;;  %v10341_v30 = vadd.f32 %v10257_v49, %v2795_v12  ;;  %v10345_v53 = vpop.f32.mrf.mxu0  ;;  %7811 = vmatprep.mubr.msk.bf16.mxu1 %vm452_vm1, %v7967_v11  ;;  %v11118_v12 = vld [vmem:[#allocation38_spill] sm:$0xff] }
 0x287   : > { %v3721_v35 = vpop.f32.mrf.mxu1 }
 0x288   : > { %v3848_v25 = vadd.f32 %v3721_v35, %v10141_v58  ;;  %v10351_v9 = vadd.f32 %v10267_v50, %v3850_v41  ;;  %v7651_v3 = vpop.f32.mrf.mxu0 }
 0x289   : > { %v7606_v19 = vpop.f32.mrf.mxu1 }
 0x28a   : > { %v10354_v49 = vadd.f32 %v7606_v19, %v10153_v37  ;;  %v10359_v47 = vadd.f32 %v10276_v27, %v3848_v25  ;;  %v4238_v52 = vpop.f32.mrf.mxu0 }
 0x28b   : > { %v3724_v21 = vpop.f32.mrf.mxu1 }
 0x28c   : > { %v10361_v33 = vadd.f32 %v3724_v21, %v3124_v46  ;;  %v10363_v28 = vpop.f32.mrf.mxu0  ;;  %v7971_v46 = vld [vmem:[%s8155_s27 + $0x30] sm:$0xff]  }
 0x28d   : > { %v7609_v58 = vpop.f32.mrf.mxu1  ;;  %7812 = vmatmul.mubr.msk.bf16.gmra.mxu1 %vm452_vm1, %v7968_v40 }
 0x28e   : > { %v3854_v50 = vadd.f32 %v7609_v58, %v10162_v32  ;;  %v10368_v45 = vpop.f32.mrf.mxu0  ;;  %7815 = vmatprep.mubr.msk.bf16.mxu1 %vm452_vm1, %v7969_v5  ;;  %v11117_v32 = vld [vmem:[#allocation13_spill] sm:$0xff] }
 0x28f   : > { %v3737_v37 = vpop.f32.mrf.mxu1  ;;  %v3128_v29 = vadd.f32 %v11118_v12, %v11117_v32 }
 0x290   : > { %v3852_v27 = vadd.f32 %v3737_v37, %v10167_v10  ;;  %v10373_v56 = vadd.f32 %v7643_v60, %v3854_v50  ;;  %v7655_v4 = vpop.f32.mrf.mxu0  ;;  %v7970_v60 = vld [vmem:[%s8155_s27 + $0x28] sm:$0xff]  }
 0x291   : > { %v7610_v20 = vpop.f32.mrf.mxu1 }
 0x292   : > { %v10376_v44 = vadd.f32 %v7610_v20, %v10170_v61  ;;  %v10380_v41 = vadd.f32 %v4206_v23, %v3852_v27  ;;  %v4254_v35 = vpop.f32.mrf.mxu0 }
 0x293   : > { %v3740_v15 = vpop.f32.mrf.mxu1 }
 0x294   : > { %v10382_v11 = vadd.f32 %v3740_v15, %v3128_v29  ;;  %v10384_v19 = vpop.f32.mrf.mxu0  ;;  %v7973_v15 = vld [vmem:[%s8155_s27 + $0x40] sm:$0xff]  }
 0x295   : > { %v7613_v25 = vpop.f32.mrf.mxu1  ;;  %7816 = vmatmul.mubr.msk.bf16.gmra.mxu1 %vm452_vm1, %v7970_v60 }
 0x296   : > { %v3858_v10 = vadd.f32 %v7613_v25, %v10178_v39  ;;  %v10389_v61 = vpop.f32.mrf.mxu0  ;;  %7819 = vmatprep.mubr.msk.bf16.mxu1 %vm452_vm1, %v7971_v46  ;;  %v11120_v39 = vld [vmem:[#allocation39_spill] sm:$0xff] }
 0x297   : > { %v3753_v17 = vpop.f32.mrf.mxu1  ;;  %11119 = vst [vmem:[#allocation7_spill] sm:$0xff] %v10389_v61  ;;  %v3132_v37 = vadd.f32 %v11120_v39, %v10158_v34 }
 0x298   : > { %v3856_v23 = vadd.f32 %v3753_v17, %v10181_v31  ;;  %v10394_v21 = vadd.f32 %v7647_v7, %v3858_v10  ;;  %v7659_v50 = vpop.f32.mrf.mxu0  ;;  %v7972_v7 = vld [vmem:[%s8155_s27 + $0x38] sm:$0xff]   ;;  %v11124_v17 = vld [vmem:[#allocation17_spill] sm:$0xff] }
 0x299   : > { %v7614_v58 = vpop.f32.mrf.mxu1  ;;  %v11122_v10 = vld [vmem:[#allocation18_spill] sm:$0xff] }
 0x29a   : > { %v10397_v40 = vadd.f32 %v7614_v58, %v10187_v2  ;;  %v10401_v5 = vadd.f32 %v4222_v24, %v3856_v23  ;;  %v4270_v20 = vpop.f32.mrf.mxu0 }
 0x29b   : > { %v3756_v27 = vpop.f32.mrf.mxu1 }
 0x29c   : > { %v10403_v32 = vadd.f32 %v3756_v27, %v3132_v37  ;;  %v10406_v29 = vpop.f32.mrf.mxu0 }
 0x29d   : > { %v7617_v12 = vpop.f32.mrf.mxu1  ;;  %11121 = vst [vmem:[#allocation6_spill] sm:$0xff] %v10406_v29  ;;  %7820 = vmatmul.mubr.msk.bf16.gmra.mxu1 %vm452_vm1, %v7972_v7  ;;  %v7975_v7 = vld [vmem:[%s8155_s27 + $0x50] sm:$0xff]  }
 0x29e   : > { %v3862_v31 = vadd.f32 %v7617_v12, %v10193_v22  ;;  %7823 = vmatprep.mubr.msk.bf16.mxu1 %vm452_vm1, %v7973_v15  ;;  %v11123_v22 = vld [vmem:[#allocation8_spill] sm:$0xff]  ;;  %v10420_v23 = vpop.f32.mrf.mxu0 }
 0x29f   : > { %v3769_v2 = vpop.f32.mrf.mxu1  ;;  %v3136_v46 = vadd.f32 %v11124_v17, %v11123_v22  ;;  %11125 = vst [vmem:[#allocation21_spill] sm:$0xff] %v10420_v23 }
 0x2a0   : > { %v3860_v34 = vadd.f32 %v3769_v2, %v10200_v42  ;;  %v10413_v24 = vadd.f32 %v7651_v3, %v3862_v31  ;;  %v7663_v42 = vpop.f32.mrf.mxu0  ;;  %v7974_v3 = vld [vmem:[%s8155_s27 + $0x48] sm:$0xff]  }
 0x2a1   : > { %v7618_v25 = vpop.f32.mrf.mxu1 }
 0x2a2   : > { %v10416_v60 = vadd.f32 %v7618_v25, %v11122_v10  ;;  %v10422_v58 = vadd.f32 %v4238_v52, %v3860_v34  ;;  %v4286_v25 = vpop.f32.mrf.mxu0 }
 0x2a3   : > { %v3772_v39 = vpop.f32.mrf.mxu1 }
 0x2a4   : > { %v10424_v37 = vadd.f32 %v3772_v39, %v3136_v46  ;;  %v10443_v39 = vpop.f32.mrf.mxu0 }
 0x2a5   : > { %v7621_v27 = vpop.f32.mrf.mxu1  ;;  %7824 = vmatmul.mubr.msk.bf16.gmra.mxu1 %vm452_vm1, %v7974_v3  ;;  %11126 = vst [vmem:[#allocation9_spill] sm:$0xff] %v10443_v39 }
 0x2a6   : > { %v3866_v12 = vadd.f32 %v7621_v27, %v10226_v8  ;;  %7827 = vmatprep.mubr.msk.bf16.mxu1 %vm452_vm1, %v7975_v7  ;;  %v7976_v27 = vld [vmem:[%s8155_s27 + $0x58] sm:$0xff]  }
 0x2a7   : > { %v3785_v31 = vpop.f32.mrf.mxu1 }
 0x2a8   : > { %v3864_v2 = vadd.f32 %v3785_v31, %v10237_v38  ;;  %v10432_v52 = vadd.f32 %v7655_v4, %v3866_v12  ;;  %v7977_v4 = vld [vmem:[%s8155_s27 + $0x60] sm:$0xff]  }
 0x2a9   : > { %v7622_v15 = vpop.f32.mrf.mxu1 }
 0x2aa   : > { %v10435_v34 = vadd.f32 %v7622_v15, %v10244_v13  ;;  %v10437_v8 = vadd.f32 %v4254_v35, %v3864_v2 }
 0x2ab   : > { %v3788_v10 = vpop.f32.mrf.mxu1 }
 0x2ac   : > { %v10440_v22 = vadd.f32 %v3788_v10, %v10254_v1 }
 0x2ad   : > { %v7625_v17 = vpop.f32.mrf.mxu1  ;;  %7828 = vmatmul.mubr.msk.bf16.gmra.mxu1 %vm452_vm1, %v7976_v27 }
 0x2ae   : > { %v3870_v46 = vadd.f32 %v7625_v17, %v10263_v6  ;;  %7831 = vmatprep.mubr.msk.bf16.mxu1 %vm452_vm1, %v7977_v4  ;;  %v10455_v6 = vpop.f32.mrf.mxu0  ;;  %v7979_v17 = vld [vmem:[%s8155_s27 + $0x70] sm:$0xff]  }
 0x2af   : > { %v3801_v38 = vpop.f32.mrf.mxu1  ;;  %11128 = vst [vmem:[#allocation30_spill] sm:$0xff] %v10455_v6 }
 0x2b0   : > { %v3868_v13 = vadd.f32 %v3801_v38, %v10273_v14  ;;  %v10450_v35 = vadd.f32 %v7659_v50, %v3870_v46  ;;  %v7667_v15 = vpop.f32.mrf.mxu0  ;;  %v7978_v14 = vld [vmem:[%s8155_s27 + $0x68] sm:$0xff]  }
 0x2b1   : > { %v7626_v1 = vpop.f32.mrf.mxu1 }
 0x2b2   : > { %v10453_v12 = vadd.f32 %v7626_v1, %v10281_v54  ;;  %v10457_v3 = vadd.f32 %v4270_v20, %v3868_v13  ;;  %v4302_v27 = vpop.f32.mrf.mxu0 }
 0x2b3   : > { %v3804_v31 = vpop.f32.mrf.mxu1 }
 0x2b4   : > { %11127 = vst [vmem:[#allocation24_spill] sm:$0xff] %v10453_v12  ;;  %v10460_v7 = vadd.f32 %v3804_v31, %v10291_v0  ;;  %v10478_v13 = vpop.f32.mrf.mxu0  ;;  %v7980_v31 = vld [vmem:[%s8155_s27 + $0x78] sm:$0xff]  }
 0x2b5   : > { %v7629_v2 = vpop.f32.mrf.mxu1  ;;  %7832 = vmatmul.mubr.msk.bf16.gmra.mxu1 %vm452_vm1, %v7978_v14  ;;  %11132 = vst [vmem:[#allocation12_spill] sm:$0xff] %v10478_v13 }
 0x2b6   : > { %11129 = vst [vmem:[#allocation10_spill] sm:$0xff] %v10460_v7  ;;  %v3874_v10 = vadd.f32 %v7629_v2, %v10302_v43  ;;  %7835 = vmatprep.mubr.msk.bf16.mxu1 %vm452_vm1, %v7979_v17 }
 0x2b7   : > { %v3817_v50 = vpop.f32.mrf.mxu1 }
 0x2b8   : > { %v3872_v54 = vadd.f32 %v3817_v50, %v10308_v55  ;;  %v10468_v20 = vadd.f32 %v7663_v42, %v3874_v10 }
 0x2b9   : > { %v7630_v46 = vpop.f32.mrf.mxu1 }
 0x2ba   : > { %v10471_v0 = vadd.f32 %v7630_v46, %v10311_v26  ;;  %v10473_v38 = vadd.f32 %v4286_v25, %v3872_v54  ;;  %v10486_v26 = vpop.f32.mrf.mxu0 }
 0x2bb   : > { %v3820_v43 = vpop.f32.mrf.mxu1  ;;  %11133 = vst [vmem:[#allocation15_spill] sm:$0xff] %v10486_v26 }
 0x2bc   : > { %11130 = vst [vmem:[#allocation33_spill] sm:$0xff] %v10471_v0  ;;  %v10476_v4 = vadd.f32 %v3820_v43, %v10318_v18  ;;  %v10496_v54 = vpop.f32.mrf.mxu0 }
 0x2bd   : > { %v7633_v1 = vpop.f32.mrf.mxu1  ;;  %7836 = vmatmul.mubr.msk.bf16.gmra.mxu1 %vm452_vm1, %v7980_v31 }
 0x2be   : > { %11131 = vst [vmem:[#allocation11_spill] sm:$0xff] %v10476_v4  ;;  %v3878_v55 = vadd.f32 %v7633_v1, %v10326_v59  ;;  %v10504_v43 = vpop.f32.mrf.mxu0 }
 0x2bf   : > { %v3833_v42 = vpop.f32.mrf.mxu1 }
 0x2c0   : > { %v3876_v2 = vadd.f32 %v3833_v42, %v10332_v36  ;;  %v10484_v10 = vadd.f32 %v7667_v15, %v3878_v55 }
 0x2c1   : > { %v7634_v25 = vpop.f32.mrf.mxu1 }
 0x2c2   : > { %v10489_v14 = vadd.f32 %v7634_v25, %v10335_v51  ;;  %v10491_v18 = vadd.f32 %v4302_v27, %v3876_v2  ;;  %v10508_v27 = vpop.f32.mrf.mxu0 }
 0x2c3   : > { %v3836_v50 = vpop.f32.mrf.mxu1 }
 0x2c4   : > { %11134 = vst [vmem:[#allocation16_spill] sm:$0xff] %v10489_v14  ;;  %v10494_v17 = vadd.f32 %v3836_v50, %v10341_v30 }
 0x2c5   : > { %v7673_v59 = vpop.f32.mrf.mxu1 }
 0x2c6   : > { %11135 = vst [vmem:[#allocation20_spill] sm:$0xff] %v10494_v17  ;;  %v10499_v46 = vadd.f32 %v7673_v59, %v10351_v9  ;;  %v10516_v9 = vpop.f32.mrf.mxu0 }
 0x2c7   : > { %v4548_v36 = vpop.f32.mrf.mxu1 }
 0x2c8   : > { %v10502_v15 = vadd.f32 %v4548_v36, %v10359_v47  ;;  %v10522_v25 = vpop.f32.mrf.mxu0 }
 0x2c9   : > { %v7674_v51 = vpop.f32.mrf.mxu1 }
 0x2cb   : > { %v10506_v1 = vpop.f32.mrf.mxu1 }
 0x2cd   : > { %v7677_v31 = vpop.f32.mrf.mxu1 }
 0x2ce   : > { %v10511_v30 = vadd.f32 %v7677_v31, %v10373_v56  ;;  %v10530_v31 = vpop.f32.mrf.mxu0 }
 0x2cf   : > { %v4564_v55 = vpop.f32.mrf.mxu1 }
 0x2d0   : > { %v10514_v42 = vadd.f32 %v4564_v55, %v10380_v41  ;;  %v10536_v26 = vpop.f32.mrf.mxu0 }
 0x2d1   : > { %v10518_v2 = vpop.f32.mrf.mxu1 }
 0x2d3   : > { %v10520_v47 = vpop.f32.mrf.mxu1 }
 0x2d5   : > { %v7681_v50 = vpop.f32.mrf.mxu1 }
 0x2d6   : > { %v10525_v59 = vadd.f32 %v7681_v50, %v10394_v21  ;;  %v10544_v50 = vpop.f32.mrf.mxu0 }
 0x2d7   : > { %v4580_v36 = vpop.f32.mrf.mxu1 }
 0x2d8   : > { %v10528_v56 = vadd.f32 %v4580_v36, %v10401_v5  ;;  %v10550_v6 = vpop.f32.mrf.mxu0 }
 0x2d9   : > { %v10532_v41 = vpop.f32.mrf.mxu1 }
 0x2db   : > { %v10534_v55 = vpop.f32.mrf.mxu1 }
 0x2dd   : > { %v7685_v17 = vpop.f32.mrf.mxu1 }
 0x2de   : > { %v10539_v13 = vadd.f32 %v7685_v17, %v10413_v24  ;;  %v10558_v17 = vpop.f32.mrf.mxu0 }
 0x2df   : > { %v4596_v14 = vpop.f32.mrf.mxu1 }
 0x2e0   : > { %v10542_v21 = vadd.f32 %v4596_v14, %v10422_v58  ;;  %v10564_v23 = vpop.f32.mrf.mxu0 }
 0x2e1   : > { %v10546_v5 = vpop.f32.mrf.mxu1 }
 0x2e3   : > { %v10548_v36 = vpop.f32.mrf.mxu1 }
 0x2e5   : > { %v7689_v4 = vpop.f32.mrf.mxu1 }
 0x2e6   : > { %v10553_v39 = vadd.f32 %v7689_v4, %v10432_v52  ;;  %v10572_v4 = vpop.f32.mrf.mxu0 }
 0x2e7   : > { %v4612_v0 = vpop.f32.mrf.mxu1 }
 0x2e8   : > { %11136 = vst [vmem:[#allocation22_spill] sm:$0xff] %v10553_v39  ;;  %v10556_v24 = vadd.f32 %v4612_v0, %v10437_v8 }
 0x2e9   : > { %v10560_v58 = vpop.f32.mrf.mxu1 }
 0x2ea   : > { %11137 = vst [vmem:[#allocation25_spill] sm:$0xff] %v10556_v24  ;;  %v10578_v24 = vpop.f32.mrf.mxu0 }
 0x2eb   : > { %v10562_v14 = vpop.f32.mrf.mxu1 }
 0x2ec   : > { %11138 = vst [vmem:[#allocation23_spill] sm:$0xff] %v10562_v14 }
 0x2ed   : > { %v7693_v7 = vpop.f32.mrf.mxu1 }
 0x2ee   : > { %v10567_v29 = vadd.f32 %v7693_v7, %v10450_v35  ;;  %v10586_v7 = vpop.f32.mrf.mxu0 }
 0x2ef   : > { %v4628_v12 = vpop.f32.mrf.mxu1 }
 0x2f0   : > { %11139 = vst [vmem:[#allocation26_spill] sm:$0xff] %v10567_v29  ;;  %v10570_v52 = vadd.f32 %v4628_v12, %v10457_v3 }
 0x2f1   : > { %v10574_v8 = vpop.f32.mrf.mxu1 }
 0x2f2   : > { %11140 = vst [vmem:[#allocation29_spill] sm:$0xff] %v10570_v52  ;;  %11141 = vst [vmem:[#allocation27_spill] sm:$0xff] %v10574_v8  ;;  %v10592_v52 = vpop.f32.mrf.mxu0 }
 0x2f3   : > { %v10576_v0 = vpop.f32.mrf.mxu1 }
 0x2f4   : > { %11142 = vst [vmem:[#allocation32_spill] sm:$0xff] %v10576_v0 }
 0x2f5   : > { %v7697_v39 = vpop.f32.mrf.mxu1 }
 0x2f6   : > { %v10581_v14 = vadd.f32 %v7697_v39, %v10468_v20  ;;  %v10600_v20 = vpop.f32.mrf.mxu0 }
 0x2f7   : > { %v4644_v61 = vpop.f32.mrf.mxu1 }
 0x2f8   : > { %11143 = vst [vmem:[#allocation14_spill] sm:$0xff] %v10581_v14  ;;  %v10584_v35 = vadd.f32 %v4644_v61, %v10473_v38  ;;  %v4320_v38 = vadd.f32 %v10283_v16, %v10354_v49  ;;  %v4318_v14 = vadd.f32 %v10298_v48, %v10361_v33  ;;  %v10620_v16 = vld [vmem:[%s11005_s4] ss:$0 sm:$0xff]  ;;  %v4324_v33 = vadd.f32 %v10313_v62, %v10376_v44 }
 0x2f9   : > { %v10588_v12 = vpop.f32.mrf.mxu1  ;;  %v5406_v62 = vadd.f32 %v10522_v25, %v10511_v30 }
 0x2fa   : > { %11144 = vst [vmem:[#allocation31_spill] sm:$0xff] %v10584_v35 }
 0x2fb   : > { %v10590_v3 = vpop.f32.mrf.mxu1 }
 0x2fc   : > { %11145 = vst [vmem:[#allocation34_spill] sm:$0xff] %v10590_v3  ;;  %v4678_v3 = vadd.f32 %v7674_v51, %v4320_v38  ;;  %v4322_v38 = vadd.f32 %v10320_v57, %v10382_v11 }
 0x2fd   : > { %v7701_v29 = vpop.f32.mrf.mxu1 }
 0x2fe   : > { %v10595_v0 = vadd.f32 %v7701_v29, %v10484_v10  ;;  %v5402_v29 = vadd.f32 %v10496_v54, %v10499_v46  ;;  %v10612_v10 = vpop.f32.mrf.mxu0  ;;  %v5403_v48 = vadd.f32 %v10508_v27, %v4678_v3  ;;  %v4680_v44 = vadd.f32 %v10520_v47, %v4322_v38 }
 0x2ff   : > { %v4660_v8 = vpop.f32.mrf.mxu1  ;;  %v4328_v47 = vadd.f32 %v10337_v63, %v10397_v40  ;;  %v5410_v40 = vadd.f32 %v10550_v6, %v10525_v59 }
 0x300   : > { %11146 = vst [vmem:[#allocation19_spill] sm:$0xff] %v10595_v0  ;;  %v10598_v39 = vadd.f32 %v4660_v8, %v10491_v18  ;;  %v4676_v8 = vadd.f32 %v10506_v1, %v4318_v14  ;;  %v5400_v0 = vadd.f32 %v10504_v43, %v10502_v15  ;;  %v10625_v54 = vpop.f32.mrf.mxu0  ;;  %v4682_v43 = vadd.f32 %v10518_v2, %v4324_v33 }
 0x301   : > { %v10602_v61 = vpop.f32.mrf.mxu1  ;;  %v4686_v38 = vadd.f32 %v10532_v41, %v4328_v47 }
 0x302   : > { %11147 = vst [vmem:[#allocation36_spill] sm:$0xff] %v10598_v39  ;;  %v5401_v15 = vadd.f32 %v10516_v9, %v4676_v8  ;;  %v5404_v9 = vadd.f32 %v10530_v31, %v10514_v42 }
 0x303   : > { %v10606_v35 = vpop.f32.mrf.mxu1 }
 0x305   : > { %v7741_v18 = vpop.f32.mrf.mxu1 }
 0x306   : > { %v5871_v39 = vadd.f32 %v7741_v18, %v5402_v29 }
 0x307   : > { %v5742_v49 = vpop.f32.mrf.mxu1 }
 0x308   : > { %v5869_v51 = vadd.f32 %v5742_v49, %v5400_v0  ;;  %v5910_v1 = vadd.f32 %v10620_v16, %v5871_v39  ;;  %v10637_v39 = vpop.f32.mrf.mxu0 }
 0x309   : > { %v7742_v46 = vpop.f32.mrf.mxu1 }
 0x30a   : > { %v5872_v14 = vadd.f32 %v7742_v46, %v5403_v48  ;;  %v5908_v0 = vadd.f32 %v10620_v16, %v5869_v51  ;;  %v5942_v2 = vmax.f32 %v5910_v1, 0.0  ;;  %v5407_v51 = vadd.f32 %v10536_v26, %v4682_v43  ;;  %v10645_v25 = vpop.f32.mrf.mxu0 }
 0x30b   : > { %v5745_v29 = vpop.f32.mrf.mxu1  ;;  %v5405_v1 = vadd.f32 %v10544_v50, %v4680_v44  ;;  %v4326_v26 = vadd.f32 %v10345_v53, %v10403_v32  ;;  %v5408_v53 = vadd.f32 %v10558_v17, %v10528_v56 }
 0x30c   : > { %v5911_v27 = vadd.f32 %v10620_v16, %v5872_v14  ;;  %v5870_v3 = vadd.f32 %v5745_v29, %v5401_v15  ;;  %v5940_v48 = vmax.f32 %v5908_v0, 0.0 }
 0x30d   : > { %v7745_v18 = vpop.f32.mrf.mxu1 }
 0x30e   : > { %v5943_v8 = vmax.f32 %v5911_v27, 0.0  ;;  %v5909_v57 = vadd.f32 %v10620_v16, %v5870_v3  ;;  %v5875_v11 = vadd.f32 %v7745_v18, %v5406_v62  ;;  %v4684_v27 = vadd.f32 %v10534_v55, %v4326_v26  ;;  %v10658_v3 = vpop.f32.mrf.mxu0 }
 0x30f   : > { %v5758_v49 = vpop.f32.mrf.mxu1  ;;  %v4336_v26 = vadd.f32 %v10384_v19, %v10435_v34  ;;  %v11149_v34 = vld [vmem:[#allocation22_spill] sm:$0xff] }
 0x310   : > { %v5973_v33 = vpack.c.bf16 %v5943_v8, %v5942_v2  ;;  %v5941_v46 = vmax.f32 %v5909_v57, 0.0  ;;  %v5873_v30 = vadd.f32 %v5758_v49, %v5404_v9  ;;  %v5914_v42 = vadd.f32 %v10620_v16, %v5875_v11  ;;  %v10667_v57 = vpop.f32.mrf.mxu0 }
 0x311   : > { %v7746_v14 = vpop.f32.mrf.mxu1  ;;  %v5411_v9 = vadd.f32 %v10564_v23, %v4686_v38  ;;  %v4332_v8 = vadd.f32 %v10363_v28, %v10416_v60  ;;  %v4330_v23 = vadd.f32 %v10368_v45, %v10424_v37  ;;  %v5414_v60 = vadd.f32 %v10578_v24, %v10539_v13 }
 0x312   : > { %v5972_v15 = vpack.c.bf16 %v5941_v46, %v5940_v48  ;;  %v5876_v31 = vadd.f32 %v7746_v14, %v5407_v51  ;;  %v5912_v29 = vadd.f32 %v10620_v16, %v5873_v30  ;;  %v5946_v32 = vmax.f32 %v5914_v42, 0.0  ;;  %v10680_v14 = vpop.f32.mrf.mxu0 }
 0x313   : > { %v5761_v43 = vpop.f32.mrf.mxu1  ;;  %v5409_v51 = vadd.f32 %v10572_v4, %v4684_v27  ;;  %v4690_v48 = vadd.f32 %v10546_v5, %v4332_v8  ;;  %v4688_v47 = vadd.f32 %v10548_v36, %v4330_v23  ;;  %v5412_v45 = vadd.f32 %v10586_v7, %v10542_v21 }
 0x314   : > { %v5915_v0 = vadd.f32 %v10620_v16, %v5876_v31  ;;  %v5874_v63 = vadd.f32 %v5761_v43, %v5405_v1  ;;  %7773 = vmatprep.mubr.msk.bf16.mxu0 %vm452_vm1, %v5972_v15  ;;  %v5944_v2 = vmax.f32 %v5912_v29, 0.0  ;;  %v10689_v43 = vpop.f32.mrf.mxu0 }
 0x315   : > { %v7749_v50 = vpop.f32.mrf.mxu1  ;;  %7774 = vmatmul.mubr.msk.bf16.vlgmr.msra.gmra.mxu0 %vm452_vm1, %v5973_v33  ;;  %v5415_v1 = vadd.f32 %v10592_v52, %v4690_v48  ;;  %v11148_v52 = vld [vmem:[#allocation7_spill] sm:$0xff]  ;;  %v11153_v48 = vld [vmem:[#allocation6_spill] sm:$0xff] }
 0x316   : > { %v5947_v41 = vmax.f32 %v5915_v0, 0.0  ;;  %v5913_v62 = vadd.f32 %v10620_v16, %v5874_v63  ;;  %v5879_v44 = vadd.f32 %v7749_v50, %v5410_v40  ;;  %v5413_v63 = vadd.f32 %v10600_v20, %v4688_v47 }
 0x317   : > { %v5774_v18 = vpop.f32.mrf.mxu1  ;;  %v4694_v40 = vadd.f32 %v10560_v58, %v4336_v26  ;;  %v4334_v27 = vadd.f32 %v11148_v52, %v10440_v22  ;;  %v11151_v58 = vld [vmem:[#allocation25_spill] sm:$0xff] }
 0x318   : > { %v5975_v6 = vpack.c.bf16 %v5947_v41, %v5946_v32  ;;  %v5945_v59 = vmax.f32 %v5913_v62, 0.0  ;;  %v5877_v55 = vadd.f32 %v5774_v18, %v5408_v53  ;;  %v5918_v56 = vadd.f32 %v10620_v16, %v5879_v44  ;;  %v11150_v62 = vld [vmem:[#allocation23_spill] sm:$0xff]  ;;  %v7731_v18 = vpop.f32.mrf.mxu0 }
 0x319   : > { %v7750_v11 = vpop.f32.mrf.mxu1  ;;  %v5418_v41 = vadd.f32 %v10612_v10, %v11149_v34  ;;  %v4692_v44 = vadd.f32 %v11150_v62, %v4334_v27  ;;  %v5416_v22 = vadd.f32 %v10625_v54, %v11151_v58  ;;  %v5419_v8 = vadd.f32 %v10637_v39, %v4694_v40 }
 0x31a   : > { %v5974_v49 = vpack.c.bf16 %v5945_v59, %v5944_v2  ;;  %v5880_v17 = vadd.f32 %v7750_v11, %v5411_v9  ;;  %v5916_v46 = vadd.f32 %v10620_v16, %v5877_v55  ;;  %v5950_v37 = vmax.f32 %v5918_v56, 0.0 }
 0x31b   : > { %v5777_v33 = vpop.f32.mrf.mxu1 }
 0x31c   : > { %v5919_v30 = vadd.f32 %v10620_v16, %v5880_v17  ;;  %v5878_v28 = vadd.f32 %v5777_v33, %v5409_v51  ;;  %7777 = vmatprep.mubr.msk.bf16.mxu0 %vm452_vm1, %v5974_v49  ;;  %v5948_v38 = vmax.f32 %v5916_v46, 0.0  ;;  %v5369_v17 = vpop.f32.mrf.mxu0  ;;  %v11152_v51 = vld [vmem:[#allocation24_spill] sm:$0xff] }
 0x31d   : > { %v7753_v4 = vpop.f32.mrf.mxu1  ;;  %7778 = vmatmul.mubr.msk.bf16.gmra.mxu0 %vm452_vm1, %v5975_v6  ;;  %v4340_v23 = vadd.f32 %v11153_v48, %v11152_v51 }
 0x31e   : > { %v5951_v5 = vmax.f32 %v5919_v30, 0.0  ;;  %v5917_v15 = vadd.f32 %v10620_v16, %v5878_v28  ;;  %v5883_v42 = vadd.f32 %v7753_v4, %v5414_v60  ;;  %v5417_v28 = vadd.f32 %v10645_v25, %v4692_v44  ;;  %v11154_v60 = vld [vmem:[#allocation27_spill] sm:$0xff]  ;;  %v11155_v4 = vld [vmem:[#allocation10_spill] sm:$0xff] }
 0x31f   : > { %v5790_v31 = vpop.f32.mrf.mxu1  ;;  %v4698_v47 = vadd.f32 %v11154_v60, %v4340_v23 }
 0x320   : > { %v5977_v13 = vpack.c.bf16 %v5951_v5, %v5950_v37  ;;  %v5949_v24 = vmax.f32 %v5917_v15, 0.0  ;;  %v5881_v36 = vadd.f32 %v5790_v31, %v5412_v45  ;;  %v5922_v21 = vadd.f32 %v10620_v16, %v5883_v42  ;;  %v11156_v45 = vld [vmem:[#allocation21_spill] sm:$0xff]  ;;  %v11157_v31 = vld [vmem:[#allocation26_spill] sm:$0xff] }
 0x321   : > { %v7754_v29 = vpop.f32.mrf.mxu1  ;;  %v4338_v39 = vadd.f32 %v11156_v45, %v11155_v4  ;;  %v5423_v40 = vadd.f32 %v10680_v14, %v4698_v47 }
 0x322   : > { %v5976_v0 = vpack.c.bf16 %v5949_v24, %v5948_v38  ;;  %v5884_v7 = vadd.f32 %v7754_v29, %v5415_v1  ;;  %v5920_v53 = vadd.f32 %v10620_v16, %v5881_v36  ;;  %v5954_v9 = vmax.f32 %v5922_v21, 0.0  ;;  %v7732_v38 = vpop.f32.mrf.mxu0  ;;  %v11159_v36 = vld [vmem:[#allocation29_spill] sm:$0xff] }
 0x323   : > { %v5793_v50 = vpop.f32.mrf.mxu1  ;;  %v5422_v1 = vadd.f32 %v10658_v3, %v11157_v31  ;;  %v5420_v26 = vadd.f32 %v10667_v57, %v11159_v36 }
 0x324   : > { %v5923_v32 = vadd.f32 %v10620_v16, %v5884_v7  ;;  %v5882_v19 = vadd.f32 %v5793_v50, %v5413_v63  ;;  %7781 = vmatprep.mubr.msk.bf16.mxu0 %vm452_vm1, %v5976_v0  ;;  %v5952_v11 = vmax.f32 %v5920_v53, 0.0  ;;  %v5372_v53 = vpop.f32.mrf.mxu0 }
 0x325   : > { %v7757_v20 = vpop.f32.mrf.mxu1  ;;  %7782 = vmatmul.mubr.msk.bf16.gmra.mxu0 %vm452_vm1, %v5977_v13  ;;  %v11158_v13 = vld [vmem:[#allocation32_spill] sm:$0xff] }
 0x326   : > { %v5955_v2 = vmax.f32 %v5923_v32, 0.0  ;;  %v5921_v6 = vadd.f32 %v10620_v16, %v5882_v19  ;;  %v5887_v59 = vadd.f32 %v7757_v20, %v5418_v41  ;;  %v4696_v24 = vadd.f32 %v11158_v13, %v4338_v39  ;;  %v11160_v32 = vld [vmem:[#allocation33_spill] sm:$0xff]  ;;  %v11168_v39 = vld [vmem:[#allocation12_spill] sm:$0xff] }
 0x327   : > { %v5806_v55 = vpop.f32.mrf.mxu1  ;;  %v11161_v19 = vld [vmem:[#allocation9_spill] sm:$0xff]  ;;  %v11169_v13 = vld [vmem:[#allocation20_spill] sm:$0xff] }
 0x328   : > { %v5979_v49 = vpack.c.bf16 %v5955_v2, %v5954_v9  ;;  %v5953_v10 = vmax.f32 %v5921_v6, 0.0  ;;  %v5885_v56 = vadd.f32 %v5806_v55, %v5416_v22  ;;  %v5926_v54 = vadd.f32 %v10620_v16, %v5887_v59  ;;  %v11162_v22 = vld [vmem:[#allocation11_spill] sm:$0xff]  ;;  %v11163_v9 = vld [vmem:[#allocation30_spill] sm:$0xff]  ;;  %v7735_v2 = vpop.f32.mrf.mxu0 }
 0x329   : > { %v7758_v33 = vpop.f32.mrf.mxu1  ;;  %v4344_v34 = vadd.f32 %v11161_v19, %v11160_v32  ;;  %v5421_v20 = vadd.f32 %v10689_v43, %v4696_v24  ;;  %v4342_v14 = vadd.f32 %v11163_v9, %v11162_v22  ;;  %v11170_v24 = vld [vmem:[#allocation15_spill] sm:$0xff] }
 0x32a   : > { %v5978_v46 = vpack.c.bf16 %v5953_v10, %v5952_v11  ;;  %v5888_v30 = vadd.f32 %v7758_v33, %v5419_v8  ;;  %v5924_v5 = vadd.f32 %v10620_v16, %v5885_v56  ;;  %v5958_v29 = vmax.f32 %v5926_v54, 0.0  ;;  %v11164_v11 = vld [vmem:[#allocation14_spill] sm:$0xff]  ;;  %v5385_v54 = vpop.f32.mrf.mxu0 }
 0x32b   : > { %v5809_v37 = vpop.f32.mrf.mxu1  ;;  %v4702_v58 = vadd.f32 %v10588_v12, %v4344_v34  ;;  %v11165_v10 = vld [vmem:[#allocation34_spill] sm:$0xff]  ;;  %v11166_v12 = vld [vmem:[#allocation31_spill] sm:$0xff] }
 0x32c   : > { %v5927_v15 = vadd.f32 %v10620_v16, %v5888_v30  ;;  %v5886_v42 = vadd.f32 %v5809_v37, %v5417_v28  ;;  %7785 = vmatprep.mubr.msk.bf16.mxu0 %vm452_vm1, %v5978_v46  ;;  %v5956_v52 = vmax.f32 %v5924_v5, 0.0  ;;  %v4700_v56 = vadd.f32 %v11165_v10, %v4342_v14  ;;  %v7736_v36 = vpop.f32.mrf.mxu0 }
 0x32d   : > { %v7761_v25 = vpop.f32.mrf.mxu1  ;;  %7786 = vmatmul.mubr.msk.bf16.gmra.mxu0 %vm452_vm1, %v5979_v49  ;;  %v5426_v49 = vadd.f32 %v7731_v18, %v11164_v11  ;;  %v5424_v43 = vadd.f32 %v5369_v17, %v11166_v12  ;;  %v5427_v28 = vadd.f32 %v7732_v38, %v4702_v58  ;;  %v11167_v18 = vld [vmem:[#allocation16_spill] sm:$0xff] }
 0x32e   : > { %v5959_v0 = vmax.f32 %v5927_v15, 0.0  ;;  %v5925_v21 = vadd.f32 %v10620_v16, %v5886_v42  ;;  %v5891_v7 = vadd.f32 %v7761_v25, %v5422_v1  ;;  %v4348_v37 = vadd.f32 %v11168_v39, %v11167_v18  ;;  %v5388_v19 = vpop.f32.mrf.mxu0 }
 0x32f   : > { %v5822_v63 = vpop.f32.mrf.mxu1  ;;  %v5425_v31 = vadd.f32 %v5372_v53, %v4700_v56  ;;  %v4346_v25 = vadd.f32 %v11170_v24, %v11169_v13 }
 0x330   : > { %v5981_v27 = vpack.c.bf16 %v5959_v0, %v5958_v29  ;;  %v5957_v3 = vmax.f32 %v5925_v21, 0.0  ;;  %v5889_v50 = vadd.f32 %v5822_v63, %v5420_v26  ;;  %v5930_v57 = vadd.f32 %v10620_v16, %v5891_v7  ;;  %v11171_v26 = vld [vmem:[#allocation19_spill] sm:$0xff]  ;;  %v11172_v63 = vld [vmem:[#allocation36_spill] sm:$0xff] }
 0x331   : > { %v7762_v41 = vpop.f32.mrf.mxu1  ;;  %v4706_v1 = vadd.f32 %v10602_v61, %v4348_v37  ;;  %v5430_v29 = vadd.f32 %v7735_v2, %v11171_v26  ;;  %v10779_v37 = vld [vmem:[%s11009_s8] ss:$0 sm:$0xff] }
 0x332   : > { %v5980_v62 = vpack.c.bf16 %v5957_v3, %v5956_v52  ;;  %v5892_v44 = vadd.f32 %v7762_v41, %v5423_v40  ;;  %v5928_v59 = vadd.f32 %v10620_v16, %v5889_v50  ;;  %v5962_v48 = vmax.f32 %v5930_v57, 0.0 }
 0x333   : > { %v5825_v6 = vpop.f32.mrf.mxu1  ;;  %v5428_v40 = vadd.f32 %v5385_v54, %v11172_v63  ;;  %v4704_v52 = vadd.f32 %v10606_v35, %v4346_v25  ;;  %v5431_v32 = vadd.f32 %v7736_v36, %v4706_v1 }
 0x334   : > { %v5931_v55 = vadd.f32 %v10620_v16, %v5892_v44  ;;  %v5890_v8 = vadd.f32 %v5825_v6, %v5421_v20  ;;  %7789 = vmatprep.mubr.msk.bf16.mxu0 %vm452_vm1, %v5980_v62  ;;  %v5960_v60 = vmax.f32 %v5928_v59, 0.0 }
 0x335   : > { %v7765_v51 = vpop.f32.mrf.mxu1  ;;  %7790 = vmatmul.mubr.msk.bf16.gmra.mxu0 %vm452_vm1, %v5981_v27  ;;  %v5429_v58 = vadd.f32 %v5388_v19, %v4704_v52 }
 0x336   : > { %v5963_v23 = vmax.f32 %v5931_v55, 0.0  ;;  %v5929_v33 = vadd.f32 %v10620_v16, %v5890_v8  ;;  %v5895_v46 = vadd.f32 %v7765_v51, %v5426_v49 }
 0x337   : > { %v5838_v30 = vpop.f32.mrf.mxu1 }
 0x338   : > { %v5983_v47 = vpack.c.bf16 %v5963_v23, %v5962_v48  ;;  %v5961_v4 = vmax.f32 %v5929_v33, 0.0  ;;  %v5893_v45 = vadd.f32 %v5838_v30, %v5424_v43  ;;  %v5934_v42 = vadd.f32 %v10620_v16, %v5895_v46 }
 0x339   : > { %v7766_v5 = vpop.f32.mrf.mxu1 }
 0x33a   : > { %v5982_v15 = vpack.c.bf16 %v5961_v4, %v5960_v60  ;;  %v5896_v17 = vadd.f32 %v7766_v5, %v5427_v28  ;;  %v5932_v0 = vadd.f32 %v10620_v16, %v5893_v45  ;;  %v5966_v61 = vmax.f32 %v5934_v42, 0.0  ;;  %v10784_v5 = vld [vmem:[%s11007_s6] ss:$0 sm:$0xff] }
 0x33b   : > { %v5841_v38 = vpop.f32.mrf.mxu1 }
 0x33c   : > { %v5935_v21 = vadd.f32 %v10620_v16, %v5896_v17  ;;  %v5894_v7 = vadd.f32 %v5841_v38, %v5425_v31  ;;  %7793 = vmatprep.mubr.msk.bf16.mxu0 %vm452_vm1, %v5982_v15  ;;  %v5964_v41 = vmax.f32 %v5932_v0, 0.0 }
 0x33d   : > { %v7769_v27 = vpop.f32.mrf.mxu1  ;;  %7794 = vmatmul.mubr.msk.bf16.gmra.mxu0 %vm452_vm1, %v5983_v47 }
 0x33e   : > { %v5967_v3 = vmax.f32 %v5935_v21, 0.0  ;;  %v5933_v50 = vadd.f32 %v10620_v16, %v5894_v7  ;;  %v5899_v53 = vadd.f32 %v7769_v27, %v5430_v29 }
 0x33f   : > { %v5854_v34 = vpop.f32.mrf.mxu1 }
 0x340   : > { %v5985_v62 = vpack.c.bf16 %v5967_v3, %v5966_v61  ;;  %v5965_v57 = vmax.f32 %v5933_v50, 0.0  ;;  %v5897_v44 = vadd.f32 %v5854_v34, %v5428_v40  ;;  %v5938_v35 = vadd.f32 %v10620_v16, %v5899_v53 }
 0x341   : > { %v7770_v20 = vpop.f32.mrf.mxu1 }
 0x342   : > { %v5984_v22 = vpack.c.bf16 %v5965_v57, %v5964_v41  ;;  %v5900_v9 = vadd.f32 %v7770_v20, %v5431_v32  ;;  %v5936_v2 = vadd.f32 %v10620_v16, %v5897_v44  ;;  %v5970_v55 = vmax.f32 %v5938_v35, 0.0 }
 0x343   : > { %v5857_v14 = vpop.f32.mrf.mxu1 }
 0x344   : > { %v5939_v6 = vadd.f32 %v10620_v16, %v5900_v9  ;;  %v5898_v59 = vadd.f32 %v5857_v14, %v5429_v58  ;;  %7797 = vmatprep.mubr.msk.bf16.mxu0 %vm452_vm1, %v5984_v22  ;;  %v5968_v49 = vmax.f32 %v5936_v2, 0.0 }
 0x345   : > { %7798 = vmatmul.mubr.msk.bf16.gmra.mxu0 %vm452_vm1, %v5985_v62  ;;  %v7809_v12 = vpop.f32.mrf.mxu1 }
 0x346   : > { %v5971_v8 = vmax.f32 %v5939_v6, 0.0  ;;  %v5937_v11 = vadd.f32 %v10620_v16, %v5898_v59  ;;  %v6262_v15 = vadd.f32 %v7809_v12, %v10779_v37 }
 0x347   : > { %v6253_v43 = vpop.f32.mrf.mxu1 }
 0x348   : > { %v5987_v10 = vpack.c.bf16 %v5971_v8, %v5970_v55  ;;  %v5969_v56 = vmax.f32 %v5937_v11, 0.0  ;;  %v6254_v13 = vadd.f32 %v10779_v37, %v6253_v43 }
 0x349   : > { %v7810_v48 = vpop.f32.mrf.mxu1 }
 0x34a   : > { %v5986_v51 = vpack.c.bf16 %v5969_v56, %v5968_v49  ;;  %v6265_v26 = vadd.f32 %v7810_v48, %v10779_v37 }
 0x34b   : > { %v6256_v23 = vpop.f32.mrf.mxu1 }
 0x34c   : > { %7801 = vmatprep.mubr.msk.bf16.mxu0 %vm452_vm1, %v5986_v51  ;;  %v6257_v7 = vadd.f32 %v10779_v37, %v6256_v23 }
 0x34d   : > { %7802 = vmatmul.mubr.msk.bf16.gmra.mxu0 %vm452_vm1, %v5987_v10  ;;  %v7813_v33 = vpop.f32.mrf.mxu1 }
 0x34e   : > { %v6278_v63 = vadd.f32 %v7813_v33, %v10779_v37 }
 0x34f   : > { %v6269_v46 = vpop.f32.mrf.mxu1 }
 0x350   : > { %v6270_v62 = vadd.f32 %v10779_v37, %v6269_v46 }
 0x351   : > { %v7814_v54 = vpop.f32.mrf.mxu1 }
 0x352   : > { %v6281_v9 = vadd.f32 %v7814_v54, %v10779_v37 }
 0x353   : > { %v6272_v30 = vpop.f32.mrf.mxu1 }
 0x354   : > { %v6273_v8 = vadd.f32 %v10779_v37, %v6272_v30 }
 0x355   : > { %v7817_v28 = vpop.f32.mrf.mxu1 }
 0x356   : > { %v6294_v11 = vadd.f32 %v7817_v28, %v10779_v37 }
 0x357   : > { %v10762_v60 = vpop.f32.mrf.mxu1 }
 0x358   : > { %v6286_v30 = vadd.f32 %v10779_v37, %v10762_v60 }
 0x359   : > { %v10764_v16 = vpop.f32.mrf.mxu1 }
 0x35b   : > { %v10766_v47 = vpop.f32.mrf.mxu1 }
 0x35d   : > { %v10768_v4 = vpop.f32.mrf.mxu1 }
 0x35f   : > { %v10770_v45 = vpop.f32.mrf.mxu1 }
 0x361   : > { %v10772_v18 = vpop.f32.mrf.mxu1 }
 0x363   : > { %v10774_v39 = vpop.f32.mrf.mxu1 }
 0x365   : > { %v10787_v42 = vpop.f32.mrf.mxu1 }
 0x367   : > { %v10795_v36 = vpop.f32.mrf.mxu1 }
 0x369   : > { %v10802_v50 = vpop.f32.mrf.mxu1 }
 0x36b   : > { %v10813_v35 = vpop.f32.mrf.mxu1 }
 0x36d   : > { %v10824_v43 = vpop.f32.mrf.mxu1 }
 0x3d5   : > { %v7775_v17 = vpop.f32.mrf.mxu0 }
 0x3d6   : > { %v6090_v31 = vadd.f32 %v7775_v17, %v10784_v5 }
 0x3d7   : > { %v6081_v1 = vpop.f32.mrf.mxu0 }
 0x3d8   : > { %v6382_v24 = vadd.f32 %v6262_v15, %v6090_v31  ;;  %v6082_v25 = vadd.f32 %v10784_v5, %v6081_v1 }
 0x3d9   : > { %v7776_v38 = vpop.f32.mrf.mxu0 }
 0x3da   : > { %v6414_v29 = vmax.f32 %v6382_v24, 0.0  ;;  %v6380_v0 = vadd.f32 %v6254_v13, %v6082_v25  ;;  %v6093_v21 = vadd.f32 %v7776_v38, %v10784_v5  ;;  %v10834_v13 = vpop.f32.mrf.mxu1  ;;  %v6297_v24 = vadd.f32 %v10764_v16, %v10779_v37 }
 0x3db   : > { %v6084_v40 = vpop.f32.mrf.mxu0 }
 0x3dc   : > { %v7196_v52 = vpack.c.bf16 %v6414_v29, %v6414_v29  ;;  %v6412_v27 = vmax.f32 %v6380_v0, 0.0  ;;  %v6383_v61 = vadd.f32 %v6265_v26, %v6093_v21  ;;  %v6085_v3 = vadd.f32 %v10784_v5, %v6084_v40 }
 0x3dd   : > { %v7779_v53 = vpop.f32.mrf.mxu0  ;;  %v6289_v0 = vadd.f32 %v10779_v37, %v10766_v47  ;;  %v6310_v21 = vadd.f32 %v10768_v4, %v10779_v37 }
 0x3de   : > { %6575 = vst.msk [vmem:[%s10804_s14 + $0x8] sm:$0xf] %vm6572_vm0, %v7196_v52  ;;  %v7194_v32 = vpack.c.bf16 %v6412_v27, %v6412_v27  ;;  %v6415_v19 = vmax.f32 %v6383_v61, 0.0  ;;  %v6381_v34 = vadd.f32 %v6257_v7, %v6085_v3  ;;  %v6106_v41 = vadd.f32 %v7779_v53, %v10784_v5  ;;  %v10848_v27 = vpop.f32.mrf.mxu1 }
 0x3df   : > { %v6097_v57 = vpop.f32.mrf.mxu0 }
 0x3e0   : > { %6573 = vst.msk [vmem:[%s10804_s14] sm:$0xf] %vm6572_vm0, %v7194_v32  ;;  %v7197_v44 = vpack.c.bf16 %v6415_v19, %v6415_v19  ;;  %v6413_v20 = vmax.f32 %v6381_v34, 0.0  ;;  %v6386_v58 = vadd.f32 %v6278_v63, %v6106_v41  ;;  %v6098_v22 = vadd.f32 %v10784_v5, %v6097_v57 }
 0x3e1   : > { %v7780_v14 = vpop.f32.mrf.mxu0  ;;  %v6302_v32 = vadd.f32 %v10779_v37, %v10770_v45 }
 0x3e2   : > { %6576 = vst.msk [vmem:[%s10804_s14 + $0xc] sm:$0xf] %vm6572_vm0, %v7197_v44  ;;  %v7195_v2 = vpack.c.bf16 %v6413_v20, %v6413_v20  ;;  %v6418_v6 = vmax.f32 %v6386_v58, 0.0  ;;  %v6384_v59 = vadd.f32 %v6270_v62, %v6098_v22  ;;  %v6109_v55 = vadd.f32 %v7780_v14, %v10784_v5  ;;  %v10858_v44 = vpop.f32.mrf.mxu1 }
 0x3e3   : > { %v6100_v49 = vpop.f32.mrf.mxu0  ;;  %v6313_v20 = vadd.f32 %v10772_v18, %v10779_v37 }
 0x3e4   : > { %6574 = vst.msk [vmem:[%s10804_s14 + $0x4] sm:$0xf] %vm6572_vm0, %v7195_v2  ;;  %v7200_v10 = vpack.c.bf16 %v6418_v6, %v6418_v6  ;;  %v6416_v56 = vmax.f32 %v6384_v59, 0.0  ;;  %v6387_v51 = vadd.f32 %v6281_v9, %v6109_v55  ;;  %v6101_v12 = vadd.f32 %v10784_v5, %v6100_v49  ;;  %v7833_v49 = vpop.f32.mrf.mxu1 }
 0x3e5   : > { %v7783_v48 = vpop.f32.mrf.mxu0  ;;  %v6305_v2 = vadd.f32 %v10779_v37, %v10774_v39  ;;  %v6326_v6 = vadd.f32 %v10787_v42, %v10779_v37  ;;  %v6318_v42 = vadd.f32 %v10779_v37, %v10795_v36 }
 0x3e6   : > { %6579 = vst.msk [vmem:[%s10804_s14 + $0x18] sm:$0xf] %vm6572_vm0, %v7200_v10  ;;  %v7198_v23 = vpack.c.bf16 %v6416_v56, %v6416_v56  ;;  %v6419_v33 = vmax.f32 %v6387_v51, 0.0  ;;  %v6385_v46 = vadd.f32 %v6273_v8, %v6101_v12  ;;  %v6122_v54 = vadd.f32 %v7783_v48, %v10784_v5 }
 0x3e7   : > { %v6113_v28 = vpop.f32.mrf.mxu0 }
 0x3e8   : > { %6577 = vst.msk [vmem:[%s10804_s14 + $0x10] sm:$0xf] %vm6572_vm0, %v7198_v23  ;;  %v7201_v15 = vpack.c.bf16 %v6419_v33, %v6419_v33  ;;  %v6417_v17 = vmax.f32 %v6385_v46, 0.0  ;;  %v6390_v31 = vadd.f32 %v6294_v11, %v6122_v54  ;;  %v6114_v1 = vadd.f32 %v10784_v5, %v6113_v28 }
 0x3e9   : > { %v7784_v25 = vpop.f32.mrf.mxu0  ;;  %v6329_v28 = vadd.f32 %v10802_v50, %v10779_v37 }
 0x3ea   : > { %6580 = vst.msk [vmem:[%s10804_s14 + $0x1c] sm:$0xf] %vm6572_vm0, %v7201_v15  ;;  %v7199_v38 = vpack.c.bf16 %v6417_v17, %v6417_v17  ;;  %v6422_v60 = vmax.f32 %v6390_v31, 0.0  ;;  %v6388_v26 = vadd.f32 %v6286_v30, %v6114_v1  ;;  %v6125_v29 = vadd.f32 %v7784_v25, %v10784_v5  ;;  %v6349_v30 = vpop.f32.mrf.mxu1 }
 0x3eb   : > { %v6116_v7 = vpop.f32.mrf.mxu0  ;;  %v6342_v25 = vadd.f32 %v10824_v43, %v10779_v37  ;;  %v6334_v43 = vadd.f32 %v10779_v37, %v10834_v13 }
 0x3ec   : > { %6578 = vst.msk [vmem:[%s10804_s14 + $0x14] sm:$0xf] %vm6572_vm0, %v7199_v38  ;;  %v7204_v16 = vpack.c.bf16 %v6422_v60, %v6422_v60  ;;  %v6420_v63 = vmax.f32 %v6388_v26, 0.0  ;;  %v6391_v40 = vadd.f32 %v6297_v24, %v6125_v29  ;;  %v6117_v52 = vadd.f32 %v10784_v5, %v6116_v7 }
 0x3ed   : > { %v7787_v61 = vpop.f32.mrf.mxu0  ;;  %v6321_v24 = vadd.f32 %v10779_v37, %v10813_v35 }
 0x3ee   : > { %6583 = vst.msk [vmem:[%s10804_s14 + $0x28] sm:$0xf] %vm6572_vm0, %v7204_v16  ;;  %v7202_v3 = vpack.c.bf16 %v6420_v63, %v6420_v63  ;;  %v6423_v47 = vmax.f32 %v6391_v40, 0.0  ;;  %v6389_v53 = vadd.f32 %v6289_v0, %v6117_v52  ;;  %v6138_v4 = vadd.f32 %v7787_v61, %v10784_v5  ;;  %v7834_v0 = vpop.f32.mrf.mxu1 }
 0x3ef   : > { %v6129_v19 = vpop.f32.mrf.mxu0 }
 0x3f0   : > { %6581 = vst.msk [vmem:[%s10804_s14 + $0x20] sm:$0xf] %vm6572_vm0, %v7202_v3  ;;  %v7205_v34 = vpack.c.bf16 %v6423_v47, %v6423_v47  ;;  %v6421_v41 = vmax.f32 %v6389_v53, 0.0  ;;  %v6394_v62 = vadd.f32 %v6310_v21, %v6138_v4  ;;  %v6130_v57 = vadd.f32 %v10784_v5, %v6129_v19  ;;  %v6352_v53 = vpop.f32.mrf.mxu1 }
 0x3f1   : > { %v7788_v58 = vpop.f32.mrf.mxu0  ;;  %v6345_v4 = vadd.f32 %v10848_v27, %v10779_v37 }
 0x3f2   : > { %6584 = vst.msk [vmem:[%s10804_s14 + $0x2c] sm:$0xf] %vm6572_vm0, %v7205_v34  ;;  %v7203_v22 = vpack.c.bf16 %v6421_v41, %v6421_v41  ;;  %v6426_v45 = vmax.f32 %v6394_v62, 0.0  ;;  %v6392_v9 = vadd.f32 %v6302_v32, %v6130_v57  ;;  %v6141_v14 = vadd.f32 %v7788_v58, %v10784_v5 }
 0x3f3   : > { %v6132_v59 = vpop.f32.mrf.mxu0  ;;  %v6337_v62 = vadd.f32 %v10779_v37, %v10858_v44  ;;  %v6358_v57 = vadd.f32 %v7833_v49, %v10779_v37 }
 0x3f4   : > { %6582 = vst.msk [vmem:[%s10804_s14 + $0x24] sm:$0xf] %vm6572_vm0, %v7203_v22  ;;  %v7208_v18 = vpack.c.bf16 %v6426_v45, %v6426_v45  ;;  %v6424_v55 = vmax.f32 %v6392_v9, 0.0  ;;  %v6395_v8 = vadd.f32 %v6313_v20, %v6141_v14  ;;  %v6133_v11 = vadd.f32 %v10784_v5, %v6132_v59  ;;  %v7837_v9 = vpop.f32.mrf.mxu1 }
 0x3f5   : > { %v7791_v10 = vpop.f32.mrf.mxu0 }
 0x3f6   : > { %6587 = vst.msk [vmem:[%s10804_s14 + $0x38] sm:$0xf] %vm6572_vm0, %v7208_v18  ;;  %v7206_v56 = vpack.c.bf16 %v6424_v55, %v6424_v55  ;;  %v6427_v51 = vmax.f32 %v6395_v8, 0.0  ;;  %v6393_v39 = vadd.f32 %v6305_v2, %v6133_v11  ;;  %v6154_v12 = vadd.f32 %v7791_v10, %v10784_v5 }
 0x3f7   : > { %v6145_v48 = vpop.f32.mrf.mxu0  ;;  %v6350_v18 = vadd.f32 %v10779_v37, %v6349_v30 }
 0x3f8   : > { %6585 = vst.msk [vmem:[%s10804_s14 + $0x30] sm:$0xf] %vm6572_vm0, %v7206_v56  ;;  %v7209_v23 = vpack.c.bf16 %v6427_v51, %v6427_v51  ;;  %v6425_v33 = vmax.f32 %v6393_v39, 0.0  ;;  %v6398_v46 = vadd.f32 %v6326_v6, %v6154_v12  ;;  %v6146_v54 = vadd.f32 %v10784_v5, %v6145_v48  ;;  %v6365_v56 = vpop.f32.mrf.mxu1 }
 0x3f9   : > { %v7792_v15 = vpop.f32.mrf.mxu0  ;;  %v6361_v51 = vadd.f32 %v7834_v0, %v10779_v37 }
 0x3fa   : > { %6588 = vst.msk [vmem:[%s10804_s14 + $0x3c] sm:$0xf] %vm6572_vm0, %v7209_v23  ;;  %v7207_v17 = vpack.c.bf16 %v6425_v33, %v6425_v33  ;;  %v6430_v31 = vmax.f32 %v6398_v46, 0.0  ;;  %v6396_v36 = vadd.f32 %v6318_v42, %v6146_v54  ;;  %v6157_v1 = vadd.f32 %v7792_v15, %v10784_v5 }
 0x3fb   : > { %v6148_v38 = vpop.f32.mrf.mxu0  ;;  %v6353_v33 = vadd.f32 %v10779_v37, %v6352_v53  ;;  %v6374_v46 = vadd.f32 %v7837_v9, %v10779_v37 }
 0x3fc   : > { %6586 = vst.msk [vmem:[%s10804_s14 + $0x34] sm:$0xf] %vm6572_vm0, %v7207_v17  ;;  %v7212_v50 = vpack.c.bf16 %v6430_v31, %v6430_v31  ;;  %v6428_v60 = vmax.f32 %v6396_v36, 0.0  ;;  %v6399_v26 = vadd.f32 %v6329_v28, %v6157_v1  ;;  %v6149_v29 = vadd.f32 %v10784_v5, %v6148_v38  ;;  %v7838_v31 = vpop.f32.mrf.mxu1 }
 0x3fd   : > { %v7795_v21 = vpop.f32.mrf.mxu0 }
 0x3fe   : > { %6591 = vst.msk [vmem:[%s10804_s14 + $0x48] sm:$0xf] %vm6572_vm0, %v7212_v50  ;;  %v7210_v7 = vpack.c.bf16 %v6428_v60, %v6428_v60  ;;  %v6431_v16 = vmax.f32 %v6399_v26, 0.0  ;;  %v6397_v35 = vadd.f32 %v6321_v24, %v6149_v29  ;;  %v6170_v63 = vadd.f32 %v7795_v21, %v10784_v5  ;;  %v6368_v21 = vpop.f32.mrf.mxu1 }
 0x3ff   : > { %v6161_v40 = vpop.f32.mrf.mxu0  ;;  %v6366_v50 = vadd.f32 %v10779_v37, %v6365_v56 }
 0x400   : > { %6589 = vst.msk [vmem:[%s10804_s14 + $0x40] sm:$0xf] %vm6572_vm0, %v7210_v7  ;;  %v7213_v52 = vpack.c.bf16 %v6431_v16, %v6431_v16  ;;  %v6429_v61 = vmax.f32 %v6397_v35, 0.0  ;;  %v6402_v3 = vadd.f32 %v6342_v25, %v6170_v63  ;;  %v6162_v47 = vadd.f32 %v10784_v5, %v6161_v40 }
 0x401   : > { %v7796_v32 = vpop.f32.mrf.mxu0  ;;  %v6377_v16 = vadd.f32 %v7838_v31, %v10779_v37 }
 0x402   : > { %6592 = vst.msk [vmem:[%s10804_s14 + $0x4c] sm:$0xf] %vm6572_vm0, %v7213_v52  ;;  %v7211_v19 = vpack.c.bf16 %v6429_v61, %v6429_v61  ;;  %v6434_v34 = vmax.f32 %v6402_v3, 0.0  ;;  %v6400_v13 = vadd.f32 %v6334_v43, %v6162_v47  ;;  %v6173_v41 = vadd.f32 %v7796_v32, %v10784_v5 }
 0x403   : > { %v6164_v20 = vpop.f32.mrf.mxu0  ;;  %v6369_v61 = vadd.f32 %v10779_v37, %v6368_v21 }
 0x404   : > { %6590 = vst.msk [vmem:[%s10804_s14 + $0x44] sm:$0xf] %vm6572_vm0, %v7211_v19  ;;  %v7216_v58 = vpack.c.bf16 %v6434_v34, %v6434_v34  ;;  %v6432_v27 = vmax.f32 %v6400_v13, 0.0  ;;  %v6403_v22 = vadd.f32 %v6345_v4, %v6173_v41  ;;  %v6165_v45 = vadd.f32 %v10784_v5, %v6164_v20 }
 0x405   : > { %v7799_v14 = vpop.f32.mrf.mxu0 }
 0x406   : > { %6595 = vst.msk [vmem:[%s10804_s14 + $0x58] sm:$0xf] %vm6572_vm0, %v7216_v58  ;;  %v7214_v2 = vpack.c.bf16 %v6432_v27, %v6432_v27  ;;  %v6435_v6 = vmax.f32 %v6403_v22, 0.0  ;;  %v6401_v59 = vadd.f32 %v6337_v62, %v6165_v45  ;;  %v6186_v44 = vadd.f32 %v7799_v14, %v10784_v5 }
 0x407   : > { %v6177_v55 = vpop.f32.mrf.mxu0 }
 0x408   : > { %6593 = vst.msk [vmem:[%s10804_s14 + $0x50] sm:$0xf] %vm6572_vm0, %v7214_v2  ;;  %v7217_v8 = vpack.c.bf16 %v6435_v6, %v6435_v6  ;;  %v6433_v11 = vmax.f32 %v6401_v59, 0.0  ;;  %v6406_v49 = vadd.f32 %v6358_v57, %v6186_v44  ;;  %v6178_v10 = vadd.f32 %v10784_v5, %v6177_v55 }
 0x409   : > { %v7800_v39 = vpop.f32.mrf.mxu0 }
 0x40a   : > { %6596 = vst.msk [vmem:[%s10804_s14 + $0x5c] sm:$0xf] %vm6572_vm0, %v7217_v8  ;;  %v7215_v12 = vpack.c.bf16 %v6433_v11, %v6433_v11  ;;  %v6438_v42 = vmax.f32 %v6406_v49, 0.0  ;;  %v6404_v48 = vadd.f32 %v6350_v18, %v6178_v10  ;;  %v6189_v23 = vadd.f32 %v7800_v39, %v10784_v5 }
 0x40b   : > { %v6180_v54 = vpop.f32.mrf.mxu0 }
 0x40c   : > { %6594 = vst.msk [vmem:[%s10804_s14 + $0x54] sm:$0xf] %vm6572_vm0, %v7215_v12  ;;  %v7220_v30 = vpack.c.bf16 %v6438_v42, %v6438_v42  ;;  %v6436_v28 = vmax.f32 %v6404_v48, 0.0  ;;  %v6407_v15 = vadd.f32 %v6361_v51, %v6189_v23  ;;  %v6181_v17 = vadd.f32 %v10784_v5, %v6180_v54 }
 0x40d   : > { %v7803_v36 = vpop.f32.mrf.mxu0 }
 0x40e   : > { %6599 = vst.msk [vmem:[%s10804_s14 + $0x68] sm:$0xf] %vm6572_vm0, %v7220_v30  ;;  %v7218_v1 = vpack.c.bf16 %v6436_v28, %v6436_v28  ;;  %v6439_v24 = vmax.f32 %v6407_v15, 0.0  ;;  %v6405_v25 = vadd.f32 %v6353_v33, %v6181_v17  ;;  %v6202_v38 = vadd.f32 %v7803_v36, %v10784_v5 }
 0x40f   : > { %v6193_v60 = vpop.f32.mrf.mxu0 }
 0x410   : > { %6597 = vst.msk [vmem:[%s10804_s14 + $0x60] sm:$0xf] %vm6572_vm0, %v7218_v1  ;;  %v7221_v26 = vpack.c.bf16 %v6439_v24, %v6439_v24  ;;  %v6437_v29 = vmax.f32 %v6405_v25, 0.0  ;;  %v6410_v0 = vadd.f32 %v6374_v46, %v6202_v38  ;;  %v6194_v7 = vadd.f32 %v10784_v5, %v6193_v60 }
 0x411   : > { %v7804_v35 = vpop.f32.mrf.mxu0 }
 0x412   : > { %6600 = vst.msk [vmem:[%s10804_s14 + $0x6c] sm:$0xf] %vm6572_vm0, %v7221_v26  ;;  %v7219_v63 = vpack.c.bf16 %v6437_v29, %v6437_v29  ;;  %v6442_v43 = vmax.f32 %v6410_v0, 0.0  ;;  %v6408_v40 = vadd.f32 %v6366_v50, %v6194_v7  ;;  %v6205_v52 = vadd.f32 %v7804_v35, %v10784_v5 }
 0x413   : > { %v6196_v3 = vpop.f32.mrf.mxu0 }
 0x414   : > { %6598 = vst.msk [vmem:[%s10804_s14 + $0x64] sm:$0xf] %vm6572_vm0, %v7219_v63  ;;  %v7224_v47 = vpack.c.bf16 %v6442_v43, %v6442_v43  ;;  %v6440_v53 = vmax.f32 %v6408_v40, 0.0  ;;  %v6411_v4 = vadd.f32 %v6377_v16, %v6205_v52  ;;  %v6197_v32 = vadd.f32 %v10784_v5, %v6196_v3 }
 0x416   : > { %6603 = vst.msk [vmem:[%s10804_s14 + $0x78] sm:$0xf] %vm6572_vm0, %v7224_v47  ;;  %v7222_v19 = vpack.c.bf16 %v6440_v53, %v6440_v53  ;;  %v6443_v34 = vmax.f32 %v6411_v4, 0.0  ;;  %v6409_v13 = vadd.f32 %v6369_v61, %v6197_v32 }
 0x418   : > { %6601 = vst.msk [vmem:[%s10804_s14 + $0x70] sm:$0xf] %vm6572_vm0, %v7222_v19  ;;  %v7225_v37 = vpack.c.bf16 %v6443_v34, %v6443_v34  ;;  %v6441_v41 = vmax.f32 %v6409_v13, 0.0 }
 0x41a   : > { %6604 = vst.msk [vmem:[%s10804_s14 + $0x7c] sm:$0xf] %vm6572_vm0, %v7225_v37  ;;  %v7223_v5 = vpack.c.bf16 %v6441_v41, %v6441_v41 }
 0x41c   : > { %6602 = vst.msk [vmem:[%s10804_s14 + $0x74] sm:$0xf] %vm6572_vm0, %v7223_v5 }
 0x41d   : > { %7994 = shalt.err (!%p7991_p3)
}
 0x41e   : > { %s7995_s28 = scalar_lea.hbm %s10951_s22, 2048  ;;  %s7999_s16 = scalar_lea.hbm %s11010_s9, 4096 }
 0x41f   : > { %p7996_p4 = scmp.ne.s32.totalorder %s10951_s22, %s7995_s28  ;;  %p8000_p9 = scmp.lt.s32.totalorder %s10951_s22, %s11010_s9 }
 0x420   : > { %p8001_p10 = scmp.lt.s32.totalorder %s7999_s16, %s7995_s28 }
 0x421   : > { %p7997_p7 = pnand %p7996_p4, %p8135_p5 }
 0x422   : > { %p8002_p11 = por %p8001_p10, %p8000_p9 }
 0x423   : > { %p7998_p8 = pneg %p7997_p7 }
 0x425   : > { %p8003_p12 = pnand %p8002_p11, %p7998_p8 }
 0x427   : > { %8006 = shalt.err (!%p8003_p12)
}
 0x428   : > { %s8045_s23 = smov 64   ;;  %s8046_s24 = smov 4  }
 0x429   : > { %7851 = dma.vmem_to_hbm [thread:$0]  (%p8135_p5), %s10953_s17, 2048, %s10951_s22, %s10961_s13, %s8045_s23, %s8045_s23, %s8046_s24  }
 0x42a PF: > { %p7857_p13 = scmp.ge.s32.totalorder %s8041_s12, 2  ;;  %s6634_s25 = sand.u32 1, %s8029_s30  }
 0x42b   : > { %s6635_s26 = scalar_lea.sflag [#allocation4], %s6634_s25 }
 0x42c   : > { %p7854_p0 = pnand %p7857_p13, %p8139_p6 }
 0x42e   : > { %p7855_p1 = pneg %p7854_p0 }
 0x430   : > { %8024 = dma.done.wait (%p7855_p1), %s6635_s26, 2048  }
 0x431   : > { %8026 = vsyncadd (%p7855_p1), %s6635_s26, 4294965248  ;;  %p19_p2 = scmp.ge.s32.totalorder %s8122_s15, 4   ;;  %s11173_s30 = smov %s8033_s10 }
 0x432   : > { %s11174_s10 = smov %s8037_s11  ;;  %s11175_s11 = smov %s8133_s18 }
 0x433   : > { %s11176_s12 = smov %s8122_s15  ;;  %21 = sbr.rel (!%p19_p2) target bundleno = 3 (0x3), region = 94 }
 0x438   :  { %6640 = vsyncpa [#allocation4], 1 }
 0x439   :  { %6642 = vsyncpa [#allocation4 + $0x1], 1 }

// kernel: tpu_custom_call.1
= control target key start
LH: loop header
LB: loop body
LE: loop exit
PB: predicated region body
PF: predicated region fallthrough
CT: control target
= control target key end

     0   :  { %14 = vsyncpa [#allocation4], 0  ;;  %s11001_s0 = inlined_call_operand.vmem [shape: bf16[2,16,16,8], index: 0, kind: input, shape index: {}]   ;;  %s11002_s1 = inlined_call_operand.vmem [shape: bf16[8,8], index: 1, kind: input, shape index: {}]   ;;  %s11003_s2 = inlined_call_operand.vmem [shape: f32[1,8], index: 2, kind: input, shape index: {}]   ;;  %s11004_s3 = inlined_call_operand.vmem [shape: bf16[72,8], index: 3, kind: input, shape index: {}]   ;;  %s11005_s4 = inlined_call_operand.vmem [shape: f32[1,8], index: 4, kind: input, shape index: {}]   ;;  %s11006_s5 = inlined_call_operand.vmem [shape: bf16[8,32], index: 5, kind: input, shape index: {}]   ;;  %s11007_s6 = inlined_call_operand.vmem [shape: f32[1,32], index: 6, kind: input, shape index: {}]   ;;  %s11008_s7 = inlined_call_operand.vmem [shape: bf16[8,32], index: 7, kind: input, shape index: {}]   ;;  %s11009_s8 = inlined_call_operand.vmem [shape: f32[1,32], index: 8, kind: input, shape index: {}]   ;;  %s11010_s9 = inlined_call_operand.hbm [shape: bf16[2,16,16,32], index: 9, kind: output, shape index: {}]  }
   0x1   :  { %16 = vsyncpa [#allocation4 + $0x1], 0  ;;  %s8097_s30 = smov 0   ;;  %s8099_s10 = smov 0  }
   0x2   :  { %s8101_s11 = smov 0   ;;  %s8103_s12 = smov 0  }
   0x3 LB: > { %s8118_s13 = sadd.s32 4294967295, %s8041_s12   ;;  %s6681_s14 = sadd.s32 4294967294, %s8041_s12   ;;  %s8041_s12 = sphi %s8103_s12, %s11176_s12   ;;  %s8037_s11 = sphi %s8101_s11, %s11175_s11   ;;  %s8033_s10 = sphi %s8099_s10, %s11174_s10   ;;  %s8029_s30 = sphi %s8097_s30, %s11173_s30  }
   0x4   : > { %s8122_s15 = sadd.s32 1, %s8041_s12   ;;  %s223_s16 = sadd.s32 1, %s8037_s11 }
   0x5   : > { %s220_s17 = ssub.s32 %s8041_s12, %s8122_s15  ;;  %p233_p0 = scmp.ne.s32.totalorder %s8037_s11, %s8033_s10 }
   0x6   : > { %p221_p1 = scmp.eq.s32.totalorder %s220_s17, 0  ;;  %p234_p2 = scmp.eq.s32.totalorder %s8118_s13, 1 }
   0x7   : > { %p239_p3 = scmp.ne.s32.totalorder %s8033_s10, %s8029_s30  ;;  %p240_p4 = scmp.eq.s32.totalorder %s6681_s14, 1 }
   0x8   : > { %s8133_s18 = scalar_select %p221_p1, %s8037_s11, %s223_s16  }
   0x9   : > { %p8135_p5 = por %p234_p2, %p233_p0  ;;  %p8139_p6 = por %p240_p4, %p239_p3 }
   0xa   : > { %p6684_p7 = scmp.ge.s32.totalorder %s8041_s12, 1  ;;  %p290_p8 = scmp.lt.s32.totalorder %s8041_s12, 3 }
   0xc   : > { %p291_p9 = pnand %p6684_p7, %p290_p8 }
   0xe   : > { %294 = sbr.rel (%p291_p9) target bundleno = 1066 (0x42a), region = 56 }
  0x13   : > { %v364_v0 = vld [vmem:[%s11002_s1] sm:$0xf]  ;;  %vm501_vm0 = vcmask 1043456   ;;  %p326_p10 = scmp.lt.s32.totalorder %s8118_s13, 1  ;;  %vm452_vm1 = vcmask 64512   ;;  %vm701_vm2 = vcmask 57344  }
  0x14   : > { %7839 = vmatprep.subr.msk.bf16.mxu0 %vm501_vm0, %v364_v0  ;;  %v503_v1 = vsel %vm501_vm0, %v364_v0, 0  ;;  %vm708_vm3 = vsmask.f32 256  ;;  %v716_v19 = vld [vmem:[#allocation2 + $0x18] sm:$0x1]  ;;  %vm698_vm7 = vcmask 60416  }
  0x15   : > { %7432 = vmatpush3.bf16.msra.mxu0 %v503_v1  ;;  %s327_s23 = scalar_select %p326_p10, %s8118_s13, 1  ;;  %vm8191_vm4 = vmand %vm701_vm2, %vm708_vm3  ;;  %vm764_vm5 = vsmask.f32 7938  ;;  %v713_v22 = vld [vmem:[#allocation2 + $0xc] sm:$0x1]  ;;  %v8043_v32 = vmov 0  }
  0x16   : > { %v717_v20 = vsel %vm8191_vm4, 0, %v716_v19  ;;  %vm8199_vm6 = vmand %vm701_vm2, %vm764_vm5  ;;  %v714_v23 = vsel %vm8191_vm4, 0, %v713_v22  ;;  %v772_v24 = vld [vmem:[#allocation2 + $0x20] sm:$0x1]  ;;  %v769_v26 = vld [vmem:[#allocation2 + $0x14] sm:$0x1] }
  0x17   : > { %s7161_s24 = sshll.u32 %s327_s23, 7  ;;  %718 = vst [vmem:[#allocation2 + $0x18] sm:$0x1] %v717_v20  ;;  %715 = vst [vmem:[#allocation2 + $0xc] sm:$0x1] %v714_v23  ;;  %v773_v25 = vsel %vm8199_vm6, 0, %v772_v24 }
  0x18   : > { %s8155_s27 = scalar_lea.vmem %s11001_s0, %s7161_s24  ;;  %774 = vst [vmem:[#allocation2 + $0x20] sm:$0x1] %v773_v25  ;;  %v770_v27 = vsel %vm8199_vm6, 0, %v769_v26  ;;  %v722_v28 = vld [vmem:[#allocation2 + $0x30] sm:$0x1]  ;;  %vm8317_vm12 = vmand %vm698_vm7, %vm764_vm5  ;;  %vm2390_vm14 = vcmask 1042432  }
  0x19   : > { %v7893_v2 = vld [vmem:[%s8155_s27] sm:$0xff]   ;;  %v7894_v3 = vld [vmem:[%s8155_s27 + $0x8] sm:$0xff]   ;;  %v7895_v4 = vld [vmem:[%s8155_s27 + $0x10] sm:$0xff]   ;;  %771 = vst [vmem:[#allocation2 + $0x14] sm:$0x1] %v770_v27  ;;  %v723_v29 = vsel %vm8191_vm4, 0, %v722_v28 }
  0x1a   : > { %7433 = vmatprep.mubr.msk.bf16.mxu0 %vm452_vm1, %v7893_v2  ;;  %v7896_v5 = vld [vmem:[%s8155_s27 + $0x18] sm:$0xff]   ;;  %v7897_v6 = vld [vmem:[%s8155_s27 + $0x20] sm:$0xff]   ;;  %v7898_v7 = vld [vmem:[%s8155_s27 + $0x28] sm:$0xff]   ;;  %724 = vst [vmem:[#allocation2 + $0x30] sm:$0x1] %v723_v29  ;;  %vm2391_vm15 = vcmask 1046532  }
  0x1b   : > { %7434 = vmatmul.mubr.msk.bf16.vlgmr.msra.gmra.mxu0 %vm452_vm1, %v7894_v3  ;;  %v7899_v8 = vld [vmem:[%s8155_s27 + $0x30] sm:$0xff]   ;;  %v7900_v9 = vld [vmem:[%s8155_s27 + $0x38] sm:$0xff]   ;;  %v7901_v10 = vld [vmem:[%s8155_s27 + $0x40] sm:$0xff]   ;;  %699 = vst.msk [vmem:[#allocation2] sm:$0xf] %vm698_vm7, %v8043_v32  ;;  %s323_s28 = sand.u32 1, %s8033_s10  }
  0x1c   : > { %7437 = vmatprep.mubr.msk.bf16.mxu0 %vm452_vm1, %v7895_v4  ;;  %v7902_v11 = vld [vmem:[%s8155_s27 + $0x48] sm:$0xff]   ;;  %v7903_v12 = vld [vmem:[%s8155_s27 + $0x50] sm:$0xff]   ;;  %v7904_v13 = vld [vmem:[%s8155_s27 + $0x58] sm:$0xff]   ;;  %700 = vst.msk [vmem:[#allocation2 + $0x4] sm:$0xf] %vm698_vm7, %v8043_v32  ;;  %s6685_s29 = sshll.u32 %s323_s28, 7 }
  0x1d   : > { %v7905_v14 = vld [vmem:[%s8155_s27 + $0x60] sm:$0xff]   ;;  %v7906_v15 = vld [vmem:[%s8155_s27 + $0x68] sm:$0xff]   ;;  %v7907_v16 = vld [vmem:[%s8155_s27 + $0x70] sm:$0xff]   ;;  %702 = vst.msk [vmem:[#allocation2 + $0x8] sm:$0x1] %vm701_vm2, %v8043_v32  ;;  %s10804_s14 = scalar_lea.vmem [#allocation3], %s6685_s29 }
  0x1e   : > { %v7908_v17 = vld [vmem:[%s8155_s27 + $0x78] sm:$0xff]   ;;  %v719_v30 = vld [vmem:[#allocation2 + $0x24] sm:$0x1]  ;;  %704 = vst.msk [vmem:[#allocation2 + $0xcc] sm:$0xf] %vm698_vm7, %v8043_v32  ;;  %s7226_s16 = sshll.u32 %s8118_s13, 11 }
  0x1f   : > { %v720_v31 = vsel %vm8191_vm4, 0, %v719_v30  ;;  %705 = vst.msk [vmem:[#allocation2 + $0xd0] sm:$0xf] %vm698_vm7, %v8043_v32  ;;  %v778_v33 = vld [vmem:[#allocation2 + $0x38] sm:$0x1]  ;;  %s6619_s17 = sshll.u32 %s10804_s14, 4  ;;  %s10951_s22 = scalar_lea.hbm %s11010_s9, %s7226_s16  ;;  %s10953_s17 = int_to_ptr.vmem [resolvable:$true] %s6619_s17 }
  0x20   : > { %721 = vst [vmem:[#allocation2 + $0x24] sm:$0x1] %v720_v31  ;;  %706 = vst.msk [vmem:[#allocation2 + $0xd4] sm:$0x1] %vm701_vm2, %v8043_v32  ;;  %v779_v34 = vsel %vm8199_vm6, 0, %v778_v33  ;;  %s10961_s13 = scalar_lea.sflag [#allocation4], %s323_s28 }
  0x21   : > { %780 = vst [vmem:[#allocation2 + $0x38] sm:$0x1] %v779_v34  ;;  %v775_v35 = vld [vmem:[#allocation2 + $0x2c] sm:$0x1]  ;;  %v728_v37 = vld [vmem:[#allocation2 + $0x48] sm:$0x1]  ;;  %vm8804_vm2 = vmor %vm2390_vm14, %vm2391_vm15 }
  0x22   : > { %v776_v36 = vsel %vm8199_vm6, 0, %v775_v35  ;;  %v729_v38 = vsel %vm8191_vm4, 0, %v728_v37  ;;  %v710_v39 = vld [vmem:[#allocation2] sm:$0x1]  ;;  %v725_v40 = vld [vmem:[#allocation2 + $0x3c] sm:$0x1] }
  0x23   : > { %7438 = vmatmul.mubr.msk.bf16.gmra.mxu0 %vm452_vm1, %v7896_v5  ;;  %777 = vst [vmem:[#allocation2 + $0x2c] sm:$0x1] %v776_v36  ;;  %730 = vst [vmem:[#allocation2 + $0x48] sm:$0x1] %v729_v38  ;;  %v711_v41 = vsel %vm8191_vm4, 0, %v710_v39  ;;  %v726_v42 = vsel %vm8191_vm4, 0, %v725_v40 }
  0x24   : > { %7441 = vmatprep.mubr.msk.bf16.mxu0 %vm452_vm1, %v7897_v6  ;;  %712 = vst [vmem:[#allocation2] sm:$0x1] %v711_v41  ;;  %727 = vst [vmem:[#allocation2 + $0x3c] sm:$0x1] %v726_v42  ;;  %v784_v43 = vld [vmem:[#allocation2 + $0x50] sm:$0x1] }
  0x25   : > { %v785_v44 = vsel %vm8199_vm6, 0, %v784_v43  ;;  %v781_v45 = vld [vmem:[#allocation2 + $0x44] sm:$0x1]  ;;  %v1385_v46 = vld [vmem:[%s11004_s3] sm:$0xf]  ;;  %s7981_s23 = scalar_lea.vmem %s10953_s17, 2048 }
  0x26   : > { %786 = vst [vmem:[#allocation2 + $0x50] sm:$0x1] %v785_v44  ;;  %v782_v47 = vsel %vm8199_vm6, 0, %v781_v45  ;;  %7841 = vmatprep.subr.msk.bf16.mxu0 %vm501_vm0, %v1385_v46  ;;  %v2179_v48 = vsel %vm501_vm0, %v1385_v46, 0  ;;  %v1354_v50 = vld [vmem:[#allocation2 + $0x4] sm:$0xf]  ;;  %p7982_p11 = scmp.ne.s32.totalorder %s10953_s17, %s7981_s23 }
  0x27   : > { %783 = vst [vmem:[#allocation2 + $0x44] sm:$0x1] %v782_v47  ;;  %v734_v51 = vld [vmem:[#allocation2 + $0x60] sm:$0x1]  ;;  %7500 = vmatpush3.bf16.msra.mxu0 %v2179_v48  ;;  %v731_v54 = vld [vmem:[#allocation2 + $0x54] sm:$0x1] }
  0x28   : > { %v735_v53 = vsel %vm8191_vm4, 0, %v734_v51  ;;  %v732_v55 = vsel %vm8191_vm4, 0, %v731_v54  ;;  %v790_v56 = vld [vmem:[#allocation2 + $0x68] sm:$0x1]  ;;  %v787_v58 = vld [vmem:[#allocation2 + $0x5c] sm:$0x1]  ;;  %p7983_p12 = pnand %p7982_p11, %p8135_p5 }
  0x29   : > { %736 = vst [vmem:[#allocation2 + $0x60] sm:$0x1] %v735_v53  ;;  %733 = vst [vmem:[#allocation2 + $0x54] sm:$0x1] %v732_v55  ;;  %v791_v57 = vsel %vm8199_vm6, 0, %v790_v56  ;;  %v788_v59 = vsel %vm8199_vm6, 0, %v787_v58 }
  0x2a   : > { %792 = vst [vmem:[#allocation2 + $0x68] sm:$0x1] %v791_v57  ;;  %v766_v60 = vld [vmem:[#allocation2 + $0x8] sm:$0x1]  ;;  %789 = vst [vmem:[#allocation2 + $0x5c] sm:$0x1] %v788_v59  ;;  %p7984_p13 = pneg %p7983_p12 }
  0x2b   : > { %7442 = vmatmul.mubr.msk.bf16.gmra.mxu0 %vm452_vm1, %v7898_v7  ;;  %v1353_v49 = vld [vmem:[#allocation2] sm:$0xf]  ;;  %v767_v61 = vsel %vm8199_vm6, 0, %v766_v60  ;;  %v1415_v0 = vshll.u32 %v1354_v50, 16  ;;  %v1419_v1 = vshrl.u32 %v1354_v50, 16  ;;  %s8044_s24 = smov [#allocation3]  }
  0x2c   : > { %7445 = vmatprep.mubr.msk.bf16.mxu0 %vm452_vm1, %v7899_v8  ;;  %v6785_v52 = vcombine.low %v1353_v49, %v1354_v50  ;;  %768 = vst [vmem:[#allocation2 + $0x8] sm:$0x1] %v767_v61  ;;  %v1406_v62 = vshrl.u32 %v1353_v49, 16  ;;  %v1409_v63 = vshll.u32 %v1353_v49, 16  ;;  %vm1402_vm8 = vsmask.f32 3328 }
  0x2d   : > { %v1417_v4 = vrot.slane %v1415_v0, 5  ;;  %v1421_v5 = vrot.slane %v1419_v1, 4  ;;  %v740_v7 = vld [vmem:[#allocation2 + $0x78] sm:$0x1]  ;;  %vm1403_vm9 = vsmask.f32 7440 }
  0x2e   : > { %v1408_v2 = vrot.slane %v1406_v62, 4  ;;  %v1411_v3 = vrot.slane %v1409_v63, 5  ;;  %vm8257_vm10 = vmor %vm1402_vm8, %vm1403_vm9  ;;  %v737_v23 = vld [vmem:[#allocation2 + $0x6c] sm:$0x1]  ;;  %v796_v25 = vld [vmem:[#allocation2 + $0x80] sm:$0x1] }
  0x2f   : > { %v738_v24 = vsel %vm8191_vm4, 0, %v737_v23  ;;  %v797_v26 = vsel %vm8199_vm6, 0, %v796_v25  ;;  %v793_v27 = vld [vmem:[#allocation2 + $0x74] sm:$0x1]  ;;  %v8277_v29 = vld [vmem:[%s11004_s3 + $0x8] sm:$0xf] }
  0x30   : > { %v1412_v8 = vor.u32 %v1411_v3, %v1408_v2  ;;  %739 = vst [vmem:[#allocation2 + $0x6c] sm:$0x1] %v738_v24  ;;  %798 = vst [vmem:[#allocation2 + $0x80] sm:$0x1] %v797_v26  ;;  %v794_v28 = vsel %vm8199_vm6, 0, %v793_v27  ;;  %s7985_s25 = sshll.u32 %s8044_s24, 4  ;;  %s7986_s25 = int_to_ptr.vmem [resolvable:$false] %s7985_s25 }
  0x31   : > { %795 = vst [vmem:[#allocation2 + $0x74] sm:$0x1] %v794_v28  ;;  %v746_v30 = vld [vmem:[#allocation2 + $0x90] sm:$0x1]  ;;  %v743_v32 = vld [vmem:[#allocation2 + $0x84] sm:$0x1]  ;;  %p7988_p0 = scmp.lt.s32.totalorder %s10953_s17, %s7986_s25 }
  0x32   : > { %v747_v31 = vsel %vm8191_vm4, 0, %v746_v30  ;;  %v744_v33 = vsel %vm8191_vm4, 0, %v743_v32  ;;  %v802_v34 = vld [vmem:[#allocation2 + $0x98] sm:$0x1]  ;;  %v799_v36 = vld [vmem:[#allocation2 + $0x8c] sm:$0x1] }
  0x33   : > { %7446 = vmatmul.mubr.msk.bf16.gmra.mxu0 %vm452_vm1, %v7900_v9  ;;  %v8249_v6 = vld [vmem:[#allocation2 + $0x8] sm:$0x1]  ;;  %v1422_v9 = vor.u32 %v1421_v5, %v1417_v4  ;;  %748 = vst [vmem:[#allocation2 + $0x90] sm:$0x1] %v747_v31  ;;  %745 = vst [vmem:[#allocation2 + $0x84] sm:$0x1] %v744_v33 }
  0x34   : > { %7449 = vmatprep.mubr.msk.bf16.mxu0 %vm452_vm1, %v7901_v10  ;;  %v1425_v10 = vshll.u32 %v8249_v6, 16  ;;  %v803_v35 = vsel %vm8199_vm6, 0, %v802_v34  ;;  %v800_v37 = vsel %vm8199_vm6, 0, %v799_v36  ;;  %v752_v38 = vld [vmem:[#allocation2 + $0xa8] sm:$0x1]  ;;  %s7987_s26 = scalar_lea.vmem %s7986_s25, 4096 }
  0x35   : > { %804 = vst [vmem:[#allocation2 + $0x98] sm:$0x1] %v803_v35  ;;  %801 = vst [vmem:[#allocation2 + $0x8c] sm:$0x1] %v800_v37  ;;  %v753_v39 = vsel %vm8191_vm4, 0, %v752_v38  ;;  %p7989_p1 = scmp.lt.s32.totalorder %s7987_s26, %s7981_s23 }
  0x36   : > { %754 = vst [vmem:[#allocation2 + $0xa8] sm:$0x1] %v753_v39  ;;  %v749_v40 = vld [vmem:[#allocation2 + $0x9c] sm:$0x1]  ;;  %v808_v42 = vld [vmem:[#allocation2 + $0xb0] sm:$0x1] }
  0x37   : > { %v750_v41 = vsel %vm8191_vm4, 0, %v749_v40  ;;  %v809_v43 = vsel %vm8199_vm6, 0, %v808_v42  ;;  %v805_v44 = vld [vmem:[#allocation2 + $0xa4] sm:$0x1]  ;;  %v758_v46 = vld [vmem:[#allocation2 + $0xc0] sm:$0x1]  ;;  %p7990_p2 = por %p7989_p1, %p7988_p0 }
  0x38   : > { %751 = vst [vmem:[#allocation2 + $0x9c] sm:$0x1] %v750_v41  ;;  %810 = vst [vmem:[#allocation2 + $0xb0] sm:$0x1] %v809_v43  ;;  %v806_v45 = vsel %vm8199_vm6, 0, %v805_v44  ;;  %v759_v47 = vsel %vm8191_vm4, 0, %v758_v46 }
  0x39   : > { %807 = vst [vmem:[#allocation2 + $0xa4] sm:$0x1] %v806_v45  ;;  %760 = vst [vmem:[#allocation2 + $0xc0] sm:$0x1] %v759_v47  ;;  %v755_v48 = vld [vmem:[#allocation2 + $0xb4] sm:$0x1]  ;;  %p7991_p3 = pnand %p7990_p2, %p7984_p13 }
  0x3a   : > { %v756_v49 = vsel %vm8191_vm4, 0, %v755_v48  ;;  %v814_v50 = vld [vmem:[#allocation2 + $0xc8] sm:$0x1]  ;;  %v8308_v54 = vld [vmem:[%s11003_s2] ss:$0 sm:$0xff] }
  0x3b   : > { %7450 = vmatmul.mubr.msk.bf16.gmra.mxu0 %vm452_vm1, %v7902_v11  ;;  %v741_v11 = vsel %vm8191_vm4, 0, %v740_v7  ;;  %757 = vst [vmem:[#allocation2 + $0xb4] sm:$0x1] %v756_v49  ;;  %v815_v51 = vsel %vm8199_vm6, 0, %v814_v50  ;;  %vm916_vm11 = vsmask.f32 4368 }
  0x3c   : > { %7453 = vmatprep.mubr.msk.bf16.mxu0 %vm452_vm1, %v7903_v12  ;;  %742 = vst [vmem:[#allocation2 + $0x78] sm:$0x1] %v741_v11  ;;  %v1413_v12 = vrot.slane %v1412_v8, 4  ;;  %816 = vst [vmem:[#allocation2 + $0xc8] sm:$0x1] %v815_v51  ;;  %v2398_v7 = vrot.slane %v8249_v6, 5 }
  0x3d   : > { %v1241_v26 = vld [vmem:[#allocation2 + $0xc] sm:$0xf]  ;;  %vm8331_vm13 = vmor %vm708_vm3, %vm916_vm11  ;;  %v1252_v37 = vld [vmem:[#allocation2 + $0x20] sm:$0x1] }
  0x3e   : > { %v1418_v19 = vsel %vm8257_vm10, %v1413_v12, %v1417_v4 }
  0x43   : > { %7454 = vmatmul.mubr.msk.bf16.gmra.mxu0 %vm452_vm1, %v7904_v13  ;;  %v1423_v13 = vrot.slane %v1422_v9, 4 }
  0x44   : > { %7457 = vmatprep.mubr.msk.bf16.mxu0 %vm452_vm1, %v7905_v14  ;;  %v1427_v14 = vrot.slane %v1425_v10, 5 }
  0x46   : > { %v1428_v20 = vsel %vm8257_vm10, %v1423_v13, %v1427_v14  ;;  %v1248_v13 = vld [vmem:[#allocation2 + $0x18] sm:$0xf] }
  0x47   : > { %v6753_v22 = vcombine.low %v1418_v19, %v1428_v20  ;;  %v8324_v20 = vsel %vm501_vm0, %v8277_v29, 0 }
  0x49   : > { %7467 = vmatprep.mubr.msk.bf16.mxu1 %vm452_vm1, %v6753_v22 }
  0x4b   : > { %7458 = vmatmul.mubr.msk.bf16.gmra.mxu0 %vm452_vm1, %v7906_v15  ;;  %v1789_v15 = vld [vmem:[%s11004_s3 + $0x4] sm:$0xf] }
  0x4c   : > { %7461 = vmatprep.mubr.msk.bf16.mxu0 %vm452_vm1, %v7907_v16  ;;  %7840 = vmatprep.subr.msk.bf16.mxu1 %vm501_vm0, %v1789_v15 }
  0x53   : > { %7462 = vmatmul.mubr.msk.bf16.gmra.mxu0 %vm452_vm1, %v7908_v17  ;;  %v1887_v17 = vsel %vm501_vm0, %v1789_v15, 0 }
  0x54   : > { %7501 = vmatprep.mubr.msk.bf16.mxu0 %vm452_vm1, %v6785_v52  ;;  %7466 = vmatpush3.bf16.msra.mxu1 %v1887_v17  ;;  %v811_v52 = vld [vmem:[#allocation2 + $0xbc] sm:$0x1] }
  0x55   : > { %7842 = vmatprep.subr.msk.bf16.mxu1 %vm501_vm0, %v8277_v29  ;;  %v812_v53 = vsel %vm8199_vm6, 0, %v811_v52 }
  0x56   : > { %813 = vst [vmem:[#allocation2 + $0xbc] sm:$0x1] %v812_v53 }
  0xdb   : > { %v7435_v55 = vpop.f32.mrf.mxu0 }
  0xdc   : > { %v548_v56 = vadd.f32 %v7435_v55, %v8308_v54  ;;  %v1245_v55 = vld [vmem:[#allocation2 + $0x14] sm:$0x1] }
  0xdd   : > { %v539_v57 = vpop.f32.mrf.mxu0 }
  0xde   : > { %v668_v58 = vmax.f32 %v548_v56, 0.0  ;;  %v540_v59 = vadd.f32 %v8308_v54, %v539_v57 }
  0xdf   : > { %v7436_v60 = vpop.f32.mrf.mxu0 }
  0xe0   : > { %v7164_v61 = vpack.c.bf16 %v668_v58, %v668_v58  ;;  %v666_v62 = vmax.f32 %v540_v59, 0.0  ;;  %v551_v63 = vadd.f32 %v7436_v60, %v8308_v54 }
  0xe1   : > { %v542_v0 = vpop.f32.mrf.mxu0 }
  0xe2   : > { %v936_v1 = vshrl.u32 %v7164_v61, 16  ;;  %v7162_v2 = vpack.c.bf16 %v666_v62, %v666_v62  ;;  %v669_v3 = vmax.f32 %v551_v63, 0.0  ;;  %v543_v4 = vadd.f32 %v8308_v54, %v542_v0  ;;  %v1262_v63 = vld [vmem:[#allocation2 + $0x30] sm:$0xf] }
  0xe3   : > { %v7439_v5 = vpop.f32.mrf.mxu0  ;;  %v939_v9 = vshll.u32 %v7164_v61, 16 }
  0xe4   : > { %v938_v8 = vrot.slane %v936_v1, 7  ;;  %v919_v10 = vshrl.u32 %v7162_v2, 16  ;;  %v7165_v11 = vpack.c.bf16 %v669_v3, %v669_v3  ;;  %v922_v14 = vshll.u32 %v7162_v2, 16 }
  0xe5   : > { %v667_v15 = vmax.f32 %v543_v4, 0.0  ;;  %v564_v17 = vadd.f32 %v7439_v5, %v8308_v54  ;;  %v555_v19 = vpop.f32.mrf.mxu0 }
  0xe6   : > { %v941_v22 = vor.u32 %v939_v9, %v938_v8  ;;  %v942_v23 = vrot.slane %v938_v8, 4  ;;  %v921_v24 = vrot.slane %v919_v10, 7  ;;  %v944_v25 = vshrl.u32 %v7165_v11, 16 }
  0xe7   : > { %v947_v27 = vshll.u32 %v7165_v11, 16  ;;  %v7163_v28 = vpack.c.bf16 %v667_v15, %v667_v15  ;;  %v672_v30 = vmax.f32 %v564_v17, 0.0  ;;  %v556_v31 = vadd.f32 %v8308_v54, %v555_v19  ;;  %v7440_v32 = vpop.f32.mrf.mxu0  ;;  %v1255_v19 = vld [vmem:[#allocation2 + $0x24] sm:$0xf] }
  0xe8   : > { %v1249_v33 = vsel %vm8317_vm12, %v941_v22, %v1248_v13  ;;  %v924_v34 = vor.u32 %v922_v14, %v921_v24  ;;  %v925_v35 = vrot.slane %v921_v24, 4  ;;  %v946_v36 = vrot.slane %v944_v25, 7 }
  0xe9   : > { %1250 = vst [vmem:[#allocation2 + $0x18] sm:$0xf] %v1249_v33  ;;  %v927_v38 = vshrl.u32 %v7163_v28, 16  ;;  %v930_v39 = vshll.u32 %v7163_v28, 16  ;;  %v7168_v40 = vpack.c.bf16 %v672_v30, %v672_v30  ;;  %v670_v41 = vmax.f32 %v556_v31, 0.0  ;;  %v558_v42 = vpop.f32.mrf.mxu0 }
  0xea   : > { %v1242_v43 = vsel %vm8317_vm12, %v924_v34, %v1241_v26  ;;  %v949_v44 = vor.u32 %v947_v27, %v946_v36  ;;  %v951_v45 = vrot.slane %v946_v36, 4  ;;  %v567_v46 = vadd.f32 %v7440_v32, %v8308_v54  ;;  %v1266_v30 = vld [vmem:[#allocation2 + $0x38] sm:$0x1] }
  0xeb   : > { %1243 = vst [vmem:[#allocation2 + $0xc] sm:$0xf] %v1242_v43  ;;  %v929_v47 = vrot.slane %v927_v38, 7  ;;  %v970_v48 = vshrl.u32 %v7168_v40, 16  ;;  %v973_v49 = vshll.u32 %v7168_v40, 16  ;;  %v7166_v50 = vpack.c.bf16 %v670_v41, %v670_v41  ;;  %v7443_v51 = vpop.f32.mrf.mxu0 }
  0xec   : > { %v950_v52 = vsel %vm8331_vm13, %v942_v23, %v949_v44  ;;  %v1253_v53 = vsel %vm8191_vm4, %v951_v45, %v1252_v37  ;;  %v673_v56 = vmax.f32 %v567_v46, 0.0  ;;  %v559_v57 = vadd.f32 %v8308_v54, %v558_v42  ;;  %v1259_v41 = vld [vmem:[#allocation2 + $0x2c] sm:$0x1] }
  0xed   : > { %1251 = vst.msk [vmem:[#allocation2 + $0x1c] sm:$0xf] %vm698_vm7, %v950_v52  ;;  %1254 = vst [vmem:[#allocation2 + $0x20] sm:$0x1] %v1253_v53  ;;  %v932_v58 = vor.u32 %v930_v39, %v929_v47  ;;  %v934_v59 = vrot.slane %v929_v47, 4  ;;  %v972_v60 = vrot.slane %v970_v48, 7  ;;  %v571_v62 = vpop.f32.mrf.mxu0  ;;  %v580_v3 = vadd.f32 %v7443_v51, %v8308_v54 }
  0xee   : > { %v953_v61 = vshrl.u32 %v7166_v50, 16  ;;  %v956_v0 = vshll.u32 %v7166_v50, 16  ;;  %v7169_v1 = vpack.c.bf16 %v673_v56, %v673_v56  ;;  %v671_v2 = vmax.f32 %v559_v57, 0.0  ;;  %v2830_v47 = vld [vmem:[%s11004_s3 + $0xc] sm:$0xf] }
  0xef   : > { %v933_v4 = vsel %vm8331_vm13, %v925_v35, %v932_v58  ;;  %v1246_v5 = vsel %vm8191_vm4, %v934_v59, %v1245_v55  ;;  %v975_v8 = vor.u32 %v973_v49, %v972_v60  ;;  %v976_v9 = vrot.slane %v972_v60, 4  ;;  %v7444_v10 = vpop.f32.mrf.mxu0  ;;  %7843 = vmatprep.subr.msk.bf16.mxu0 %vm501_vm0, %v2830_v47  ;;  %v1276_v60 = vld [vmem:[#allocation2 + $0x48] sm:$0xf] }
  0xf0   : > { %1244 = vst.msk [vmem:[#allocation2 + $0x10] sm:$0xf] %vm698_vm7, %v933_v4  ;;  %1247 = vst [vmem:[#allocation2 + $0x14] sm:$0x1] %v1246_v5  ;;  %v955_v11 = vrot.slane %v953_v61, 7  ;;  %v978_v13 = vshrl.u32 %v7169_v1, 16  ;;  %v7167_v15 = vpack.c.bf16 %v671_v2, %v671_v2  ;;  %v572_v23 = vadd.f32 %v8308_v54, %v571_v62 }
  0xf1   : > { %v981_v14 = vshll.u32 %v7169_v1, 16  ;;  %v1263_v17 = vsel %vm8317_vm12, %v975_v8, %v1262_v63  ;;  %v676_v22 = vmax.f32 %v580_v3, 0.0  ;;  %v583_v24 = vadd.f32 %v7444_v10, %v8308_v54  ;;  %v574_v25 = vpop.f32.mrf.mxu0  ;;  %v1269_v4 = vld [vmem:[#allocation2 + $0x3c] sm:$0xf] }
  0xf2   : > { %1264 = vst [vmem:[#allocation2 + $0x30] sm:$0xf] %v1263_v17  ;;  %v958_v26 = vor.u32 %v956_v0, %v955_v11  ;;  %v959_v27 = vrot.slane %v955_v11, 4  ;;  %v980_v28 = vrot.slane %v978_v13, 7  ;;  %v961_v31 = vshrl.u32 %v7167_v15, 16 }
  0xf3   : > { %v964_v32 = vshll.u32 %v7167_v15, 16  ;;  %v7172_v33 = vpack.c.bf16 %v676_v22, %v676_v22  ;;  %v674_v34 = vmax.f32 %v572_v23, 0.0  ;;  %v677_v35 = vmax.f32 %v583_v24, 0.0  ;;  %v7447_v36 = vpop.f32.mrf.mxu0  ;;  %v1280_v17 = vld [vmem:[#allocation2 + $0x50] sm:$0x1] }
  0xf4   : > { %v1256_v37 = vsel %vm8317_vm12, %v958_v26, %v1255_v19  ;;  %v983_v38 = vor.u32 %v981_v14, %v980_v28  ;;  %v985_v39 = vrot.slane %v980_v28, 4  ;;  %v963_v40 = vrot.slane %v961_v31, 7 }
  0xf5   : > { %1257 = vst [vmem:[#allocation2 + $0x24] sm:$0xf] %v1256_v37  ;;  %v1004_v42 = vshrl.u32 %v7172_v33, 16  ;;  %v1007_v43 = vshll.u32 %v7172_v33, 16  ;;  %v7170_v44 = vpack.c.bf16 %v674_v34, %v674_v34  ;;  %v7173_v45 = vpack.c.bf16 %v677_v35, %v677_v35  ;;  %v587_v46 = vpop.f32.mrf.mxu0  ;;  %v8390_v37 = vld [vmem:[#allocation2 + $0xc] sm:$0xf] }
  0xf6   : > { %v984_v48 = vsel %vm8331_vm13, %v976_v9, %v983_v38  ;;  %v1267_v49 = vsel %vm8191_vm4, %v985_v39, %v1266_v30  ;;  %v966_v50 = vor.u32 %v964_v32, %v963_v40  ;;  %v968_v51 = vrot.slane %v963_v40, 4  ;;  %v8385_v32 = vld [vmem:[#allocation2 + $0x18] sm:$0xf] }
  0xf7   : > { %1265 = vst.msk [vmem:[#allocation2 + $0x34] sm:$0xf] %vm698_vm7, %v984_v48  ;;  %1268 = vst [vmem:[#allocation2 + $0x38] sm:$0x1] %v1267_v49  ;;  %v1006_v52 = vrot.slane %v1004_v42, 7  ;;  %v987_v53 = vshrl.u32 %v7170_v44, 16  ;;  %v7448_v57 = vpop.f32.mrf.mxu0  ;;  %v575_v62 = vadd.f32 %v8308_v54, %v574_v25  ;;  %v596_v8 = vadd.f32 %v7447_v36, %v8308_v54 }
  0xf8   : > { %v990_v55 = vshll.u32 %v7170_v44, 16  ;;  %v1012_v56 = vshrl.u32 %v7173_v45, 16  ;;  %v967_v58 = vsel %vm8331_vm13, %v959_v27, %v966_v50  ;;  %v1260_v59 = vsel %vm8191_vm4, %v968_v51, %v1259_v41  ;;  %v8378_v26 = vld [vmem:[#allocation2 + $0x10] sm:$0xf]  ;;  %v1273_v44 = vld [vmem:[#allocation2 + $0x44] sm:$0x1] }
  0xf9   : > { %v1015_v61 = vshll.u32 %v7173_v45, 16  ;;  %1258 = vst.msk [vmem:[#allocation2 + $0x28] sm:$0xf] %vm698_vm7, %v967_v58  ;;  %1261 = vst [vmem:[#allocation2 + $0x2c] sm:$0x1] %v1260_v59  ;;  %v1009_v63 = vor.u32 %v1007_v43, %v1006_v52  ;;  %v1010_v0 = vrot.slane %v1006_v52, 4  ;;  %v590_v3 = vpop.f32.mrf.mxu0  ;;  %v588_v9 = vadd.f32 %v8308_v54, %v587_v46 }
  0xfa   : > { %v989_v1 = vrot.slane %v987_v53, 7  ;;  %v1014_v2 = vrot.slane %v1012_v56, 7  ;;  %v675_v5 = vmax.f32 %v575_v62, 0.0  ;;  %v599_v10 = vadd.f32 %v7448_v57, %v8308_v54  ;;  %v1290_v48 = vld [vmem:[#allocation2 + $0x60] sm:$0xf] }
  0xfb   : > { %v1277_v11 = vsel %vm8317_vm12, %v1009_v63, %v1276_v60  ;;  %v8376_v19 = vpop.f32.mrf.mxu0  ;;  %v680_v24 = vmax.f32 %v596_v8, 0.0  ;;  %v678_v25 = vmax.f32 %v588_v9, 0.0  ;;  %v591_v31 = vadd.f32 %v8308_v54, %v590_v3  ;;  %v1283_v57 = vld [vmem:[#allocation2 + $0x54] sm:$0xf]  ;;  %v1294_v62 = vld [vmem:[#allocation2 + $0x68] sm:$0x1] }
  0xfc   : > { %v992_v13 = vor.u32 %v990_v55, %v989_v1  ;;  %v993_v14 = vrot.slane %v989_v1, 4  ;;  %v1017_v15 = vor.u32 %v1015_v61, %v1014_v2  ;;  %1278 = vst [vmem:[#allocation2 + $0x48] sm:$0xf] %v1277_v11  ;;  %v1019_v22 = vrot.slane %v1014_v2, 4 }
  0xfd   : > { %v7171_v23 = vpack.c.bf16 %v675_v5, %v675_v5  ;;  %v681_v30 = vmax.f32 %v599_v10, 0.0  ;;  %v7176_v36 = vpack.c.bf16 %v680_v24, %v680_v24  ;;  %v603_v38 = vpop.f32.mrf.mxu0  ;;  %v7174_v39 = vpack.c.bf16 %v678_v25, %v678_v25  ;;  %v8403_v5 = vld [vmem:[#allocation2 + $0x1c] sm:$0xf] }
  0xfe   : > { %v1270_v27 = vsel %vm8317_vm12, %v992_v13, %v1269_v4  ;;  %v1018_v28 = vsel %vm8331_vm13, %v1010_v0, %v1017_v15  ;;  %v1281_v33 = vsel %vm8191_vm4, %v1019_v22, %v1280_v17  ;;  %v679_v41 = vmax.f32 %v591_v31, 0.0 }
  0xff   : > { %1271 = vst [vmem:[#allocation2 + $0x3c] sm:$0xf] %v1270_v27  ;;  %1279 = vst.msk [vmem:[#allocation2 + $0x4c] sm:$0xf] %vm698_vm7, %v1018_v28  ;;  %v995_v34 = vshrl.u32 %v7171_v23, 16  ;;  %v998_v35 = vshll.u32 %v7171_v23, 16  ;;  %v7177_v40 = vpack.c.bf16 %v681_v30, %v681_v30  ;;  %v6786_v42 = vcombine.low %v8390_v37, %v8378_v26  ;;  %v7452_v59 = vpop.f32.mrf.mxu0 }
 0x100   : > { %1282 = vst [vmem:[#allocation2 + $0x50] sm:$0x1] %v1281_v33  ;;  %v1038_v45 = vshrl.u32 %v7176_v36, 16  ;;  %v1041_v46 = vshll.u32 %v7176_v36, 16  ;;  %v1454_v47 = vshrl.u32 %v8385_v32, 16  ;;  %v1021_v49 = vshrl.u32 %v7174_v39, 16 }
 0x101   : > { %v997_v43 = vrot.slane %v995_v34, 7  ;;  %v1024_v50 = vshll.u32 %v7174_v39, 16  ;;  %v1046_v51 = vshrl.u32 %v7177_v40, 16  ;;  %v1049_v52 = vshll.u32 %v7177_v40, 16  ;;  %7502 = vmatmul.mubr.msk.bf16.vlgmr.msra.gmra.mxu0 %vm452_vm1, %v6786_v42  ;;  %v606_v22 = vpop.f32.mrf.mxu0  ;;  %v1359_v23 = vld [vmem:[#allocation2 + $0x24] sm:$0xf] }
 0x102   : > { %v1040_v56 = vrot.slane %v1038_v45, 7  ;;  %v7175_v58 = vpack.c.bf16 %v679_v41, %v679_v41  ;;  %v1023_v60 = vrot.slane %v1021_v49, 7  ;;  %v8396_v63 = vrot.slane %v1454_v47, 4 }
 0x103   : > { %v1000_v53 = vor.u32 %v998_v35, %v997_v43  ;;  %v1002_v55 = vrot.slane %v997_v43, 4  ;;  %v1048_v61 = vrot.slane %v1046_v51, 7  ;;  %v1457_v0 = vshll.u32 %v8385_v32, 16  ;;  %v1287_v35 = vld [vmem:[#allocation2 + $0x5c] sm:$0x1] }
 0x104   : > { %v1043_v3 = vor.u32 %v1041_v46, %v1040_v56  ;;  %v1044_v4 = vrot.slane %v1040_v56, 4  ;;  %v1026_v8 = vor.u32 %v1024_v50, %v1023_v60  ;;  %v1027_v9 = vrot.slane %v1023_v60, 4  ;;  %v8426_v46 = vld [vmem:[#allocation2 + $0x28] sm:$0xf] }
 0x105   : > { %v1001_v1 = vsel %vm8331_vm13, %v993_v14, %v1000_v53  ;;  %v1274_v2 = vsel %vm8191_vm4, %v1002_v55, %v1273_v44  ;;  %v1051_v10 = vor.u32 %v1049_v52, %v1048_v61  ;;  %v1053_v11 = vrot.slane %v1048_v61, 4 }
 0x106   : > { %1272 = vst.msk [vmem:[#allocation2 + $0x40] sm:$0xf] %vm698_vm7, %v1001_v1  ;;  %1275 = vst [vmem:[#allocation2 + $0x44] sm:$0x1] %v1274_v2  ;;  %v1291_v13 = vsel %vm8317_vm12, %v1043_v3, %v1290_v48  ;;  %v1029_v15 = vshrl.u32 %v7175_v58, 16  ;;  %v1032_v17 = vshll.u32 %v7175_v58, 16  ;;  %v1284_v24 = vsel %vm8317_vm12, %v1026_v8, %v1283_v57  ;;  %v8439_v57 = vpop.f32.mrf.mxu0 }
 0x107   : > { %v8408_v14 = vrot.slane %v1457_v0, 5  ;;  %1292 = vst [vmem:[#allocation2 + $0x60] sm:$0xf] %v1291_v13  ;;  %v1052_v25 = vsel %vm8331_vm13, %v1044_v4, %v1051_v10  ;;  %v1295_v27 = vsel %vm8191_vm4, %v1053_v11, %v1294_v62  ;;  %v1467_v28 = vshrl.u32 %v8403_v5, 16  ;;  %1285 = vst [vmem:[#allocation2 + $0x54] sm:$0xf] %v1284_v24 }
 0x108   : > { %1293 = vst.msk [vmem:[#allocation2 + $0x64] sm:$0xf] %vm698_vm7, %v1052_v25  ;;  %1296 = vst [vmem:[#allocation2 + $0x68] sm:$0x1] %v1295_v27  ;;  %v1031_v30 = vrot.slane %v1029_v15, 7  ;;  %v6787_v31 = vcombine.low %v8385_v32, %v8403_v5  ;;  %v612_v33 = vadd.f32 %v8376_v19, %v8308_v54  ;;  %v604_v34 = vadd.f32 %v8308_v54, %v603_v38  ;;  %v619_v25 = vpop.f32.mrf.mxu0 }
 0x109   : > { %v615_v36 = vadd.f32 %v7452_v59, %v8308_v54  ;;  %v607_v39 = vadd.f32 %v8308_v54, %v606_v22  ;;  %v1478_v40 = vshrl.u32 %v1359_v23, 16  ;;  %v1481_v41 = vshll.u32 %v1359_v23, 16  ;;  %v1304_v62 = vld [vmem:[#allocation2 + $0x78] sm:$0xf]  ;;  %v1297_v0 = vld [vmem:[#allocation2 + $0x6c] sm:$0xf] }
 0x10a   : > { %v1034_v42 = vor.u32 %v1032_v17, %v1031_v30  ;;  %v1036_v43 = vrot.slane %v1031_v30, 4  ;;  %7505 = vmatprep.mubr.msk.bf16.mxu0 %vm452_vm1, %v6787_v31  ;;  %v684_v44 = vmax.f32 %v612_v33, 0.0  ;;  %v682_v45 = vmax.f32 %v604_v34, 0.0  ;;  %v1308_v10 = vld [vmem:[#allocation2 + $0x80] sm:$0x1] }
 0x10b   : > { %v685_v32 = vmax.f32 %v615_v36, 0.0  ;;  %v683_v47 = vmax.f32 %v607_v39, 0.0  ;;  %v8428_v19 = vrot.slane %v1478_v40, 4  ;;  %v8430_v38 = vrot.slane %v1481_v41, 5  ;;  %v1301_v22 = vld [vmem:[#allocation2 + $0x74] sm:$0x1] }
 0x10c   : > { %v1035_v48 = vsel %vm8331_vm13, %v1027_v9, %v1034_v42  ;;  %v1288_v49 = vsel %vm8191_vm4, %v1036_v43, %v1287_v35  ;;  %v7180_v50 = vpack.c.bf16 %v684_v44, %v684_v44  ;;  %v7178_v51 = vpack.c.bf16 %v682_v45, %v682_v45  ;;  %v8446_v40 = vld [vmem:[#allocation2 + $0x14] sm:$0x1] }
 0x10d   : > { %1286 = vst.msk [vmem:[#allocation2 + $0x58] sm:$0xf] %vm698_vm7, %v1035_v48  ;;  %1289 = vst [vmem:[#allocation2 + $0x5c] sm:$0x1] %v1288_v49  ;;  %v7181_v52 = vpack.c.bf16 %v685_v32, %v685_v32  ;;  %v7179_v53 = vpack.c.bf16 %v683_v47, %v683_v47  ;;  %v1491_v55 = vshrl.u32 %v8426_v46, 16  ;;  %v6788_v56 = vcombine.low %v1359_v23, %v8426_v46  ;;  %v7456_v49 = vpop.f32.mrf.mxu0 }
 0x10e   : > { %v1072_v58 = vshrl.u32 %v7180_v50, 16  ;;  %v1075_v59 = vshll.u32 %v7180_v50, 16  ;;  %v1055_v60 = vshrl.u32 %v7178_v51, 16  ;;  %v1058_v61 = vshll.u32 %v7178_v51, 16  ;;  %v8452_v44 = vld [vmem:[#allocation2 + $0x34] sm:$0xf] }
 0x10f   : > { %v1080_v1 = vshrl.u32 %v7181_v52, 16  ;;  %v1083_v2 = vshll.u32 %v7181_v52, 16  ;;  %v1063_v3 = vshrl.u32 %v7179_v53, 16  ;;  %v1066_v4 = vshll.u32 %v7179_v53, 16  ;;  %7506 = vmatmul.mubr.msk.bf16.gmra.mxu0 %vm452_vm1, %v6788_v56  ;;  %v8673_v29 = vld [vmem:[#allocation2 + $0x68] sm:$0x1] }
 0x110   : > { %v1074_v8 = vrot.slane %v1072_v58, 7  ;;  %v1057_v9 = vrot.slane %v1055_v60, 7  ;;  %v1430_v11 = vshrl.u32 %v8390_v37, 16  ;;  %v1433_v13 = vshll.u32 %v8390_v37, 16 }
 0x111   : > { %v1082_v15 = vrot.slane %v1080_v1, 7  ;;  %v1065_v17 = vrot.slane %v1063_v3, 7  ;;  %v1439_v23 = vshll.u32 %v8378_v26, 16  ;;  %v1443_v24 = vshrl.u32 %v8378_v26, 16  ;;  %v1361_v26 = vld [vmem:[#allocation2 + $0x30] sm:$0xf] }
 0x112   : > { %v1077_v27 = vor.u32 %v1075_v59, %v1074_v8  ;;  %v1078_v30 = vrot.slane %v1074_v8, 4  ;;  %v1060_v31 = vor.u32 %v1058_v61, %v1057_v9  ;;  %v1061_v33 = vrot.slane %v1057_v9, 4 }
 0x113   : > { %v1085_v34 = vor.u32 %v1083_v2, %v1082_v15  ;;  %v1087_v35 = vrot.slane %v1082_v15, 4  ;;  %v1068_v36 = vor.u32 %v1066_v4, %v1065_v17  ;;  %v1070_v39 = vrot.slane %v1065_v17, 4  ;;  %v1388_v2 = vld [vmem:[#allocation2 + $0x20] sm:$0x1] }
 0x114   : > { %v1305_v37 = vsel %vm8317_vm12, %v1077_v27, %v1304_v62  ;;  %v1298_v41 = vsel %vm8317_vm12, %v1060_v31, %v1297_v0  ;;  %v1432_v42 = vrot.slane %v1430_v11, 4  ;;  %v1435_v43 = vrot.slane %v1433_v13, 5  ;;  %v8487_v31 = vld [vmem:[#allocation2 + $0x3c] sm:$0xf] }
 0x115   : > { %1306 = vst [vmem:[#allocation2 + $0x78] sm:$0xf] %v1305_v37  ;;  %1299 = vst [vmem:[#allocation2 + $0x6c] sm:$0xf] %v1298_v41  ;;  %v1086_v45 = vsel %vm8331_vm13, %v1078_v30, %v1085_v34  ;;  %v1309_v32 = vsel %vm8191_vm4, %v1087_v35, %v1308_v10  ;;  %v1069_v47 = vsel %vm8331_vm13, %v1061_v33, %v1068_v36  ;;  %v1441_v51 = vrot.slane %v1439_v23, 5  ;;  %v622_v10 = vpop.f32.mrf.mxu0 }
 0x116   : > { %v1302_v48 = vsel %vm8191_vm4, %v1070_v39, %v1301_v22  ;;  %1307 = vst.msk [vmem:[#allocation2 + $0x7c] sm:$0xf] %vm698_vm7, %v1086_v45  ;;  %1310 = vst [vmem:[#allocation2 + $0x80] sm:$0x1] %v1309_v32  ;;  %v1436_v50 = vor.u32 %v1435_v43, %v1432_v42  ;;  %v1445_v52 = vrot.slane %v1443_v24, 4  ;;  %v1449_v53 = vshll.u32 %v8446_v40, 16 }
 0x117   : > { %1300 = vst.msk [vmem:[#allocation2 + $0x70] sm:$0xf] %vm698_vm7, %v1069_v47  ;;  %1303 = vst [vmem:[#allocation2 + $0x74] sm:$0x1] %v1302_v48  ;;  %v2405_v56 = vrot.slane %v8446_v40, 5  ;;  %v1502_v58 = vshrl.u32 %v1361_v26, 16  ;;  %v6789_v1 = vcombine.low %v1361_v26, %v8452_v44  ;;  %v628_v8 = vadd.f32 %v8439_v57, %v8308_v54 }
 0x118   : > { %v1505_v59 = vshll.u32 %v1361_v26, 16  ;;  %v1515_v60 = vshrl.u32 %v8452_v44, 16  ;;  %v1437_v61 = vrot.slane %v1436_v50, 4  ;;  %v1446_v62 = vor.u32 %v1445_v52, %v1441_v51  ;;  %v8494_v37 = vld [vmem:[%s11004_s3 + $0x10] sm:$0xf]  ;;  %v8500_v50 = vpop.f32.mrf.mxu0 }
 0x119   : > { %v1451_v0 = vrot.slane %v1449_v53, 5  ;;  %v8468_v3 = vrot.slane %v1502_v58, 4  ;;  %v1460_v9 = vor.u32 %v8408_v14, %v8396_v63  ;;  %7509 = vmatprep.mubr.msk.bf16.mxu0 %vm452_vm1, %v6789_v1  ;;  %v1463_v15 = vshll.u32 %v8403_v5, 16  ;;  %v1318_v45 = vld [vmem:[#allocation2 + $0x90] sm:$0xf] }
 0x11a   : > { %v8470_v4 = vrot.slane %v1505_v59, 5  ;;  %v1442_v11 = vsel %vm8257_vm10, %v1437_v61, %v1441_v51  ;;  %v1447_v13 = vrot.slane %v1446_v62, 4  ;;  %v1469_v17 = vrot.slane %v1467_v28, 4  ;;  %v8508_v1 = vld [vmem:[#allocation2 + $0x40] sm:$0xf] }
 0x11b   : > { %v688_v22 = vmax.f32 %v628_v8, 0.0  ;;  %v1461_v23 = vrot.slane %v1460_v9, 4  ;;  %v1473_v24 = vshll.u32 %v1388_v2, 16  ;;  %v620_v57 = vadd.f32 %v8308_v54, %v619_v25 }
 0x11c   : > { %v1452_v63 = vsel %vm8257_vm10, %v1447_v13, %v1451_v0  ;;  %v1465_v14 = vrot.slane %v1463_v15, 5  ;;  %v631_v27 = vadd.f32 %v7456_v49, %v8308_v54  ;;  %v623_v30 = vadd.f32 %v8308_v54, %v622_v10  ;;  %v1315_v13 = vld [vmem:[#allocation2 + $0x8c] sm:$0x1] }
 0x11d   : > { %v6754_v33 = vcombine.low %v1442_v11, %v1452_v63  ;;  %v7184_v34 = vpack.c.bf16 %v688_v22, %v688_v22  ;;  %v1475_v35 = vrot.slane %v1473_v24, 5  ;;  %v686_v5 = vmax.f32 %v620_v57, 0.0  ;;  %v1322_v11 = vld [vmem:[#allocation2 + $0x98] sm:$0x1]  ;;  %v8512_v24 = vld [vmem:[#allocation2 + $0x2c] sm:$0x1]  ;;  %v635_v57 = vpop.f32.mrf.mxu0 }
 0x11e   : > { %v1466_v28 = vsel %vm8257_vm10, %v1461_v23, %v1465_v14  ;;  %v1470_v36 = vor.u32 %v1469_v17, %v1465_v14  ;;  %v689_v39 = vmax.f32 %v631_v27, 0.0  ;;  %v687_v25 = vmax.f32 %v623_v30, 0.0 }
 0x11f   : > { %7468 = vmatmul.mubr.msk.bf16.vlgmr.msra.gmra.mxu1 %vm452_vm1, %v6754_v33  ;;  %v1106_v41 = vshrl.u32 %v7184_v34, 16  ;;  %v1109_v42 = vshll.u32 %v7184_v34, 16  ;;  %v7182_v43 = vpack.c.bf16 %v686_v5, %v686_v5  ;;  %v1526_v26 = vshrl.u32 %v8487_v31, 16  ;;  %v1365_v33 = vld [vmem:[#allocation2 + $0x48] sm:$0xf] }
 0x120   : > { %7534 = vmatpush3.bf16.msra.mxu1 %v8324_v20  ;;  %v1471_v32 = vrot.slane %v1470_v36, 4  ;;  %v7185_v47 = vpack.c.bf16 %v689_v39, %v689_v39  ;;  %v7183_v48 = vpack.c.bf16 %v687_v25, %v687_v25  ;;  %v1529_v49 = vshll.u32 %v8487_v31, 16  ;;  %v1311_v20 = vld [vmem:[#allocation2 + $0x84] sm:$0xf] }
 0x121   : > { %v1108_v51 = vrot.slane %v1106_v41, 7  ;;  %v1089_v52 = vshrl.u32 %v7182_v43, 16  ;;  %v1092_v53 = vshll.u32 %v7182_v43, 16  ;;  %v8502_v58 = vrot.slane %v1526_v26, 4  ;;  %7844 = vmatprep.subr.msk.bf16.mxu1 %vm501_vm0, %v8494_v37 }
 0x122   : > { %v1476_v59 = vsel %vm8257_vm10, %v1471_v32, %v1475_v35  ;;  %v1114_v61 = vshrl.u32 %v7185_v47, 16  ;;  %v1117_v62 = vshll.u32 %v7185_v47, 16  ;;  %v1097_v0 = vshrl.u32 %v7183_v48, 16  ;;  %v7460_v32 = vpop.f32.mrf.mxu0 }
 0x123   : > { %v1111_v2 = vor.u32 %v1109_v42, %v1108_v51  ;;  %v1112_v8 = vrot.slane %v1108_v51, 4  ;;  %v6755_v9 = vcombine.low %v1466_v28, %v1476_v59  ;;  %v1091_v10 = vrot.slane %v1089_v52, 7  ;;  %v8525_v42 = vld [vmem:[#allocation2 + $0x4c] sm:$0xf]  ;;  %v8543_v59 = vld [vmem:[#allocation2 + $0x38] sm:$0x1] }
 0x124   : > { %v1116_v15 = vrot.slane %v1114_v61, 7  ;;  %v1099_v17 = vrot.slane %v1097_v0, 7  ;;  %v1100_v22 = vshll.u32 %v7183_v48, 16  ;;  %v8510_v23 = vrot.slane %v1529_v49, 5 }
 0x125   : > { %v1319_v63 = vsel %vm8317_vm12, %v1111_v2, %v1318_v45  ;;  %7471 = vmatprep.mubr.msk.bf16.mxu1 %vm452_vm1, %v6755_v9  ;;  %v1094_v14 = vor.u32 %v1092_v53, %v1091_v10  ;;  %v1095_v27 = vrot.slane %v1091_v10, 4  ;;  %v1539_v30 = vshrl.u32 %v8508_v1, 16  ;;  %v638_v9 = vpop.f32.mrf.mxu0 }
 0x126   : > { %1320 = vst [vmem:[#allocation2 + $0x90] sm:$0xf] %v1319_v63  ;;  %v1119_v34 = vor.u32 %v1117_v62, %v1116_v15  ;;  %v1121_v35 = vrot.slane %v1116_v15, 4  ;;  %v1102_v5 = vor.u32 %v1100_v22, %v1099_v17  ;;  %v1104_v28 = vrot.slane %v1099_v17, 4 }
 0x127   : > { %v1312_v36 = vsel %vm8317_vm12, %v1094_v14, %v1311_v20  ;;  %v6790_v39 = vcombine.low %v8487_v31, %v8508_v1  ;;  %v1484_v25 = vor.u32 %v8430_v38, %v8428_v19  ;;  %v1487_v41 = vshll.u32 %v8426_v46, 16 }
 0x128   : > { %1313 = vst [vmem:[#allocation2 + $0x84] sm:$0xf] %v1312_v36  ;;  %v1120_v43 = vsel %vm8331_vm13, %v1112_v8, %v1119_v34  ;;  %v1323_v26 = vsel %vm8191_vm4, %v1121_v35, %v1322_v11  ;;  %v1103_v45 = vsel %vm8331_vm13, %v1095_v27, %v1102_v5  ;;  %v1316_v31 = vsel %vm8191_vm4, %v1104_v28, %v1315_v13  ;;  %v8567_v5 = vld [vmem:[#allocation2 + $0x58] sm:$0xf] }
 0x129   : > { %1321 = vst.msk [vmem:[#allocation2 + $0x94] sm:$0xf] %vm698_vm7, %v1120_v43  ;;  %1324 = vst [vmem:[#allocation2 + $0x98] sm:$0x1] %v1323_v26  ;;  %7510 = vmatmul.mubr.msk.bf16.gmra.mxu0 %vm452_vm1, %v6790_v39  ;;  %v1485_v19 = vrot.slane %v1484_v25, 4  ;;  %v1489_v38 = vrot.slane %v1487_v41, 5  ;;  %v6791_v53 = vcombine.low %v1365_v33, %v8525_v42  ;;  %v644_v0 = vadd.f32 %v8500_v50, %v8308_v54 }
 0x12a   : > { %1314 = vst.msk [vmem:[#allocation2 + $0x88] sm:$0xf] %vm698_vm7, %v1103_v45  ;;  %1317 = vst [vmem:[#allocation2 + $0x8c] sm:$0x1] %v1316_v31  ;;  %v1493_v47 = vrot.slane %v1491_v55, 4  ;;  %v1497_v48 = vshll.u32 %v8512_v24, 16  ;;  %v1508_v2 = vor.u32 %v8470_v4, %v8468_v3  ;;  %v636_v22 = vadd.f32 %v8308_v54, %v635_v57 }
 0x12b   : > { %v1550_v49 = vshrl.u32 %v1365_v33, 16  ;;  %v1553_v51 = vshll.u32 %v1365_v33, 16  ;;  %v1563_v52 = vshrl.u32 %v8525_v42, 16  ;;  %v1490_v20 = vsel %vm8257_vm10, %v1485_v19, %v1489_v38  ;;  %7513 = vmatprep.mubr.msk.bf16.mxu0 %vm452_vm1, %v6791_v53  ;;  %v1367_v33 = vld [vmem:[#allocation2 + $0x54] sm:$0xf] }
 0x12c   : > { %v1494_v61 = vor.u32 %v1493_v47, %v1489_v38  ;;  %v1499_v62 = vrot.slane %v1497_v48, 5  ;;  %v1511_v8 = vshll.u32 %v8452_v44, 16  ;;  %v692_v11 = vmax.f32 %v644_v0, 0.0  ;;  %v1332_v38 = vld [vmem:[#allocation2 + $0xa8] sm:$0xf] }
 0x12d   : > { %v8549_v46 = vrot.slane %v1550_v49, 4  ;;  %v8551_v55 = vrot.slane %v1553_v51, 5  ;;  %v1517_v13 = vrot.slane %v1515_v60, 4  ;;  %v1521_v15 = vshll.u32 %v8543_v59, 16 }
 0x12e   : > { %v1495_v10 = vrot.slane %v1494_v61, 4  ;;  %v1509_v50 = vrot.slane %v1508_v2, 4  ;;  %v1513_v17 = vrot.slane %v1511_v8, 5  ;;  %v647_v63 = vadd.f32 %v7460_v32, %v8308_v54 }
 0x12f   : > { %v7188_v3 = vpack.c.bf16 %v692_v11, %v692_v11  ;;  %v1523_v4 = vrot.slane %v1521_v15, 5  ;;  %v639_v27 = vadd.f32 %v8308_v54, %v638_v9  ;;  %v690_v35 = vmax.f32 %v636_v22, 0.0  ;;  %v8570_v54 = vpop.f32.mrf.mxu0 }
 0x130   : > { %v1500_v14 = vsel %vm8257_vm10, %v1495_v10, %v1499_v62  ;;  %v1514_v44 = vsel %vm8257_vm10, %v1509_v50, %v1513_v17  ;;  %v1518_v60 = vor.u32 %v1517_v13, %v1513_v17  ;;  %v693_v36 = vmax.f32 %v647_v63, 0.0  ;;  %v1325_v13 = vld [vmem:[#allocation2 + $0x9c] sm:$0xf]  ;;  %v1336_v50 = vld [vmem:[#allocation2 + $0xb0] sm:$0x1] }
 0x131   : > { %v6756_v34 = vcombine.low %v1490_v20, %v1500_v14  ;;  %v1140_v28 = vshrl.u32 %v7188_v3, 16  ;;  %v1143_v57 = vshll.u32 %v7188_v3, 16  ;;  %v691_v39 = vmax.f32 %v639_v27, 0.0  ;;  %v651_v10 = vpop.f32.mrf.mxu0  ;;  %v8583_v27 = vld [vmem:[#allocation2 + $0x44] sm:$0x1] }
 0x132   : > { %v1519_v25 = vrot.slane %v1518_v60, 4  ;;  %v7186_v41 = vpack.c.bf16 %v690_v35, %v690_v35  ;;  %v1574_v43 = vshrl.u32 %v1367_v33, 16  ;;  %v1577_v26 = vshll.u32 %v1367_v33, 16 }
 0x133   : > { %7472 = vmatmul.mubr.msk.bf16.gmra.mxu1 %vm452_vm1, %v6756_v34  ;;  %v1142_v45 = vrot.slane %v1140_v28, 7  ;;  %v7189_v31 = vpack.c.bf16 %v693_v36, %v693_v36  ;;  %v7187_v32 = vpack.c.bf16 %v691_v39, %v691_v39  ;;  %v1587_v19 = vshrl.u32 %v8567_v5, 16 }
 0x134   : > { %v1524_v47 = vsel %vm8257_vm10, %v1519_v25, %v1523_v4  ;;  %v1123_v48 = vshrl.u32 %v7186_v41, 16  ;;  %v1126_v49 = vshll.u32 %v7186_v41, 16  ;;  %v8575_v51 = vrot.slane %v1574_v43, 4  ;;  %v1329_v4 = vld [vmem:[#allocation2 + $0xa4] sm:$0x1]  ;;  %v7464_v43 = vpop.f32.mrf.mxu0 }
 0x135   : > { %v1145_v53 = vor.u32 %v1143_v57, %v1142_v45  ;;  %v1146_v20 = vrot.slane %v1142_v45, 4  ;;  %v6757_v61 = vcombine.low %v1514_v44, %v1524_v47  ;;  %v1148_v62 = vshrl.u32 %v7189_v31, 16  ;;  %v8593_v41 = vld [vmem:[#allocation2 + $0x64] sm:$0xf]  ;;  %v8605_v47 = vld [vmem:[#allocation2 + $0x50] sm:$0x1] }
 0x136   : > { %v1125_v0 = vrot.slane %v1123_v48, 7  ;;  %v1151_v2 = vshll.u32 %v7189_v31, 16  ;;  %v1131_v8 = vshrl.u32 %v7187_v32, 16  ;;  %v1134_v9 = vshll.u32 %v7187_v32, 16 }
 0x137   : > { %v1333_v11 = vsel %vm8317_vm12, %v1145_v53, %v1332_v38  ;;  %7475 = vmatprep.mubr.msk.bf16.mxu1 %vm452_vm1, %v6757_v61  ;;  %v1150_v15 = vrot.slane %v1148_v62, 7  ;;  %v8580_v17 = vrot.slane %v1577_v26, 5  ;;  %v6792_v22 = vcombine.low %v1367_v33, %v8567_v5  ;;  %v1369_v33 = vld [vmem:[#allocation2 + $0x60] sm:$0xf] }
 0x138   : > { %1334 = vst [vmem:[#allocation2 + $0xa8] sm:$0xf] %v1333_v11  ;;  %v1128_v63 = vor.u32 %v1126_v49, %v1125_v0  ;;  %v1129_v14 = vrot.slane %v1125_v0, 4  ;;  %v1133_v3 = vrot.slane %v1131_v8, 7  ;;  %v1532_v34 = vor.u32 %v8510_v23, %v8502_v58 }
 0x139   : > { %v1153_v44 = vor.u32 %v1151_v2, %v1150_v15  ;;  %v1155_v60 = vrot.slane %v1150_v15, 4  ;;  %7514 = vmatmul.mubr.msk.bf16.gmra.mxu0 %vm452_vm1, %v6792_v22  ;;  %v1535_v35 = vshll.u32 %v8508_v1, 16  ;;  %v1541_v28 = vrot.slane %v1539_v30, 4  ;;  %v7957_v2 = vld [vmem:[%s11003_s2] ss:$0 sm:$0xff] }
 0x13a   : > { %v1326_v57 = vsel %vm8317_vm12, %v1128_v63, %v1325_v13  ;;  %v1136_v36 = vor.u32 %v1134_v9, %v1133_v3  ;;  %v1138_v39 = vrot.slane %v1133_v3, 4  ;;  %v1533_v25 = vrot.slane %v1532_v34, 4  ;;  %v654_v9 = vpop.f32.mrf.mxu0 }
 0x13b   : > { %1327 = vst [vmem:[#allocation2 + $0x9c] sm:$0xf] %v1326_v57  ;;  %v1154_v58 = vsel %vm8331_vm13, %v1146_v20, %v1153_v44  ;;  %v1337_v23 = vsel %vm8191_vm4, %v1155_v60, %v1336_v50  ;;  %v1537_v26 = vrot.slane %v1535_v35, 5  ;;  %v1545_v30 = vshll.u32 %v8583_v27, 16  ;;  %v8629_v60 = vld [vmem:[#allocation2 + $0x6c] sm:$0xf] }
 0x13c   : > { %1335 = vst.msk [vmem:[#allocation2 + $0xac] sm:$0xf] %vm698_vm7, %v1154_v58  ;;  %1338 = vst [vmem:[#allocation2 + $0xb0] sm:$0x1] %v1337_v23  ;;  %v1137_v45 = vsel %vm8331_vm13, %v1129_v14, %v1136_v36  ;;  %v1330_v31 = vsel %vm8191_vm4, %v1138_v39, %v1329_v4  ;;  %v1598_v32 = vshrl.u32 %v1369_v33, 16  ;;  %v1601_v38 = vshll.u32 %v1369_v33, 16 }
 0x13d   : > { %1328 = vst.msk [vmem:[#allocation2 + $0xa0] sm:$0xf] %vm698_vm7, %v1137_v45  ;;  %1331 = vst [vmem:[#allocation2 + $0xa4] sm:$0x1] %v1330_v31  ;;  %v1538_v48 = vsel %vm8257_vm10, %v1533_v25, %v1537_v26  ;;  %v1542_v49 = vor.u32 %v1541_v28, %v1537_v26  ;;  %v1547_v53 = vrot.slane %v1545_v30, 5  ;;  %v1611_v20 = vshrl.u32 %v8593_v41, 16 }
 0x13e   : > { %v8611_v61 = vrot.slane %v1598_v32, 4  ;;  %v8613_v62 = vrot.slane %v1601_v38, 5  ;;  %v6793_v0 = vcombine.low %v1369_v33, %v8593_v41  ;;  %v660_v8 = vadd.f32 %v7957_v2, %v8570_v54  ;;  %v1346_v58 = vld [vmem:[#allocation2 + $0xc0] sm:$0xf] }
 0x13f   : > { %v1543_v11 = vrot.slane %v1542_v49, 4  ;;  %v1556_v13 = vor.u32 %v8551_v55, %v8549_v46  ;;  %v1559_v15 = vshll.u32 %v8525_v42, 16  ;;  %v1565_v50 = vrot.slane %v1563_v52, 4 }
 0x140   : > { %7517 = vmatprep.mubr.msk.bf16.mxu0 %vm452_vm1, %v6793_v0  ;;  %v696_v22 = vmax.f32 %v660_v8, 0.0  ;;  %v1569_v63 = vshll.u32 %v8605_v47, 16  ;;  %v652_v14 = vadd.f32 %v7957_v2, %v651_v10  ;;  %v663_v3 = vadd.f32 %v7957_v2, %v7464_v43  ;;  %v8640_v8 = vld [vmem:[#allocation2 + $0x70] sm:$0xf] }
 0x141   : > { %v1548_v54 = vsel %vm8257_vm10, %v1543_v11, %v1547_v53  ;;  %v1557_v4 = vrot.slane %v1556_v13, 4  ;;  %v1561_v34 = vrot.slane %v1559_v15, 5  ;;  %v655_v44 = vadd.f32 %v7957_v2, %v654_v9 }
 0x142   : > { %v6758_v46 = vcombine.low %v1538_v48, %v1548_v54  ;;  %v7192_v55 = vpack.c.bf16 %v696_v22, %v696_v22  ;;  %v1571_v35 = vrot.slane %v1569_v63, 5  ;;  %v694_v28 = vmax.f32 %v652_v14, 0.0  ;;  %v1350_v63 = vld [vmem:[#allocation2 + $0xc8] sm:$0x1] }
 0x143   : > { %v1562_v52 = vsel %vm8257_vm10, %v1557_v4, %v1561_v34  ;;  %v1566_v33 = vor.u32 %v1565_v50, %v1561_v34  ;;  %v697_v57 = vmax.f32 %v663_v3, 0.0  ;;  %v695_v36 = vmax.f32 %v655_v44, 0.0  ;;  %v1339_v50 = vld [vmem:[#allocation2 + $0xb4] sm:$0xf] }
 0x144   : > { %7476 = vmatmul.mubr.msk.bf16.gmra.mxu1 %vm452_vm1, %v6758_v46  ;;  %v1174_v10 = vshrl.u32 %v7192_v55, 16  ;;  %v1177_v39 = vshll.u32 %v7192_v55, 16  ;;  %v7190_v25 = vpack.c.bf16 %v694_v28, %v694_v28  ;;  %v1622_v43 = vshrl.u32 %v8629_v60, 16  ;;  %v1343_v46 = vld [vmem:[#allocation2 + $0xbc] sm:$0x1] }
 0x145   : > { %v1567_v23 = vrot.slane %v1566_v33, 4  ;;  %v7193_v26 = vpack.c.bf16 %v697_v57, %v697_v57  ;;  %v7191_v30 = vpack.c.bf16 %v695_v36, %v695_v36  ;;  %v1625_v45 = vshll.u32 %v8629_v60, 16  ;;  %v1373_v36 = vld [vmem:[#allocation2 + $0x78] sm:$0xf] }
 0x146   : > { %v1176_v31 = vrot.slane %v1174_v10, 7  ;;  %v1157_v32 = vshrl.u32 %v7190_v25, 16  ;;  %v1160_v38 = vshll.u32 %v7190_v25, 16  ;;  %v8636_v48 = vrot.slane %v1622_v43, 4  ;;  %v8650_v10 = vld [vmem:[#allocation2 + $0x7c] sm:$0xf] }
 0x147   : > { %v1572_v49 = vsel %vm8257_vm10, %v1567_v23, %v1571_v35  ;;  %v1182_v53 = vshrl.u32 %v7193_v26, 16  ;;  %v1185_v0 = vshll.u32 %v7193_v26, 16  ;;  %v1165_v2 = vshrl.u32 %v7191_v30, 16  ;;  %v8648_v35 = vld [vmem:[#allocation2 + $0x5c] sm:$0x1] }
 0x148   : > { %v1179_v9 = vor.u32 %v1177_v39, %v1176_v31  ;;  %v1180_v11 = vrot.slane %v1176_v31, 4  ;;  %v6759_v13 = vcombine.low %v1562_v52, %v1572_v49  ;;  %v1159_v15 = vrot.slane %v1157_v32, 7 }
 0x149   : > { %v1184_v22 = vrot.slane %v1182_v53, 7  ;;  %v1167_v14 = vrot.slane %v1165_v2, 7  ;;  %v1168_v3 = vshll.u32 %v7191_v30, 16  ;;  %v8642_v54 = vrot.slane %v1625_v45, 5  ;;  %v1375_v53 = vld [vmem:[#allocation2 + $0x84] sm:$0xf] }
 0x14a   : > { %v1347_v4 = vsel %vm8317_vm12, %v1179_v9, %v1346_v58  ;;  %7479 = vmatprep.mubr.msk.bf16.mxu1 %vm452_vm1, %v6759_v13  ;;  %v1162_v34 = vor.u32 %v1160_v38, %v1159_v15  ;;  %v1163_v44 = vrot.slane %v1159_v15, 4  ;;  %v1635_v55 = vshrl.u32 %v8640_v8, 16 }
 0x14b   : > { %1348 = vst [vmem:[#allocation2 + $0xc0] sm:$0xf] %v1347_v4  ;;  %v1187_v28 = vor.u32 %v1185_v0, %v1184_v22  ;;  %v1189_v52 = vrot.slane %v1184_v22, 4  ;;  %v1170_v33 = vor.u32 %v1168_v3, %v1167_v14  ;;  %v1172_v57 = vrot.slane %v1167_v14, 4 }
 0x14c   : > { %v1340_v39 = vsel %vm8317_vm12, %v1162_v34, %v1339_v50  ;;  %v6794_v25 = vcombine.low %v8629_v60, %v8640_v8  ;;  %v1580_v43 = vor.u32 %v8580_v17, %v8575_v51  ;;  %v1583_v58 = vshll.u32 %v8567_v5, 16 }
 0x14d   : > { %1341 = vst [vmem:[#allocation2 + $0xb4] sm:$0xf] %v1340_v39  ;;  %v1188_v23 = vsel %vm8331_vm13, %v1180_v11, %v1187_v28  ;;  %v1351_v26 = vsel %vm8191_vm4, %v1189_v52, %v1350_v63  ;;  %v1171_v30 = vsel %vm8331_vm13, %v1163_v44, %v1170_v33  ;;  %v1344_v12 = vsel %vm8191_vm4, %v1172_v57, %v1343_v46  ;;  %v8687_v63 = vld [vmem:[#allocation2 + $0x74] sm:$0x1]  ;;  %v1377_v28 = vld [vmem:[#allocation2 + $0x90] sm:$0xf] }
 0x14e   : > { %1349 = vst.msk [vmem:[#allocation2 + $0xc4] sm:$0xf] %vm698_vm7, %v1188_v23  ;;  %1352 = vst [vmem:[#allocation2 + $0xc8] sm:$0x1] %v1351_v26  ;;  %7518 = vmatmul.mubr.msk.bf16.gmra.mxu0 %vm452_vm1, %v6794_v25  ;;  %v1581_v51 = vrot.slane %v1580_v43, 4  ;;  %v1585_v17 = vrot.slane %v1583_v58, 5  ;;  %v6795_v49 = vcombine.low %v1373_v36, %v8650_v10  ;;  %v1604_v11 = vor.u32 %v8613_v62, %v8611_v61 }
 0x14f   : > { %1342 = vst.msk [vmem:[#allocation2 + $0xb8] sm:$0xf] %vm698_vm7, %v1171_v30  ;;  %1345 = vst [vmem:[#allocation2 + $0xbc] sm:$0x1] %v1344_v12  ;;  %v1589_v60 = vrot.slane %v1587_v19, 4  ;;  %v1593_v45 = vshll.u32 %v8648_v35, 16 }
 0x150   : > { %v1646_v31 = vshrl.u32 %v1373_v36, 16  ;;  %v1649_v32 = vshll.u32 %v1373_v36, 16  ;;  %v1659_v38 = vshrl.u32 %v8650_v10, 16  ;;  %v1586_v0 = vsel %vm8257_vm10, %v1581_v51, %v1585_v17  ;;  %v8681_v19 = vld [vmem:[#allocation2 + $0x88] sm:$0xf]  ;;  %7521 = vmatprep.mubr.msk.bf16.mxu0 %vm452_vm1, %v6795_v49 }
 0x151   : > { %v1590_v2 = vor.u32 %v1589_v60, %v1585_v17  ;;  %v1595_v9 = vrot.slane %v1593_v45, 5  ;;  %v1607_v50 = vshll.u32 %v8593_v41, 16  ;;  %v1613_v22 = vrot.slane %v1611_v20, 4  ;;  %v8696_v36 = vld [vmem:[#allocation2 + $0x94] sm:$0xf] }
 0x152   : > { %v1648_v13 = vrot.slane %v1646_v31, 4  ;;  %v1651_v15 = vrot.slane %v1649_v32, 5  ;;  %v1605_v3 = vrot.slane %v1604_v11, 4  ;;  %v1617_v4 = vshll.u32 %v8673_v29, 16  ;;  %v8708_v32 = vld [vmem:[#allocation2 + $0x80] sm:$0x1] }
 0x153   : > { %v1591_v14 = vrot.slane %v1590_v2, 4  ;;  %v1670_v34 = vshrl.u32 %v1375_v53, 16  ;;  %v1609_v44 = vrot.slane %v1607_v50, 5  ;;  %v1673_v61 = vshll.u32 %v1375_v53, 16  ;;  %v8713_v11 = vld [vmem:[#allocation2 + $0xa0] sm:$0xf] }
 0x154   : > { %v1683_v62 = vshrl.u32 %v8681_v19, 16  ;;  %v6796_v46 = vcombine.low %v1375_v53, %v8681_v19  ;;  %v1619_v33 = vrot.slane %v1617_v4, 5  ;;  %v1628_v20 = vor.u32 %v8642_v54, %v8636_v48  ;;  %v1379_v53 = vld [vmem:[#allocation2 + $0x9c] sm:$0xf] }
 0x155   : > { %v1596_v52 = vsel %vm8257_vm10, %v1591_v14, %v1595_v9  ;;  %v1672_v57 = vrot.slane %v1670_v34, 4  ;;  %v1610_v25 = vsel %vm8257_vm10, %v1605_v3, %v1609_v44  ;;  %v1614_v43 = vor.u32 %v1613_v22, %v1609_v44 }
 0x156   : > { %v6760_v39 = vcombine.low %v1586_v0, %v1596_v52  ;;  %v1675_v58 = vrot.slane %v1673_v61, 5  ;;  %7522 = vmatmul.mubr.msk.bf16.gmra.mxu0 %vm452_vm1, %v6796_v46  ;;  %v1629_v23 = vrot.slane %v1628_v20, 4  ;;  %v1631_v26 = vshll.u32 %v8640_v8, 16  ;;  %v8722_v52 = vld [vmem:[#allocation2 + $0x8c] sm:$0x1] }
 0x157   : > { %v1637_v30 = vrot.slane %v1635_v55, 4  ;;  %v1641_v12 = vshll.u32 %v8687_v63, 16  ;;  %v1615_v48 = vrot.slane %v1614_v43, 4  ;;  %v1694_v54 = vshrl.u32 %v1377_v28, 16 }
 0x158   : > { %7480 = vmatmul.mubr.msk.bf16.gmra.mxu1 %vm452_vm1, %v6760_v39  ;;  %v1697_v51 = vshll.u32 %v1377_v28, 16  ;;  %v1707_v17 = vshrl.u32 %v8696_v36, 16  ;;  %v1633_v60 = vrot.slane %v1631_v26, 5  ;;  %v6797_v31 = vcombine.low %v1377_v28, %v8696_v36 }
 0x159   : > { %v1643_v45 = vrot.slane %v1641_v12, 5  ;;  %v1652_v49 = vor.u32 %v1651_v15, %v1648_v13  ;;  %v1620_v55 = vsel %vm8257_vm10, %v1615_v48, %v1619_v33  ;;  %v1696_v0 = vrot.slane %v1694_v54, 4  ;;  %v8732_v12 = vld [vmem:[#allocation2 + $0xac] sm:$0xf] }
 0x15a   : > { %v1699_v2 = vrot.slane %v1697_v51, 5  ;;  %v1655_v9 = vshll.u32 %v8650_v10, 16  ;;  %v6761_v50 = vcombine.low %v1610_v25, %v1620_v55  ;;  %v1634_v22 = vsel %vm8257_vm10, %v1629_v23, %v1633_v60  ;;  %7525 = vmatprep.mubr.msk.bf16.mxu0 %vm452_vm1, %v6797_v31  ;;  %v8735_v31 = vld [vmem:[#allocation2 + $0x98] sm:$0x1] }
 0x15b   : > { %v1638_v14 = vor.u32 %v1637_v30, %v1633_v60  ;;  %v1653_v3 = vrot.slane %v1652_v49, 4  ;;  %v1661_v13 = vrot.slane %v1659_v38, 4  ;;  %v1665_v15 = vshll.u32 %v8708_v32, 16  ;;  %v1381_v38 = vld [vmem:[#allocation2 + $0xa8] sm:$0xf] }
 0x15c   : > { %v1657_v4 = vrot.slane %v1655_v9, 5  ;;  %v1718_v34 = vshrl.u32 %v1379_v53, 16  ;;  %7483 = vmatprep.mubr.msk.bf16.mxu1 %vm452_vm1, %v6761_v50  ;;  %v1721_v61 = vshll.u32 %v1379_v53, 16  ;;  %v1731_v46 = vshrl.u32 %v8713_v11, 16  ;;  %v1383_v49 = vld [vmem:[#allocation2 + $0xb4] sm:$0xf] }
 0x15d   : > { %v1639_v44 = vrot.slane %v1638_v14, 4  ;;  %v6798_v28 = vcombine.low %v1379_v53, %v8713_v11  ;;  %v1667_v39 = vrot.slane %v1665_v15, 5  ;;  %v1676_v26 = vor.u32 %v1675_v58, %v1672_v57 }
 0x15e   : > { %v1658_v33 = vsel %vm8257_vm10, %v1653_v3, %v1657_v4  ;;  %v1662_v20 = vor.u32 %v1661_v13, %v1657_v4  ;;  %v8726_v25 = vrot.slane %v1718_v34, 4  ;;  %v1723_v23 = vrot.slane %v1721_v61, 5  ;;  %v8744_v13 = vld [vmem:[#allocation2 + $0xb8] sm:$0xf] }
 0x15f   : > { %v1644_v43 = vsel %vm8257_vm10, %v1639_v44, %v1643_v45  ;;  %7526 = vmatmul.mubr.msk.bf16.gmra.mxu0 %vm452_vm1, %v6798_v28  ;;  %v1679_v30 = vshll.u32 %v8681_v19, 16  ;;  %v1685_v51 = vrot.slane %v1683_v62, 4  ;;  %v1689_v60 = vshll.u32 %v8722_v52, 16 }
 0x160   : > { %v6762_v48 = vcombine.low %v1634_v22, %v1644_v43  ;;  %v1663_v54 = vrot.slane %v1662_v20, 4  ;;  %v1677_v53 = vrot.slane %v1676_v26, 4  ;;  %v1742_v9 = vshrl.u32 %v1381_v38, 16 }
 0x161   : > { %v1681_v55 = vrot.slane %v1679_v30, 5  ;;  %v1745_v45 = vshll.u32 %v1381_v38, 16  ;;  %v1691_v58 = vrot.slane %v1689_v60, 5  ;;  %v1755_v50 = vshrl.u32 %v8732_v12, 16 }
 0x162   : > { %7484 = vmatmul.mubr.msk.bf16.gmra.mxu1 %vm452_vm1, %v6762_v48  ;;  %v1668_v57 = vsel %vm8257_vm10, %v1663_v54, %v1667_v39  ;;  %v6799_v22 = vcombine.low %v1381_v38, %v8732_v12  ;;  %v1744_v4 = vrot.slane %v1742_v9, 4  ;;  %v1700_v34 = vor.u32 %v1699_v2, %v1696_v0  ;;  %v8750_v38 = vld [vmem:[#allocation2 + $0xa4] sm:$0x1] }
 0x163   : > { %v6763_v62 = vcombine.low %v1658_v33, %v1668_v57  ;;  %v1682_v14 = vsel %vm8257_vm10, %v1677_v53, %v1681_v55  ;;  %v1686_v3 = vor.u32 %v1685_v51, %v1681_v55  ;;  %v1747_v15 = vrot.slane %v1745_v45, 5  ;;  %v7925_v51 = vld [vmem:[#allocation2 + $0xc] sm:$0xff]  }
 0x164   : > { %7529 = vmatprep.mubr.msk.bf16.mxu0 %vm452_vm1, %v6799_v22  ;;  %v1703_v44 = vshll.u32 %v8696_v36, 16  ;;  %v1709_v61 = vrot.slane %v1707_v17, 4  ;;  %v1713_v20 = vshll.u32 %v8735_v31, 16  ;;  %v1766_v33 = vshrl.u32 %v1383_v49, 16  ;;  %v8760_v45 = vld [vmem:[#allocation2 + $0xb0] sm:$0x1] }
 0x165   : > { %7487 = vmatprep.mubr.msk.bf16.mxu1 %vm452_vm1, %v6763_v62  ;;  %v1687_v28 = vrot.slane %v1686_v3, 4  ;;  %v1769_v39 = vshll.u32 %v1383_v49, 16  ;;  %v1701_v43 = vrot.slane %v1700_v34, 4  ;;  %v1779_v30 = vshrl.u32 %v8744_v13, 16 }
 0x166   : > { %v1705_v26 = vrot.slane %v1703_v44, 5  ;;  %v6800_v48 = vcombine.low %v1383_v49, %v8744_v13  ;;  %v1715_v2 = vrot.slane %v1713_v20, 5  ;;  %v1768_v17 = vrot.slane %v1766_v33, 4  ;;  %v2342_v44 = vld [vmem:[#allocation2] sm:$0xe] }
 0x167   : > { %v1692_v0 = vsel %vm8257_vm10, %v1687_v28, %v1691_v58  ;;  %v1771_v54 = vrot.slane %v1769_v39, 5  ;;  %v1724_v9 = vor.u32 %v1723_v23, %v8726_v25  ;;  %v1727_v49 = vshll.u32 %v8713_v11, 16  ;;  %v8770_v25 = vld [vmem:[%s11004_s3 + $0x14] sm:$0xf]  ;;  %v7958_v20 = vld [vmem:[%s11004_s3 + $0xc] sm:$0xf] }
 0x168   : > { %v6764_v60 = vcombine.low %v1682_v14, %v1692_v0  ;;  %v1706_v53 = vsel %vm8257_vm10, %v1701_v43, %v1705_v26  ;;  %v1710_v55 = vor.u32 %v1709_v61, %v1705_v26  ;;  %7530 = vmatmul.mubr.msk.bf16.gmra.mxu0 %vm452_vm1, %v6800_v48  ;;  %v1733_v57 = vrot.slane %v1731_v46, 4  ;;  %v8779_v33 = vld [vmem:[#allocation2 + $0xbc] sm:$0x1] }
 0x169   : > { %v1737_v58 = vshll.u32 %v8750_v38, 16  ;;  %7569 = vmatprep.mubr.msk.bf16.mxu0 %vm452_vm1, %v7925_v51  ;;  %v1748_v22 = vor.u32 %v1747_v15, %v1744_v4  ;;  %v1725_v14 = vrot.slane %v1724_v9, 4  ;;  %v1751_v3 = vshll.u32 %v8732_v12, 16  ;;  %v2343_v51 = vld [vmem:[#allocation2 + $0xc] sm:$0xe] }
 0x16a   : > { %7488 = vmatmul.mubr.msk.bf16.gmra.mxu1 %vm452_vm1, %v6764_v60  ;;  %v1711_v62 = vrot.slane %v1710_v55, 4  ;;  %v1757_v34 = vrot.slane %v1755_v50, 4  ;;  %v1729_v23 = vrot.slane %v1727_v49, 5  ;;  %v1761_v28 = vshll.u32 %v8760_v45, 16  ;;  %v7926_v55 = vld [vmem:[#allocation2 + $0x18] sm:$0xff]  }
 0x16b   : > { %v1739_v46 = vrot.slane %v1737_v58, 5  ;;  %v1749_v61 = vrot.slane %v1748_v22, 4  ;;  %v1753_v15 = vrot.slane %v1751_v3, 5  ;;  %v2960_v50 = vsel %vm501_vm0, %v7958_v20, 0 }
 0x16c   : > { %v1716_v4 = vsel %vm8257_vm10, %v1711_v62, %v1715_v2  ;;  %v1772_v39 = vor.u32 %v1771_v54, %v1768_v17  ;;  %v1730_v26 = vsel %vm8257_vm10, %v1725_v14, %v1729_v23  ;;  %v1734_v48 = vor.u32 %v1733_v57, %v1729_v23  ;;  %7568 = vmatpush3.bf16.msra.mxu0 %v2960_v50  ;;  %v7927_v57 = vld [vmem:[#allocation2 + $0x24] sm:$0xff]  }
 0x16d   : > { %v6765_v43 = vcombine.low %v1706_v53, %v1716_v4  ;;  %v1763_v0 = vrot.slane %v1761_v28, 5  ;;  %v1754_v2 = vsel %vm8257_vm10, %v1749_v61, %v1753_v15  ;;  %v1758_v60 = vor.u32 %v1757_v34, %v1753_v15  ;;  %7845 = vmatprep.subr.msk.bf16.mxu0 %vm501_vm0, %v8770_v25  ;;  %v7959_v14 = vld [vmem:[#allocation2 + $0x4] sm:$0xf]  ;;  %v7960_v28 = vld [vmem:[#allocation2 + $0x10] sm:$0xf] }
 0x16e   : > { %v1773_v9 = vrot.slane %v1772_v39, 4  ;;  %v1775_v49 = vshll.u32 %v8744_v13, 16  ;;  %v1735_v17 = vrot.slane %v1734_v48, 4  ;;  %v1781_v54 = vrot.slane %v1779_v30, 4 }
 0x16f   : > { %7491 = vmatprep.mubr.msk.bf16.mxu1 %vm452_vm1, %v6765_v43  ;;  %v1785_v53 = vshll.u32 %v8779_v33, 16  ;;  %v6817_v58 = vrot.slane %v2342_v44, 9  ;;  %v1759_v22 = vrot.slane %v1758_v60, 4  ;;  %v2395_v3 = vrot.slane %v7959_v14, 5  ;;  %v2344_v44 = vld [vmem:[#allocation2 + $0x18] sm:$0xe] }
 0x170   : > { %7570 = vmatmul.mubr.msk.bf16.vlgmr.msra.gmra.mxu0 %vm452_vm1, %v7926_v55  ;;  %v1777_v62 = vrot.slane %v1775_v49, 5  ;;  %v6818_v34 = vrot.slane %v2343_v51, 9  ;;  %v1740_v23 = vsel %vm8257_vm10, %v1735_v17, %v1739_v46  ;;  %v2402_v4 = vrot.slane %v7960_v28, 5  ;;  %v2345_v43 = vld [vmem:[#allocation2 + $0x24] sm:$0xe] }
 0x171   : > { %v1787_v61 = vrot.slane %v1785_v53, 5  ;;  %7573 = vmatprep.mubr.msk.bf16.mxu0 %vm452_vm1, %v7927_v57  ;;  %v8796_v30 = vsel %vm501_vm0, %v8494_v37, 0  ;;  %v6766_v15 = vcombine.low %v1730_v26, %v1740_v23  ;;  %v1764_v20 = vsel %vm8257_vm10, %v1759_v22, %v1763_v0  ;;  %v7962_v17 = vld [vmem:[#allocation2 + $0x20] sm:$0x1]  ;;  %v7963_v57 = vld [vmem:[#allocation2 + $0x28] sm:$0xf] }
 0x172   : > { %v1778_v50 = vsel %vm8257_vm10, %v1773_v9, %v1777_v62  ;;  %v1782_v39 = vor.u32 %v1781_v54, %v1777_v62  ;;  %v6767_v48 = vcombine.low %v1754_v2, %v1764_v20  ;;  %v2396_v37 = vsel %vm8804_vm2, %v6817_v58, %v2395_v3  ;;  %v7961_v9 = vld [vmem:[#allocation2 + $0x1c] sm:$0xf]  ;;  %v2346_v22 = vld [vmem:[#allocation2 + $0x30] sm:$0xe]  ;;  %v7964_v20 = vld [vmem:[#allocation2 + $0x34] sm:$0xf] }
 0x173   : > { %v2397_v51 = vrot.slane %v2395_v3, 4  ;;  %v8812_v26 = vsel %vm8804_vm2, %v6818_v34, %v2402_v4  ;;  %7492 = vmatmul.mubr.msk.bf16.gmra.mxu1 %vm452_vm1, %v6766_v15  ;;  %v2404_v60 = vrot.slane %v2402_v4, 4  ;;  %v6819_v55 = vrot.slane %v2344_v44, 9  ;;  %v7928_v3 = vld [vmem:[#allocation2 + $0x30] sm:$0xff]   ;;  %v7929_v4 = vld [vmem:[#allocation2 + $0x3c] sm:$0xff]  }
 0x174   : > { %v1783_v0 = vrot.slane %v1782_v39, 4  ;;  %v2409_v49 = vrot.slane %v7961_v9, 5  ;;  %7495 = vmatprep.mubr.msk.bf16.mxu1 %vm452_vm1, %v6767_v48  ;;  %v2412_v54 = vrot.slane %v7962_v17, 5  ;;  %v6820_v53 = vrot.slane %v2345_v43, 9  ;;  %v2349_v9 = vld [vmem:[#allocation2 + $0x54] sm:$0xe] }
 0x175   : > { %v2399_v2 = vsel %vm8804_vm2, %v2397_v51, %v2398_v7  ;;  %v2416_v58 = vrot.slane %v7963_v57, 5  ;;  %v8826_v34 = vsel %vm8804_vm2, %v2404_v60, %v2405_v56  ;;  %v2347_v7 = vld [vmem:[#allocation2 + $0x3c] sm:$0xe]  ;;  %v2419_v56 = vrot.slane %v8512_v24, 5  ;;  %v2348_v51 = vld [vmem:[#allocation2 + $0x48] sm:$0xe] }
 0x176   : > { %v1788_v62 = vsel %vm8257_vm10, %v1783_v0, %v1787_v61  ;;  %v6833_v14 = vcombine.low %v2396_v37, %v2399_v2  ;;  %v8830_v6 = vsel %vm8804_vm2, %v6819_v55, %v2409_v49  ;;  %v6834_v28 = vcombine.low %v8812_v26, %v8826_v34 }
 0x177   : > { %v6768_v23 = vcombine.low %v1778_v50, %v1788_v62  ;;  %v2411_v44 = vrot.slane %v2409_v49, 4  ;;  %v8836_v61 = vsel %vm8804_vm2, %v6820_v53, %v2416_v58  ;;  %v2418_v40 = vrot.slane %v2416_v58, 4  ;;  %v2350_v58 = vld [vmem:[#allocation2 + $0x60] sm:$0xe] }
 0x178   : > { %7574 = vmatmul.mubr.msk.bf16.gmra.mxu0 %vm452_vm1, %v7928_v3  ;;  %v6821_v15 = vrot.slane %v2346_v22, 9  ;;  %v2423_v39 = vrot.slane %v7964_v20, 5  ;;  %v2426_v43 = vrot.slane %v8543_v59, 5  ;;  %v6822_v48 = vrot.slane %v2347_v7, 9  ;;  %v7930_v7 = vld [vmem:[#allocation2 + $0x48] sm:$0xff]  }
 0x179   : > { %7577 = vmatprep.mubr.msk.bf16.mxu0 %vm452_vm1, %v7929_v4  ;;  %v8843_v50 = vsel %vm8804_vm2, %v2411_v44, %v2412_v54  ;;  %v2430_v37 = vrot.slane %v8508_v1, 5  ;;  %v8851_v24 = vsel %vm8804_vm2, %v2418_v40, %v2419_v56  ;;  %v2433_v2 = vrot.slane %v8583_v27, 5  ;;  %v7931_v4 = vld [vmem:[#allocation2 + $0x54] sm:$0xff]  }
 0x17a   : > { %v6835_v0 = vcombine.low %v8830_v6, %v8843_v50  ;;  %v8855_v60 = vsel %vm8804_vm2, %v6821_v15, %v2423_v39  ;;  %v2425_v55 = vrot.slane %v2423_v39, 4  ;;  %v6836_v59 = vcombine.low %v8836_v61, %v8851_v24  ;;  %v2351_v6 = vld [vmem:[#allocation2 + $0x6c] sm:$0xe]  ;;  %v2352_v50 = vld [vmem:[#allocation2 + $0x78] sm:$0xe] }
 0x17b   : > { %v8861_v1 = vsel %vm8804_vm2, %v6822_v48, %v2430_v37  ;;  %v2432_v49 = vrot.slane %v2430_v37, 4  ;;  %7496 = vmatmul.mubr.msk.bf16.gmra.mxu1 %vm452_vm1, %v6768_v23  ;;  %v6823_v54 = vrot.slane %v2348_v51, 9  ;;  %v2437_v53 = vrot.slane %v8525_v42, 5  ;;  %v2353_v51 = vld [vmem:[#allocation2 + $0x84] sm:$0xe] }
 0x17c   : > { %v8867_v17 = vsel %vm8804_vm2, %v2425_v55, %v2426_v43  ;;  %v2440_v57 = vrot.slane %v8605_v47, 5  ;;  %7535 = vmatprep.mubr.msk.bf16.mxu1 %vm452_vm1, %v6833_v14  ;;  %v6824_v62 = vrot.slane %v2349_v9, 9  ;;  %v2444_v3 = vrot.slane %v8567_v5, 5 }
 0x17d   : > { %v6837_v22 = vcombine.low %v8855_v60, %v8867_v17  ;;  %v8876_v27 = vsel %vm8804_vm2, %v2432_v49, %v2433_v2  ;;  %v8883_v47 = vsel %vm8804_vm2, %v6823_v54, %v2437_v53  ;;  %v2439_v14 = vrot.slane %v2437_v53, 4  ;;  %v2354_v49 = vld [vmem:[#allocation2 + $0x90] sm:$0xe] }
 0x17e   : > { %v6838_v42 = vcombine.low %v8861_v1, %v8876_v27  ;;  %v2447_v23 = vrot.slane %v8648_v35, 5  ;;  %v8888_v44 = vsel %vm8804_vm2, %v6824_v62, %v2444_v3  ;;  %v2446_v40 = vrot.slane %v2444_v3, 4  ;;  %v2355_v3 = vld [vmem:[#allocation2 + $0x9c] sm:$0xe] }
 0x17f   : > { %v6825_v56 = vrot.slane %v2350_v58, 9  ;;  %v2451_v5 = vrot.slane %v8593_v41, 5  ;;  %v8894_v15 = vsel %vm8804_vm2, %v2439_v14, %v2440_v57  ;;  %v2454_v20 = vrot.slane %v8673_v29, 5  ;;  %v8925_v58 = vld [vmem:[%s11004_s3 + $0x18] sm:$0xf]  ;;  %v7932_v14 = vld [vmem:[#allocation2 + $0x60] sm:$0xff]  }
 0x180   : > { %7578 = vmatmul.mubr.msk.bf16.gmra.mxu0 %vm452_vm1, %v7930_v7  ;;  %v6826_v39 = vrot.slane %v2351_v6, 9  ;;  %v2458_v35 = vrot.slane %v8640_v8, 5  ;;  %v6839_v43 = vcombine.low %v8883_v47, %v8894_v15  ;;  %v8903_v41 = vsel %vm8804_vm2, %v2446_v40, %v2447_v23  ;;  %v3880_v7 = vld [vmem:[#allocation2 + $0xc] sm:$0xe]  ;;  %v7937_v15 = vld [vmem:[#allocation2 + $0x9c] sm:$0xff]  }
 0x181   : > { %7581 = vmatprep.mubr.msk.bf16.mxu0 %vm452_vm1, %v7931_v4  ;;  %v8907_v48 = vsel %vm8804_vm2, %v6825_v56, %v2451_v5  ;;  %v2453_v37 = vrot.slane %v2451_v5, 4  ;;  %v6840_v29 = vcombine.low %v8888_v44, %v8903_v41  ;;  %v2461_v9 = vrot.slane %v8687_v63, 5  ;;  %v8952_v4 = vld [vmem:[#allocation2 + $0x10] sm:$0xf]  ;;  %v7938_v41 = vld [vmem:[#allocation2 + $0xa8] sm:$0xff]  }
 0x182   : > { %v8913_v8 = vsel %vm8804_vm2, %v6826_v39, %v2458_v35  ;;  %v2460_v55 = vrot.slane %v2458_v35, 4  ;;  %v6827_v54 = vrot.slane %v2352_v50, 9  ;;  %v2465_v53 = vrot.slane %v8650_v10, 5  ;;  %v7933_v40 = vld [vmem:[#allocation2 + $0x6c] sm:$0xff]   ;;  %v8962_v39 = vld [vmem:[#allocation2 + $0x14] sm:$0x1] }
 0x183   : > { %v8918_v2 = vsel %vm8804_vm2, %v2453_v37, %v2454_v20  ;;  %v2468_v57 = vrot.slane %v8708_v32, 5  ;;  %7536 = vmatmul.mubr.msk.bf16.vlgmr.msra.gmra.mxu1 %vm452_vm1, %v6834_v28  ;;  %v6828_v10 = vrot.slane %v2353_v51, 9  ;;  %v2472_v32 = vrot.slane %v8681_v19, 5 }
 0x184   : > { %v6841_v63 = vcombine.low %v8907_v48, %v8918_v2  ;;  %v8935_v62 = vsel %vm8804_vm2, %v2460_v55, %v2461_v9  ;;  %7602 = vmatpush3.bf16.msra.mxu1 %v8796_v30  ;;  %7539 = vmatprep.mubr.msk.bf16.mxu1 %vm452_vm1, %v6835_v0  ;;  %v8944_v34 = vsel %vm8804_vm2, %v6827_v54, %v2465_v53  ;;  %v2467_v28 = vrot.slane %v2465_v53, 4  ;;  %v3885_v2 = vld [vmem:[#allocation2 + $0x48] sm:$0xe] }
 0x185   : > { %v6842_v26 = vcombine.low %v8913_v8, %v8935_v62  ;;  %v2475_v6 = vrot.slane %v8722_v52, 5  ;;  %v8949_v19 = vsel %vm8804_vm2, %v6828_v10, %v2472_v32  ;;  %v2474_v23 = vrot.slane %v2472_v32, 4  ;;  %7846 = vmatprep.subr.msk.bf16.mxu1 %vm501_vm0, %v8925_v58  ;;  %v8989_v32 = vld [vmem:[#allocation2 + $0x1c] sm:$0xf] }
 0x186   : > { %v6829_v30 = vrot.slane %v2354_v49, 9  ;;  %v2479_v0 = vrot.slane %v8696_v36, 5  ;;  %v8958_v56 = vsel %vm8804_vm2, %v2467_v28, %v2468_v57  ;;  %v2482_v52 = vrot.slane %v8735_v31, 5  ;;  %v2356_v31 = vld [vmem:[#allocation2 + $0xa8] sm:$0xe] }
 0x187   : > { %v6830_v5 = vrot.slane %v2355_v3, 9  ;;  %v2486_v20 = vrot.slane %v8713_v11, 5  ;;  %v6843_v36 = vcombine.low %v8944_v34, %v8958_v56  ;;  %v8969_v35 = vsel %vm8804_vm2, %v2474_v23, %v2475_v6  ;;  %v3881_v49 = vld [vmem:[#allocation2 + $0x18] sm:$0xe]  ;;  %v2357_v23 = vld [vmem:[#allocation2 + $0xb4] sm:$0xe] }
 0x188   : > { %7582 = vmatmul.mubr.msk.bf16.gmra.mxu0 %vm452_vm1, %v7932_v14  ;;  %v8973_v50 = vsel %vm8804_vm2, %v6829_v30, %v2479_v0  ;;  %v2481_v37 = vrot.slane %v2479_v0, 4  ;;  %v2489_v9 = vrot.slane %v8750_v38, 5  ;;  %v6929_v53 = vrot.slane %v3880_v7, 9  ;;  %v8998_v14 = vld [vmem:[#allocation2 + $0x20] sm:$0x1] }
 0x189   : > { %7585 = vmatprep.mubr.msk.bf16.mxu0 %vm452_vm1, %v7933_v40  ;;  %v8980_v51 = vsel %vm8804_vm2, %v6830_v5, %v2486_v20  ;;  %v2488_v55 = vrot.slane %v2486_v20, 4  ;;  %v3946_v57 = vrot.slane %v8952_v4, 5  ;;  %v3949_v10 = vrot.slane %v8962_v39, 5  ;;  %v9026_v5 = vld [vmem:[#allocation2 + $0x28] sm:$0xf]  ;;  %v7934_v20 = vld [vmem:[#allocation2 + $0x78] sm:$0xff]  }
 0x18a   : > { %v8985_v54 = vsel %vm8804_vm2, %v2481_v37, %v2482_v52  ;;  %v6831_v38 = vrot.slane %v2356_v31, 9  ;;  %v2493_v6 = vrot.slane %v8732_v12, 5  ;;  %v2496_v40 = vrot.slane %v8760_v45, 5  ;;  %v3882_v52 = vld [vmem:[#allocation2 + $0x24] sm:$0xe] }
 0x18b   : > { %v8995_v28 = vsel %vm8804_vm2, %v2488_v55, %v2489_v9  ;;  %7540 = vmatmul.mubr.msk.bf16.gmra.mxu1 %vm452_vm1, %v6836_v59  ;;  %v9008_v30 = vsel %vm8804_vm2, %v6929_v53, %v3946_v57  ;;  %v3948_v0 = vrot.slane %v3946_v57, 4  ;;  %v9014_v12 = vld [vmem:[%s11004_s3 + $0x1c] sm:$0xf]  ;;  %v4154_v59 = vsel %vm501_vm0, %v8770_v25, 0  ;;  %v9034_v31 = vld [vmem:[#allocation2 + $0x2c] sm:$0x1] }
 0x18c   : > { %7543 = vmatprep.mubr.msk.bf16.mxu1 %vm452_vm1, %v6837_v22  ;;  %v9022_v61 = vsel %vm8804_vm2, %v6831_v38, %v2493_v6  ;;  %v2495_v24 = vrot.slane %v2493_v6, 4  ;;  %v6930_v45 = vrot.slane %v3881_v49, 9  ;;  %7636 = vmatpush3.bf16.msra.mxu0 %v4154_v59  ;;  %v3953_v60 = vrot.slane %v8989_v32, 5  ;;  %v7935_v55 = vld [vmem:[#allocation2 + $0x84] sm:$0xff]   ;;  %v3155_v57 = vld [vmem:[#allocation2 + $0xc] sm:$0xf] }
 0x18d   : > { %v9030_v37 = vsel %vm8804_vm2, %v3948_v0, %v3949_v10  ;;  %v3956_v17 = vrot.slane %v8998_v14, 5  ;;  %v6832_v22 = vrot.slane %v2357_v23, 9  ;;  %v2500_v49 = vrot.slane %v8744_v13, 5  ;;  %7847 = vmatprep.subr.msk.bf16.mxu0 %vm501_vm0, %v9014_v12  ;;  %v9075_v10 = vld [vmem:[#allocation2 + $0x34] sm:$0xf] }
 0x18e   : > { %v6945_v25 = vcombine.low %v9008_v30, %v9030_v37  ;;  %v9040_v9 = vsel %vm8804_vm2, %v2495_v24, %v2496_v40  ;;  %v2503_v53 = vrot.slane %v8779_v33, 5  ;;  %v9051_v38 = vsel %vm8804_vm2, %v6930_v45, %v3953_v60  ;;  %v3158_v7 = vld [vmem:[#allocation2 + $0x18] sm:$0xf]  ;;  %v9109_v3 = vld [vmem:[#allocation2 + $0x44] sm:$0x1] }
 0x18f   : > { %v3955_v6 = vrot.slane %v3953_v60, 4  ;;  %v6931_v23 = vrot.slane %v3882_v52, 9  ;;  %v9056_v13 = vsel %vm8804_vm2, %v6832_v22, %v2500_v49  ;;  %v2502_v33 = vrot.slane %v2500_v49, 4  ;;  %v3883_v52 = vld [vmem:[#allocation2 + $0x30] sm:$0xe] }
 0x190   : > { %7586 = vmatmul.mubr.msk.bf16.gmra.mxu0 %vm452_vm1, %v7934_v20  ;;  %v3960_v0 = vrot.slane %v9026_v5, 5  ;;  %v3963_v40 = vrot.slane %v9034_v31, 5  ;;  %v3204_v59 = vshrl.u32 %v3155_v57, 16  ;;  %v3207_v45 = vshll.u32 %v3155_v57, 16 }
 0x191   : > { %7589 = vmatprep.mubr.msk.bf16.mxu0 %vm452_vm1, %v7935_v55  ;;  %v9062_v24 = vsel %vm8804_vm2, %v3955_v6, %v3956_v17  ;;  %v3213_v20 = vshll.u32 %v8952_v4, 16  ;;  %v9069_v22 = vsel %vm8804_vm2, %v2502_v33, %v2503_v53  ;;  %v9077_v17 = vld [vmem:[#allocation2 + $0x38] sm:$0x1]  ;;  %v3217_v1 = vshrl.u32 %v8952_v4, 16 }
 0x192   : > { %v9073_v55 = vsel %vm8804_vm2, %v6931_v23, %v3960_v0  ;;  %v3962_v49 = vrot.slane %v3960_v0, 4  ;;  %v3206_v6 = vrot.slane %v3204_v59, 4  ;;  %v3209_v53 = vrot.slane %v3207_v45, 5  ;;  %v7936_v0 = vld [vmem:[#allocation2 + $0x90] sm:$0xff]  }
 0x193   : > { %7544 = vmatmul.mubr.msk.bf16.gmra.mxu1 %vm452_vm1, %v6838_v42  ;;  %v3215_v33 = vrot.slane %v3213_v20, 5  ;;  %v3223_v27 = vshll.u32 %v8962_v39, 16  ;;  %v6932_v42 = vrot.slane %v3883_v52, 9  ;;  %v3967_v20 = vrot.slane %v9075_v10, 5 }
 0x194   : > { %7547 = vmatprep.mubr.msk.bf16.mxu1 %vm452_vm1, %v6839_v43  ;;  %v9091_v23 = vsel %vm8804_vm2, %v3962_v49, %v3963_v40  ;;  %v3210_v45 = vor.u32 %v3209_v53, %v3206_v6  ;;  %v3970_v47 = vrot.slane %v9077_v17, 5  ;;  %v3219_v43 = vrot.slane %v3217_v1, 4  ;;  %v3884_v49 = vld [vmem:[#allocation2 + $0x3c] sm:$0xe]  ;;  %v9105_v53 = vld [vmem:[#allocation2 + $0x40] sm:$0xf] }
 0x195   : > { %v3225_v57 = vrot.slane %v3223_v27, 5  ;;  %v3228_v60 = vshrl.u32 %v3158_v7, 16  ;;  %v3231_v40 = vshll.u32 %v3158_v7, 16  ;;  %v9102_v39 = vsel %vm8804_vm2, %v6932_v42, %v3967_v20 }
 0x196   : > { %v3211_v4 = vrot.slane %v3210_v45, 4  ;;  %v3969_v52 = vrot.slane %v3967_v20, 4  ;;  %v3237_v6 = vshll.u32 %v8989_v32, 16  ;;  %v3220_v59 = vor.u32 %v3219_v43, %v3215_v33 }
 0x197   : > { %v3230_v1 = vrot.slane %v3228_v60, 4  ;;  %v3233_v27 = vrot.slane %v3231_v40, 5  ;;  %v3241_v7 = vshrl.u32 %v8989_v32, 16  ;;  %v3247_v20 = vshll.u32 %v8998_v14, 16  ;;  %v3161_v40 = vld [vmem:[#allocation2 + $0x24] sm:$0xf] }
 0x198   : > { %7590 = vmatmul.mubr.msk.bf16.gmra.mxu0 %vm452_vm1, %v7936_v0  ;;  %v3216_v0 = vsel %vm8257_vm10, %v3211_v4, %v3215_v33  ;;  %v9115_v42 = vsel %vm8804_vm2, %v3969_v52, %v3970_v47  ;;  %v3239_v45 = vrot.slane %v3237_v6, 5  ;;  %v3221_v11 = vrot.slane %v3220_v59, 4 }
 0x199   : > { %7593 = vmatprep.mubr.msk.bf16.mxu0 %vm452_vm1, %v7937_v15  ;;  %v6948_v15 = vcombine.low %v9102_v39, %v9115_v42  ;;  %v3234_v60 = vor.u32 %v3233_v27, %v3230_v1  ;;  %v3243_v43 = vrot.slane %v3241_v7, 4  ;;  %v3249_v32 = vrot.slane %v3247_v20, 5  ;;  %v7939_v1 = vld [vmem:[#allocation2 + $0xb4] sm:$0xff]   ;;  %v9145_v7 = vld [vmem:[#allocation2 + $0x4c] sm:$0xf] }
 0x19a   : > { %v6933_v33 = vrot.slane %v3884_v49, 9  ;;  %v3974_v47 = vrot.slane %v9105_v53, 5  ;;  %v3977_v4 = vrot.slane %v9109_v3, 5  ;;  %v3226_v14 = vsel %vm8257_vm10, %v3221_v11, %v3225_v57 }
 0x19b   : > { %7548 = vmatmul.mubr.msk.bf16.gmra.mxu1 %vm452_vm1, %v6840_v29  ;;  %v3235_v59 = vrot.slane %v3234_v60, 4  ;;  %v3244_v52 = vor.u32 %v3243_v43, %v3239_v45  ;;  %v9134_v44 = vsel %vm501_vm0, %v8925_v58, 0  ;;  %v9136_v29 = vcombine.low %v3216_v0, %v3226_v14 }
 0x19c   : > { %7551 = vmatprep.mubr.msk.bf16.mxu1 %vm452_vm1, %v6841_v63  ;;  %v9140_v49 = vsel %vm8804_vm2, %v6933_v33, %v3974_v47  ;;  %v3976_v6 = vrot.slane %v3974_v47, 4  ;;  %v3252_v48 = vshrl.u32 %v3161_v40, 16  ;;  %v3164_v63 = vld [vmem:[#allocation2 + $0x30] sm:$0xf]  ;;  %v3255_v27 = vshll.u32 %v3161_v40, 16 }
 0x19d   : > { %v3240_v11 = vsel %vm8257_vm10, %v3235_v59, %v3239_v45  ;;  %v3245_v57 = vrot.slane %v3244_v52, 4  ;;  %v3261_v58 = vshll.u32 %v9026_v5, 16  ;;  %v3265_v60 = vshrl.u32 %v9026_v5, 16  ;;  %v9154_v33 = vld [vmem:[#allocation2 + $0x50] sm:$0x1] }
 0x19e   : > { %v9150_v0 = vsel %vm8804_vm2, %v3976_v6, %v3977_v4  ;;  %v3254_v20 = vrot.slane %v3252_v48, 4  ;;  %v3271_v43 = vshll.u32 %v9034_v31, 16  ;;  %v3257_v47 = vrot.slane %v3255_v27, 5 }
 0x19f   : > { %v3250_v45 = vsel %vm8257_vm10, %v3245_v57, %v3249_v32  ;;  %v6949_v40 = vcombine.low %v9140_v49, %v9150_v0  ;;  %v3263_v14 = vrot.slane %v3261_v58, 5  ;;  %v3267_v4 = vrot.slane %v3265_v60, 4  ;;  %v9171_v58 = vld [vmem:[#allocation2 + $0x58] sm:$0xf] }
 0x1a0   : > { %7594 = vmatmul.mubr.msk.bf16.gmra.mxu0 %vm452_vm1, %v7938_v41  ;;  %v9161_v59 = vcombine.low %v3240_v11, %v3250_v45  ;;  %v3273_v52 = vrot.slane %v3271_v43, 5  ;;  %v6934_v41 = vrot.slane %v3885_v2, 9  ;;  %v3258_v5 = vor.u32 %v3257_v47, %v3254_v20 }
 0x1a1   : > { %7597 = vmatprep.mubr.msk.bf16.mxu0 %vm452_vm1, %v7939_v1  ;;  %v3981_v31 = vrot.slane %v9145_v7, 5  ;;  %v3984_v6 = vrot.slane %v9154_v33, 5  ;;  %v3276_v48 = vshrl.u32 %v3164_v63, 16  ;;  %v3886_v1 = vld [vmem:[#allocation2 + $0x54] sm:$0xe]  ;;  %v3268_v32 = vor.u32 %v3267_v4, %v3263_v14 }
 0x1a2   : > { %v3279_v57 = vshll.u32 %v3164_v63, 16  ;;  %v3285_v11 = vshll.u32 %v9075_v10, 16  ;;  %v3289_v27 = vshrl.u32 %v9075_v10, 16  ;;  %v3259_v2 = vrot.slane %v3258_v5, 4  ;;  %v7940_v63 = vld [vmem:[#allocation2 + $0xc0] sm:$0xff]  }
 0x1a3   : > { %7552 = vmatmul.mubr.msk.bf16.gmra.mxu1 %vm452_vm1, %v6842_v26  ;;  %v9179_v20 = vsel %vm8804_vm2, %v6934_v41, %v3981_v31  ;;  %v3983_v8 = vrot.slane %v3981_v31, 4  ;;  %v3278_v62 = vrot.slane %v3276_v48, 4  ;;  %v9181_v26 = vld [vmem:[#allocation2 + $0x5c] sm:$0x1]  ;;  %v3269_v60 = vrot.slane %v3268_v32, 4 }
 0x1a4   : > { %7555 = vmatprep.mubr.msk.bf16.mxu1 %vm452_vm1, %v6843_v36  ;;  %v3281_v43 = vrot.slane %v3279_v57, 5  ;;  %v3287_v10 = vrot.slane %v3285_v11, 5  ;;  %v3291_v45 = vrot.slane %v3289_v27, 4  ;;  %v3264_v47 = vsel %vm8257_vm10, %v3259_v2, %v3263_v14  ;;  %v3167_v4 = vld [vmem:[#allocation2 + $0x3c] sm:$0xf] }
 0x1a5   : > { %v9187_v34 = vsel %vm8804_vm2, %v3983_v8, %v3984_v6  ;;  %v3295_v56 = vshll.u32 %v9077_v17, 16  ;;  %v6935_v36 = vrot.slane %v3886_v1, 9  ;;  %v3274_v41 = vsel %vm8257_vm10, %v3269_v60, %v3273_v52  ;;  %v9203_v27 = vld [vmem:[#allocation2 + $0x64] sm:$0xf]  ;;  %v3887_v8 = vld [vmem:[#allocation2 + $0x60] sm:$0xe] }
 0x1a6   : > { %v6950_v5 = vcombine.low %v9179_v20, %v9187_v34  ;;  %v3282_v31 = vor.u32 %v3281_v43, %v3278_v62  ;;  %v3292_v48 = vor.u32 %v3291_v45, %v3287_v10  ;;  %v9199_v14 = vcombine.low %v3264_v47, %v3274_v41  ;;  %v9219_v47 = vld [vmem:[#allocation2 + $0x68] sm:$0x1] }
 0x1a7   : > { %v3297_v17 = vrot.slane %v3295_v56, 5  ;;  %v3988_v6 = vrot.slane %v9171_v58, 5  ;;  %v3991_v1 = vrot.slane %v9181_v26, 5  ;;  %v3300_v52 = vshrl.u32 %v3167_v4, 16  ;;  %v3170_v56 = vld [vmem:[#allocation2 + $0x48] sm:$0xf] }
 0x1a8   : > { %7598 = vmatmul.mubr.msk.bf16.gmra.mxu0 %vm452_vm1, %v7940_v63  ;;  %v3283_v32 = vrot.slane %v3282_v31, 4  ;;  %v3293_v57 = vrot.slane %v3292_v48, 4  ;;  %v3303_v11 = vshll.u32 %v3167_v4, 16  ;;  %v3309_v37 = vshll.u32 %v9105_v53, 16 }
 0x1a9   : > { %7637 = vmatprep.mubr.msk.bf16.mxu0 %vm452_vm1, %v6945_v25  ;;  %v9207_v2 = vsel %vm8804_vm2, %v6935_v36, %v3988_v6  ;;  %v3990_v30 = vrot.slane %v3988_v6, 4  ;;  %v3313_v25 = vshrl.u32 %v9105_v53, 16  ;;  %v11034_v62 = vcombine.low %v8949_v19, %v8969_v35 }
 0x1aa   : > { %v3288_v63 = vsel %vm8257_vm10, %v3283_v32, %v3287_v10  ;;  %v3298_v60 = vsel %vm8257_vm10, %v3293_v57, %v3297_v17  ;;  %v3302_v43 = vrot.slane %v3300_v52, 4  ;;  %v3305_v45 = vrot.slane %v3303_v11, 5 }
 0x1ab   : > { %7556 = vmatmul.mubr.msk.bf16.gmra.mxu1 %vm452_vm1, %v11034_v62  ;;  %v11035_v53 = vcombine.low %v8973_v50, %v8985_v54  ;;  %v9225_v36 = vcombine.low %v3288_v63, %v3298_v60  ;;  %v9229_v19 = vsel %vm8804_vm2, %v3990_v30, %v3991_v1  ;;  %v3311_v35 = vrot.slane %v3309_v37, 5  ;;  %v3888_v30 = vld [vmem:[#allocation2 + $0x6c] sm:$0xe]  ;;  %v3173_v37 = vld [vmem:[#allocation2 + $0x54] sm:$0xf] }
 0x1ac   : > { %v3315_v10 = vrot.slane %v3313_v25, 4  ;;  %v6951_v4 = vcombine.low %v9207_v2, %v9229_v19  ;;  %v3306_v41 = vor.u32 %v3305_v45, %v3302_v43  ;;  %v3319_v31 = vshll.u32 %v9109_v3, 16  ;;  %v9249_v62 = vld [vmem:[#allocation2 + $0x70] sm:$0xf] }
 0x1ad   : > { %7559 = vmatprep.mubr.msk.bf16.mxu1 %vm452_vm1, %v11035_v53  ;;  %v6936_v48 = vrot.slane %v3887_v8, 9  ;;  %v3995_v50 = vrot.slane %v9203_v27, 5  ;;  %v3998_v54 = vrot.slane %v9219_v47, 5  ;;  %v3324_v6 = vshrl.u32 %v3170_v56, 16 }
 0x1ae   : > { %v3316_v17 = vor.u32 %v3315_v10, %v3311_v35  ;;  %v11036_v32 = vcombine.low %v9051_v38, %v9062_v24  ;;  %v3307_v1 = vrot.slane %v3306_v41, 4  ;;  %v3321_v57 = vrot.slane %v3319_v31, 5 }
 0x1af   : > { %v3327_v52 = vshll.u32 %v3170_v56, 16  ;;  %v3333_v11 = vshll.u32 %v9145_v7, 16  ;;  %v11037_v3 = vcombine.low %v9073_v55, %v9091_v23  ;;  %v9247_v8 = vsel %vm8804_vm2, %v6936_v48, %v3995_v50  ;;  %v9254_v56 = vld [vmem:[#allocation2 + $0x74] sm:$0x1] }
 0x1b0   : > { %7638 = vmatmul.mubr.msk.bf16.vlgmr.msra.gmra.mxu0 %vm452_vm1, %v11036_v32  ;;  %v3317_v25 = vrot.slane %v3316_v17, 4  ;;  %v3997_v38 = vrot.slane %v3995_v50, 4  ;;  %v3326_v24 = vrot.slane %v3324_v6, 4  ;;  %v3312_v63 = vsel %vm8257_vm10, %v3307_v1, %v3311_v35 }
 0x1b1   : > { %7641 = vmatprep.mubr.msk.bf16.mxu0 %vm452_vm1, %v11037_v3  ;;  %v3329_v60 = vrot.slane %v3327_v52, 5  ;;  %v3335_v43 = vrot.slane %v3333_v11, 5  ;;  %v3337_v45 = vshrl.u32 %v9145_v7, 16  ;;  %v3343_v53 = vshll.u32 %v9154_v33, 16 }
 0x1b2   : > { %v3322_v55 = vsel %vm8257_vm10, %v3317_v25, %v3321_v57  ;;  %v9260_v23 = vsel %vm8804_vm2, %v3997_v38, %v3998_v54  ;;  %v6937_v10 = vrot.slane %v3888_v30, 9  ;;  %v11038_v41 = vcombine.low %v8980_v51, %v8995_v28  ;;  %v3889_v57 = vld [vmem:[#allocation2 + $0x78] sm:$0xe]  ;;  %v9283_v30 = vld [vmem:[#allocation2 + $0x7c] sm:$0xf] }
 0x1b3   : > { %v9267_v35 = vcombine.low %v3312_v63, %v3322_v55  ;;  %v6952_v7 = vcombine.low %v9247_v8, %v9260_v23  ;;  %v3330_v31 = vor.u32 %v3329_v60, %v3326_v24  ;;  %v3339_v48 = vrot.slane %v3337_v45, 4  ;;  %v9291_v24 = vld [vmem:[#allocation2 + $0x80] sm:$0x1]  ;;  %v3892_v23 = vld [vmem:[#allocation2 + $0x9c] sm:$0xe] }
 0x1b4   : > { %7560 = vmatmul.mubr.msk.bf16.gmra.mxu1 %vm452_vm1, %v11038_v41  ;;  %v11039_v17 = vcombine.low %v9022_v61, %v9040_v9  ;;  %v3345_v50 = vrot.slane %v3343_v53, 5  ;;  %v4002_v33 = vrot.slane %v9249_v62, 5  ;;  %v4005_v54 = vrot.slane %v9254_v56, 5  ;;  %v3176_v63 = vld [vmem:[#allocation2 + $0x60] sm:$0xf] }
 0x1b5   : > { %v3348_v51 = vshrl.u32 %v3173_v37, 16  ;;  %v3331_v28 = vrot.slane %v3330_v31, 4  ;;  %v3340_v6 = vor.u32 %v3339_v48, %v3335_v43  ;;  %v3351_v32 = vshll.u32 %v3173_v37, 16 }
 0x1b6   : > { %7563 = vmatprep.mubr.msk.bf16.mxu1 %vm452_vm1, %v11039_v17  ;;  %v3357_v1 = vshll.u32 %v9171_v58, 16  ;;  %v9280_v52 = vsel %vm8804_vm2, %v6937_v10, %v4002_v33  ;;  %v4004_v11 = vrot.slane %v4002_v33, 4  ;;  %v3361_v9 = vshrl.u32 %v9171_v58, 16  ;;  %v3179_v17 = vld [vmem:[#allocation2 + $0x6c] sm:$0xf] }
 0x1b7   : > { %v3350_v61 = vrot.slane %v3348_v51, 4  ;;  %v3336_v37 = vsel %vm8257_vm10, %v3331_v28, %v3335_v43  ;;  %v3341_v3 = vrot.slane %v3340_v6, 4  ;;  %v3353_v25 = vrot.slane %v3351_v32, 5 }
 0x1b8   : > { %7642 = vmatmul.mubr.msk.bf16.gmra.mxu0 %vm452_vm1, %v6948_v15  ;;  %v3359_v38 = vrot.slane %v3357_v1, 5  ;;  %v9299_v58 = vsel %vm8804_vm2, %v4004_v11, %v4005_v54  ;;  %v3363_v39 = vrot.slane %v3361_v9, 4  ;;  %v3367_v42 = vshll.u32 %v9181_v26, 16  ;;  %v9329_v1 = vld [vmem:[#allocation2 + $0x88] sm:$0xf] }
 0x1b9   : > { %7645 = vmatprep.mubr.msk.bf16.mxu0 %vm452_vm1, %v6949_v40  ;;  %v6938_v15 = vrot.slane %v3889_v57, 9  ;;  %v3346_v60 = vsel %vm8257_vm10, %v3341_v3, %v3345_v50  ;;  %v6953_v43 = vcombine.low %v9280_v52, %v9299_v58  ;;  %v3354_v45 = vor.u32 %v3353_v25, %v3350_v61  ;;  %v9404_v58 = vld [vmem:[#allocation2 + $0xa0] sm:$0xf] }
 0x1ba   : > { %v4009_v49 = vrot.slane %v9283_v30, 5  ;;  %v9307_v0 = vcombine.low %v3336_v37, %v3346_v60  ;;  %v3364_v40 = vor.u32 %v3363_v39, %v3359_v38  ;;  %v3369_v55 = vrot.slane %v3367_v42, 5  ;;  %v9351_v60 = vld [vmem:[#allocation2 + $0x94] sm:$0xf] }
 0x1bb   : > { %v4012_v53 = vrot.slane %v9291_v24, 5  ;;  %v11040_v26 = vcombine.low %v9056_v13, %v9069_v22  ;;  %v3355_v10 = vrot.slane %v3354_v45, 4  ;;  %v3372_v48 = vshrl.u32 %v3176_v63, 16  ;;  %v3890_v13 = vld [vmem:[#allocation2 + $0x84] sm:$0xe] }
 0x1bc   : > { %v9316_v41 = vsel %vm8804_vm2, %v6938_v15, %v4009_v49  ;;  %v4011_v31 = vrot.slane %v4009_v49, 4  ;;  %v3365_v50 = vrot.slane %v3364_v40, 4  ;;  %v3375_v33 = vshll.u32 %v3176_v63, 16  ;;  %v3891_v15 = vld [vmem:[#allocation2 + $0x90] sm:$0xe] }
 0x1bd   : > { %7564 = vmatmul.mubr.msk.bf16.gmra.mxu1 %vm452_vm1, %v11040_v26  ;;  %v3381_v54 = vshll.u32 %v9203_v27, 16  ;;  %v3385_v51 = vshrl.u32 %v9203_v27, 16  ;;  %v3360_v22 = vsel %vm8257_vm10, %v3355_v10, %v3359_v38  ;;  %v3374_v6 = vrot.slane %v3372_v48, 4  ;;  %v9360_v49 = vld [vmem:[%s11004_s3 + $0x20] sm:$0xf] }
 0x1be   : > { %7603 = vmatprep.mubr.msk.bf16.mxu1 %vm452_vm1, %v9136_v29  ;;  %v9326_v28 = vsel %vm8804_vm2, %v4011_v31, %v4012_v53  ;;  %v3391_v32 = vshll.u32 %v9219_v47, 16  ;;  %v9331_v29 = vld [vmem:[#allocation2 + $0x8c] sm:$0x1]  ;;  %v3370_v57 = vsel %vm8257_vm10, %v3365_v50, %v3369_v55  ;;  %v3377_v11 = vrot.slane %v3375_v33, 5  ;;  %v9364_v26 = vld [vmem:[#allocation2 + $0x98] sm:$0x1] }
 0x1bf   : > { %v6954_v27 = vcombine.low %v9316_v41, %v9326_v28  ;;  %v3383_v61 = vrot.slane %v3381_v54, 5  ;;  %v9341_v9 = vcombine.low %v3360_v22, %v3370_v57  ;;  %v3387_v47 = vrot.slane %v3385_v51, 4 }
 0x1c0   : > { %7646 = vmatmul.mubr.msk.bf16.gmra.mxu0 %vm452_vm1, %v6950_v5  ;;  %v3393_v37 = vrot.slane %v3391_v32, 5  ;;  %v6939_v3 = vrot.slane %v3890_v13, 9  ;;  %v3378_v25 = vor.u32 %v3377_v11, %v3374_v6  ;;  %v4016_v38 = vrot.slane %v9329_v1, 5  ;;  %v3185_v11 = vld [vmem:[#allocation2 + $0x84] sm:$0xf] }
 0x1c1   : > { %7649 = vmatprep.mubr.msk.bf16.mxu0 %vm452_vm1, %v6951_v4  ;;  %v4019_v39 = vrot.slane %v9331_v29, 5  ;;  %v3396_v42 = vshrl.u32 %v3179_v17, 16  ;;  %v3388_v20 = vor.u32 %v3387_v47, %v3383_v61  ;;  %v3399_v34 = vshll.u32 %v3179_v17, 16  ;;  %v3182_v17 = vld [vmem:[#allocation2 + $0x78] sm:$0xf] }
 0x1c2   : > { %v3405_v5 = vshll.u32 %v9249_v62, 16  ;;  %v3409_v63 = vshrl.u32 %v9249_v62, 16  ;;  %v3379_v45 = vrot.slane %v3378_v25, 4  ;;  %v9355_v2 = vsel %vm8804_vm2, %v6939_v3, %v4016_v38 }
 0x1c3   : > { %v4018_v19 = vrot.slane %v4016_v38, 4  ;;  %v3398_v4 = vrot.slane %v3396_v42, 4  ;;  %v3389_v40 = vrot.slane %v3388_v20, 4  ;;  %v3401_v55 = vrot.slane %v3399_v34, 5 }
 0x1c4   : > { %v3407_v62 = vrot.slane %v3405_v5, 5  ;;  %v3411_v53 = vrot.slane %v3409_v63, 4  ;;  %v3384_v10 = vsel %vm8257_vm10, %v3379_v45, %v3383_v61  ;;  %v6940_v48 = vrot.slane %v3891_v15, 9 }
 0x1c5   : > { %7604 = vmatmul.mubr.msk.bf16.vlgmr.msra.gmra.mxu1 %vm452_vm1, %v9161_v59  ;;  %v9373_v31 = vsel %vm8804_vm2, %v4018_v19, %v4019_v39  ;;  %v3415_v59 = vshll.u32 %v9254_v56, 16  ;;  %v3394_v50 = vsel %vm8257_vm10, %v3389_v40, %v3393_v37  ;;  %v3402_v33 = vor.u32 %v3401_v55, %v3398_v4 }
 0x1c6   : > { %7670 = vmatpush3.bf16.msra.mxu1 %v9134_v44  ;;  %7607 = vmatprep.mubr.msk.bf16.mxu1 %vm452_vm1, %v9199_v14  ;;  %v6955_v44 = vcombine.low %v9355_v2, %v9373_v31  ;;  %v3412_v54 = vor.u32 %v3411_v53, %v3407_v62  ;;  %v9382_v14 = vcombine.low %v3384_v10, %v3394_v50  ;;  %v4023_v13 = vrot.slane %v9351_v60, 5  ;;  %v3188_v53 = vld [vmem:[#allocation2 + $0x90] sm:$0xf] }
 0x1c7   : > { %7848 = vmatprep.subr.msk.bf16.mxu1 %vm501_vm0, %v9360_v49  ;;  %v3417_v51 = vrot.slane %v3415_v59, 5  ;;  %v4026_v56 = vrot.slane %v9364_v26, 5  ;;  %v3403_v22 = vrot.slane %v3402_v33, 4  ;;  %v3420_v32 = vshrl.u32 %v3182_v17, 16 }
 0x1c8   : > { %7650 = vmatmul.mubr.msk.bf16.gmra.mxu0 %vm452_vm1, %v6952_v7  ;;  %v3413_v6 = vrot.slane %v3412_v54, 4  ;;  %v3423_v57 = vshll.u32 %v3182_v17, 16  ;;  %v9396_v61 = vsel %vm8804_vm2, %v6940_v48, %v4023_v13  ;;  %v4025_v47 = vrot.slane %v4023_v13, 4  ;;  %v9428_v48 = vpop.f32.mrf.mxu0 }
 0x1c9   : > { %7653 = vmatprep.mubr.msk.bf16.mxu0 %vm452_vm1, %v6953_v43  ;;  %v3429_v37 = vshll.u32 %v9283_v30, 16  ;;  %v3433_v8 = vshrl.u32 %v9283_v30, 16  ;;  %v3408_v7 = vsel %vm8257_vm10, %v3403_v22, %v3407_v62  ;;  %v3422_v25 = vrot.slane %v3420_v32, 4  ;;  %v9406_v43 = vld [vmem:[#allocation2 + $0xa4] sm:$0x1] }
 0x1ca   : > { %v3418_v3 = vsel %vm8257_vm10, %v3413_v6, %v3417_v51  ;;  %v3425_v52 = vrot.slane %v3423_v57, 5  ;;  %v9412_v39 = vsel %vm8804_vm2, %v4025_v47, %v4026_v56  ;;  %v3439_v34 = vshll.u32 %v9291_v24, 16  ;;  %v3893_v62 = vld [vmem:[#allocation2 + $0xa8] sm:$0xe]  ;;  %v9437_v51 = vld [vmem:[#allocation2 + $0xb0] sm:$0x1]  ;;  %v9449_v47 = vpop.f32.mrf.mxu0 }
 0x1cb   : > { %v9408_v38 = vcombine.low %v3408_v7, %v3418_v3  ;;  %v3431_v30 = vrot.slane %v3429_v37, 5  ;;  %v3435_v42 = vrot.slane %v3433_v8, 4  ;;  %v6956_v15 = vcombine.low %v9396_v61, %v9412_v39  ;;  %v3894_v7 = vld [vmem:[#allocation2 + $0xb4] sm:$0xe] }
 0x1cc   : > { %v3426_v20 = vor.u32 %v3425_v52, %v3422_v25  ;;  %v6941_v5 = vrot.slane %v3892_v23, 9  ;;  %v4030_v45 = vrot.slane %v9404_v58, 5  ;;  %v4033_v2 = vrot.slane %v9406_v43, 5 }
 0x1cd   : > { %7608 = vmatmul.mubr.msk.bf16.gmra.mxu1 %vm452_vm1, %v9225_v36  ;;  %v3436_v63 = vor.u32 %v3435_v42, %v3431_v30  ;;  %v3444_v19 = vshrl.u32 %v3185_v11, 16  ;;  %v3441_v40 = vrot.slane %v3439_v34, 5  ;;  %v3447_v55 = vshll.u32 %v3185_v11, 16  ;;  %v9459_v42 = vld [vmem:[#allocation2 + $0xb8] sm:$0xf] }
 0x1ce   : > { %7611 = vmatprep.mubr.msk.bf16.mxu1 %vm452_vm1, %v9267_v35  ;;  %v3427_v4 = vrot.slane %v3426_v20, 4  ;;  %v3453_v36 = vshll.u32 %v9329_v1, 16  ;;  %v4031_v24 = vsel %vm8804_vm2, %v6941_v5, %v4030_v45  ;;  %v4032_v31 = vrot.slane %v4030_v45, 4  ;;  %v9426_v35 = vld [vmem:[#allocation2 + $0xac] sm:$0xf] }
 0x1cf   : > { %v3437_v10 = vrot.slane %v3436_v63, 4  ;;  %v3446_v59 = vrot.slane %v3444_v19, 4  ;;  %v3449_v50 = vrot.slane %v3447_v55, 5  ;;  %v3457_v54 = vshrl.u32 %v9329_v1, 16  ;;  %v9463_v63 = vld [vmem:[#allocation2 + $0xbc] sm:$0x1] }
 0x1d0   : > { %7654 = vmatmul.mubr.msk.bf16.gmra.mxu0 %vm452_vm1, %v6954_v27  ;;  %v3432_v17 = vsel %vm8257_vm10, %v3427_v4, %v3431_v30  ;;  %v3455_v33 = vrot.slane %v3453_v36, 5  ;;  %v4034_v56 = vsel %vm8804_vm2, %v4032_v31, %v4033_v2  ;;  %v3463_v41 = vshll.u32 %v9331_v29, 16  ;;  %v3191_v4 = vld [vmem:[#allocation2 + $0x9c] sm:$0xf] }
 0x1d1   : > { %7657 = vmatprep.mubr.msk.bf16.mxu0 %vm452_vm1, %v6955_v44  ;;  %v3442_v13 = vsel %vm8257_vm10, %v3437_v10, %v3441_v40  ;;  %v6942_v28 = vrot.slane %v3893_v62, 9  ;;  %v6957_v22 = vcombine.low %v4031_v24, %v4034_v56  ;;  %v3450_v6 = vor.u32 %v3449_v50, %v3446_v59  ;;  %v9468_v40 = vpop.f32.mrf.mxu0  ;;  %v3194_v59 = vld [vmem:[#allocation2 + $0xa8] sm:$0xf] }
 0x1d2   : > { %v9445_v27 = vcombine.low %v3432_v17, %v3442_v13  ;;  %v3459_v32 = vrot.slane %v3457_v54, 4  ;;  %v3465_v57 = vrot.slane %v3463_v41, 5  ;;  %v4037_v1 = vrot.slane %v9426_v35, 5  ;;  %v3895_v13 = vld [vmem:[#allocation2 + $0xc0] sm:$0xe] }
 0x1d3   : > { %v4040_v11 = vrot.slane %v9437_v51, 5  ;;  %v3468_v44 = vshrl.u32 %v3188_v53, 16  ;;  %v3451_v37 = vrot.slane %v3450_v6, 4  ;;  %v3471_v29 = vshll.u32 %v3188_v53, 16  ;;  %v9485_v56 = vpop.f32.mrf.mxu0 }
 0x1d4   : > { %v3460_v8 = vor.u32 %v3459_v32, %v3455_v33  ;;  %v3477_v23 = vshll.u32 %v9351_v60, 16  ;;  %v4038_v3 = vsel %vm8804_vm2, %v6942_v28, %v4037_v1  ;;  %v4039_v25 = vrot.slane %v4037_v1, 4  ;;  %v9494_v32 = vld [vmem:[#allocation2 + $0xc4] sm:$0xf] }
 0x1d5   : > { %7612 = vmatmul.mubr.msk.bf16.gmra.mxu1 %vm452_vm1, %v9307_v0  ;;  %v3470_v52 = vrot.slane %v3468_v44, 4  ;;  %v3481_v30 = vshrl.u32 %v9351_v60, 16  ;;  %v3456_v0 = vsel %vm8257_vm10, %v3451_v37, %v3455_v33  ;;  %v3473_v34 = vrot.slane %v3471_v29, 5 }
 0x1d6   : > { %7615 = vmatprep.mubr.msk.bf16.mxu1 %vm452_vm1, %v9341_v9  ;;  %v3461_v20 = vrot.slane %v3460_v8, 4  ;;  %v3479_v5 = vrot.slane %v3477_v23, 5  ;;  %v4041_v9 = vsel %vm8804_vm2, %v4039_v25, %v4040_v11  ;;  %v3487_v2 = vshll.u32 %v9364_v26, 16  ;;  %v9506_v25 = vpop.f32.mrf.mxu0 }
 0x1d7   : > { %v3483_v45 = vrot.slane %v3481_v30, 4  ;;  %v6943_v19 = vrot.slane %v3894_v7, 9  ;;  %v6958_v55 = vcombine.low %v4038_v3, %v4041_v9  ;;  %v3474_v36 = vor.u32 %v3473_v34, %v3470_v52 }
 0x1d8   : > { %7658 = vmatmul.mubr.msk.bf16.gmra.mxu0 %vm452_vm1, %v6956_v15  ;;  %v3466_v60 = vsel %vm8257_vm10, %v3461_v20, %v3465_v57  ;;  %v4044_v62 = vrot.slane %v9459_v42, 5  ;;  %v3489_v10 = vrot.slane %v3487_v2, 5  ;;  %v4047_v24 = vrot.slane %v9463_v63, 5  ;;  %v9496_v57 = vld [vmem:[#allocation2 + $0xc8] sm:$0x1] }
 0x1d9   : > { %7661 = vmatprep.mubr.msk.bf16.mxu0 %vm452_vm1, %v6957_v22  ;;  %v9478_v53 = vcombine.low %v3456_v0, %v3466_v60  ;;  %v3484_v26 = vor.u32 %v3483_v45, %v3479_v5  ;;  %v3475_v31 = vrot.slane %v3474_v36, 4  ;;  %v3492_v15 = vshrl.u32 %v3191_v4, 16  ;;  %v4707_v20 = vld [vmem:[#allocation2 + $0x18] sm:$0xf] }
 0x1da   : > { %v4045_v61 = vsel %vm8804_vm2, %v6943_v19, %v4044_v62  ;;  %v4046_v39 = vrot.slane %v4044_v62, 4  ;;  %v3495_v50 = vshll.u32 %v3191_v4, 16  ;;  %v3501_v33 = vshll.u32 %v9404_v58, 16  ;;  %v9519_v62 = vld [vmem:[#allocation2 + $0x1c] sm:$0xf] }
 0x1db   : > { %v3485_v17 = vrot.slane %v3484_v26, 4  ;;  %v3505_v54 = vshrl.u32 %v9404_v58, 16  ;;  %v3480_v41 = vsel %vm8257_vm10, %v3475_v31, %v3479_v5  ;;  %v3494_v22 = vrot.slane %v3492_v15, 4  ;;  %v9527_v15 = vld [vmem:[#allocation2 + $0x20] sm:$0x1] }
 0x1dc   : > { %v4048_v28 = vsel %vm8804_vm2, %v4046_v39, %v4047_v24  ;;  %v3511_v6 = vshll.u32 %v9406_v43, 16  ;;  %v3497_v1 = vrot.slane %v3495_v50, 5  ;;  %v3503_v11 = vrot.slane %v3501_v33, 5 }
 0x1dd   : > { %7616 = vmatmul.mubr.msk.bf16.gmra.mxu1 %vm452_vm1, %v9382_v14  ;;  %v3490_v58 = vsel %vm8257_vm10, %v3485_v17, %v3489_v10  ;;  %v6959_v14 = vcombine.low %v4045_v61, %v4048_v28  ;;  %v3507_v37 = vrot.slane %v3505_v54, 4  ;;  %v6944_v29 = vrot.slane %v3895_v13, 9  ;;  %v9521_v10 = vpop.f32.mrf.mxu0 }
 0x1de   : > { %7619 = vmatprep.mubr.msk.bf16.mxu1 %vm452_vm1, %v9408_v38  ;;  %v9502_v44 = vcombine.low %v3480_v41, %v3490_v58  ;;  %v3513_v8 = vrot.slane %v3511_v6, 5  ;;  %v3498_v23 = vor.u32 %v3497_v1, %v3494_v22  ;;  %v4051_v43 = vrot.slane %v9494_v32, 5 }
 0x1df   : > { %v4054_v7 = vrot.slane %v9496_v57, 5  ;;  %v3516_v3 = vshrl.u32 %v3194_v59, 16  ;;  %v3508_v38 = vor.u32 %v3507_v37, %v3503_v11  ;;  %v3519_v52 = vshll.u32 %v3194_v59, 16  ;;  %v3197_v59 = vld [vmem:[#allocation2 + $0xb4] sm:$0xf]  ;;  %v9536_v1 = vpop.f32.mrf.mxu0 }
 0x1e0   : > { %7662 = vmatmul.mubr.msk.bf16.gmra.mxu0 %vm452_vm1, %v6958_v55  ;;  %v3525_v30 = vshll.u32 %v9426_v35, 16  ;;  %v3529_v0 = vshrl.u32 %v9426_v35, 16  ;;  %v3499_v34 = vrot.slane %v3498_v23, 4  ;;  %v4052_v5 = vsel %vm8804_vm2, %v6944_v29, %v4051_v43  ;;  %v4710_v29 = vld [vmem:[#allocation2 + $0x24] sm:$0xf] }
 0x1e1   : > { %7665 = vmatprep.mubr.msk.bf16.mxu0 %vm452_vm1, %v6959_v14  ;;  %v4053_v9 = vrot.slane %v4051_v43, 4  ;;  %v3518_v45 = vrot.slane %v3516_v3, 4  ;;  %v3509_v2 = vrot.slane %v3508_v38, 4  ;;  %v3521_v19 = vrot.slane %v3519_v52, 5  ;;  %v9534_v14 = vpop.f32.mrf.mxu1 }
 0x1e2   : > { %v3527_v4 = vrot.slane %v3525_v30, 5  ;;  %v3531_v60 = vrot.slane %v3529_v0, 4  ;;  %v3504_v55 = vsel %vm8257_vm10, %v3499_v34, %v3503_v11  ;;  %v3535_v35 = vshll.u32 %v9437_v51, 16 }
 0x1e3   : > { %v4055_v36 = vsel %vm8804_vm2, %v4053_v9, %v4054_v7  ;;  %v4756_v26 = vshrl.u32 %v4707_v20, 16  ;;  %v3514_v24 = vsel %vm8257_vm10, %v3509_v2, %v3513_v8  ;;  %v3522_v61 = vor.u32 %v3521_v19, %v3518_v45  ;;  %v9548_v9 = vld [vmem:[#allocation2 + $0x28] sm:$0xf]  ;;  %v9550_v2 = vpop.f32.mrf.mxu1  ;;  %v9552_v19 = vpop.f32.mrf.mxu0 }
 0x1e4   : > { %v6960_v31 = vcombine.low %v4052_v5, %v4055_v36  ;;  %v3532_v39 = vor.u32 %v3531_v60, %v3527_v4  ;;  %v6909_v51 = vcombine.low %v3504_v55, %v3514_v24  ;;  %v3537_v17 = vrot.slane %v3535_v35, 5  ;;  %11041 = vst [vmem:[#allocation6_spill] sm:$0xff] %v9552_v19  ;;  %v9556_v36 = vld [vmem:[#allocation2 + $0x2c] sm:$0x1]  ;;  %v3200_v24 = vld [vmem:[#allocation2 + $0xc0] sm:$0xf] }
 0x1e5   : > { %7620 = vmatmul.mubr.msk.bf16.gmra.mxu1 %vm452_vm1, %v9445_v27  ;;  %v4758_v50 = vrot.slane %v4756_v26, 4  ;;  %v4759_v33 = vshll.u32 %v4707_v20, 16  ;;  %v3523_v54 = vrot.slane %v3522_v61, 4  ;;  %v4765_v27 = vshll.u32 %v9519_v62, 16 }
 0x1e6   : > { %7623 = vmatprep.mubr.msk.bf16.mxu1 %vm452_vm1, %v9478_v53  ;;  %v3533_v13 = vrot.slane %v3532_v39, 4  ;;  %v4769_v41 = vshrl.u32 %v9519_v62, 16  ;;  %v4775_v22 = vshll.u32 %v9527_v15, 16  ;;  %v3540_v6 = vshrl.u32 %v3197_v59, 16 }
 0x1e7   : > { %v4761_v28 = vrot.slane %v4759_v33, 5  ;;  %v3543_v58 = vshll.u32 %v3197_v59, 16  ;;  %v3528_v53 = vsel %vm8257_vm10, %v3523_v54, %v3527_v4  ;;  %v4767_v37 = vrot.slane %v4765_v27, 5  ;;  %v9566_v33 = vpop.f32.mrf.mxu1 }
 0x1e8   : > { %7666 = vmatmul.mubr.msk.bf16.gmra.mxu0 %vm452_vm1, %v6960_v31  ;;  %v3538_v11 = vsel %vm8257_vm10, %v3533_v13, %v3537_v17  ;;  %v4771_v8 = vrot.slane %v4769_v41, 4  ;;  %v4777_v7 = vrot.slane %v4775_v22, 5  ;;  %v3542_v3 = vrot.slane %v3540_v6, 4 }
 0x1e9   : > { %v6910_v23 = vcombine.low %v3528_v53, %v3538_v11  ;;  %v4762_v43 = vor.u32 %v4761_v28, %v4758_v50  ;;  %v3545_v52 = vrot.slane %v3543_v58, 5  ;;  %v3549_v30 = vshll.u32 %v9459_v42, 16  ;;  %v9568_v54 = vpop.f32.mrf.mxu0  ;;  %v4713_v11 = vld [vmem:[#allocation2 + $0x30] sm:$0xf] }
 0x1ea   : > { %v4772_v38 = vor.u32 %v4771_v8, %v4767_v37  ;;  %v3553_v0 = vshrl.u32 %v9459_v42, 16  ;;  %v3559_v34 = vshll.u32 %v9463_v63, 16  ;;  %v5237_v5 = vsel %vm501_vm0, %v9014_v12, 0 }
 0x1eb   : > { %v4763_v20 = vrot.slane %v4762_v43, 4  ;;  %v4780_v45 = vshrl.u32 %v4710_v29, 16  ;;  %v3546_v60 = vor.u32 %v3545_v52, %v3542_v3  ;;  %v3551_v55 = vrot.slane %v3549_v30, 5  ;;  %7704 = vmatpush3.bf16.msra.mxu0 %v5237_v5  ;;  %v9577_v30 = vld [vmem:[#allocation2 + $0x34] sm:$0xf] }
 0x1ec   : > { %v4773_v4 = vrot.slane %v4772_v38, 4  ;;  %v3555_v42 = vrot.slane %v3553_v0, 4  ;;  %v3561_v63 = vrot.slane %v3559_v34, 5  ;;  %v4783_v26 = vshll.u32 %v4710_v29, 16  ;;  %v9579_v0 = vpop.f32.mrf.mxu1 }
 0x1ed   : > { %7624 = vmatmul.mubr.msk.bf16.gmra.mxu1 %vm452_vm1, %v9502_v44  ;;  %v4768_v12 = vsel %vm8257_vm10, %v4763_v20, %v4767_v37  ;;  %v4782_v35 = vrot.slane %v4780_v45, 4  ;;  %v3547_v44 = vrot.slane %v3546_v60, 4  ;;  %v4789_v39 = vshll.u32 %v9548_v9, 16  ;;  %v9581_v20 = vpop.f32.mrf.mxu0 }
 0x1ee   : > { %7627 = vmatprep.mubr.msk.bf16.mxu1 %vm452_vm1, %v6909_v51  ;;  %v4778_v31 = vsel %vm8257_vm10, %v4773_v4, %v4777_v7  ;;  %v3556_v61 = vor.u32 %v3555_v42, %v3551_v55  ;;  %v4785_v17 = vrot.slane %v4783_v26, 5  ;;  %v4793_v50 = vshrl.u32 %v9548_v9, 16  ;;  %v9588_v42 = vld [vmem:[#allocation2 + $0x38] sm:$0x1] }
 0x1ef   : > { %v7009_v59 = vcombine.low %v4768_v12, %v4778_v31  ;;  %v4799_v51 = vshll.u32 %v9556_v36, 16  ;;  %v3552_v13 = vsel %vm8257_vm10, %v3547_v44, %v3551_v55  ;;  %v4791_v41 = vrot.slane %v4789_v39, 5  ;;  %v9594_v39 = vld [vmem:[#allocation2 + $0x40] sm:$0xf] }
 0x1f0   : > { %v3557_v27 = vrot.slane %v3556_v61, 4  ;;  %v3564_v28 = vshrl.u32 %v3200_v24, 16  ;;  %v4786_v22 = vor.u32 %v4785_v17, %v4782_v35  ;;  %v4795_v6 = vrot.slane %v4793_v50, 4  ;;  %v9598_v17 = vpop.f32.mrf.mxu0 }
 0x1f1   : > { %7705 = vmatprep.mubr.msk.bf16.mxu0 %vm452_vm1, %v7009_v59  ;;  %v4801_v58 = vrot.slane %v4799_v51, 5  ;;  %v3567_v53 = vshll.u32 %v3200_v24, 16  ;;  %v3573_v29 = vshll.u32 %v9494_v32, 16  ;;  %v3577_v43 = vshrl.u32 %v9494_v32, 16  ;;  %v4716_v24 = vld [vmem:[#allocation2 + $0x3c] sm:$0xf] }
 0x1f2   : > { %v3562_v37 = vsel %vm8257_vm10, %v3557_v27, %v3561_v63  ;;  %v3566_v8 = vrot.slane %v3564_v28, 4  ;;  %v4787_v3 = vrot.slane %v4786_v22, 4  ;;  %v4796_v38 = vor.u32 %v4795_v6, %v4791_v41 }
 0x1f3   : > { %v6911_v7 = vcombine.low %v3552_v13, %v3562_v37  ;;  %v3569_v52 = vrot.slane %v3567_v53, 5  ;;  %v3575_v34 = vrot.slane %v3573_v29, 5  ;;  %v3579_v5 = vrot.slane %v3577_v43, 4  ;;  %v9596_v59 = vpop.f32.mrf.mxu1  ;;  %v9606_v53 = vld [vmem:[#allocation2 + $0x44] sm:$0x1] }
 0x1f4   : > { %v3583_v45 = vshll.u32 %v9496_v57, 16  ;;  %v4804_v4 = vshrl.u32 %v4713_v11, 16  ;;  %v4792_v32 = vsel %vm8257_vm10, %v4787_v3, %v4791_v41  ;;  %v4797_v60 = vrot.slane %v4796_v38, 4  ;;  %v7941_v3 = vld [vmem:[#allocation2 + $0x18] sm:$0xff]  }
 0x1f5   : > { %7628 = vmatmul.mubr.msk.bf16.gmra.mxu1 %vm452_vm1, %v6910_v23  ;;  %v3570_v55 = vor.u32 %v3569_v52, %v3566_v8  ;;  %v4807_v12 = vshll.u32 %v4713_v11, 16  ;;  %v3580_v63 = vor.u32 %v3579_v5, %v3575_v34  ;;  %v4813_v23 = vshll.u32 %v9577_v30, 16  ;;  %v4719_v8 = vld [vmem:[#allocation2 + $0x48] sm:$0xf]  ;;  %v9609_v52 = vpop.f32.mrf.mxu1  ;;  %v9611_v5 = vpop.f32.mrf.mxu0 }
 0x1f6   : > { %7631 = vmatprep.mubr.msk.bf16.mxu1 %vm452_vm1, %v6911_v7  ;;  %v3585_v35 = vrot.slane %v3583_v45, 5  ;;  %v4806_v26 = vrot.slane %v4804_v4, 4  ;;  %v4802_v57 = vsel %vm8257_vm10, %v4797_v60, %v4801_v58  ;;  %v4817_v61 = vshrl.u32 %v9577_v30, 16  ;;  %v9614_v60 = vld [vmem:[#allocation2 + $0x4c] sm:$0xf] }
 0x1f7   : > { %v3571_v31 = vrot.slane %v3570_v55, 4  ;;  %v4809_v44 = vrot.slane %v4807_v12, 5  ;;  %v7010_v50 = vcombine.low %v4792_v32, %v4802_v57  ;;  %v3581_v51 = vrot.slane %v3580_v63, 4  ;;  %v9625_v57 = vld [vmem:[#allocation2 + $0x50] sm:$0x1] }
 0x1f8   : > { %v4815_v13 = vrot.slane %v4813_v23, 5  ;;  %v4823_v27 = vshll.u32 %v9588_v42, 16  ;;  %v4819_v28 = vrot.slane %v4817_v61, 4  ;;  %v4828_v22 = vshrl.u32 %v4716_v24, 16 }
 0x1f9   : > { %v4810_v41 = vor.u32 %v4809_v44, %v4806_v26  ;;  %7706 = vmatmul.mubr.msk.bf16.vlgmr.msra.gmra.mxu0 %vm452_vm1, %v7010_v50  ;;  %v3576_v6 = vsel %vm8257_vm10, %v3571_v31, %v3575_v34  ;;  %v3586_v58 = vsel %vm8257_vm10, %v3581_v51, %v3585_v35  ;;  %v4831_v11 = vshll.u32 %v4716_v24, 16  ;;  %v9633_v51 = vpop.f32.mrf.mxu0 }
 0x1fa   : > { %v4837_v37 = vshll.u32 %v9594_v39, 16  ;;  %v6912_v29 = vcombine.low %v3576_v6, %v3586_v58  ;;  %v4820_v7 = vor.u32 %v4819_v28, %v4815_v13  ;;  %v4830_v38 = vrot.slane %v4828_v22, 4 }
 0x1fb   : > { %v4811_v43 = vrot.slane %v4810_v41, 4  ;;  %v4825_v45 = vrot.slane %v4823_v27, 5  ;;  %v4833_v34 = vrot.slane %v4831_v11, 5  ;;  %v4841_v32 = vshrl.u32 %v9594_v39, 16 }
 0x1fc   : > { %v4839_v4 = vrot.slane %v4837_v37, 5  ;;  %v4821_v55 = vrot.slane %v4820_v7, 4  ;;  %v4847_v12 = vshll.u32 %v9606_v53, 16  ;;  %v9620_v63 = vadd.f32 %v9428_v48, %v9534_v14  ;;  %v9631_v14 = vpop.f32.mrf.mxu1  ;;  %v4722_v37 = vld [vmem:[#allocation2 + $0x54] sm:$0xf] }
 0x1fd   : > { %7632 = vmatmul.mubr.msk.bf16.gmra.mxu1 %vm452_vm1, %v6912_v29  ;;  %v4852_v35 = vshrl.u32 %v4719_v8, 16  ;;  %v4816_v26 = vsel %vm8257_vm10, %v4811_v43, %v4815_v13  ;;  %v4834_v23 = vor.u32 %v4833_v34, %v4830_v38  ;;  %v4843_v24 = vrot.slane %v4841_v32, 4 }
 0x1fe   : > { %7671 = vmatprep.mubr.msk.bf16.mxu1 %vm452_vm1, %v7941_v3  ;;  %v4855_v31 = vshll.u32 %v4719_v8, 16  ;;  %v4826_v44 = vsel %vm8257_vm10, %v4821_v55, %v4825_v45  ;;  %v4861_v50 = vshll.u32 %v9614_v60, 16  ;;  %v4865_v48 = vshrl.u32 %v9614_v60, 16  ;;  %v9643_v3 = vld [vmem:[#allocation2 + $0x58] sm:$0xf]  ;;  %v7942_v45 = vld [vmem:[#allocation2 + $0x24] sm:$0xff]  }
 0x1ff   : > { %v4854_v61 = vrot.slane %v4852_v35, 4  ;;  %v7011_v13 = vcombine.low %v4816_v26, %v4826_v44  ;;  %v4835_v27 = vrot.slane %v4834_v23, 4  ;;  %v4844_v41 = vor.u32 %v4843_v24, %v4839_v4  ;;  %v9653_v35 = vpop.f32.mrf.mxu1  ;;  %v7943_v26 = vld [vmem:[#allocation2 + $0x30] sm:$0xff]   ;;  %v4725_v44 = vld [vmem:[#allocation2 + $0x60] sm:$0xf] }
 0x200   : > { %v4857_v28 = vrot.slane %v4855_v31, 5  ;;  %v4849_v22 = vrot.slane %v4847_v12, 5  ;;  %v4863_v6 = vrot.slane %v4861_v50, 5  ;;  %v4867_v58 = vrot.slane %v4865_v48, 4  ;;  %v9651_v12 = vld [vmem:[#allocation2 + $0x5c] sm:$0x1] }
 0x201   : > { %v4871_v11 = vshll.u32 %v9625_v57, 16  ;;  %7709 = vmatprep.mubr.msk.bf16.mxu0 %vm452_vm1, %v7011_v13  ;;  %v4845_v8 = vrot.slane %v4844_v41, 4  ;;  %v5706_v43 = vsel %vm501_vm0, %v9360_v49, 0  ;;  %v9641_v7 = vadd.f32 %v9449_v47, %v9550_v2  ;;  %11042 = vst [vmem:[#allocation7_spill] sm:$0xff] %v9653_v35  ;;  %v9655_v49 = vpop.f32.mrf.mxu0 }
 0x202   : > { %v4858_v29 = vor.u32 %v4857_v28, %v4854_v61  ;;  %v4840_v38 = vsel %vm8257_vm10, %v4835_v27, %v4839_v4  ;;  %v4868_v34 = vor.u32 %v4867_v58, %v4863_v6  ;;  %v9649_v55 = vadd.f32 %v9468_v40, %v9566_v33  ;;  %v9666_v27 = vld [vmem:[#allocation2 + $0x64] sm:$0xf] }
 0x203   : > { %v4873_v32 = vrot.slane %v4871_v11, 5  ;;  %v4850_v47 = vsel %vm8257_vm10, %v4845_v8, %v4849_v22  ;;  %v4876_v23 = vshrl.u32 %v4722_v37, 16  ;;  %v4879_v4 = vshll.u32 %v4722_v37, 16  ;;  %v9677_v37 = vpop.f32.mrf.mxu0 }
 0x204   : > { %v4859_v2 = vrot.slane %v4858_v29, 4  ;;  %v7012_v24 = vcombine.low %v4840_v38, %v4850_v47  ;;  %v4869_v31 = vrot.slane %v4868_v34, 4  ;;  %v4885_v40 = vshll.u32 %v9643_v3, 16  ;;  %v7477_v11 = vpop.f32.mrf.mxu1 }
 0x205   : > { %7672 = vmatmul.mubr.msk.bf16.vlgmr.msra.gmra.mxu1 %vm452_vm1, %v7942_v45  ;;  %v4889_v33 = vshrl.u32 %v9643_v3, 16  ;;  %v4878_v50 = vrot.slane %v4876_v23, 4  ;;  %v4881_v48 = vrot.slane %v4879_v4, 5  ;;  %v4895_v13 = vshll.u32 %v9651_v12, 16  ;;  %v4728_v4 = vld [vmem:[#allocation2 + $0x6c] sm:$0xf] }
 0x206   : > { %v4864_v61 = vsel %vm8257_vm10, %v4859_v2, %v4863_v6  ;;  %7738 = vmatpush3.bf16.msra.mxu1 %v5706_v43  ;;  %7675 = vmatprep.mubr.msk.bf16.mxu1 %vm452_vm1, %v7943_v26  ;;  %v4874_v41 = vsel %vm8257_vm10, %v4869_v31, %v4873_v32  ;;  %v4887_v28 = vrot.slane %v4885_v40, 5  ;;  %v9673_v58 = vadd.f32 %v9506_v25, %v9596_v59  ;;  %v9675_v6 = vld [vmem:[#allocation2 + $0x68] sm:$0x1]  ;;  %v7944_v25 = vld [vmem:[#allocation2 + $0x3c] sm:$0xff]  }
 0x207   : > { %7710 = vmatmul.mubr.msk.bf16.gmra.mxu0 %vm452_vm1, %v7012_v24  ;;  %v4891_v22 = vrot.slane %v4889_v33, 4  ;;  %v7013_v8 = vcombine.low %v4864_v61, %v4874_v41  ;;  %v4882_v29 = vor.u32 %v4881_v48, %v4878_v50  ;;  %v4897_v43 = vrot.slane %v4895_v13, 5  ;;  %v1955_v61 = vpop.f32.mrf.mxu1  ;;  %v9689_v50 = vpop.f32.mrf.mxu0  ;;  %v7945_v41 = vld [vmem:[#allocation2 + $0x48] sm:$0xff]  }
 0x208   : > { %v4900_v38 = vshrl.u32 %v4725_v44, 16  ;;  %v4903_v34 = vshll.u32 %v4725_v44, 16  ;;  %v4909_v47 = vshll.u32 %v9666_v27, 16  ;;  %v4913_v32 = vshrl.u32 %v9666_v27, 16  ;;  %v9687_v44 = vld [vmem:[#allocation2 + $0x70] sm:$0xf] }
 0x209   : > { %v4892_v45 = vor.u32 %v4891_v22, %v4887_v28  ;;  %7713 = vmatprep.mubr.msk.bf16.mxu0 %vm452_vm1, %v7013_v8  ;;  %v4883_v2 = vrot.slane %v4882_v29, 4  ;;  %v4919_v26 = vshll.u32 %v9675_v6, 16  ;;  %v9685_v23 = vadd.f32 %v9521_v10, %v9609_v52  ;;  %v9697_v10 = vld [vmem:[#allocation2 + $0x74] sm:$0x1] }
 0x20a   : > { %v4902_v59 = vrot.slane %v4900_v38, 4  ;;  %v4905_v31 = vrot.slane %v4903_v34, 5  ;;  %v4911_v40 = vrot.slane %v4909_v47, 5  ;;  %v4915_v33 = vrot.slane %v4913_v32, 4 }
 0x20b   : > { %11043 = vst [vmem:[#allocation8_spill] sm:$0xff] %v9685_v23  ;;  %v4893_v24 = vrot.slane %v4892_v45, 4  ;;  %v4888_v48 = vsel %vm8257_vm10, %v4883_v2, %v4887_v28  ;;  %v4921_v13 = vrot.slane %v4919_v26, 5  ;;  %v9695_v22 = vadd.f32 %v9536_v1, %v9631_v14  ;;  %v4731_v1 = vld [vmem:[#allocation2 + $0x78] sm:$0xf] }
 0x20c   : > { %v4906_v8 = vor.u32 %v4905_v31, %v4902_v59  ;;  %v4916_v29 = vor.u32 %v4915_v33, %v4911_v40  ;;  %v4924_v38 = vshrl.u32 %v4728_v4, 16  ;;  %v4927_v28 = vshll.u32 %v4728_v4, 16  ;;  %v9737_v23 = vld [vmem:[#allocation2 + $0x8c] sm:$0x1] }
 0x20d   : > { %11044 = vst [vmem:[#allocation9_spill] sm:$0xff] %v9695_v22  ;;  %v4898_v52 = vsel %vm8257_vm10, %v4893_v24, %v4897_v43  ;;  %7676 = vmatmul.mubr.msk.bf16.gmra.mxu1 %vm452_vm1, %v7944_v25  ;;  %v4933_v34 = vshll.u32 %v9687_v44, 16  ;;  %v4937_v47 = vshrl.u32 %v9687_v44, 16  ;;  %v4943_v26 = vshll.u32 %v9697_v10, 16  ;;  %v9706_v43 = vld [vmem:[#allocation2 + $0x7c] sm:$0xf]  ;;  %v7478_v25 = vpop.f32.mrf.mxu1 }
 0x20e   : > { %v7014_v45 = vcombine.low %v4888_v48, %v4898_v52  ;;  %7679 = vmatprep.mubr.msk.bf16.mxu1 %vm452_vm1, %v7945_v41  ;;  %v4907_v14 = vrot.slane %v4906_v8, 4  ;;  %v4917_v32 = vrot.slane %v4916_v29, 4  ;;  %v4926_v2 = vrot.slane %v4924_v38, 4  ;;  %v9708_v59 = vpop.f32.mrf.mxu0  ;;  %v9714_v48 = vld [vmem:[#allocation2 + $0x80] sm:$0x1]  ;;  %11048 = vst [vmem:[#allocation13_spill] sm:$0xff] %v9737_v23 }
 0x20f   : > { %v4929_v24 = vrot.slane %v4927_v28, 5  ;;  %v4935_v31 = vrot.slane %v4933_v34, 5  ;;  %v4939_v4 = vrot.slane %v4937_v47, 4  ;;  %v9712_v33 = vadd.f32 %v9568_v54, %v7477_v11  ;;  %v7946_v34 = vld [vmem:[#allocation2 + $0x54] sm:$0xff]  }
 0x210   : > { %7714 = vmatmul.mubr.msk.bf16.gmra.mxu0 %vm452_vm1, %v7014_v45  ;;  %v4912_v41 = vsel %vm8257_vm10, %v4907_v14, %v4911_v40  ;;  %v4922_v52 = vsel %vm8257_vm10, %v4917_v32, %v4921_v13  ;;  %v4945_v8 = vrot.slane %v4943_v26, 5  ;;  %v4948_v29 = vshrl.u32 %v4731_v1, 16  ;;  %v9720_v38 = vpop.f32.mrf.mxu0  ;;  %v1958_v40 = vpop.f32.mrf.mxu1  ;;  %v4734_v14 = vld [vmem:[#allocation2 + $0x84] sm:$0xf] }
 0x211   : > { %11045 = vst [vmem:[#allocation10_spill] sm:$0xff] %v9712_v33  ;;  %v7015_v22 = vcombine.low %v4912_v41, %v4922_v52  ;;  %v4930_v45 = vor.u32 %v4929_v24, %v4926_v2  ;;  %v4940_v28 = vor.u32 %v4939_v4, %v4935_v31  ;;  %v4951_v47 = vshll.u32 %v4731_v1, 16  ;;  %v7947_v2 = vld [vmem:[#allocation2 + $0x60] sm:$0xff]   ;;  %v9731_v1 = vld [vmem:[#allocation2 + $0x88] sm:$0xf] }
 0x212   : > { %v4950_v19 = vrot.slane %v4948_v29, 4  ;;  %v4957_v54 = vshll.u32 %v9706_v43, 16  ;;  %v4961_v11 = vshrl.u32 %v9706_v43, 16  ;;  %v4967_v33 = vshll.u32 %v9714_v48, 16  ;;  %v9725_v35 = vpop.f32.mrf.mxu0 }
 0x213   : > { %7717 = vmatprep.mubr.msk.bf16.mxu0 %vm452_vm1, %v7015_v22  ;;  %v4931_v13 = vrot.slane %v4930_v45, 4  ;;  %v4941_v32 = vrot.slane %v4940_v28, 4  ;;  %v4953_v26 = vrot.slane %v4951_v47, 5  ;;  %v9729_v24 = vadd.f32 %v9581_v20, %v1955_v61 }
 0x214   : > { %v4959_v4 = vrot.slane %v4957_v54, 5  ;;  %v4963_v41 = vrot.slane %v4961_v11, 4  ;;  %v4969_v52 = vrot.slane %v4967_v33, 5  ;;  %v9735_v29 = vadd.f32 %v9598_v17, %v7478_v25  ;;  %v9739_v22 = vpop.f32.mrf.mxu0 }
 0x215   : > { %11046 = vst [vmem:[#allocation11_spill] sm:$0xff] %v9729_v24  ;;  %7680 = vmatmul.mubr.msk.bf16.gmra.mxu1 %vm452_vm1, %v7946_v34  ;;  %11049 = vst [vmem:[#allocation14_spill] sm:$0xff] %v9739_v22  ;;  %v4936_v45 = vsel %vm8257_vm10, %v4931_v13, %v4935_v31  ;;  %v4946_v20 = vsel %vm8257_vm10, %v4941_v32, %v4945_v8  ;;  %v4954_v61 = vor.u32 %v4953_v26, %v4950_v19  ;;  %v4737_v19 = vld [vmem:[#allocation2 + $0x90] sm:$0xf]  ;;  %v9764_v22 = vld [vmem:[#allocation2 + $0x98] sm:$0x1] }
 0x216   : > { %11047 = vst [vmem:[#allocation12_spill] sm:$0xff] %v9735_v29  ;;  %7683 = vmatprep.mubr.msk.bf16.mxu1 %vm452_vm1, %v7947_v2  ;;  %v9747_v28 = vadd.f32 %v9611_v5, %v1958_v40  ;;  %v7016_v33 = vcombine.low %v4936_v45, %v4946_v20  ;;  %v4964_v34 = vor.u32 %v4963_v41, %v4959_v4  ;;  %v4972_v17 = vshrl.u32 %v4734_v14, 16  ;;  %v9749_v47 = vpop.f32.mrf.mxu0 }
 0x217   : > { %v4975_v25 = vshll.u32 %v4734_v14, 16  ;;  %v4955_v54 = vrot.slane %v4954_v61, 4  ;;  %v4981_v11 = vshll.u32 %v9731_v1, 16  ;;  %v4985_v31 = vshrl.u32 %v9731_v1, 16  ;;  %v9758_v14 = vld [vmem:[#allocation2 + $0x94] sm:$0xf] }
 0x218   : > { %11050 = vst [vmem:[#allocation15_spill] sm:$0xff] %v9747_v28  ;;  %v4991_v13 = vshll.u32 %v9737_v23, 16  ;;  %v7481_v8 = vpop.f32.mrf.mxu1  ;;  %7718 = vmatmul.mubr.msk.bf16.gmra.mxu0 %vm452_vm1, %v7016_v33  ;;  %v4965_v32 = vrot.slane %v4964_v34, 4  ;;  %v4974_v5 = vrot.slane %v4972_v17, 4  ;;  %11052 = vst [vmem:[#allocation17_spill] sm:$0xff] %v9758_v14  ;;  %v9760_v2 = vpop.f32.mrf.mxu0  ;;  %v7948_v17 = vld [vmem:[#allocation2 + $0x6c] sm:$0xff]  }
 0x219   : > { %v4977_v40 = vrot.slane %v4975_v25, 5  ;;  %v9756_v26 = vadd.f32 %v9633_v51, %v7481_v8  ;;  %v4960_v41 = vsel %vm8257_vm10, %v4955_v54, %v4959_v4  ;;  %v4983_v45 = vrot.slane %v4981_v11, 5  ;;  %11053 = vst [vmem:[#allocation18_spill] sm:$0xff] %v9764_v22  ;;  %v7949_v54 = vld [vmem:[#allocation2 + $0x78] sm:$0xff]  }
 0x21a   : > { %v4987_v20 = vrot.slane %v4985_v31, 4  ;;  %v4993_v61 = vrot.slane %v4991_v13, 5  ;;  %v1971_v28 = vpop.f32.mrf.mxu1  ;;  %v4970_v33 = vsel %vm8257_vm10, %v4965_v32, %v4969_v52  ;;  %v4996_v51 = vshrl.u32 %v4737_v19, 16  ;;  %v9768_v8 = vpop.f32.mrf.mxu0  ;;  %v4740_v32 = vld [vmem:[#allocation2 + $0x9c] sm:$0xf] }
 0x21b   : > { %11051 = vst [vmem:[#allocation16_spill] sm:$0xff] %v9756_v26  ;;  %v4978_v34 = vor.u32 %v4977_v40, %v4974_v5  ;;  %v4999_v25 = vshll.u32 %v4737_v19, 16  ;;  %v7017_v26 = vcombine.low %v4960_v41, %v4970_v33  ;;  %v5005_v24 = vshll.u32 %v9758_v14, 16 }
 0x21c   : > { %v4988_v29 = vor.u32 %v4987_v20, %v4983_v45  ;;  %v5009_v4 = vshrl.u32 %v9758_v14, 16  ;;  %v7482_v11 = vpop.f32.mrf.mxu1  ;;  %v4998_v13 = vrot.slane %v4996_v51, 4  ;;  %v5015_v52 = vshll.u32 %v9764_v22, 16  ;;  %v9774_v5 = vpop.f32.mrf.mxu0 }
 0x21d   : > { %v4979_v31 = vrot.slane %v4978_v34, 4  ;;  %7684 = vmatmul.mubr.msk.bf16.gmra.mxu1 %vm452_vm1, %v7948_v17  ;;  %v5001_v23 = vrot.slane %v4999_v25, 5  ;;  %11054 = vst [vmem:[#allocation19_spill] sm:$0xff] %v9774_v5  ;;  %7721 = vmatprep.mubr.msk.bf16.mxu0 %vm452_vm1, %v7017_v26  ;;  %v5007_v40 = vrot.slane %v5005_v24, 5  ;;  %v9779_v20 = vadd.f32 %v9655_v49, %v1971_v28  ;;  %v9781_v34 = vld [vmem:[#allocation2 + $0xa0] sm:$0xf] }
 0x21e   : > { %v4989_v19 = vrot.slane %v4988_v29, 4  ;;  %v5011_v41 = vrot.slane %v5009_v4, 4  ;;  %7687 = vmatprep.mubr.msk.bf16.mxu1 %vm452_vm1, %v7949_v54  ;;  %v1974_v33 = vpop.f32.mrf.mxu1  ;;  %11056 = vst [vmem:[#allocation21_spill] sm:$0xff] %v9781_v34  ;;  %v9786_v25 = vadd.f32 %v9677_v37, %v7482_v11  ;;  %v9795_v49 = vld [vmem:[#allocation2 + $0xa4] sm:$0x1]  ;;  %v5020_v28 = vshrl.u32 %v4740_v32, 16 }
 0x21f   : > { %11055 = vst [vmem:[#allocation20_spill] sm:$0xff] %v9779_v20  ;;  %v4984_v17 = vsel %vm8257_vm10, %v4979_v31, %v4983_v45  ;;  %v5002_v51 = vor.u32 %v5001_v23, %v4998_v13  ;;  %v9788_v5 = vpop.f32.mrf.mxu0  ;;  %v9793_v26 = vadd.f32 %v9689_v50, %v1974_v33  ;;  %11059 = vst [vmem:[#allocation24_spill] sm:$0xff] %v9795_v49  ;;  %v5023_v20 = vshll.u32 %v4740_v32, 16  ;;  %v4743_v45 = vld [vmem:[#allocation2 + $0xa8] sm:$0xf] }
 0x220   : > { %11057 = vst [vmem:[#allocation22_spill] sm:$0xff] %v9786_v25  ;;  %v4994_v24 = vsel %vm8257_vm10, %v4989_v19, %v4993_v61  ;;  %v5012_v29 = vor.u32 %v5011_v41, %v5007_v40  ;;  %v5029_v23 = vshll.u32 %v9781_v34, 16  ;;  %v5017_v31 = vrot.slane %v5015_v52, 5  ;;  %v9801_v41 = vld [vmem:[#allocation2 + $0xac] sm:$0xf] }
 0x221   : > { %11058 = vst [vmem:[#allocation23_spill] sm:$0xff] %v9793_v26  ;;  %v7018_v4 = vcombine.low %v4984_v17, %v4994_v24  ;;  %v5003_v54 = vrot.slane %v5002_v51, 4  ;;  %v9798_v37 = vpop.f32.mrf.mxu0  ;;  %v5022_v13 = vrot.slane %v5020_v28, 4  ;;  %v5033_v61 = vshrl.u32 %v9781_v34, 16  ;;  %11060 = vst [vmem:[#allocation25_spill] sm:$0xff] %v9801_v41  ;;  %v7950_v51 = vld [vmem:[#allocation2 + $0x84] sm:$0xff]  }
 0x222   : > { %v5013_v11 = vrot.slane %v5012_v29, 4  ;;  %v7485_v19 = vpop.f32.mrf.mxu1  ;;  %v5025_v50 = vrot.slane %v5023_v20, 5  ;;  %v5031_v33 = vrot.slane %v5029_v23, 5  ;;  %v5039_v17 = vshll.u32 %v9795_v49, 16  ;;  %v9808_v24 = vld [vmem:[#allocation2 + $0xb0] sm:$0x1] }
 0x223   : > { %7722 = vmatmul.mubr.msk.bf16.gmra.mxu0 %vm452_vm1, %v7018_v4  ;;  %v9806_v32 = vadd.f32 %v9708_v59, %v7485_v19  ;;  %11062 = vst [vmem:[#allocation27_spill] sm:$0xff] %v9808_v24  ;;  %v9810_v29 = vpop.f32.mrf.mxu0  ;;  %v5008_v52 = vsel %vm8257_vm10, %v5003_v54, %v5007_v40  ;;  %v5035_v26 = vrot.slane %v5033_v61, 4  ;;  %v5044_v4 = vshrl.u32 %v4743_v45, 16  ;;  %v7951_v20 = vld [vmem:[#allocation2 + $0x90] sm:$0xff]  }
 0x224   : > { %v5018_v28 = vsel %vm8257_vm10, %v5013_v11, %v5017_v31  ;;  %v1987_v23 = vpop.f32.mrf.mxu1  ;;  %v5026_v49 = vor.u32 %v5025_v50, %v5022_v13  ;;  %v5047_v59 = vshll.u32 %v4743_v45, 16  ;;  %v5053_v19 = vshll.u32 %v9801_v41, 16  ;;  %v4746_v31 = vld [vmem:[#allocation2 + $0xb4] sm:$0xf] }
 0x225   : > { %11061 = vst [vmem:[#allocation26_spill] sm:$0xff] %v9806_v32  ;;  %v7019_v25 = vcombine.low %v5008_v52, %v5018_v28  ;;  %7688 = vmatmul.mubr.msk.bf16.gmra.mxu1 %vm452_vm1, %v7950_v51  ;;  %v9818_v32 = vpop.f32.mrf.mxu0  ;;  %v5036_v34 = vor.u32 %v5035_v26, %v5031_v33  ;;  %v5046_v22 = vrot.slane %v5044_v4, 4  ;;  %v5057_v40 = vshrl.u32 %v9801_v41, 16  ;;  %v9827_v51 = vld [vmem:[#allocation2 + $0xb8] sm:$0xf] }
 0x226   : > { %11063 = vst [vmem:[#allocation28_spill] sm:$0xff] %v9818_v32  ;;  %v5063_v54 = vshll.u32 %v9808_v24, 16  ;;  %7691 = vmatprep.mubr.msk.bf16.mxu1 %vm452_vm1, %v7951_v20  ;;  %v7486_v11 = vpop.f32.mrf.mxu1  ;;  %v5027_v13 = vrot.slane %v5026_v49, 4  ;;  %v5049_v61 = vrot.slane %v5047_v59, 5  ;;  %v5055_v50 = vrot.slane %v5053_v19, 5  ;;  %11065 = vst [vmem:[#allocation30_spill] sm:$0xff] %v9827_v51 }
 0x227   : > { %7725 = vmatprep.mubr.msk.bf16.mxu0 %vm452_vm1, %v7019_v25  ;;  %v9825_v45 = vadd.f32 %v9720_v38, %v1987_v23  ;;  %v5037_v26 = vrot.slane %v5036_v34, 4  ;;  %v5041_v52 = vrot.slane %v5039_v17, 5  ;;  %v5059_v28 = vrot.slane %v5057_v40, 4  ;;  %v9838_v19 = vld [vmem:[#allocation2 + $0xbc] sm:$0x1] }
 0x228   : > { %v9830_v4 = vadd.f32 %v9725_v35, %v7486_v11  ;;  %v9832_v32 = vpop.f32.mrf.mxu1  ;;  %v9834_v20 = vpop.f32.mrf.mxu0  ;;  %v5032_v25 = vsel %vm8257_vm10, %v5027_v13, %v5031_v33  ;;  %v5050_v49 = vor.u32 %v5049_v61, %v5046_v22  ;;  %v5065_v59 = vrot.slane %v5063_v54, 5  ;;  %11068 = vst [vmem:[#allocation33_spill] sm:$0xff] %v9838_v19  ;;  %v4749_v11 = vld [vmem:[#allocation2 + $0xc0] sm:$0xf]  ;;  %v7953_v54 = vld [vmem:[#allocation2 + $0xa8] sm:$0xff]  }
 0x229   : > { %11064 = vst [vmem:[#allocation29_spill] sm:$0xff] %v9825_v45  ;;  %11067 = vst [vmem:[#allocation32_spill] sm:$0xff] %v9832_v32  ;;  %v5068_v38 = vshrl.u32 %v4746_v31, 16  ;;  %v5042_v34 = vsel %vm8257_vm10, %v5037_v26, %v5041_v52  ;;  %v5060_v17 = vor.u32 %v5059_v28, %v5055_v50  ;;  %v5071_v23 = vshll.u32 %v4746_v31, 16  ;;  %v7952_v33 = vld [vmem:[#allocation2 + $0x9c] sm:$0xff]  }
 0x22a   : > { %11066 = vst [vmem:[#allocation31_spill] sm:$0xff] %v9830_v4  ;;  %v5077_v35 = vshll.u32 %v9827_v51, 16  ;;  %v7489_v40 = vpop.f32.mrf.mxu1  ;;  %v9843_v4 = vpop.f32.mrf.mxu0  ;;  %v7020_v32 = vcombine.low %v5032_v25, %v5042_v34  ;;  %v5051_v24 = vrot.slane %v5050_v49, 4  ;;  %v5081_v22 = vshrl.u32 %v9827_v51, 16  ;;  %v9847_v52 = vld [vmem:[#allocation2 + $0xc4] sm:$0xf] }
 0x22b   : > { %v5070_v45 = vrot.slane %v5068_v38, 4  ;;  %v5061_v13 = vrot.slane %v5060_v17, 4  ;;  %v5073_v61 = vrot.slane %v5071_v23, 5  ;;  %v5087_v26 = vshll.u32 %v9838_v19, 16 }
 0x22c   : > { %v5079_v41 = vrot.slane %v5077_v35, 5  ;;  %v2003_v31 = vpop.f32.mrf.mxu1  ;;  %v9849_v28 = vpop.f32.mrf.mxu0  ;;  %7726 = vmatmul.mubr.msk.bf16.gmra.mxu0 %vm452_vm1, %v7020_v32  ;;  %v5083_v14 = vrot.slane %v5081_v22, 4  ;;  %v9853_v25 = vadd.f32 %v9749_v47, %v7489_v40  ;;  %v5092_v49 = vshrl.u32 %v4749_v11, 16  ;;  %v9863_v47 = vld [vmem:[#allocation2 + $0xc8] sm:$0x1] }
 0x22d   : > { %7692 = vmatmul.mubr.msk.bf16.gmra.mxu1 %vm452_vm1, %v7952_v33  ;;  %v5056_v38 = vsel %vm8257_vm10, %v5051_v24, %v5055_v50  ;;  %v5066_v34 = vsel %vm8257_vm10, %v5061_v13, %v5065_v59  ;;  %v5074_v17 = vor.u32 %v5073_v61, %v5070_v45  ;;  %v5095_v23 = vshll.u32 %v4749_v11, 16  ;;  %v761_v11 = vld [vmem:[#allocation2 + $0xcc] sm:$0x1] }
 0x22e   : > { %11069 = vst [vmem:[#allocation34_spill] sm:$0xff] %v9853_v25  ;;  %7695 = vmatprep.mubr.msk.bf16.mxu1 %vm452_vm1, %v7953_v54  ;;  %v7490_v35 = vpop.f32.mrf.mxu1  ;;  %v9861_v19 = vpop.f32.mrf.mxu0  ;;  %v7021_v32 = vcombine.low %v5056_v38, %v5066_v34  ;;  %v5084_v22 = vor.u32 %v5083_v14, %v5079_v41  ;;  %v5094_v40 = vrot.slane %v5092_v49, 4  ;;  %v5101_v33 = vshll.u32 %v9847_v52, 16 }
 0x22f   : > { %11070 = vst [vmem:[#allocation35_spill] sm:$0xff] %v9861_v19  ;;  %v5075_v25 = vrot.slane %v5074_v17, 4  ;;  %v5089_v51 = vrot.slane %v5087_v26, 5  ;;  %v5097_v24 = vrot.slane %v5095_v23, 5  ;;  %v5105_v50 = vshrl.u32 %v9847_v52, 16 }
 0x230   : > { %v9867_v59 = vpop.f32.mrf.mxu1  ;;  %v9869_v45 = vpop.f32.mrf.mxu0  ;;  %7729 = vmatprep.mubr.msk.bf16.mxu0 %vm452_vm1, %v7021_v32  ;;  %v5085_v54 = vrot.slane %v5084_v22, 4  ;;  %v5103_v13 = vrot.slane %v5101_v33, 5  ;;  %v9873_v14 = vadd.f32 %v9760_v2, %v2003_v31  ;;  %v9876_v61 = vadd.f32 %v9768_v8, %v7490_v35  ;;  %v817_v17 = vld [vmem:[#allocation2 + $0xd4] sm:$0x1]  ;;  %v9881_v23 = vld [vmem:[#allocation2 + $0xd0] sm:$0xf] }
 0x231   : > { %v5098_v49 = vor.u32 %v5097_v24, %v5094_v40  ;;  %v5107_v26 = vrot.slane %v5105_v50, 4  ;;  %v5111_v38 = vshll.u32 %v9863_v47, 16  ;;  %v5080_v32 = vsel %vm8257_vm10, %v5075_v25, %v5079_v41  ;;  %v7954_v2 = vld [vmem:[#allocation2 + $0xb4] sm:$0xff]   ;;  %v7955_v24 = vld [vmem:[#allocation2 + $0xc0] sm:$0xff]  }
 0x232   : > { %11071 = vst [vmem:[#allocation36_spill] sm:$0xff] %v9876_v61  ;;  %v9879_v34 = vpop.f32.mrf.mxu0  ;;  %v5090_v22 = vsel %vm8257_vm10, %v5085_v54, %v5089_v51  ;;  %v762_v8 = vsel %vm8191_vm4, 0, %v761_v11  ;;  %v5432_v50 = vld [vmem:[#allocation2 + $0x18] sm:$0xe]  ;;  %v5498_v19 = vrot.slane %v9519_v62, 5  ;;  %v818_v18 = vsel %vm8199_vm6, 0, %v817_v17 }
 0x233   : > { %v7022_v31 = vcombine.low %v5080_v32, %v5090_v22  ;;  %v5099_v35 = vrot.slane %v5098_v49, 4  ;;  %v5108_v40 = vor.u32 %v5107_v26, %v5103_v13  ;;  %v7493_v33 = vpop.f32.mrf.mxu1  ;;  %763 = vst [vmem:[#allocation2 + $0xcc] sm:$0x1] %v762_v8  ;;  %v5125_v51 = vshll.u32 %v9881_v23, 16  ;;  %819 = vst [vmem:[#allocation2 + $0xd4] sm:$0x1] %v818_v18 }
 0x234   : > { %v9890_v61 = vpop.f32.mrf.mxu0  ;;  %v9893_v41 = vadd.f32 %v9788_v5, %v7493_v33  ;;  %v5113_v11 = vrot.slane %v5111_v38, 5  ;;  %v5500_v62 = vrot.slane %v5498_v19, 4  ;;  %v5501_v49 = vrot.slane %v9527_v15, 5  ;;  %v5433_v22 = vld [vmem:[#allocation2 + $0x24] sm:$0xe] }
 0x235   : > { %7696 = vmatmul.mubr.msk.bf16.gmra.mxu1 %vm452_vm1, %v7954_v2  ;;  %7730 = vmatmul.mubr.msk.bf16.gmra.mxu0 %vm452_vm1, %v7022_v31  ;;  %v5109_v25 = vrot.slane %v5108_v40, 4  ;;  %v2019_v54 = vpop.f32.mrf.mxu1  ;;  %v7041_v21 = vrot.slane %v5432_v50, 9  ;;  %v9907_v17 = vrot.slane %v5125_v51, 5  ;;  %v5129_v32 = vshrl.u32 %v9881_v23, 16  ;;  %v5434_v50 = vld [vmem:[#allocation2 + $0x30] sm:$0xe] }
 0x236   : > { %7699 = vmatprep.mubr.msk.bf16.mxu1 %vm452_vm1, %v7955_v24  ;;  %v9902_v5 = vpop.f32.mrf.mxu0  ;;  %v9905_v26 = vadd.f32 %v9798_v37, %v2019_v54  ;;  %v5104_v38 = vsel %vm8257_vm10, %v5099_v35, %v5103_v13  ;;  %v5502_v15 = vsel %vm8804_vm2, %v5500_v62, %v5501_v49  ;;  %v5505_v37 = vrot.slane %v9548_v9, 5 }
 0x237   : > { %11072 = vst [vmem:[#allocation37_spill] sm:$0xff] %v9902_v5  ;;  %v5114_v2 = vsel %vm8257_vm10, %v5109_v25, %v5113_v11  ;;  %v7494_v8 = vpop.f32.mrf.mxu1  ;;  %v5131_v24 = vrot.slane %v5129_v32, 4  ;;  %v5499_v13 = vsel %vm8804_vm2, %v7041_v21, %v5498_v19  ;;  %v7042_v35 = vrot.slane %v5433_v22, 9 }
 0x238   : > { %v9916_v31 = vpop.f32.mrf.mxu0  ;;  %v7023_v40 = vcombine.low %v5104_v38, %v5114_v2  ;;  %v9920_v33 = vadd.f32 %v9810_v29, %v7494_v8  ;;  %v5507_v51 = vrot.slane %v5505_v37, 4  ;;  %v5512_v11 = vrot.slane %v9577_v30, 5 }
 0x239   : > { %v9922_v18 = vpop.f32.mrf.mxu1  ;;  %v9931_v9 = vadd.f32 %v9485_v56, %v9579_v0  ;;  %v7057_v54 = vcombine.low %v5499_v13, %v5502_v15  ;;  %v5132_v49 = vor.u32 %v5131_v24, %v9907_v17  ;;  %v5508_v32 = vrot.slane %v9556_v36, 5 }
 0x23a   : > { %v9926_v25 = vpop.f32.mrf.mxu0  ;;  %7733 = vmatprep.mubr.msk.bf16.mxu0 %vm452_vm1, %v7023_v40  ;;  %v7956_v29 = vld [vmem:[#allocation2 + $0xcc] sm:$0xff]   ;;  %v5506_v38 = vsel %vm8804_vm2, %v7042_v35, %v5505_v37  ;;  %v7043_v30 = vrot.slane %v5434_v50, 9  ;;  %v9944_v0 = vld [vmem:[#allocation2 + $0xd4] sm:$0x1]  ;;  %v5514_v36 = vrot.slane %v5512_v11, 4  ;;  %v5515_v15 = vrot.slane %v9588_v42, 5 }
 0x23b   : > { %v4752_v62 = vld [vmem:[#allocation2 + $0xcc] sm:$0xf]  ;;  %v7497_v19 = vpop.f32.mrf.mxu1  ;;  %v5509_v8 = vsel %vm8804_vm2, %v5507_v51, %v5508_v32  ;;  %v5435_v40 = vld [vmem:[#allocation2 + $0x3c] sm:$0xe]  ;;  %v5133_v13 = vrot.slane %v5132_v49, 4 }
 0x23c   : > { %v5116_v21 = vshrl.u32 %v4752_v62, 16  ;;  %v5119_v22 = vshll.u32 %v4752_v62, 16  ;;  %v9938_v2 = vpop.f32.mrf.mxu0  ;;  %v9941_v56 = vadd.f32 %v9834_v20, %v7497_v19  ;;  %v5135_v20 = vshll.u32 %v9944_v0, 16 }
 0x23d   : > { %7700 = vmatmul.mubr.msk.bf16.gmra.mxu1 %vm452_vm1, %v7956_v29  ;;  %v2035_v37 = vpop.f32.mrf.mxu1  ;;  %v5513_v51 = vsel %vm8804_vm2, %v7043_v30, %v5512_v11  ;;  %v5516_v42 = vsel %vm8804_vm2, %v5514_v36, %v5515_v15  ;;  %v5519_v62 = vrot.slane %v9594_v39, 5  ;;  %v7058_v49 = vcombine.low %v5506_v38, %v5509_v8  ;;  %v5437_v30 = vld [vmem:[#allocation2 + $0x54] sm:$0xe] }
 0x23e   : > { %7739 = vmatprep.mubr.msk.bf16.mxu1 %vm452_vm1, %v7057_v54  ;;  %v5118_v24 = vrot.slane %v5116_v21, 4  ;;  %v5121_v50 = vrot.slane %v5119_v22, 5  ;;  %v9951_v35 = vpop.f32.mrf.mxu0  ;;  %v9954_v29 = vadd.f32 %v9843_v4, %v2035_v37  ;;  %v5436_v54 = vld [vmem:[#allocation2 + $0x48] sm:$0xe]  ;;  %v5137_v19 = vrot.slane %v5135_v20, 5 }
 0x23f   : > { %11073 = vst [vmem:[#allocation38_spill] sm:$0xff] %v9951_v35  ;;  %v7498_v21 = vpop.f32.mrf.mxu1  ;;  %v7044_v5 = vrot.slane %v5435_v40, 9  ;;  %v5521_v4 = vrot.slane %v5519_v62, 4  ;;  %v5522_v37 = vrot.slane %v9606_v53, 5  ;;  %v5526_v11 = vrot.slane %v9614_v60, 5 }
 0x240   : > { %v5122_v32 = vor.u32 %v5121_v50, %v5118_v24  ;;  %v9961_v22 = vpop.f32.mrf.mxu0  ;;  %v9964_v35 = vadd.f32 %v9849_v28, %v7498_v21  ;;  %v5138_v39 = vsel %vm8257_vm10, %v5133_v13, %v5137_v19  ;;  %v7059_v24 = vcombine.low %v5513_v51, %v5516_v42  ;;  %v5438_v50 = vld [vmem:[#allocation2 + $0x60] sm:$0xe] }
 0x241   : > { %v9970_v15 = vpop.f32.mrf.mxu1  ;;  %v7045_v8 = vrot.slane %v5436_v54, 9  ;;  %v5520_v28 = vsel %vm8804_vm2, %v7044_v5, %v5519_v62  ;;  %v5523_v40 = vsel %vm8804_vm2, %v5521_v4, %v5522_v37  ;;  %v5528_v53 = vrot.slane %v5526_v11, 4 }
 0x242   : > { %v5123_v36 = vrot.slane %v5122_v32, 4  ;;  %v9972_v38 = vpop.f32.mrf.mxu0  ;;  %v5529_v60 = vrot.slane %v9625_v57, 5  ;;  %v7046_v54 = vrot.slane %v5437_v30, 9  ;;  %v5533_v5 = vrot.slane %v9643_v3, 5 }
 0x243   : > { %v7537_v20 = vpop.f32.mrf.mxu1  ;;  %v5527_v51 = vsel %vm8804_vm2, %v7045_v8, %v5526_v11  ;;  %v7060_v57 = vcombine.low %v5520_v28, %v5523_v40  ;;  %v5536_v37 = vrot.slane %v9651_v12, 5  ;;  %v7047_v3 = vrot.slane %v5438_v50, 9 }
 0x244   : > { %v5128_v13 = vsel %vm8257_vm10, %v5123_v36, %v9907_v17  ;;  %v9984_v42 = vpop.f32.mrf.mxu0  ;;  %v9988_v32 = vadd.f32 %v7537_v20, %v9620_v63  ;;  %v5530_v16 = vsel %vm8804_vm2, %v5528_v53, %v5529_v60  ;;  %v5439_v17 = vld [vmem:[#allocation2 + $0x6c] sm:$0xe]  ;;  %v5535_v4 = vrot.slane %v5533_v5, 4 }
 0x245   : > { %v7024_v62 = vcombine.low %v5128_v13, %v5138_v39  ;;  %7740 = vmatmul.mubr.msk.bf16.vlgmr.msra.gmra.mxu1 %vm452_vm1, %v7058_v49  ;;  %v2639_v19 = vpop.f32.mrf.mxu1  ;;  %v5540_v11 = vrot.slane %v9666_v27, 5  ;;  %v7061_v49 = vcombine.low %v5527_v51, %v5530_v16  ;;  %v10004_v30 = vsel %vm8804_vm2, %v7046_v54, %v5533_v5  ;;  %v5441_v54 = vld [vmem:[#allocation2 + $0x84] sm:$0xe] }
 0x246   : > { %7743 = vmatprep.mubr.msk.bf16.mxu1 %vm452_vm1, %v7059_v24  ;;  %v9994_v21 = vpop.f32.mrf.mxu0  ;;  %v10000_v63 = vadd.f32 %v2639_v19, %v9641_v7  ;;  %v5547_v36 = vrot.slane %v9687_v44, 5  ;;  %v10011_v12 = vsel %vm8804_vm2, %v5535_v4, %v5536_v37  ;;  %v5543_v8 = vrot.slane %v9675_v6, 5  ;;  %v5440_v7 = vld [vmem:[#allocation2 + $0x78] sm:$0xe] }
 0x247   : > { %11074 = vst [vmem:[#allocation39_spill] sm:$0xff] %v9994_v21  ;;  %7734 = vmatmul.mubr.msk.bf16.gmra.mxu0 %vm452_vm1, %v7024_v62  ;;  %v7538_v39 = vpop.f32.mrf.mxu1  ;;  %v5542_v27 = vrot.slane %v5540_v11, 4  ;;  %v7048_v28 = vrot.slane %v5439_v17, 9  ;;  %v5550_v44 = vrot.slane %v9697_v10, 5  ;;  %v10024_v20 = vsel %vm8804_vm2, %v7047_v3, %v5540_v11  ;;  %v5442_v17 = vld [vmem:[#allocation2 + $0x90] sm:$0xe] }
 0x248   : > { %v10007_v24 = vpop.f32.mrf.mxu0  ;;  %v10015_v40 = vadd.f32 %v7538_v39, %v9649_v55  ;;  %v5549_v60 = vrot.slane %v5547_v36, 4  ;;  %v5554_v51 = vrot.slane %v9706_v43, 5  ;;  %v7049_v16 = vrot.slane %v5440_v7, 9 }
 0x249   : > { %v2642_v50 = vpop.f32.mrf.mxu1  ;;  %v5544_v6 = vsel %vm8804_vm2, %v5542_v27, %v5543_v8  ;;  %v10030_v55 = vsel %vm8804_vm2, %v7048_v28, %v5547_v36  ;;  %v5557_v43 = vrot.slane %v9714_v48, 5  ;;  %v7050_v39 = vrot.slane %v5441_v54, 9  ;;  %v11075_v27 = vld [vmem:[#allocation17_spill] sm:$0xff] }
 0x24a   : > { %v10020_v13 = vpop.f32.mrf.mxu0  ;;  %v10034_v5 = vadd.f32 %v2642_v50, %v9931_v9  ;;  %v7063_v10 = vcombine.low %v10024_v20, %v5544_v6  ;;  %v10039_v62 = vsel %vm8804_vm2, %v5549_v60, %v5550_v44  ;;  %v5556_v3 = vrot.slane %v5554_v51, 4  ;;  %v11078_v44 = vld [vmem:[#allocation8_spill] sm:$0xff] }
 0x24b   : > { %v7541_v19 = vpop.f32.mrf.mxu1  ;;  %v5561_v9 = vrot.slane %v9731_v1, 5  ;;  %v10053_v36 = vsel %vm8804_vm2, %v7049_v16, %v5554_v51  ;;  %v5568_v8 = vrot.slane %v11075_v27, 5  ;;  %v11077_v1 = vld [vmem:[#allocation13_spill] sm:$0xff]  ;;  %v11079_v51 = vld [vmem:[#allocation18_spill] sm:$0xff]  ;;  %v11080_v16 = vld [vmem:[#allocation7_spill] sm:$0xff] }
 0x24c   : > { %v10041_v4 = vpop.f32.mrf.mxu0  ;;  %v10048_v11 = vadd.f32 %v7541_v19, %v9673_v58  ;;  %v10061_v48 = vsel %vm8804_vm2, %v5556_v3, %v5557_v43  ;;  %v5564_v60 = vrot.slane %v11077_v1, 5  ;;  %v5571_v54 = vrot.slane %v11079_v51, 5  ;;  %v11081_v19 = vld [vmem:[#allocation6_spill] sm:$0xff]  ;;  %v11082_v43 = vld [vmem:[#allocation21_spill] sm:$0xff] }
 0x24d   : > { %7744 = vmatmul.mubr.msk.bf16.gmra.mxu1 %vm452_vm1, %v7060_v57  ;;  %v2655_v28 = vpop.f32.mrf.mxu1  ;;  %v5563_v58 = vrot.slane %v5561_v9, 4  ;;  %v7051_v57 = vrot.slane %v5442_v17, 9  ;;  %v7065_v20 = vcombine.low %v10053_v36, %v10061_v48  ;;  %v5570_v6 = vrot.slane %v5568_v8, 4  ;;  %v11086_v1 = vld [vmem:[#allocation30_spill] sm:$0xff] }
 0x24e   : > { %7747 = vmatprep.mubr.msk.bf16.mxu1 %vm452_vm1, %v7061_v49  ;;  %v10057_v7 = vpop.f32.mrf.mxu0  ;;  %v2770_v50 = vadd.f32 %v2655_v28, %v11078_v44  ;;  %v5443_v49 = vld [vmem:[#allocation2 + $0x9c] sm:$0xe]  ;;  %v2235_v27 = vadd.f32 %v11081_v19, %v11080_v16  ;;  %v10074_v3 = vsel %vm8804_vm2, %v7050_v39, %v5561_v9  ;;  %v5575_v36 = vrot.slane %v11082_v43, 5  ;;  %v11083_v28 = vld [vmem:[#allocation9_spill] sm:$0xff]  ;;  %v11084_v19 = vld [vmem:[#allocation24_spill] sm:$0xff] }
 0x24f   : > { %11076 = vst [vmem:[#allocation17_spill] sm:$0xff] %v10057_v7  ;;  %v7542_v37 = vpop.f32.mrf.mxu1  ;;  %v10078_v17 = vsel %vm8804_vm2, %v5563_v58, %v5564_v60  ;;  %v10086_v44 = vsel %vm8804_vm2, %v7051_v57, %v5568_v8  ;;  %v10090_v51 = vsel %vm8804_vm2, %v5570_v6, %v5571_v54  ;;  %v5445_v9 = vld [vmem:[#allocation2 + $0xb4] sm:$0xe]  ;;  %v7052_v60 = vrot.slane %v5443_v49, 9  ;;  %v11087_v49 = vld [vmem:[#allocation10_spill] sm:$0xff] }
 0x250   : > { %v10070_v53 = vpop.f32.mrf.mxu0  ;;  %v2773_v48 = vadd.f32 %v7542_v37, %v11083_v28  ;;  %v5577_v37 = vrot.slane %v5575_v36, 4  ;;  %v5578_v43 = vrot.slane %v11084_v19, 5  ;;  %v5589_v8 = vrot.slane %v11086_v1, 5  ;;  %v11089_v19 = vld [vmem:[#allocation33_spill] sm:$0xff] }
 0x251   : > { %v2658_v39 = vpop.f32.mrf.mxu1  ;;  %v10104_v6 = vsel %vm8804_vm2, %v7052_v60, %v5575_v36  ;;  %v7054_v58 = vrot.slane %v5445_v9, 9  ;;  %v11094_v1 = vcombine.low %v10030_v55, %v10039_v62  ;;  %v11095_v62 = vld [vmem:[#allocation20_spill] sm:$0xff] }
 0x252   : > { %v10092_v16 = vpop.f32.mrf.mxu0  ;;  %v10097_v28 = vadd.f32 %v2658_v39, %v2235_v27  ;;  %v10108_v54 = vsel %vm8804_vm2, %v5577_v37, %v5578_v43  ;;  %v11088_v27 = vcombine.low %v10004_v30, %v10011_v12  ;;  %v5591_v39 = vrot.slane %v5589_v8, 4  ;;  %v11090_v37 = vld [vmem:[#allocation11_spill] sm:$0xff] }
 0x253   : > { %v7545_v57 = vpop.f32.mrf.mxu1  ;;  %v10124_v43 = vsel %vm8804_vm2, %v7054_v58, %v5589_v8  ;;  %v10141_v58 = vadd.f32 %v9879_v34, %v10000_v63  ;;  %v6208_v8 = vld [vmem:[%s11008_s7] sm:$0xf] }
 0x254   : > { %11085 = vst [vmem:[#allocation13_spill] sm:$0xff] %v10097_v28  ;;  %v10100_v7 = vpop.f32.mrf.mxu0  ;;  %v2776_v21 = vadd.f32 %v7545_v57, %v11087_v49  ;;  %v5592_v28 = vrot.slane %v11089_v19, 5  ;;  %v10137_v19 = vadd.f32 %v9869_v45, %v9988_v32  ;;  %7850 = vmatprep.subr.msk.bf16.mxu1 %vm501_vm0, %v6208_v8  ;;  %v11092_v45 = vld [vmem:[#allocation15_spill] sm:$0xff]  ;;  %v10162_v32 = vadd.f32 %v9916_v31, %v10048_v11 }
 0x255   : > { %7748 = vmatmul.mubr.msk.bf16.gmra.mxu1 %vm452_vm1, %v11088_v27  ;;  %v2671_v36 = vpop.f32.mrf.mxu1  ;;  %v6217_v55 = vsel %vm501_vm0, %v6208_v8, 0  ;;  %v11098_v8 = vld [vmem:[#allocation23_spill] sm:$0xff] }
 0x256   : > { %7751 = vmatprep.mubr.msk.bf16.mxu1 %vm452_vm1, %v7063_v10  ;;  %v10119_v60 = vpop.f32.mrf.mxu0  ;;  %v2774_v9 = vadd.f32 %v2671_v36, %v11090_v37  ;;  %v10128_v30 = vsel %vm8804_vm2, %v5591_v39, %v5592_v28  ;;  %v11091_v10 = vld [vmem:[#allocation12_spill] sm:$0xff]  ;;  %v5988_v28 = vld [vmem:[%s11006_s5] sm:$0xf]  ;;  %v10153_v37 = vadd.f32 %v9890_v61, %v10015_v40  ;;  %v10170_v61 = vadd.f32 %v9938_v2, %v2773_v48 }
 0x257   : > { %v7546_v12 = vpop.f32.mrf.mxu1  ;;  %7849 = vmatprep.subr.msk.bf16.mxu0 %vm501_vm0, %v5988_v28  ;;  %v11093_v40 = vld [vmem:[#allocation16_spill] sm:$0xff]  ;;  %7806 = vmatpush3.bf16.msra.mxu1 %v6217_v55  ;;  %v11102_v55 = vcombine.low %v10074_v3, %v10078_v17  ;;  %v11107_v17 = vld [vmem:[#allocation14_spill] sm:$0xff] }
 0x258   : > { %v10130_v57 = vpop.f32.mrf.mxu0  ;;  %v2777_v27 = vadd.f32 %v7546_v12, %v11091_v10  ;;  %v10167_v10 = vadd.f32 %v9926_v25, %v2770_v50  ;;  %v10181_v31 = vadd.f32 %v9972_v38, %v2774_v9  ;;  %v6045_v50 = vsel %vm501_vm0, %v5988_v28, 0  ;;  %v11097_v9 = vld [vmem:[#allocation25_spill] sm:$0xff]  ;;  %v11106_v3 = vld [vmem:[#allocation32_spill] sm:$0xff] }
 0x259   : > { %v2674_v39 = vpop.f32.mrf.mxu1  ;;  %7772 = vmatpush3.bf16.msra.mxu0 %v6045_v50  ;;  %vm6572_vm0 = vcmask 257024  }
 0x25a   : > { %v10149_v36 = vpop.f32.mrf.mxu0  ;;  %v10158_v34 = vadd.f32 %v2674_v39, %v11092_v45  ;;  %v10178_v39 = vadd.f32 %v9961_v22, %v2776_v21  ;;  %v10187_v2 = vadd.f32 %v9984_v42, %v2777_v27  ;;  %v5582_v45 = vrot.slane %v11097_v9, 5  ;;  %v11105_v9 = vld [vmem:[#allocation27_spill] sm:$0xff] }
 0x25b   : > { %v7549_v63 = vpop.f32.mrf.mxu1 }
 0x25c   : > { %v10164_v12 = vpop.f32.mrf.mxu0  ;;  %v2780_v49 = vadd.f32 %v7549_v63, %v11093_v40 }
 0x25d   : > { %7752 = vmatmul.mubr.msk.bf16.gmra.mxu1 %vm452_vm1, %v11094_v1  ;;  %v2687_v25 = vpop.f32.mrf.mxu1 }
 0x25e   : > { %7755 = vmatprep.mubr.msk.bf16.mxu1 %vm452_vm1, %v7065_v20  ;;  %v10184_v11 = vpop.f32.mrf.mxu0  ;;  %v2778_v48 = vadd.f32 %v2687_v25, %v11095_v62  ;;  %v10193_v22 = vadd.f32 %v10007_v24, %v2780_v49  ;;  %v11096_v20 = vld [vmem:[#allocation22_spill] sm:$0xff]  ;;  %v5584_v62 = vrot.slane %v5582_v45, 4 }
 0x25f   : > { %v7550_v38 = vpop.f32.mrf.mxu1  ;;  %v11101_v25 = vld [vmem:[#allocation26_spill] sm:$0xff] }
 0x260   : > { %v10195_v21 = vpop.f32.mrf.mxu0  ;;  %v2781_v1 = vadd.f32 %v7550_v38, %v11096_v20  ;;  %v10200_v42 = vadd.f32 %v10020_v13, %v2778_v48  ;;  %v5444_v13 = vld [vmem:[#allocation2 + $0xa8] sm:$0xe]  ;;  %v11103_v48 = vcombine.low %v10086_v44, %v10090_v51  ;;  %v11104_v20 = vld [vmem:[#allocation29_spill] sm:$0xff]  ;;  %v11108_v44 = vld [vmem:[#allocation31_spill] sm:$0xff] }
 0x261   : > { %v2690_v27 = vpop.f32.mrf.mxu1 }
 0x262   : > { %v10202_v28 = vpop.f32.mrf.mxu0  ;;  %v10205_v63 = vadd.f32 %v2690_v27, %v11098_v8  ;;  %v10208_v24 = vadd.f32 %v10041_v4, %v2781_v1  ;;  %v5585_v27 = vrot.slane %v11105_v9, 5 }
 0x263   : > { %v7553_v49 = vpop.f32.mrf.mxu1 }
 0x264   : > { %11099 = vst [vmem:[#allocation8_spill] sm:$0xff] %v10205_v63  ;;  %11100 = vst [vmem:[#allocation18_spill] sm:$0xff] %v10208_v24  ;;  %v10210_v40 = vpop.f32.mrf.mxu0  ;;  %v2784_v50 = vadd.f32 %v7553_v49, %v11101_v25  ;;  %v2283_v49 = vadd.f32 %v11107_v17, %v11106_v3  ;;  %v5596_v24 = vrot.slane %v9847_v52, 5  ;;  %v11110_v52 = vcombine.low %v10104_v6, %v10108_v54  ;;  %v11111_v54 = vld [vmem:[#allocation19_spill] sm:$0xff] }
 0x265   : > { %7756 = vmatmul.mubr.msk.bf16.gmra.mxu1 %vm452_vm1, %v11102_v55  ;;  %v2703_v38 = vpop.f32.mrf.mxu1  ;;  %v7053_v55 = vrot.slane %v5444_v13, 9 }
 0x266   : > { %7759 = vmatprep.mubr.msk.bf16.mxu1 %vm452_vm1, %v11103_v48  ;;  %v10221_v4 = vpop.f32.mrf.mxu0  ;;  %v2782_v1 = vadd.f32 %v2703_v38, %v11104_v20  ;;  %v10226_v8 = vadd.f32 %v10070_v53, %v2784_v50  ;;  %v5586_v48 = vsel %vm8804_vm2, %v5584_v62, %v5585_v27  ;;  %v11109_v62 = vld [vmem:[#allocation34_spill] sm:$0xff] }
 0x267   : > { %v7554_v25 = vpop.f32.mrf.mxu1  ;;  %v5583_v9 = vsel %vm8804_vm2, %v7053_v55, %v5582_v45  ;;  %v5603_v55 = vrot.slane %v9881_v23, 5 }
 0x268   : > { %v10230_v63 = vpop.f32.mrf.mxu0  ;;  %v2785_v51 = vadd.f32 %v7554_v25, %v11108_v44  ;;  %v10237_v38 = vadd.f32 %v10092_v16, %v2782_v1  ;;  %v7069_v17 = vcombine.low %v5583_v9, %v5586_v48  ;;  %v5598_v16 = vrot.slane %v5596_v24, 4  ;;  %v5447_v48 = vld [vmem:[#allocation2 + $0xcc] sm:$0xe] }
 0x269   : > { %v2706_v20 = vpop.f32.mrf.mxu1  ;;  %v11112_v9 = vld [vmem:[#allocation36_spill] sm:$0xff] }
 0x26a   : > { %v10239_v53 = vpop.f32.mrf.mxu0  ;;  %v2783_v50 = vadd.f32 %v2706_v20, %v2283_v49  ;;  %v10244_v13 = vadd.f32 %v10100_v7, %v2785_v51  ;;  %v5446_v7 = vld [vmem:[#allocation2 + $0xc0] sm:$0xe]  ;;  %v5599_v51 = vrot.slane %v9863_v47, 5 }
 0x26b   : > { %v7557_v3 = vpop.f32.mrf.mxu1 }
 0x26c   : > { %v10246_v25 = vpop.f32.mrf.mxu0  ;;  %v2788_v27 = vadd.f32 %v7557_v3, %v11109_v62  ;;  %v10254_v1 = vadd.f32 %v10119_v60, %v2783_v50  ;;  %v2299_v60 = vadd.f32 %v11111_v54, %v9867_v59  ;;  %v5600_v23 = vsel %vm8804_vm2, %v5598_v16, %v5599_v51 }
 0x26d   : > { %7760 = vmatmul.mubr.msk.bf16.gmra.mxu1 %vm452_vm1, %v11110_v52  ;;  %v2719_v45 = vpop.f32.mrf.mxu1  ;;  %v7056_v62 = vrot.slane %v5447_v48, 9  ;;  %v5605_v52 = vrot.slane %v5603_v55, 4 }
 0x26e   : > { %7763 = vmatprep.mubr.msk.bf16.mxu1 %vm452_vm1, %v7069_v17  ;;  %v10257_v49 = vpop.f32.mrf.mxu0  ;;  %v2786_v44 = vadd.f32 %v2719_v45, %v9873_v14  ;;  %v10263_v6 = vadd.f32 %v10130_v57, %v2788_v27  ;;  %v7055_v17 = vrot.slane %v5446_v7, 9  ;;  %v5606_v57 = vrot.slane %v9944_v0, 5 }
 0x26f   : > { %v7558_v20 = vpop.f32.mrf.mxu1 }
 0x270   : > { %v10267_v50 = vpop.f32.mrf.mxu0  ;;  %v2789_v3 = vadd.f32 %v7558_v20, %v11112_v9  ;;  %v10273_v14 = vadd.f32 %v10149_v36, %v2786_v44  ;;  %v5597_v45 = vsel %vm8804_vm2, %v7055_v17, %v5596_v24  ;;  %v11113_v44 = vcombine.low %v10124_v43, %v10128_v30 }
 0x271   : > { %v2722_v47 = vpop.f32.mrf.mxu1  ;;  %v7071_v20 = vcombine.low %v5597_v45, %v5600_v23  ;;  %v5607_v51 = vsel %vm8804_vm2, %v5605_v52, %v5606_v57 }
 0x272   : > { %v10276_v27 = vpop.f32.mrf.mxu0  ;;  %v2787_v59 = vadd.f32 %v2722_v47, %v2299_v60  ;;  %v10281_v54 = vadd.f32 %v10164_v12, %v2789_v3  ;;  %v5604_v12 = vsel %vm8804_vm2, %v7056_v62, %v5603_v55 }
 0x273   : > { %v7072_v17 = vcombine.low %v5604_v12, %v5607_v51 }
 0x274   : > { %v7561_v7 = vpop.f32.mrf.mxu1  ;;  %v10283_v16 = vpop.f32.mrf.mxu0  ;;  %v10291_v0 = vadd.f32 %v10184_v11, %v2787_v59  ;;  %v11114_v11 = vld [vmem:[#allocation28_spill] sm:$0xff] }
 0x275   : > { %v2792_v36 = vadd.f32 %v7561_v7, %v9893_v41  ;;  %7764 = vmatmul.mubr.msk.bf16.gmra.mxu1 %vm452_vm1, %v11113_v44  ;;  %v2315_v9 = vadd.f32 %v11114_v11, %v9922_v18  ;;  %v7967_v11 = vld [vmem:[%s8155_s27 + $0x10] sm:$0xff]  }
 0x276   : > { %7767 = vmatprep.mubr.msk.bf16.mxu1 %vm452_vm1, %v7071_v20  ;;  %v2735_v24 = vpop.f32.mrf.mxu1  ;;  %v10298_v48 = vpop.f32.mrf.mxu0 }
 0x277   : > { %v2790_v41 = vadd.f32 %v2735_v24, %v9905_v26  ;;  %v10302_v43 = vadd.f32 %v10195_v21, %v2792_v36 }
 0x278   : > { %v7562_v30 = vpop.f32.mrf.mxu1  ;;  %v7643_v60 = vpop.f32.mrf.mxu0 }
 0x279   : > { %v2793_v3 = vadd.f32 %v7562_v30, %v9920_v33  ;;  %v10308_v55 = vadd.f32 %v10202_v28, %v2790_v41  ;;  %v7965_v28 = vld [vmem:[%s8155_s27] sm:$0xff]  }
 0x27a   : > { %v2738_v46 = vpop.f32.mrf.mxu1  ;;  %v4206_v23 = vpop.f32.mrf.mxu0 }
 0x27b   : > { %v2791_v47 = vadd.f32 %v2738_v46, %v2315_v9  ;;  %v10311_v26 = vadd.f32 %v10210_v40, %v2793_v3 }
 0x27c   : > { %v10313_v62 = vpop.f32.mrf.mxu0 }
 0x27d   : > { %v7565_v21 = vpop.f32.mrf.mxu1  ;;  %7768 = vmatmul.mubr.msk.bf16.gmra.mxu1 %vm452_vm1, %v7072_v17  ;;  %v10318_v18 = vadd.f32 %v10221_v4, %v2791_v47  ;;  %v11116_v17 = vld [vmem:[#allocation37_spill] sm:$0xff] }
 0x27e   : > { %v2796_v52 = vadd.f32 %v7565_v21, %v9941_v56  ;;  %v10320_v57 = vpop.f32.mrf.mxu0  ;;  %7807 = vmatprep.mubr.msk.bf16.mxu1 %vm452_vm1, %v7965_v28  ;;  %v11115_v56 = vld [vmem:[#allocation35_spill] sm:$0xff]  ;;  %v3124_v46 = vadd.f32 %v11116_v17, %v10034_v5 }
 0x27f   : > { %v2751_v33 = vpop.f32.mrf.mxu1  ;;  %v2331_v20 = vadd.f32 %v11115_v56, %v9970_v15  ;;  %v7966_v15 = vld [vmem:[%s8155_s27 + $0x8] sm:$0xff]   ;;  %v7969_v5 = vld [vmem:[%s8155_s27 + $0x20] sm:$0xff]  }
 0x280   : > { %v2794_v40 = vadd.f32 %v2751_v33, %v9954_v29  ;;  %v10326_v59 = vadd.f32 %v10230_v63, %v2796_v52  ;;  %v7647_v7 = vpop.f32.mrf.mxu0 }
 0x281   : > { %v7566_v45 = vpop.f32.mrf.mxu1 }
 0x282   : > { %v2797_v4 = vadd.f32 %v7566_v45, %v9964_v35  ;;  %v10332_v36 = vadd.f32 %v10239_v53, %v2794_v40  ;;  %v4222_v24 = vpop.f32.mrf.mxu0  ;;  %v7968_v40 = vld [vmem:[%s8155_s27 + $0x18] sm:$0xff]  }
 0x283   : > { %v2754_v44 = vpop.f32.mrf.mxu1 }
 0x284   : > { %v2795_v12 = vadd.f32 %v2754_v44, %v2331_v20  ;;  %v10335_v51 = vadd.f32 %v10246_v25, %v2797_v4  ;;  %v10337_v63 = vpop.f32.mrf.mxu0 }
 0x285   : > { %v7605_v29 = vpop.f32.mrf.mxu1  ;;  %7808 = vmatmul.mubr.msk.bf16.vlgmr.msra.gmra.mxu1 %vm452_vm1, %v7966_v15 }
 0x286   : > { %v3850_v41 = vadd.f32 %v7605_v29, %v10137_v19  ;;  %v10341_v30 = vadd.f32 %v10257_v49, %v2795_v12  ;;  %v10345_v53 = vpop.f32.mrf.mxu0  ;;  %7811 = vmatprep.mubr.msk.bf16.mxu1 %vm452_vm1, %v7967_v11  ;;  %v11118_v12 = vld [vmem:[#allocation38_spill] sm:$0xff] }
 0x287   : > { %v3721_v35 = vpop.f32.mrf.mxu1 }
 0x288   : > { %v3848_v25 = vadd.f32 %v3721_v35, %v10141_v58  ;;  %v10351_v9 = vadd.f32 %v10267_v50, %v3850_v41  ;;  %v7651_v3 = vpop.f32.mrf.mxu0 }
 0x289   : > { %v7606_v19 = vpop.f32.mrf.mxu1 }
 0x28a   : > { %v10354_v49 = vadd.f32 %v7606_v19, %v10153_v37  ;;  %v10359_v47 = vadd.f32 %v10276_v27, %v3848_v25  ;;  %v4238_v52 = vpop.f32.mrf.mxu0 }
 0x28b   : > { %v3724_v21 = vpop.f32.mrf.mxu1 }
 0x28c   : > { %v10361_v33 = vadd.f32 %v3724_v21, %v3124_v46  ;;  %v10363_v28 = vpop.f32.mrf.mxu0  ;;  %v7971_v46 = vld [vmem:[%s8155_s27 + $0x30] sm:$0xff]  }
 0x28d   : > { %v7609_v58 = vpop.f32.mrf.mxu1  ;;  %7812 = vmatmul.mubr.msk.bf16.gmra.mxu1 %vm452_vm1, %v7968_v40 }
 0x28e   : > { %v3854_v50 = vadd.f32 %v7609_v58, %v10162_v32  ;;  %v10368_v45 = vpop.f32.mrf.mxu0  ;;  %7815 = vmatprep.mubr.msk.bf16.mxu1 %vm452_vm1, %v7969_v5  ;;  %v11117_v32 = vld [vmem:[#allocation13_spill] sm:$0xff] }
 0x28f   : > { %v3737_v37 = vpop.f32.mrf.mxu1  ;;  %v3128_v29 = vadd.f32 %v11118_v12, %v11117_v32 }
 0x290   : > { %v3852_v27 = vadd.f32 %v3737_v37, %v10167_v10  ;;  %v10373_v56 = vadd.f32 %v7643_v60, %v3854_v50  ;;  %v7655_v4 = vpop.f32.mrf.mxu0  ;;  %v7970_v60 = vld [vmem:[%s8155_s27 + $0x28] sm:$0xff]  }
 0x291   : > { %v7610_v20 = vpop.f32.mrf.mxu1 }
 0x292   : > { %v10376_v44 = vadd.f32 %v7610_v20, %v10170_v61  ;;  %v10380_v41 = vadd.f32 %v4206_v23, %v3852_v27  ;;  %v4254_v35 = vpop.f32.mrf.mxu0 }
 0x293   : > { %v3740_v15 = vpop.f32.mrf.mxu1 }
 0x294   : > { %v10382_v11 = vadd.f32 %v3740_v15, %v3128_v29  ;;  %v10384_v19 = vpop.f32.mrf.mxu0  ;;  %v7973_v15 = vld [vmem:[%s8155_s27 + $0x40] sm:$0xff]  }
 0x295   : > { %v7613_v25 = vpop.f32.mrf.mxu1  ;;  %7816 = vmatmul.mubr.msk.bf16.gmra.mxu1 %vm452_vm1, %v7970_v60 }
 0x296   : > { %v3858_v10 = vadd.f32 %v7613_v25, %v10178_v39  ;;  %v10389_v61 = vpop.f32.mrf.mxu0  ;;  %7819 = vmatprep.mubr.msk.bf16.mxu1 %vm452_vm1, %v7971_v46  ;;  %v11120_v39 = vld [vmem:[#allocation39_spill] sm:$0xff] }
 0x297   : > { %v3753_v17 = vpop.f32.mrf.mxu1  ;;  %11119 = vst [vmem:[#allocation7_spill] sm:$0xff] %v10389_v61  ;;  %v3132_v37 = vadd.f32 %v11120_v39, %v10158_v34 }
 0x298   : > { %v3856_v23 = vadd.f32 %v3753_v17, %v10181_v31  ;;  %v10394_v21 = vadd.f32 %v7647_v7, %v3858_v10  ;;  %v7659_v50 = vpop.f32.mrf.mxu0  ;;  %v7972_v7 = vld [vmem:[%s8155_s27 + $0x38] sm:$0xff]   ;;  %v11124_v17 = vld [vmem:[#allocation17_spill] sm:$0xff] }
 0x299   : > { %v7614_v58 = vpop.f32.mrf.mxu1  ;;  %v11122_v10 = vld [vmem:[#allocation18_spill] sm:$0xff] }
 0x29a   : > { %v10397_v40 = vadd.f32 %v7614_v58, %v10187_v2  ;;  %v10401_v5 = vadd.f32 %v4222_v24, %v3856_v23  ;;  %v4270_v20 = vpop.f32.mrf.mxu0 }
 0x29b   : > { %v3756_v27 = vpop.f32.mrf.mxu1 }
 0x29c   : > { %v10403_v32 = vadd.f32 %v3756_v27, %v3132_v37  ;;  %v10406_v29 = vpop.f32.mrf.mxu0 }
 0x29d   : > { %v7617_v12 = vpop.f32.mrf.mxu1  ;;  %11121 = vst [vmem:[#allocation6_spill] sm:$0xff] %v10406_v29  ;;  %7820 = vmatmul.mubr.msk.bf16.gmra.mxu1 %vm452_vm1, %v7972_v7  ;;  %v7975_v7 = vld [vmem:[%s8155_s27 + $0x50] sm:$0xff]  }
 0x29e   : > { %v3862_v31 = vadd.f32 %v7617_v12, %v10193_v22  ;;  %7823 = vmatprep.mubr.msk.bf16.mxu1 %vm452_vm1, %v7973_v15  ;;  %v11123_v22 = vld [vmem:[#allocation8_spill] sm:$0xff]  ;;  %v10420_v23 = vpop.f32.mrf.mxu0 }
 0x29f   : > { %v3769_v2 = vpop.f32.mrf.mxu1  ;;  %v3136_v46 = vadd.f32 %v11124_v17, %v11123_v22  ;;  %11125 = vst [vmem:[#allocation21_spill] sm:$0xff] %v10420_v23 }
 0x2a0   : > { %v3860_v34 = vadd.f32 %v3769_v2, %v10200_v42  ;;  %v10413_v24 = vadd.f32 %v7651_v3, %v3862_v31  ;;  %v7663_v42 = vpop.f32.mrf.mxu0  ;;  %v7974_v3 = vld [vmem:[%s8155_s27 + $0x48] sm:$0xff]  }
 0x2a1   : > { %v7618_v25 = vpop.f32.mrf.mxu1 }
 0x2a2   : > { %v10416_v60 = vadd.f32 %v7618_v25, %v11122_v10  ;;  %v10422_v58 = vadd.f32 %v4238_v52, %v3860_v34  ;;  %v4286_v25 = vpop.f32.mrf.mxu0 }
 0x2a3   : > { %v3772_v39 = vpop.f32.mrf.mxu1 }
 0x2a4   : > { %v10424_v37 = vadd.f32 %v3772_v39, %v3136_v46  ;;  %v10443_v39 = vpop.f32.mrf.mxu0 }
 0x2a5   : > { %v7621_v27 = vpop.f32.mrf.mxu1  ;;  %7824 = vmatmul.mubr.msk.bf16.gmra.mxu1 %vm452_vm1, %v7974_v3  ;;  %11126 = vst [vmem:[#allocation9_spill] sm:$0xff] %v10443_v39 }
 0x2a6   : > { %v3866_v12 = vadd.f32 %v7621_v27, %v10226_v8  ;;  %7827 = vmatprep.mubr.msk.bf16.mxu1 %vm452_vm1, %v7975_v7  ;;  %v7976_v27 = vld [vmem:[%s8155_s27 + $0x58] sm:$0xff]  }
 0x2a7   : > { %v3785_v31 = vpop.f32.mrf.mxu1 }
 0x2a8   : > { %v3864_v2 = vadd.f32 %v3785_v31, %v10237_v38  ;;  %v10432_v52 = vadd.f32 %v7655_v4, %v3866_v12  ;;  %v7977_v4 = vld [vmem:[%s8155_s27 + $0x60] sm:$0xff]  }
 0x2a9   : > { %v7622_v15 = vpop.f32.mrf.mxu1 }
 0x2aa   : > { %v10435_v34 = vadd.f32 %v7622_v15, %v10244_v13  ;;  %v10437_v8 = vadd.f32 %v4254_v35, %v3864_v2 }
 0x2ab   : > { %v3788_v10 = vpop.f32.mrf.mxu1 }
 0x2ac   : > { %v10440_v22 = vadd.f32 %v3788_v10, %v10254_v1 }
 0x2ad   : > { %v7625_v17 = vpop.f32.mrf.mxu1  ;;  %7828 = vmatmul.mubr.msk.bf16.gmra.mxu1 %vm452_vm1, %v7976_v27 }
 0x2ae   : > { %v3870_v46 = vadd.f32 %v7625_v17, %v10263_v6  ;;  %7831 = vmatprep.mubr.msk.bf16.mxu1 %vm452_vm1, %v7977_v4  ;;  %v10455_v6 = vpop.f32.mrf.mxu0  ;;  %v7979_v17 = vld [vmem:[%s8155_s27 + $0x70] sm:$0xff]  }
 0x2af   : > { %v3801_v38 = vpop.f32.mrf.mxu1  ;;  %11128 = vst [vmem:[#allocation30_spill] sm:$0xff] %v10455_v6 }
 0x2b0   : > { %v3868_v13 = vadd.f32 %v3801_v38, %v10273_v14  ;;  %v10450_v35 = vadd.f32 %v7659_v50, %v3870_v46  ;;  %v7667_v15 = vpop.f32.mrf.mxu0  ;;  %v7978_v14 = vld [vmem:[%s8155_s27 + $0x68] sm:$0xff]  }
 0x2b1   : > { %v7626_v1 = vpop.f32.mrf.mxu1 }
 0x2b2   : > { %v10453_v12 = vadd.f32 %v7626_v1, %v10281_v54  ;;  %v10457_v3 = vadd.f32 %v4270_v20, %v3868_v13  ;;  %v4302_v27 = vpop.f32.mrf.mxu0 }
 0x2b3   : > { %v3804_v31 = vpop.f32.mrf.mxu1 }
 0x2b4   : > { %11127 = vst [vmem:[#allocation24_spill] sm:$0xff] %v10453_v12  ;;  %v10460_v7 = vadd.f32 %v3804_v31, %v10291_v0  ;;  %v10478_v13 = vpop.f32.mrf.mxu0  ;;  %v7980_v31 = vld [vmem:[%s8155_s27 + $0x78] sm:$0xff]  }
 0x2b5   : > { %v7629_v2 = vpop.f32.mrf.mxu1  ;;  %7832 = vmatmul.mubr.msk.bf16.gmra.mxu1 %vm452_vm1, %v7978_v14  ;;  %11132 = vst [vmem:[#allocation12_spill] sm:$0xff] %v10478_v13 }
 0x2b6   : > { %11129 = vst [vmem:[#allocation10_spill] sm:$0xff] %v10460_v7  ;;  %v3874_v10 = vadd.f32 %v7629_v2, %v10302_v43  ;;  %7835 = vmatprep.mubr.msk.bf16.mxu1 %vm452_vm1, %v7979_v17 }
 0x2b7   : > { %v3817_v50 = vpop.f32.mrf.mxu1 }
 0x2b8   : > { %v3872_v54 = vadd.f32 %v3817_v50, %v10308_v55  ;;  %v10468_v20 = vadd.f32 %v7663_v42, %v3874_v10 }
 0x2b9   : > { %v7630_v46 = vpop.f32.mrf.mxu1 }
 0x2ba   : > { %v10471_v0 = vadd.f32 %v7630_v46, %v10311_v26  ;;  %v10473_v38 = vadd.f32 %v4286_v25, %v3872_v54  ;;  %v10486_v26 = vpop.f32.mrf.mxu0 }
 0x2bb   : > { %v3820_v43 = vpop.f32.mrf.mxu1  ;;  %11133 = vst [vmem:[#allocation15_spill] sm:$0xff] %v10486_v26 }
 0x2bc   : > { %11130 = vst [vmem:[#allocation33_spill] sm:$0xff] %v10471_v0  ;;  %v10476_v4 = vadd.f32 %v3820_v43, %v10318_v18  ;;  %v10496_v54 = vpop.f32.mrf.mxu0 }
 0x2bd   : > { %v7633_v1 = vpop.f32.mrf.mxu1  ;;  %7836 = vmatmul.mubr.msk.bf16.gmra.mxu1 %vm452_vm1, %v7980_v31 }
 0x2be   : > { %11131 = vst [vmem:[#allocation11_spill] sm:$0xff] %v10476_v4  ;;  %v3878_v55 = vadd.f32 %v7633_v1, %v10326_v59  ;;  %v10504_v43 = vpop.f32.mrf.mxu0 }
 0x2bf   : > { %v3833_v42 = vpop.f32.mrf.mxu1 }
 0x2c0   : > { %v3876_v2 = vadd.f32 %v3833_v42, %v10332_v36  ;;  %v10484_v10 = vadd.f32 %v7667_v15, %v3878_v55 }
 0x2c1   : > { %v7634_v25 = vpop.f32.mrf.mxu1 }
 0x2c2   : > { %v10489_v14 = vadd.f32 %v7634_v25, %v10335_v51  ;;  %v10491_v18 = vadd.f32 %v4302_v27, %v3876_v2  ;;  %v10508_v27 = vpop.f32.mrf.mxu0 }
 0x2c3   : > { %v3836_v50 = vpop.f32.mrf.mxu1 }
 0x2c4   : > { %11134 = vst [vmem:[#allocation16_spill] sm:$0xff] %v10489_v14  ;;  %v10494_v17 = vadd.f32 %v3836_v50, %v10341_v30 }
 0x2c5   : > { %v7673_v59 = vpop.f32.mrf.mxu1 }
 0x2c6   : > { %11135 = vst [vmem:[#allocation20_spill] sm:$0xff] %v10494_v17  ;;  %v10499_v46 = vadd.f32 %v7673_v59, %v10351_v9  ;;  %v10516_v9 = vpop.f32.mrf.mxu0 }
 0x2c7   : > { %v4548_v36 = vpop.f32.mrf.mxu1 }
 0x2c8   : > { %v10502_v15 = vadd.f32 %v4548_v36, %v10359_v47  ;;  %v10522_v25 = vpop.f32.mrf.mxu0 }
 0x2c9   : > { %v7674_v51 = vpop.f32.mrf.mxu1 }
 0x2cb   : > { %v10506_v1 = vpop.f32.mrf.mxu1 }
 0x2cd   : > { %v7677_v31 = vpop.f32.mrf.mxu1 }
 0x2ce   : > { %v10511_v30 = vadd.f32 %v7677_v31, %v10373_v56  ;;  %v10530_v31 = vpop.f32.mrf.mxu0 }
 0x2cf   : > { %v4564_v55 = vpop.f32.mrf.mxu1 }
 0x2d0   : > { %v10514_v42 = vadd.f32 %v4564_v55, %v10380_v41  ;;  %v10536_v26 = vpop.f32.mrf.mxu0 }
 0x2d1   : > { %v10518_v2 = vpop.f32.mrf.mxu1 }
 0x2d3   : > { %v10520_v47 = vpop.f32.mrf.mxu1 }
 0x2d5   : > { %v7681_v50 = vpop.f32.mrf.mxu1 }
 0x2d6   : > { %v10525_v59 = vadd.f32 %v7681_v50, %v10394_v21  ;;  %v10544_v50 = vpop.f32.mrf.mxu0 }
 0x2d7   : > { %v4580_v36 = vpop.f32.mrf.mxu1 }
 0x2d8   : > { %v10528_v56 = vadd.f32 %v4580_v36, %v10401_v5  ;;  %v10550_v6 = vpop.f32.mrf.mxu0 }
 0x2d9   : > { %v10532_v41 = vpop.f32.mrf.mxu1 }
 0x2db   : > { %v10534_v55 = vpop.f32.mrf.mxu1 }
 0x2dd   : > { %v7685_v17 = vpop.f32.mrf.mxu1 }
 0x2de   : > { %v10539_v13 = vadd.f32 %v7685_v17, %v10413_v24  ;;  %v10558_v17 = vpop.f32.mrf.mxu0 }
 0x2df   : > { %v4596_v14 = vpop.f32.mrf.mxu1 }
 0x2e0   : > { %v10542_v21 = vadd.f32 %v4596_v14, %v10422_v58  ;;  %v10564_v23 = vpop.f32.mrf.mxu0 }
 0x2e1   : > { %v10546_v5 = vpop.f32.mrf.mxu1 }
 0x2e3   : > { %v10548_v36 = vpop.f32.mrf.mxu1 }
 0x2e5   : > { %v7689_v4 = vpop.f32.mrf.mxu1 }
 0x2e6   : > { %v10553_v39 = vadd.f32 %v7689_v4, %v10432_v52  ;;  %v10572_v4 = vpop.f32.mrf.mxu0 }
 0x2e7   : > { %v4612_v0 = vpop.f32.mrf.mxu1 }
 0x2e8   : > { %11136 = vst [vmem:[#allocation22_spill] sm:$0xff] %v10553_v39  ;;  %v10556_v24 = vadd.f32 %v4612_v0, %v10437_v8 }
 0x2e9   : > { %v10560_v58 = vpop.f32.mrf.mxu1 }
 0x2ea   : > { %11137 = vst [vmem:[#allocation25_spill] sm:$0xff] %v10556_v24  ;;  %v10578_v24 = vpop.f32.mrf.mxu0 }
 0x2eb   : > { %v10562_v14 = vpop.f32.mrf.mxu1 }
 0x2ec   : > { %11138 = vst [vmem:[#allocation23_spill] sm:$0xff] %v10562_v14 }
 0x2ed   : > { %v7693_v7 = vpop.f32.mrf.mxu1 }
 0x2ee   : > { %v10567_v29 = vadd.f32 %v7693_v7, %v10450_v35  ;;  %v10586_v7 = vpop.f32.mrf.mxu0 }
 0x2ef   : > { %v4628_v12 = vpop.f32.mrf.mxu1 }
 0x2f0   : > { %11139 = vst [vmem:[#allocation26_spill] sm:$0xff] %v10567_v29  ;;  %v10570_v52 = vadd.f32 %v4628_v12, %v10457_v3 }
 0x2f1   : > { %v10574_v8 = vpop.f32.mrf.mxu1 }
 0x2f2   : > { %11140 = vst [vmem:[#allocation29_spill] sm:$0xff] %v10570_v52  ;;  %11141 = vst [vmem:[#allocation27_spill] sm:$0xff] %v10574_v8  ;;  %v10592_v52 = vpop.f32.mrf.mxu0 }
 0x2f3   : > { %v10576_v0 = vpop.f32.mrf.mxu1 }
 0x2f4   : > { %11142 = vst [vmem:[#allocation32_spill] sm:$0xff] %v10576_v0 }
 0x2f5   : > { %v7697_v39 = vpop.f32.mrf.mxu1 }
 0x2f6   : > { %v10581_v14 = vadd.f32 %v7697_v39, %v10468_v20  ;;  %v10600_v20 = vpop.f32.mrf.mxu0 }
 0x2f7   : > { %v4644_v61 = vpop.f32.mrf.mxu1 }
 0x2f8   : > { %11143 = vst [vmem:[#allocation14_spill] sm:$0xff] %v10581_v14  ;;  %v10584_v35 = vadd.f32 %v4644_v61, %v10473_v38  ;;  %v4320_v38 = vadd.f32 %v10283_v16, %v10354_v49  ;;  %v4318_v14 = vadd.f32 %v10298_v48, %v10361_v33  ;;  %v10620_v16 = vld [vmem:[%s11005_s4] ss:$0 sm:$0xff]  ;;  %v4324_v33 = vadd.f32 %v10313_v62, %v10376_v44 }
 0x2f9   : > { %v10588_v12 = vpop.f32.mrf.mxu1  ;;  %v5406_v62 = vadd.f32 %v10522_v25, %v10511_v30 }
 0x2fa   : > { %11144 = vst [vmem:[#allocation31_spill] sm:$0xff] %v10584_v35 }
 0x2fb   : > { %v10590_v3 = vpop.f32.mrf.mxu1 }
 0x2fc   : > { %11145 = vst [vmem:[#allocation34_spill] sm:$0xff] %v10590_v3  ;;  %v4678_v3 = vadd.f32 %v7674_v51, %v4320_v38  ;;  %v4322_v38 = vadd.f32 %v10320_v57, %v10382_v11 }
 0x2fd   : > { %v7701_v29 = vpop.f32.mrf.mxu1 }
 0x2fe   : > { %v10595_v0 = vadd.f32 %v7701_v29, %v10484_v10  ;;  %v5402_v29 = vadd.f32 %v10496_v54, %v10499_v46  ;;  %v10612_v10 = vpop.f32.mrf.mxu0  ;;  %v5403_v48 = vadd.f32 %v10508_v27, %v4678_v3  ;;  %v4680_v44 = vadd.f32 %v10520_v47, %v4322_v38 }
 0x2ff   : > { %v4660_v8 = vpop.f32.mrf.mxu1  ;;  %v4328_v47 = vadd.f32 %v10337_v63, %v10397_v40  ;;  %v5410_v40 = vadd.f32 %v10550_v6, %v10525_v59 }
 0x300   : > { %11146 = vst [vmem:[#allocation19_spill] sm:$0xff] %v10595_v0  ;;  %v10598_v39 = vadd.f32 %v4660_v8, %v10491_v18  ;;  %v4676_v8 = vadd.f32 %v10506_v1, %v4318_v14  ;;  %v5400_v0 = vadd.f32 %v10504_v43, %v10502_v15  ;;  %v10625_v54 = vpop.f32.mrf.mxu0  ;;  %v4682_v43 = vadd.f32 %v10518_v2, %v4324_v33 }
 0x301   : > { %v10602_v61 = vpop.f32.mrf.mxu1  ;;  %v4686_v38 = vadd.f32 %v10532_v41, %v4328_v47 }
 0x302   : > { %11147 = vst [vmem:[#allocation36_spill] sm:$0xff] %v10598_v39  ;;  %v5401_v15 = vadd.f32 %v10516_v9, %v4676_v8  ;;  %v5404_v9 = vadd.f32 %v10530_v31, %v10514_v42 }
 0x303   : > { %v10606_v35 = vpop.f32.mrf.mxu1 }
 0x305   : > { %v7741_v18 = vpop.f32.mrf.mxu1 }
 0x306   : > { %v5871_v39 = vadd.f32 %v7741_v18, %v5402_v29 }
 0x307   : > { %v5742_v49 = vpop.f32.mrf.mxu1 }
 0x308   : > { %v5869_v51 = vadd.f32 %v5742_v49, %v5400_v0  ;;  %v5910_v1 = vadd.f32 %v10620_v16, %v5871_v39  ;;  %v10637_v39 = vpop.f32.mrf.mxu0 }
 0x309   : > { %v7742_v46 = vpop.f32.mrf.mxu1 }
 0x30a   : > { %v5872_v14 = vadd.f32 %v7742_v46, %v5403_v48  ;;  %v5908_v0 = vadd.f32 %v10620_v16, %v5869_v51  ;;  %v5942_v2 = vmax.f32 %v5910_v1, 0.0  ;;  %v5407_v51 = vadd.f32 %v10536_v26, %v4682_v43  ;;  %v10645_v25 = vpop.f32.mrf.mxu0 }
 0x30b   : > { %v5745_v29 = vpop.f32.mrf.mxu1  ;;  %v5405_v1 = vadd.f32 %v10544_v50, %v4680_v44  ;;  %v4326_v26 = vadd.f32 %v10345_v53, %v10403_v32  ;;  %v5408_v53 = vadd.f32 %v10558_v17, %v10528_v56 }
 0x30c   : > { %v5911_v27 = vadd.f32 %v10620_v16, %v5872_v14  ;;  %v5870_v3 = vadd.f32 %v5745_v29, %v5401_v15  ;;  %v5940_v48 = vmax.f32 %v5908_v0, 0.0 }
 0x30d   : > { %v7745_v18 = vpop.f32.mrf.mxu1 }
 0x30e   : > { %v5943_v8 = vmax.f32 %v5911_v27, 0.0  ;;  %v5909_v57 = vadd.f32 %v10620_v16, %v5870_v3  ;;  %v5875_v11 = vadd.f32 %v7745_v18, %v5406_v62  ;;  %v4684_v27 = vadd.f32 %v10534_v55, %v4326_v26  ;;  %v10658_v3 = vpop.f32.mrf.mxu0 }
 0x30f   : > { %v5758_v49 = vpop.f32.mrf.mxu1  ;;  %v4336_v26 = vadd.f32 %v10384_v19, %v10435_v34  ;;  %v11149_v34 = vld [vmem:[#allocation22_spill] sm:$0xff] }
 0x310   : > { %v5973_v33 = vpack.c.bf16 %v5943_v8, %v5942_v2  ;;  %v5941_v46 = vmax.f32 %v5909_v57, 0.0  ;;  %v5873_v30 = vadd.f32 %v5758_v49, %v5404_v9  ;;  %v5914_v42 = vadd.f32 %v10620_v16, %v5875_v11  ;;  %v10667_v57 = vpop.f32.mrf.mxu0 }
 0x311   : > { %v7746_v14 = vpop.f32.mrf.mxu1  ;;  %v5411_v9 = vadd.f32 %v10564_v23, %v4686_v38  ;;  %v4332_v8 = vadd.f32 %v10363_v28, %v10416_v60  ;;  %v4330_v23 = vadd.f32 %v10368_v45, %v10424_v37  ;;  %v5414_v60 = vadd.f32 %v10578_v24, %v10539_v13 }
 0x312   : > { %v5972_v15 = vpack.c.bf16 %v5941_v46, %v5940_v48  ;;  %v5876_v31 = vadd.f32 %v7746_v14, %v5407_v51  ;;  %v5912_v29 = vadd.f32 %v10620_v16, %v5873_v30  ;;  %v5946_v32 = vmax.f32 %v5914_v42, 0.0  ;;  %v10680_v14 = vpop.f32.mrf.mxu0 }
 0x313   : > { %v5761_v43 = vpop.f32.mrf.mxu1  ;;  %v5409_v51 = vadd.f32 %v10572_v4, %v4684_v27  ;;  %v4690_v48 = vadd.f32 %v10546_v5, %v4332_v8  ;;  %v4688_v47 = vadd.f32 %v10548_v36, %v4330_v23  ;;  %v5412_v45 = vadd.f32 %v10586_v7, %v10542_v21 }
 0x314   : > { %v5915_v0 = vadd.f32 %v10620_v16, %v5876_v31  ;;  %v5874_v63 = vadd.f32 %v5761_v43, %v5405_v1  ;;  %7773 = vmatprep.mubr.msk.bf16.mxu0 %vm452_vm1, %v5972_v15  ;;  %v5944_v2 = vmax.f32 %v5912_v29, 0.0  ;;  %v10689_v43 = vpop.f32.mrf.mxu0 }
 0x315   : > { %v7749_v50 = vpop.f32.mrf.mxu1  ;;  %7774 = vmatmul.mubr.msk.bf16.vlgmr.msra.gmra.mxu0 %vm452_vm1, %v5973_v33  ;;  %v5415_v1 = vadd.f32 %v10592_v52, %v4690_v48  ;;  %v11148_v52 = vld [vmem:[#allocation7_spill] sm:$0xff]  ;;  %v11153_v48 = vld [vmem:[#allocation6_spill] sm:$0xff] }
 0x316   : > { %v5947_v41 = vmax.f32 %v5915_v0, 0.0  ;;  %v5913_v62 = vadd.f32 %v10620_v16, %v5874_v63  ;;  %v5879_v44 = vadd.f32 %v7749_v50, %v5410_v40  ;;  %v5413_v63 = vadd.f32 %v10600_v20, %v4688_v47 }
 0x317   : > { %v5774_v18 = vpop.f32.mrf.mxu1  ;;  %v4694_v40 = vadd.f32 %v10560_v58, %v4336_v26  ;;  %v4334_v27 = vadd.f32 %v11148_v52, %v10440_v22  ;;  %v11151_v58 = vld [vmem:[#allocation25_spill] sm:$0xff] }
 0x318   : > { %v5975_v6 = vpack.c.bf16 %v5947_v41, %v5946_v32  ;;  %v5945_v59 = vmax.f32 %v5913_v62, 0.0  ;;  %v5877_v55 = vadd.f32 %v5774_v18, %v5408_v53  ;;  %v5918_v56 = vadd.f32 %v10620_v16, %v5879_v44  ;;  %v11150_v62 = vld [vmem:[#allocation23_spill] sm:$0xff]  ;;  %v7731_v18 = vpop.f32.mrf.mxu0 }
 0x319   : > { %v7750_v11 = vpop.f32.mrf.mxu1  ;;  %v5418_v41 = vadd.f32 %v10612_v10, %v11149_v34  ;;  %v4692_v44 = vadd.f32 %v11150_v62, %v4334_v27  ;;  %v5416_v22 = vadd.f32 %v10625_v54, %v11151_v58  ;;  %v5419_v8 = vadd.f32 %v10637_v39, %v4694_v40 }
 0x31a   : > { %v5974_v49 = vpack.c.bf16 %v5945_v59, %v5944_v2  ;;  %v5880_v17 = vadd.f32 %v7750_v11, %v5411_v9  ;;  %v5916_v46 = vadd.f32 %v10620_v16, %v5877_v55  ;;  %v5950_v37 = vmax.f32 %v5918_v56, 0.0 }
 0x31b   : > { %v5777_v33 = vpop.f32.mrf.mxu1 }
 0x31c   : > { %v5919_v30 = vadd.f32 %v10620_v16, %v5880_v17  ;;  %v5878_v28 = vadd.f32 %v5777_v33, %v5409_v51  ;;  %7777 = vmatprep.mubr.msk.bf16.mxu0 %vm452_vm1, %v5974_v49  ;;  %v5948_v38 = vmax.f32 %v5916_v46, 0.0  ;;  %v5369_v17 = vpop.f32.mrf.mxu0  ;;  %v11152_v51 = vld [vmem:[#allocation24_spill] sm:$0xff] }
 0x31d   : > { %v7753_v4 = vpop.f32.mrf.mxu1  ;;  %7778 = vmatmul.mubr.msk.bf16.gmra.mxu0 %vm452_vm1, %v5975_v6  ;;  %v4340_v23 = vadd.f32 %v11153_v48, %v11152_v51 }
 0x31e   : > { %v5951_v5 = vmax.f32 %v5919_v30, 0.0  ;;  %v5917_v15 = vadd.f32 %v10620_v16, %v5878_v28  ;;  %v5883_v42 = vadd.f32 %v7753_v4, %v5414_v60  ;;  %v5417_v28 = vadd.f32 %v10645_v25, %v4692_v44  ;;  %v11154_v60 = vld [vmem:[#allocation27_spill] sm:$0xff]  ;;  %v11155_v4 = vld [vmem:[#allocation10_spill] sm:$0xff] }
 0x31f   : > { %v5790_v31 = vpop.f32.mrf.mxu1  ;;  %v4698_v47 = vadd.f32 %v11154_v60, %v4340_v23 }
 0x320   : > { %v5977_v13 = vpack.c.bf16 %v5951_v5, %v5950_v37  ;;  %v5949_v24 = vmax.f32 %v5917_v15, 0.0  ;;  %v5881_v36 = vadd.f32 %v5790_v31, %v5412_v45  ;;  %v5922_v21 = vadd.f32 %v10620_v16, %v5883_v42  ;;  %v11156_v45 = vld [vmem:[#allocation21_spill] sm:$0xff]  ;;  %v11157_v31 = vld [vmem:[#allocation26_spill] sm:$0xff] }
 0x321   : > { %v7754_v29 = vpop.f32.mrf.mxu1  ;;  %v4338_v39 = vadd.f32 %v11156_v45, %v11155_v4  ;;  %v5423_v40 = vadd.f32 %v10680_v14, %v4698_v47 }
 0x322   : > { %v5976_v0 = vpack.c.bf16 %v5949_v24, %v5948_v38  ;;  %v5884_v7 = vadd.f32 %v7754_v29, %v5415_v1  ;;  %v5920_v53 = vadd.f32 %v10620_v16, %v5881_v36  ;;  %v5954_v9 = vmax.f32 %v5922_v21, 0.0  ;;  %v7732_v38 = vpop.f32.mrf.mxu0  ;;  %v11159_v36 = vld [vmem:[#allocation29_spill] sm:$0xff] }
 0x323   : > { %v5793_v50 = vpop.f32.mrf.mxu1  ;;  %v5422_v1 = vadd.f32 %v10658_v3, %v11157_v31  ;;  %v5420_v26 = vadd.f32 %v10667_v57, %v11159_v36 }
 0x324   : > { %v5923_v32 = vadd.f32 %v10620_v16, %v5884_v7  ;;  %v5882_v19 = vadd.f32 %v5793_v50, %v5413_v63  ;;  %7781 = vmatprep.mubr.msk.bf16.mxu0 %vm452_vm1, %v5976_v0  ;;  %v5952_v11 = vmax.f32 %v5920_v53, 0.0  ;;  %v5372_v53 = vpop.f32.mrf.mxu0 }
 0x325   : > { %v7757_v20 = vpop.f32.mrf.mxu1  ;;  %7782 = vmatmul.mubr.msk.bf16.gmra.mxu0 %vm452_vm1, %v5977_v13  ;;  %v11158_v13 = vld [vmem:[#allocation32_spill] sm:$0xff] }
 0x326   : > { %v5955_v2 = vmax.f32 %v5923_v32, 0.0  ;;  %v5921_v6 = vadd.f32 %v10620_v16, %v5882_v19  ;;  %v5887_v59 = vadd.f32 %v7757_v20, %v5418_v41  ;;  %v4696_v24 = vadd.f32 %v11158_v13, %v4338_v39  ;;  %v11160_v32 = vld [vmem:[#allocation33_spill] sm:$0xff]  ;;  %v11168_v39 = vld [vmem:[#allocation12_spill] sm:$0xff] }
 0x327   : > { %v5806_v55 = vpop.f32.mrf.mxu1  ;;  %v11161_v19 = vld [vmem:[#allocation9_spill] sm:$0xff]  ;;  %v11169_v13 = vld [vmem:[#allocation20_spill] sm:$0xff] }
 0x328   : > { %v5979_v49 = vpack.c.bf16 %v5955_v2, %v5954_v9  ;;  %v5953_v10 = vmax.f32 %v5921_v6, 0.0  ;;  %v5885_v56 = vadd.f32 %v5806_v55, %v5416_v22  ;;  %v5926_v54 = vadd.f32 %v10620_v16, %v5887_v59  ;;  %v11162_v22 = vld [vmem:[#allocation11_spill] sm:$0xff]  ;;  %v11163_v9 = vld [vmem:[#allocation30_spill] sm:$0xff]  ;;  %v7735_v2 = vpop.f32.mrf.mxu0 }
 0x329   : > { %v7758_v33 = vpop.f32.mrf.mxu1  ;;  %v4344_v34 = vadd.f32 %v11161_v19, %v11160_v32  ;;  %v5421_v20 = vadd.f32 %v10689_v43, %v4696_v24  ;;  %v4342_v14 = vadd.f32 %v11163_v9, %v11162_v22  ;;  %v11170_v24 = vld [vmem:[#allocation15_spill] sm:$0xff] }
 0x32a   : > { %v5978_v46 = vpack.c.bf16 %v5953_v10, %v5952_v11  ;;  %v5888_v30 = vadd.f32 %v7758_v33, %v5419_v8  ;;  %v5924_v5 = vadd.f32 %v10620_v16, %v5885_v56  ;;  %v5958_v29 = vmax.f32 %v5926_v54, 0.0  ;;  %v11164_v11 = vld [vmem:[#allocation14_spill] sm:$0xff]  ;;  %v5385_v54 = vpop.f32.mrf.mxu0 }
 0x32b   : > { %v5809_v37 = vpop.f32.mrf.mxu1  ;;  %v4702_v58 = vadd.f32 %v10588_v12, %v4344_v34  ;;  %v11165_v10 = vld [vmem:[#allocation34_spill] sm:$0xff]  ;;  %v11166_v12 = vld [vmem:[#allocation31_spill] sm:$0xff] }
 0x32c   : > { %v5927_v15 = vadd.f32 %v10620_v16, %v5888_v30  ;;  %v5886_v42 = vadd.f32 %v5809_v37, %v5417_v28  ;;  %7785 = vmatprep.mubr.msk.bf16.mxu0 %vm452_vm1, %v5978_v46  ;;  %v5956_v52 = vmax.f32 %v5924_v5, 0.0  ;;  %v4700_v56 = vadd.f32 %v11165_v10, %v4342_v14  ;;  %v7736_v36 = vpop.f32.mrf.mxu0 }
 0x32d   : > { %v7761_v25 = vpop.f32.mrf.mxu1  ;;  %7786 = vmatmul.mubr.msk.bf16.gmra.mxu0 %vm452_vm1, %v5979_v49  ;;  %v5426_v49 = vadd.f32 %v7731_v18, %v11164_v11  ;;  %v5424_v43 = vadd.f32 %v5369_v17, %v11166_v12  ;;  %v5427_v28 = vadd.f32 %v7732_v38, %v4702_v58  ;;  %v11167_v18 = vld [vmem:[#allocation16_spill] sm:$0xff] }
 0x32e   : > { %v5959_v0 = vmax.f32 %v5927_v15, 0.0  ;;  %v5925_v21 = vadd.f32 %v10620_v16, %v5886_v42  ;;  %v5891_v7 = vadd.f32 %v7761_v25, %v5422_v1  ;;  %v4348_v37 = vadd.f32 %v11168_v39, %v11167_v18  ;;  %v5388_v19 = vpop.f32.mrf.mxu0 }
 0x32f   : > { %v5822_v63 = vpop.f32.mrf.mxu1  ;;  %v5425_v31 = vadd.f32 %v5372_v53, %v4700_v56  ;;  %v4346_v25 = vadd.f32 %v11170_v24, %v11169_v13 }
 0x330   : > { %v5981_v27 = vpack.c.bf16 %v5959_v0, %v5958_v29  ;;  %v5957_v3 = vmax.f32 %v5925_v21, 0.0  ;;  %v5889_v50 = vadd.f32 %v5822_v63, %v5420_v26  ;;  %v5930_v57 = vadd.f32 %v10620_v16, %v5891_v7  ;;  %v11171_v26 = vld [vmem:[#allocation19_spill] sm:$0xff]  ;;  %v11172_v63 = vld [vmem:[#allocation36_spill] sm:$0xff] }
 0x331   : > { %v7762_v41 = vpop.f32.mrf.mxu1  ;;  %v4706_v1 = vadd.f32 %v10602_v61, %v4348_v37  ;;  %v5430_v29 = vadd.f32 %v7735_v2, %v11171_v26  ;;  %v10779_v37 = vld [vmem:[%s11009_s8] ss:$0 sm:$0xff] }
 0x332   : > { %v5980_v62 = vpack.c.bf16 %v5957_v3, %v5956_v52  ;;  %v5892_v44 = vadd.f32 %v7762_v41, %v5423_v40  ;;  %v5928_v59 = vadd.f32 %v10620_v16, %v5889_v50  ;;  %v5962_v48 = vmax.f32 %v5930_v57, 0.0 }
 0x333   : > { %v5825_v6 = vpop.f32.mrf.mxu1  ;;  %v5428_v40 = vadd.f32 %v5385_v54, %v11172_v63  ;;  %v4704_v52 = vadd.f32 %v10606_v35, %v4346_v25  ;;  %v5431_v32 = vadd.f32 %v7736_v36, %v4706_v1 }
 0x334   : > { %v5931_v55 = vadd.f32 %v10620_v16, %v5892_v44  ;;  %v5890_v8 = vadd.f32 %v5825_v6, %v5421_v20  ;;  %7789 = vmatprep.mubr.msk.bf16.mxu0 %vm452_vm1, %v5980_v62  ;;  %v5960_v60 = vmax.f32 %v5928_v59, 0.0 }
 0x335   : > { %v7765_v51 = vpop.f32.mrf.mxu1  ;;  %7790 = vmatmul.mubr.msk.bf16.gmra.mxu0 %vm452_vm1, %v5981_v27  ;;  %v5429_v58 = vadd.f32 %v5388_v19, %v4704_v52 }
 0x336   : > { %v5963_v23 = vmax.f32 %v5931_v55, 0.0  ;;  %v5929_v33 = vadd.f32 %v10620_v16, %v5890_v8  ;;  %v5895_v46 = vadd.f32 %v7765_v51, %v5426_v49 }
 0x337   : > { %v5838_v30 = vpop.f32.mrf.mxu1 }
 0x338   : > { %v5983_v47 = vpack.c.bf16 %v5963_v23, %v5962_v48  ;;  %v5961_v4 = vmax.f32 %v5929_v33, 0.0  ;;  %v5893_v45 = vadd.f32 %v5838_v30, %v5424_v43  ;;  %v5934_v42 = vadd.f32 %v10620_v16, %v5895_v46 }
 0x339   : > { %v7766_v5 = vpop.f32.mrf.mxu1 }
 0x33a   : > { %v5982_v15 = vpack.c.bf16 %v5961_v4, %v5960_v60  ;;  %v5896_v17 = vadd.f32 %v7766_v5, %v5427_v28  ;;  %v5932_v0 = vadd.f32 %v10620_v16, %v5893_v45  ;;  %v5966_v61 = vmax.f32 %v5934_v42, 0.0  ;;  %v10784_v5 = vld [vmem:[%s11007_s6] ss:$0 sm:$0xff] }
 0x33b   : > { %v5841_v38 = vpop.f32.mrf.mxu1 }
 0x33c   : > { %v5935_v21 = vadd.f32 %v10620_v16, %v5896_v17  ;;  %v5894_v7 = vadd.f32 %v5841_v38, %v5425_v31  ;;  %7793 = vmatprep.mubr.msk.bf16.mxu0 %vm452_vm1, %v5982_v15  ;;  %v5964_v41 = vmax.f32 %v5932_v0, 0.0 }
 0x33d   : > { %v7769_v27 = vpop.f32.mrf.mxu1  ;;  %7794 = vmatmul.mubr.msk.bf16.gmra.mxu0 %vm452_vm1, %v5983_v47 }
 0x33e   : > { %v5967_v3 = vmax.f32 %v5935_v21, 0.0  ;;  %v5933_v50 = vadd.f32 %v10620_v16, %v5894_v7  ;;  %v5899_v53 = vadd.f32 %v7769_v27, %v5430_v29 }
 0x33f   : > { %v5854_v34 = vpop.f32.mrf.mxu1 }
 0x340   : > { %v5985_v62 = vpack.c.bf16 %v5967_v3, %v5966_v61  ;;  %v5965_v57 = vmax.f32 %v5933_v50, 0.0  ;;  %v5897_v44 = vadd.f32 %v5854_v34, %v5428_v40  ;;  %v5938_v35 = vadd.f32 %v10620_v16, %v5899_v53 }
 0x341   : > { %v7770_v20 = vpop.f32.mrf.mxu1 }
 0x342   : > { %v5984_v22 = vpack.c.bf16 %v5965_v57, %v5964_v41  ;;  %v5900_v9 = vadd.f32 %v7770_v20, %v5431_v32  ;;  %v5936_v2 = vadd.f32 %v10620_v16, %v5897_v44  ;;  %v5970_v55 = vmax.f32 %v5938_v35, 0.0 }
 0x343   : > { %v5857_v14 = vpop.f32.mrf.mxu1 }
 0x344   : > { %v5939_v6 = vadd.f32 %v10620_v16, %v5900_v9  ;;  %v5898_v59 = vadd.f32 %v5857_v14, %v5429_v58  ;;  %7797 = vmatprep.mubr.msk.bf16.mxu0 %vm452_vm1, %v5984_v22  ;;  %v5968_v49 = vmax.f32 %v5936_v2, 0.0 }
 0x345   : > { %7798 = vmatmul.mubr.msk.bf16.gmra.mxu0 %vm452_vm1, %v5985_v62  ;;  %v7809_v12 = vpop.f32.mrf.mxu1 }
 0x346   : > { %v5971_v8 = vmax.f32 %v5939_v6, 0.0  ;;  %v5937_v11 = vadd.f32 %v10620_v16, %v5898_v59  ;;  %v6262_v15 = vadd.f32 %v7809_v12, %v10779_v37 }
 0x347   : > { %v6253_v43 = vpop.f32.mrf.mxu1 }
 0x348   : > { %v5987_v10 = vpack.c.bf16 %v5971_v8, %v5970_v55  ;;  %v5969_v56 = vmax.f32 %v5937_v11, 0.0  ;;  %v6254_v13 = vadd.f32 %v10779_v37, %v6253_v43 }
 0x349   : > { %v7810_v48 = vpop.f32.mrf.mxu1 }
 0x34a   : > { %v5986_v51 = vpack.c.bf16 %v5969_v56, %v5968_v49  ;;  %v6265_v26 = vadd.f32 %v7810_v48, %v10779_v37 }
 0x34b   : > { %v6256_v23 = vpop.f32.mrf.mxu1 }
 0x34c   : > { %7801 = vmatprep.mubr.msk.bf16.mxu0 %vm452_vm1, %v5986_v51  ;;  %v6257_v7 = vadd.f32 %v10779_v37, %v6256_v23 }
 0x34d   : > { %7802 = vmatmul.mubr.msk.bf16.gmra.mxu0 %vm452_vm1, %v5987_v10  ;;  %v7813_v33 = vpop.f32.mrf.mxu1 }
 0x34e   : > { %v6278_v63 = vadd.f32 %v7813_v33, %v10779_v37 }
 0x34f   : > { %v6269_v46 = vpop.f32.mrf.mxu1 }
 0x350   : > { %v6270_v62 = vadd.f32 %v10779_v37, %v6269_v46 }
 0x351   : > { %v7814_v54 = vpop.f32.mrf.mxu1 }
 0x352   : > { %v6281_v9 = vadd.f32 %v7814_v54, %v10779_v37 }
 0x353   : > { %v6272_v30 = vpop.f32.mrf.mxu1 }
 0x354   : > { %v6273_v8 = vadd.f32 %v10779_v37, %v6272_v30 }
 0x355   : > { %v7817_v28 = vpop.f32.mrf.mxu1 }
 0x356   : > { %v6294_v11 = vadd.f32 %v7817_v28, %v10779_v37 }
 0x357   : > { %v10762_v60 = vpop.f32.mrf.mxu1 }
 0x358   : > { %v6286_v30 = vadd.f32 %v10779_v37, %v10762_v60 }
 0x359   : > { %v10764_v16 = vpop.f32.mrf.mxu1 }
 0x35b   : > { %v10766_v47 = vpop.f32.mrf.mxu1 }
 0x35d   : > { %v10768_v4 = vpop.f32.mrf.mxu1 }
 0x35f   : > { %v10770_v45 = vpop.f32.mrf.mxu1 }
 0x361   : > { %v10772_v18 = vpop.f32.mrf.mxu1 }
 0x363   : > { %v10774_v39 = vpop.f32.mrf.mxu1 }
 0x365   : > { %v10787_v42 = vpop.f32.mrf.mxu1 }
 0x367   : > { %v10795_v36 = vpop.f32.mrf.mxu1 }
 0x369   : > { %v10802_v50 = vpop.f32.mrf.mxu1 }
 0x36b   : > { %v10813_v35 = vpop.f32.mrf.mxu1 }
 0x36d   : > { %v10824_v43 = vpop.f32.mrf.mxu1 }
 0x3d5   : > { %v7775_v17 = vpop.f32.mrf.mxu0 }
 0x3d6   : > { %v6090_v31 = vadd.f32 %v7775_v17, %v10784_v5 }
 0x3d7   : > { %v6081_v1 = vpop.f32.mrf.mxu0 }
 0x3d8   : > { %v6382_v24 = vadd.f32 %v6262_v15, %v6090_v31  ;;  %v6082_v25 = vadd.f32 %v10784_v5, %v6081_v1 }
 0x3d9   : > { %v7776_v38 = vpop.f32.mrf.mxu0 }
 0x3da   : > { %v6414_v29 = vmax.f32 %v6382_v24, 0.0  ;;  %v6380_v0 = vadd.f32 %v6254_v13, %v6082_v25  ;;  %v6093_v21 = vadd.f32 %v7776_v38, %v10784_v5  ;;  %v10834_v13 = vpop.f32.mrf.mxu1  ;;  %v6297_v24 = vadd.f32 %v10764_v16, %v10779_v37 }
 0x3db   : > { %v6084_v40 = vpop.f32.mrf.mxu0 }
 0x3dc   : > { %v7196_v52 = vpack.c.bf16 %v6414_v29, %v6414_v29  ;;  %v6412_v27 = vmax.f32 %v6380_v0, 0.0  ;;  %v6383_v61 = vadd.f32 %v6265_v26, %v6093_v21  ;;  %v6085_v3 = vadd.f32 %v10784_v5, %v6084_v40 }
 0x3dd   : > { %v7779_v53 = vpop.f32.mrf.mxu0  ;;  %v6289_v0 = vadd.f32 %v10779_v37, %v10766_v47  ;;  %v6310_v21 = vadd.f32 %v10768_v4, %v10779_v37 }
 0x3de   : > { %6575 = vst.msk [vmem:[%s10804_s14 + $0x8] sm:$0xf] %vm6572_vm0, %v7196_v52  ;;  %v7194_v32 = vpack.c.bf16 %v6412_v27, %v6412_v27  ;;  %v6415_v19 = vmax.f32 %v6383_v61, 0.0  ;;  %v6381_v34 = vadd.f32 %v6257_v7, %v6085_v3  ;;  %v6106_v41 = vadd.f32 %v7779_v53, %v10784_v5  ;;  %v10848_v27 = vpop.f32.mrf.mxu1 }
 0x3df   : > { %v6097_v57 = vpop.f32.mrf.mxu0 }
 0x3e0   : > { %6573 = vst.msk [vmem:[%s10804_s14] sm:$0xf] %vm6572_vm0, %v7194_v32  ;;  %v7197_v44 = vpack.c.bf16 %v6415_v19, %v6415_v19  ;;  %v6413_v20 = vmax.f32 %v6381_v34, 0.0  ;;  %v6386_v58 = vadd.f32 %v6278_v63, %v6106_v41  ;;  %v6098_v22 = vadd.f32 %v10784_v5, %v6097_v57 }
 0x3e1   : > { %v7780_v14 = vpop.f32.mrf.mxu0  ;;  %v6302_v32 = vadd.f32 %v10779_v37, %v10770_v45 }
 0x3e2   : > { %6576 = vst.msk [vmem:[%s10804_s14 + $0xc] sm:$0xf] %vm6572_vm0, %v7197_v44  ;;  %v7195_v2 = vpack.c.bf16 %v6413_v20, %v6413_v20  ;;  %v6418_v6 = vmax.f32 %v6386_v58, 0.0  ;;  %v6384_v59 = vadd.f32 %v6270_v62, %v6098_v22  ;;  %v6109_v55 = vadd.f32 %v7780_v14, %v10784_v5  ;;  %v10858_v44 = vpop.f32.mrf.mxu1 }
 0x3e3   : > { %v6100_v49 = vpop.f32.mrf.mxu0  ;;  %v6313_v20 = vadd.f32 %v10772_v18, %v10779_v37 }
 0x3e4   : > { %6574 = vst.msk [vmem:[%s10804_s14 + $0x4] sm:$0xf] %vm6572_vm0, %v7195_v2  ;;  %v7200_v10 = vpack.c.bf16 %v6418_v6, %v6418_v6  ;;  %v6416_v56 = vmax.f32 %v6384_v59, 0.0  ;;  %v6387_v51 = vadd.f32 %v6281_v9, %v6109_v55  ;;  %v6101_v12 = vadd.f32 %v10784_v5, %v6100_v49  ;;  %v7833_v49 = vpop.f32.mrf.mxu1 }
 0x3e5   : > { %v7783_v48 = vpop.f32.mrf.mxu0  ;;  %v6305_v2 = vadd.f32 %v10779_v37, %v10774_v39  ;;  %v6326_v6 = vadd.f32 %v10787_v42, %v10779_v37  ;;  %v6318_v42 = vadd.f32 %v10779_v37, %v10795_v36 }
 0x3e6   : > { %6579 = vst.msk [vmem:[%s10804_s14 + $0x18] sm:$0xf] %vm6572_vm0, %v7200_v10  ;;  %v7198_v23 = vpack.c.bf16 %v6416_v56, %v6416_v56  ;;  %v6419_v33 = vmax.f32 %v6387_v51, 0.0  ;;  %v6385_v46 = vadd.f32 %v6273_v8, %v6101_v12  ;;  %v6122_v54 = vadd.f32 %v7783_v48, %v10784_v5 }
 0x3e7   : > { %v6113_v28 = vpop.f32.mrf.mxu0 }
 0x3e8   : > { %6577 = vst.msk [vmem:[%s10804_s14 + $0x10] sm:$0xf] %vm6572_vm0, %v7198_v23  ;;  %v7201_v15 = vpack.c.bf16 %v6419_v33, %v6419_v33  ;;  %v6417_v17 = vmax.f32 %v6385_v46, 0.0  ;;  %v6390_v31 = vadd.f32 %v6294_v11, %v6122_v54  ;;  %v6114_v1 = vadd.f32 %v10784_v5, %v6113_v28 }
 0x3e9   : > { %v7784_v25 = vpop.f32.mrf.mxu0  ;;  %v6329_v28 = vadd.f32 %v10802_v50, %v10779_v37 }
 0x3ea   : > { %6580 = vst.msk [vmem:[%s10804_s14 + $0x1c] sm:$0xf] %vm6572_vm0, %v7201_v15  ;;  %v7199_v38 = vpack.c.bf16 %v6417_v17, %v6417_v17  ;;  %v6422_v60 = vmax.f32 %v6390_v31, 0.0  ;;  %v6388_v26 = vadd.f32 %v6286_v30, %v6114_v1  ;;  %v6125_v29 = vadd.f32 %v7784_v25, %v10784_v5  ;;  %v6349_v30 = vpop.f32.mrf.mxu1 }
 0x3eb   : > { %v6116_v7 = vpop.f32.mrf.mxu0  ;;  %v6342_v25 = vadd.f32 %v10824_v43, %v10779_v37  ;;  %v6334_v43 = vadd.f32 %v10779_v37, %v10834_v13 }
 0x3ec   : > { %6578 = vst.msk [vmem:[%s10804_s14 + $0x14] sm:$0xf] %vm6572_vm0, %v7199_v38  ;;  %v7204_v16 = vpack.c.bf16 %v6422_v60, %v6422_v60  ;;  %v6420_v63 = vmax.f32 %v6388_v26, 0.0  ;;  %v6391_v40 = vadd.f32 %v6297_v24, %v6125_v29  ;;  %v6117_v52 = vadd.f32 %v10784_v5, %v6116_v7 }
 0x3ed   : > { %v7787_v61 = vpop.f32.mrf.mxu0  ;;  %v6321_v24 = vadd.f32 %v10779_v37, %v10813_v35 }
 0x3ee   : > { %6583 = vst.msk [vmem:[%s10804_s14 + $0x28] sm:$0xf] %vm6572_vm0, %v7204_v16  ;;  %v7202_v3 = vpack.c.bf16 %v6420_v63, %v6420_v63  ;;  %v6423_v47 = vmax.f32 %v6391_v40, 0.0  ;;  %v6389_v53 = vadd.f32 %v6289_v0, %v6117_v52  ;;  %v6138_v4 = vadd.f32 %v7787_v61, %v10784_v5  ;;  %v7834_v0 = vpop.f32.mrf.mxu1 }
 0x3ef   : > { %v6129_v19 = vpop.f32.mrf.mxu0 }
 0x3f0   : > { %6581 = vst.msk [vmem:[%s10804_s14 + $0x20] sm:$0xf] %vm6572_vm0, %v7202_v3  ;;  %v7205_v34 = vpack.c.bf16 %v6423_v47, %v6423_v47  ;;  %v6421_v41 = vmax.f32 %v6389_v53, 0.0  ;;  %v6394_v62 = vadd.f32 %v6310_v21, %v6138_v4  ;;  %v6130_v57 = vadd.f32 %v10784_v5, %v6129_v19  ;;  %v6352_v53 = vpop.f32.mrf.mxu1 }
 0x3f1   : > { %v7788_v58 = vpop.f32.mrf.mxu0  ;;  %v6345_v4 = vadd.f32 %v10848_v27, %v10779_v37 }
 0x3f2   : > { %6584 = vst.msk [vmem:[%s10804_s14 + $0x2c] sm:$0xf] %vm6572_vm0, %v7205_v34  ;;  %v7203_v22 = vpack.c.bf16 %v6421_v41, %v6421_v41  ;;  %v6426_v45 = vmax.f32 %v6394_v62, 0.0  ;;  %v6392_v9 = vadd.f32 %v6302_v32, %v6130_v57  ;;  %v6141_v14 = vadd.f32 %v7788_v58, %v10784_v5 }
 0x3f3   : > { %v6132_v59 = vpop.f32.mrf.mxu0  ;;  %v6337_v62 = vadd.f32 %v10779_v37, %v10858_v44  ;;  %v6358_v57 = vadd.f32 %v7833_v49, %v10779_v37 }
 0x3f4   : > { %6582 = vst.msk [vmem:[%s10804_s14 + $0x24] sm:$0xf] %vm6572_vm0, %v7203_v22  ;;  %v7208_v18 = vpack.c.bf16 %v6426_v45, %v6426_v45  ;;  %v6424_v55 = vmax.f32 %v6392_v9, 0.0  ;;  %v6395_v8 = vadd.f32 %v6313_v20, %v6141_v14  ;;  %v6133_v11 = vadd.f32 %v10784_v5, %v6132_v59  ;;  %v7837_v9 = vpop.f32.mrf.mxu1 }
 0x3f5   : > { %v7791_v10 = vpop.f32.mrf.mxu0 }
 0x3f6   : > { %6587 = vst.msk [vmem:[%s10804_s14 + $0x38] sm:$0xf] %vm6572_vm0, %v7208_v18  ;;  %v7206_v56 = vpack.c.bf16 %v6424_v55, %v6424_v55  ;;  %v6427_v51 = vmax.f32 %v6395_v8, 0.0  ;;  %v6393_v39 = vadd.f32 %v6305_v2, %v6133_v11  ;;  %v6154_v12 = vadd.f32 %v7791_v10, %v10784_v5 }
 0x3f7   : > { %v6145_v48 = vpop.f32.mrf.mxu0  ;;  %v6350_v18 = vadd.f32 %v10779_v37, %v6349_v30 }
 0x3f8   : > { %6585 = vst.msk [vmem:[%s10804_s14 + $0x30] sm:$0xf] %vm6572_vm0, %v7206_v56  ;;  %v7209_v23 = vpack.c.bf16 %v6427_v51, %v6427_v51  ;;  %v6425_v33 = vmax.f32 %v6393_v39, 0.0  ;;  %v6398_v46 = vadd.f32 %v6326_v6, %v6154_v12  ;;  %v6146_v54 = vadd.f32 %v10784_v5, %v6145_v48  ;;  %v6365_v56 = vpop.f32.mrf.mxu1 }
 0x3f9   : > { %v7792_v15 = vpop.f32.mrf.mxu0  ;;  %v6361_v51 = vadd.f32 %v7834_v0, %v10779_v37 }
 0x3fa   : > { %6588 = vst.msk [vmem:[%s10804_s14 + $0x3c] sm:$0xf] %vm6572_vm0, %v7209_v23  ;;  %v7207_v17 = vpack.c.bf16 %v6425_v33, %v6425_v33  ;;  %v6430_v31 = vmax.f32 %v6398_v46, 0.0  ;;  %v6396_v36 = vadd.f32 %v6318_v42, %v6146_v54  ;;  %v6157_v1 = vadd.f32 %v7792_v15, %v10784_v5 }
 0x3fb   : > { %v6148_v38 = vpop.f32.mrf.mxu0  ;;  %v6353_v33 = vadd.f32 %v10779_v37, %v6352_v53  ;;  %v6374_v46 = vadd.f32 %v7837_v9, %v10779_v37 }
 0x3fc   : > { %6586 = vst.msk [vmem:[%s10804_s14 + $0x34] sm:$0xf] %vm6572_vm0, %v7207_v17  ;;  %v7212_v50 = vpack.c.bf16 %v6430_v31, %v6430_v31  ;;  %v6428_v60 = vmax.f32 %v6396_v36, 0.0  ;;  %v6399_v26 = vadd.f32 %v6329_v28, %v6157_v1  ;;  %v6149_v29 = vadd.f32 %v10784_v5, %v6148_v38  ;;  %v7838_v31 = vpop.f32.mrf.mxu1 }
 0x3fd   : > { %v7795_v21 = vpop.f32.mrf.mxu0 }
 0x3fe   : > { %6591 = vst.msk [vmem:[%s10804_s14 + $0x48] sm:$0xf] %vm6572_vm0, %v7212_v50  ;;  %v7210_v7 = vpack.c.bf16 %v6428_v60, %v6428_v60  ;;  %v6431_v16 = vmax.f32 %v6399_v26, 0.0  ;;  %v6397_v35 = vadd.f32 %v6321_v24, %v6149_v29  ;;  %v6170_v63 = vadd.f32 %v7795_v21, %v10784_v5  ;;  %v6368_v21 = vpop.f32.mrf.mxu1 }
 0x3ff   : > { %v6161_v40 = vpop.f32.mrf.mxu0  ;;  %v6366_v50 = vadd.f32 %v10779_v37, %v6365_v56 }
 0x400   : > { %6589 = vst.msk [vmem:[%s10804_s14 + $0x40] sm:$0xf] %vm6572_vm0, %v7210_v7  ;;  %v7213_v52 = vpack.c.bf16 %v6431_v16, %v6431_v16  ;;  %v6429_v61 = vmax.f32 %v6397_v35, 0.0  ;;  %v6402_v3 = vadd.f32 %v6342_v25, %v6170_v63  ;;  %v6162_v47 = vadd.f32 %v10784_v5, %v6161_v40 }
 0x401   : > { %v7796_v32 = vpop.f32.mrf.mxu0  ;;  %v6377_v16 = vadd.f32 %v7838_v31, %v10779_v37 }
 0x402   : > { %6592 = vst.msk [vmem:[%s10804_s14 + $0x4c] sm:$0xf] %vm6572_vm0, %v7213_v52  ;;  %v7211_v19 = vpack.c.bf16 %v6429_v61, %v6429_v61  ;;  %v6434_v34 = vmax.f32 %v6402_v3, 0.0  ;;  %v6400_v13 = vadd.f32 %v6334_v43, %v6162_v47  ;;  %v6173_v41 = vadd.f32 %v7796_v32, %v10784_v5 }
 0x403   : > { %v6164_v20 = vpop.f32.mrf.mxu0  ;;  %v6369_v61 = vadd.f32 %v10779_v37, %v6368_v21 }
 0x404   : > { %6590 = vst.msk [vmem:[%s10804_s14 + $0x44] sm:$0xf] %vm6572_vm0, %v7211_v19  ;;  %v7216_v58 = vpack.c.bf16 %v6434_v34, %v6434_v34  ;;  %v6432_v27 = vmax.f32 %v6400_v13, 0.0  ;;  %v6403_v22 = vadd.f32 %v6345_v4, %v6173_v41  ;;  %v6165_v45 = vadd.f32 %v10784_v5, %v6164_v20 }
 0x405   : > { %v7799_v14 = vpop.f32.mrf.mxu0 }
 0x406   : > { %6595 = vst.msk [vmem:[%s10804_s14 + $0x58] sm:$0xf] %vm6572_vm0, %v7216_v58  ;;  %v7214_v2 = vpack.c.bf16 %v6432_v27, %v6432_v27  ;;  %v6435_v6 = vmax.f32 %v6403_v22, 0.0  ;;  %v6401_v59 = vadd.f32 %v6337_v62, %v6165_v45  ;;  %v6186_v44 = vadd.f32 %v7799_v14, %v10784_v5 }
 0x407   : > { %v6177_v55 = vpop.f32.mrf.mxu0 }
 0x408   : > { %6593 = vst.msk [vmem:[%s10804_s14 + $0x50] sm:$0xf] %vm6572_vm0, %v7214_v2  ;;  %v7217_v8 = vpack.c.bf16 %v6435_v6, %v6435_v6  ;;  %v6433_v11 = vmax.f32 %v6401_v59, 0.0  ;;  %v6406_v49 = vadd.f32 %v6358_v57, %v6186_v44  ;;  %v6178_v10 = vadd.f32 %v10784_v5, %v6177_v55 }
 0x409   : > { %v7800_v39 = vpop.f32.mrf.mxu0 }
 0x40a   : > { %6596 = vst.msk [vmem:[%s10804_s14 + $0x5c] sm:$0xf] %vm6572_vm0, %v7217_v8  ;;  %v7215_v12 = vpack.c.bf16 %v6433_v11, %v6433_v11  ;;  %v6438_v42 = vmax.f32 %v6406_v49, 0.0  ;;  %v6404_v48 = vadd.f32 %v6350_v18, %v6178_v10  ;;  %v6189_v23 = vadd.f32 %v7800_v39, %v10784_v5 }
 0x40b   : > { %v6180_v54 = vpop.f32.mrf.mxu0 }
 0x40c   : > { %6594 = vst.msk [vmem:[%s10804_s14 + $0x54] sm:$0xf] %vm6572_vm0, %v7215_v12  ;;  %v7220_v30 = vpack.c.bf16 %v6438_v42, %v6438_v42  ;;  %v6436_v28 = vmax.f32 %v6404_v48, 0.0  ;;  %v6407_v15 = vadd.f32 %v6361_v51, %v6189_v23  ;;  %v6181_v17 = vadd.f32 %v10784_v5, %v6180_v54 }
 0x40d   : > { %v7803_v36 = vpop.f32.mrf.mxu0 }
 0x40e   : > { %6599 = vst.msk [vmem:[%s10804_s14 + $0x68] sm:$0xf] %vm6572_vm0, %v7220_v30  ;;  %v7218_v1 = vpack.c.bf16 %v6436_v28, %v6436_v28  ;;  %v6439_v24 = vmax.f32 %v6407_v15, 0.0  ;;  %v6405_v25 = vadd.f32 %v6353_v33, %v6181_v17  ;;  %v6202_v38 = vadd.f32 %v7803_v36, %v10784_v5 }
 0x40f   : > { %v6193_v60 = vpop.f32.mrf.mxu0 }
 0x410   : > { %6597 = vst.msk [vmem:[%s10804_s14 + $0x60] sm:$0xf] %vm6572_vm0, %v7218_v1  ;;  %v7221_v26 = vpack.c.bf16 %v6439_v24, %v6439_v24  ;;  %v6437_v29 = vmax.f32 %v6405_v25, 0.0  ;;  %v6410_v0 = vadd.f32 %v6374_v46, %v6202_v38  ;;  %v6194_v7 = vadd.f32 %v10784_v5, %v6193_v60 }
 0x411   : > { %v7804_v35 = vpop.f32.mrf.mxu0 }
 0x412   : > { %6600 = vst.msk [vmem:[%s10804_s14 + $0x6c] sm:$0xf] %vm6572_vm0, %v7221_v26  ;;  %v7219_v63 = vpack.c.bf16 %v6437_v29, %v6437_v29  ;;  %v6442_v43 = vmax.f32 %v6410_v0, 0.0  ;;  %v6408_v40 = vadd.f32 %v6366_v50, %v6194_v7  ;;  %v6205_v52 = vadd.f32 %v7804_v35, %v10784_v5 }
 0x413   : > { %v6196_v3 = vpop.f32.mrf.mxu0 }
 0x414   : > { %6598 = vst.msk [vmem:[%s10804_s14 + $0x64] sm:$0xf] %vm6572_vm0, %v7219_v63  ;;  %v7224_v47 = vpack.c.bf16 %v6442_v43, %v6442_v43  ;;  %v6440_v53 = vmax.f32 %v6408_v40, 0.0  ;;  %v6411_v4 = vadd.f32 %v6377_v16, %v6205_v52  ;;  %v6197_v32 = vadd.f32 %v10784_v5, %v6196_v3 }
 0x416   : > { %6603 = vst.msk [vmem:[%s10804_s14 + $0x78] sm:$0xf] %vm6572_vm0, %v7224_v47  ;;  %v7222_v19 = vpack.c.bf16 %v6440_v53, %v6440_v53  ;;  %v6443_v34 = vmax.f32 %v6411_v4, 0.0  ;;  %v6409_v13 = vadd.f32 %v6369_v61, %v6197_v32 }
 0x418   : > { %6601 = vst.msk [vmem:[%s10804_s14 + $0x70] sm:$0xf] %vm6572_vm0, %v7222_v19  ;;  %v7225_v37 = vpack.c.bf16 %v6443_v34, %v6443_v34  ;;  %v6441_v41 = vmax.f32 %v6409_v13, 0.0 }
 0x41a   : > { %6604 = vst.msk [vmem:[%s10804_s14 + $0x7c] sm:$0xf] %vm6572_vm0, %v7225_v37  ;;  %v7223_v5 = vpack.c.bf16 %v6441_v41, %v6441_v41 }
 0x41c   : > { %6602 = vst.msk [vmem:[%s10804_s14 + $0x74] sm:$0xf] %vm6572_vm0, %v7223_v5 }
 0x41d   : > { %7994 = shalt.err (!%p7991_p3)
}
 0x41e   : > { %s7995_s28 = scalar_lea.hbm %s10951_s22, 2048  ;;  %s7999_s16 = scalar_lea.hbm %s11010_s9, 4096 }
 0x41f   : > { %p7996_p4 = scmp.ne.s32.totalorder %s10951_s22, %s7995_s28  ;;  %p8000_p9 = scmp.lt.s32.totalorder %s10951_s22, %s11010_s9 }
 0x420   : > { %p8001_p10 = scmp.lt.s32.totalorder %s7999_s16, %s7995_s28 }
 0x421   : > { %p7997_p7 = pnand %p7996_p4, %p8135_p5 }
 0x422   : > { %p8002_p11 = por %p8001_p10, %p8000_p9 }
 0x423   : > { %p7998_p8 = pneg %p7997_p7 }
 0x425   : > { %p8003_p12 = pnand %p8002_p11, %p7998_p8 }
 0x427   : > { %8006 = shalt.err (!%p8003_p12)
}
 0x428   : > { %s8045_s23 = smov 64   ;;  %s8046_s24 = smov 4  }
 0x429   : > { %7851 = dma.vmem_to_hbm [thread:$0]  (%p8135_p5), %s10953_s17, 2048, %s10951_s22, %s10961_s13, %s8045_s23, %s8045_s23, %s8046_s24  }
 0x42a PF: > { %p7857_p13 = scmp.ge.s32.totalorder %s8041_s12, 2  ;;  %s6634_s25 = sand.u32 1, %s8029_s30  }
 0x42b   : > { %s6635_s26 = scalar_lea.sflag [#allocation4], %s6634_s25 }
 0x42c   : > { %p7854_p0 = pnand %p7857_p13, %p8139_p6 }
 0x42e   : > { %p7855_p1 = pneg %p7854_p0 }
 0x430   : > { %8024 = dma.done.wait (%p7855_p1), %s6635_s26, 2048  }
 0x431   : > { %8026 = vsyncadd (%p7855_p1), %s6635_s26, 4294965248  ;;  %p19_p2 = scmp.ge.s32.totalorder %s8122_s15, 4   ;;  %s11173_s30 = smov %s8033_s10 }
 0x432   : > { %s11174_s10 = smov %s8037_s11  ;;  %s11175_s11 = smov %s8133_s18 }
 0x433   : > { %s11176_s12 = smov %s8122_s15  ;;  %21 = sbr.rel (!%p19_p2) target bundleno = 3 (0x3), region = 94 }
 0x438   :  { %6640 = vsyncpa [#allocation4], 1 }
 0x439   :  { %6642 = vsyncpa [#allocation4 + $0x1], 1 }

</bundles_post_ra>
